<compile_context>
chip_gen: v7x
topology: tpu7x:2x2x1
jax: 0.10.0
libtpu: 0.0.40
codegen_flags: <defaults>
</compile_context>

<pallas_src>
import functools

import jax
import jax.numpy as jnp
from jax.experimental import pallas as pl
from jax.experimental.pallas import tpu as pltpu

D = 4096  # hidden size hard-coded in the PyTorch module


def _linear_kernel(x_ref, w_ref, b_ref, o_ref, acc_ref, *, activation):
    """K-streamed matmul; bias folded into acc init; optional fused SiLU epilogue."""
    k = pl.program_id(1)

    @pl.when(k == 0)
    def _():
        acc_ref[...] = jnp.broadcast_to(
            b_ref[...].astype(jnp.float32), acc_ref.shape
        )

    acc_ref[...] += jnp.dot(
        x_ref[...], w_ref[...], preferred_element_type=jnp.float32
    )

    @pl.when(k == pl.num_programs(1) - 1)
    def _():
        z = acc_ref[...]
        if activation == "silu":
            z = z * jax.nn.sigmoid(z)
        o_ref[...] = z.astype(o_ref.dtype)


def pallas_linear(x, w, b, *, activation=None, out_dtype=None, tn=2048, tk=1024):
    """y = act(x @ w + b) with x:[M,K], w:[K,N] (pre-transposed), b:[1,N]."""
    M, K = x.shape
    Kw, N = w.shape
    assert K == Kw and b.shape == (1, N)
    tn = min(tn, N)
    tk = min(tk, K)
    assert N % tn == 0 and K % tk == 0
    out_dtype = x.dtype if out_dtype is None else out_dtype

    kernel = functools.partial(_linear_kernel, activation=activation)
    return pl.pallas_call(
        kernel,
        out_shape=jax.ShapeDtypeStruct((M, N), out_dtype),
        grid_spec=pltpu.PrefetchScalarGridSpec(
            num_scalar_prefetch=0,
            grid=(N // tn, K // tk),
            in_specs=[
                pl.BlockSpec((M, tk), lambda j, k: (0, k)),   # x rows: tiny, resident
                pl.BlockSpec((tk, tn), lambda j, k: (k, j)),  # streamed weight slab
                pl.BlockSpec((1, tn), lambda j, k: (0, j)),   # bias: re-DMA'd only per j
            ],
            out_specs=pl.BlockSpec((M, tn), lambda j, k: (0, j)),
            scratch_shapes=[pltpu.VMEM((M, tn), jnp.float32)],
        ),
        compiler_params=pltpu.CompilerParams(
            dimension_semantics=("parallel", "arbitrary"),
            vmem_limit_bytes=48 * 1024 * 1024,
        ),
    )(x, w, b)


def init_prompt_encoder_params(key, dtype=jnp.bfloat16):
    """Mirror nn.Linear's U(-1/sqrt(fan_in), +1/sqrt(fan_in)); store as [in, out]."""
    k1, k2, k3, k4 = jax.random.split(key, 4)
    bound = 1.0 / (D ** 0.5)

    def u(k, shape):
        return jax.random.uniform(
            k, shape, jnp.float32, minval=-bound, maxval=bound
        ).astype(dtype)

    return {
        "w1": u(k1, (D, D)),
        "b1": u(k2, (1, D)),
        "w2": u(k3, (D, D)),
        "b2": u(k4, (1, D)),
    }


def prompt_encoder_forward(x, params):
    """x: [M, 4096] -> [M, 4096]; Linear -> SiLU -> Linear, matmuls in Pallas."""
    M = x.shape[0]
    out_dtype = x.dtype
    pad = (-M) % 8  # keep a sublane-aligned row count for arbitrary prompt lengths
    xp = jnp.pad(x, ((0, pad), (0, 0))) if pad else x
    xp = xp.astype(params["w1"].dtype)
    h = pallas_linear(xp, params["w1"], params["b1"], activation="silu")
    y = pallas_linear(h, params["w2"], params["b2"], activation=None,
                      out_dtype=out_dtype)
    return y[:M] if pad else y


def _reference_forward(x, params):
    """Pure-JAX reference with the same bf16 weight/activation semantics."""
    cdt = params["w1"].dtype
    w1 = params["w1"].astype(jnp.float32)
    b1 = params["b1"].astype(jnp.float32)
    w2 = params["w2"].astype(jnp.float32)
    b2 = params["b2"].astype(jnp.float32)
    xb = x.astype(cdt).astype(jnp.float32)
    h = jnp.dot(xb, w1) + b1
    h = h * jax.nn.sigmoid(h)
    h = h.astype(cdt).astype(jnp.float32)  # mirror the bf16 intermediate
    return (jnp.dot(h, w2) + b2).astype(x.dtype)


if __name__ == "__main__":
    key = jax.random.PRNGKey(0)
    pkey, xkey = jax.random.split(key)

    params = init_prompt_encoder_params(pkey)
    M = 8  # small batch of prompt tokens
    x = jax.random.normal(xkey, (M, D), dtype=jnp.float32)

    y = jax.jit(prompt_encoder_forward)(x, params)
    y = jax.block_until_ready(y)

    y_ref = _reference_forward(x, params)
    assert y.shape == (M, D)
    assert y.dtype == x.dtype
    max_err = float(jnp.max(jnp.abs(y - y_ref)))
    assert jnp.allclose(y, y_ref, rtol=3e-2, atol=3e-2), max_err

    print("KERNEL_OK")
</pallas_src>

<mosaic_0001>
module attributes {stable_mosaic.version = 11 : i64} {
  func.func @_linear_kernel(%arg0: i32, %arg1: i32, %arg2: memref<8x1024xbf16, #tpu.memory_space<vmem>>, %arg3: memref<1024x2048xbf16, #tpu.memory_space<vmem>>, %arg4: memref<1x2048xbf16, #tpu.memory_space<vmem>>, %arg5: memref<8x2048xf32, #tpu.memory_space<vmem>>, %arg6: memref<8x2048xf32, #tpu.memory_space<vmem>>) attributes {dimension_semantics = [#tpu.dimension_semantics<parallel>, #tpu.dimension_semantics<arbitrary>], iteration_bounds = array<i64: 2, 4>, scalar_prefetch = 0 : i64, scratch_operands = 1 : i64, tpu.core_type = #tpu.core_type<tc>, window_params = [{transform_indices = @transform_0, window_bounds = array<i64: 8, 1024>}, {transform_indices = @transform_1, window_bounds = array<i64: 1024, 2048>}, {transform_indices = @transform_2, window_bounds = array<i64: 1, 2048>}, {transform_indices = @transform_3, window_bounds = array<i64: 8, 2048>}]} {
    %c0_i32 = arith.constant 0 : i32
    %0 = arith.cmpi eq, %arg1, %c0_i32 : i32
    %1 = arith.extui %0 : i1 to i32
    %c0_i32_0 = arith.constant 0 : i32
    %2 = arith.cmpi ne, %1, %c0_i32_0 : i32
    scf.if %2 {
      %c0_9 = arith.constant 0 : index
      %c0_10 = arith.constant 0 : index
      %12 = vector.load %arg4[%c0_9, %c0_10] : memref<1x2048xbf16, #tpu.memory_space<vmem>>, vector<1x2048xbf16>
      %13 = arith.extf %12 : vector<1x2048xbf16> to vector<1x2048xf32>
      %14 = vector.shape_cast %13 : vector<1x2048xf32> to vector<1x2048xf32>
      %15 = vector.broadcast %14 : vector<1x2048xf32> to vector<8x2048xf32>
      %c0_11 = arith.constant 0 : index
      %c0_12 = arith.constant 0 : index
      %16 = vector.load %arg6[%c0_11, %c0_12] : memref<8x2048xf32, #tpu.memory_space<vmem>>, vector<8x2048xf32>
      tpu.vector_store %arg6[%c0_11, %c0_12], %15 {strides = array<i32>} : memref<8x2048xf32, #tpu.memory_space<vmem>>, vector<8x2048xf32>,
    } else {
    }
    %c0 = arith.constant 0 : index
    %c0_1 = arith.constant 0 : index
    %3 = vector.load %arg6[%c0, %c0_1] : memref<8x2048xf32, #tpu.memory_space<vmem>>, vector<8x2048xf32>
    %c0_2 = arith.constant 0 : index
    %c0_3 = arith.constant 0 : index
    %4 = vector.load %arg2[%c0_2, %c0_3] : memref<8x1024xbf16, #tpu.memory_space<vmem>>, vector<8x1024xbf16>
    %c0_4 = arith.constant 0 : index
    %c0_5 = arith.constant 0 : index
    %5 = vector.load %arg3[%c0_4, %c0_5] : memref<1024x2048xbf16, #tpu.memory_space<vmem>>, vector<1024x2048xbf16>
    %cst = arith.constant dense<0.000000e+00> : vector<8x2048xf32>
    %6 = tpu.matmul %4, %5, %cst {dimension_numbers = #tpu.dot_dimension_numbers<[1], [0], [0], [1], [0, 0, 1, 1], [], []>} : vector<8x1024xbf16>, vector<1024x2048xbf16>, vector<8x2048xf32> -> vector<8x2048xf32>
    %7 = arith.addf %3, %6 : vector<8x2048xf32>
    %c0_6 = arith.constant 0 : index
    %c0_7 = arith.constant 0 : index
    %8 = vector.load %arg6[%c0_6, %c0_7] : memref<8x2048xf32, #tpu.memory_space<vmem>>, vector<8x2048xf32>
    tpu.vector_store %arg6[%c0_6, %c0_7], %7 {strides = array<i32>} : memref<8x2048xf32, #tpu.memory_space<vmem>>, vector<8x2048xf32>,
    %c3_i32 = arith.constant 3 : i32
    %9 = arith.cmpi eq, %arg1, %c3_i32 : i32
    %10 = arith.extui %9 : i1 to i32
    %c0_i32_8 = arith.constant 0 : i32
    %11 = arith.cmpi ne, %10, %c0_i32_8 : i32
    scf.if %11 {
      %c0_9 = arith.constant 0 : index
      %c0_10 = arith.constant 0 : index
      %12 = vector.load %arg6[%c0_9, %c0_10] : memref<8x2048xf32, #tpu.memory_space<vmem>>, vector<8x2048xf32>
      %c0_11 = arith.constant 0 : index
      %c0_12 = arith.constant 0 : index
      %13 = vector.load %arg5[%c0_11, %c0_12] : memref<8x2048xf32, #tpu.memory_space<vmem>>, vector<8x2048xf32>
      tpu.vector_store %arg5[%c0_11, %c0_12], %12 {strides = array<i32>} : memref<8x2048xf32, #tpu.memory_space<vmem>>, vector<8x2048xf32>,
    } else {
    }
    return
  }
  func.func @transform_0(%arg0: i32, %arg1: i32) -> (i32, i32) {
    %c0_i32 = arith.constant 0 : i32
    %c0_i32_0 = arith.constant 0 : i32
    return %c0_i32, %arg1 : i32, i32
  }
  func.func @transform_1(%arg0: i32, %arg1: i32) -> (i32, i32) {
    %c0_i32 = arith.constant 0 : i32
    return %arg1, %arg0 : i32, i32
  }
  func.func @transform_2(%arg0: i32, %arg1: i32) -> (i32, i32) {
    %c0_i32 = arith.constant 0 : i32
    %c0_i32_0 = arith.constant 0 : i32
    return %c0_i32, %arg0 : i32, i32
  }
  func.func @transform_3(%arg0: i32, %arg1: i32) -> (i32, i32) {
    %c0_i32 = arith.constant 0 : i32
    %c0_i32_0 = arith.constant 0 : i32
    return %c0_i32, %arg0 : i32, i32
  }
}

module attributes {stable_mosaic.version = 11 : i64} {
  func.func @_linear_kernel(%arg0: i32, %arg1: i32, %arg2: memref<8x1024xbf16, #tpu.memory_space<vmem>>, %arg3: memref<1024x2048xbf16, #tpu.memory_space<vmem>>, %arg4: memref<1x2048xbf16, #tpu.memory_space<vmem>>, %arg5: memref<8x2048xbf16, #tpu.memory_space<vmem>>, %arg6: memref<8x2048xf32, #tpu.memory_space<vmem>>) attributes {dimension_semantics = [#tpu.dimension_semantics<parallel>, #tpu.dimension_semantics<arbitrary>], iteration_bounds = array<i64: 2, 4>, scalar_prefetch = 0 : i64, scratch_operands = 1 : i64, tpu.core_type = #tpu.core_type<tc>, window_params = [{transform_indices = @transform_0, window_bounds = array<i64: 8, 1024>}, {transform_indices = @transform_1, window_bounds = array<i64: 1024, 2048>}, {transform_indices = @transform_2, window_bounds = array<i64: 1, 2048>}, {transform_indices = @transform_3, window_bounds = array<i64: 8, 2048>}]} {
    %c0_i32 = arith.constant 0 : i32
    %0 = arith.cmpi eq, %arg1, %c0_i32 : i32
    %1 = arith.extui %0 : i1 to i32
    %c0_i32_0 = arith.constant 0 : i32
    %2 = arith.cmpi ne, %1, %c0_i32_0 : i32
    scf.if %2 {
      %c0_9 = arith.constant 0 : index
      %c0_10 = arith.constant 0 : index
      %12 = vector.load %arg4[%c0_9, %c0_10] : memref<1x2048xbf16, #tpu.memory_space<vmem>>, vector<1x2048xbf16>
      %13 = arith.extf %12 : vector<1x2048xbf16> to vector<1x2048xf32>
      %14 = vector.shape_cast %13 : vector<1x2048xf32> to vector<1x2048xf32>
      %15 = vector.broadcast %14 : vector<1x2048xf32> to vector<8x2048xf32>
      %c0_11 = arith.constant 0 : index
      %c0_12 = arith.constant 0 : index
      %16 = vector.load %arg6[%c0_11, %c0_12] : memref<8x2048xf32, #tpu.memory_space<vmem>>, vector<8x2048xf32>
      tpu.vector_store %arg6[%c0_11, %c0_12], %15 {strides = array<i32>} : memref<8x2048xf32, #tpu.memory_space<vmem>>, vector<8x2048xf32>,
    } else {
    }
    %c0 = arith.constant 0 : index
    %c0_1 = arith.constant 0 : index
    %3 = vector.load %arg6[%c0, %c0_1] : memref<8x2048xf32, #tpu.memory_space<vmem>>, vector<8x2048xf32>
    %c0_2 = arith.constant 0 : index
    %c0_3 = arith.constant 0 : index
    %4 = vector.load %arg2[%c0_2, %c0_3] : memref<8x1024xbf16, #tpu.memory_space<vmem>>, vector<8x1024xbf16>
    %c0_4 = arith.constant 0 : index
    %c0_5 = arith.constant 0 : index
    %5 = vector.load %arg3[%c0_4, %c0_5] : memref<1024x2048xbf16, #tpu.memory_space<vmem>>, vector<1024x2048xbf16>
    %cst = arith.constant dense<0.000000e+00> : vector<8x2048xf32>
    %6 = tpu.matmul %4, %5, %cst {dimension_numbers = #tpu.dot_dimension_numbers<[1], [0], [0], [1], [0, 0, 1, 1], [], []>} : vector<8x1024xbf16>, vector<1024x2048xbf16>, vector<8x2048xf32> -> vector<8x2048xf32>
    %7 = arith.addf %3, %6 : vector<8x2048xf32>
    %c0_6 = arith.constant 0 : index
    %c0_7 = arith.constant 0 : index
    %8 = vector.load %arg6[%c0_6, %c0_7] : memref<8x2048xf32, #tpu.memory_space<vmem>>, vector<8x2048xf32>
    tpu.vector_store %arg6[%c0_6, %c0_7], %7 {strides = array<i32>} : memref<8x2048xf32, #tpu.memory_space<vmem>>, vector<8x2048xf32>,
    %c3_i32 = arith.constant 3 : i32
    %9 = arith.cmpi eq, %arg1, %c3_i32 : i32
    %10 = arith.extui %9 : i1 to i32
    %c0_i32_8 = arith.constant 0 : i32
    %11 = arith.cmpi ne, %10, %c0_i32_8 : i32
    scf.if %11 {
      %c0_9 = arith.constant 0 : index
      %c0_10 = arith.constant 0 : index
      %12 = vector.load %arg6[%c0_9, %c0_10] : memref<8x2048xf32, #tpu.memory_space<vmem>>, vector<8x2048xf32>
      %13 = arith.negf %12 : vector<8x2048xf32>
      %14 = math.exp %13 : vector<8x2048xf32>
      %cst_11 = arith.constant 1.000000e+00 : f32
      %15 = vector.broadcast %cst_11 : f32 to vector<8x2048xf32>
      %16 = arith.addf %15, %14 : vector<8x2048xf32>
      %17 = arith.divf %15, %16 : vector<8x2048xf32>
      %18 = arith.mulf %12, %17 : vector<8x2048xf32>
      %19 = arith.truncf %18 : vector<8x2048xf32> to vector<8x2048xbf16>
      %c0_12 = arith.constant 0 : index
      %c0_13 = arith.constant 0 : index
      %20 = vector.load %arg5[%c0_12, %c0_13] : memref<8x2048xbf16, #tpu.memory_space<vmem>>, vector<8x2048xbf16>
      tpu.vector_store %arg5[%c0_12, %c0_13], %19 {strides = array<i32>} : memref<8x2048xbf16, #tpu.memory_space<vmem>>, vector<8x2048xbf16>,
    } else {
    }
    return
  }
  func.func @transform_0(%arg0: i32, %arg1: i32) -> (i32, i32) {
    %c0_i32 = arith.constant 0 : i32
    %c0_i32_0 = arith.constant 0 : i32
    return %c0_i32, %arg1 : i32, i32
  }
  func.func @transform_1(%arg0: i32, %arg1: i32) -> (i32, i32) {
    %c0_i32 = arith.constant 0 : i32
    return %arg1, %arg0 : i32, i32
  }
  func.func @transform_2(%arg0: i32, %arg1: i32) -> (i32, i32) {
    %c0_i32 = arith.constant 0 : i32
    %c0_i32_0 = arith.constant 0 : i32
    return %c0_i32, %arg0 : i32, i32
  }
  func.func @transform_3(%arg0: i32, %arg1: i32) -> (i32, i32) {
    %c0_i32 = arith.constant 0 : i32
    %c0_i32_0 = arith.constant 0 : i32
    return %c0_i32, %arg0 : i32, i32
  }
}

</mosaic_0001>

<bundles_post_ra>
// kernel: prompt_encoder_forward.3
= control target key start
LH: loop header
LB: loop body
LE: loop exit
PB: predicated region body
PF: predicated region fallthrough
CT: control target
= control target key end

     0   :  { %8 = vsyncpa [#allocation4], 0  ;;  %s10882_s0 = inlined_call_operand.vmem [shape: bf16[8,4096], index: 0, kind: input, shape index: {}]   ;;  %s10883_s1 = inlined_call_operand.hbm [shape: bf16[4096,4096], index: 1, kind: input, shape index: {}]   ;;  %s10884_s2 = inlined_call_operand.vmem [shape: bf16[1,4096], index: 2, kind: input, shape index: {}]   ;;  %s10885_s3 = inlined_call_operand.hbm [shape: f32[8,4096], index: 3, kind: output, shape index: {}]  }
   0x1   :  { %10 = vsyncpa [#allocation4 + $0x1], 0 }
   0x2   :  { %11 = vsyncpa [#allocation5], 0 }
   0x3   :  { %13 = vsyncpa [#allocation5 + $0x1], 0  ;;  %s9464_s12 = smov 0   ;;  %s9466_s13 = smov 0  }
   0x4   :  { %s9468_s14 = smov 0   ;;  %s9470_s15 = smov 0  }
   0x5   :  { %s9472_s16 = smov 0   ;;  %s9474_s17 = smov 0  }
   0x6   :  { %s9476_s18 = smov 0   ;;  %s9478_s19 = smov 0  }
   0x7   :  { %s9480_s20 = smov 0   ;;  %s9482_s21 = smov 0  }
   0x8   :  { %s9484_s22 = smov 0  }
   0x9 LB: > { %s8116_s23 = sadd.s32 4294967295, %s9437_s22   ;;  %s8117_s24 = sadd.s32 4294967294, %s9437_s22   ;;  %s9437_s22 = sphi %s9484_s22, %s19_s22   ;;  %s9433_s21 = sphi %s9482_s21, %s10912_s21   ;;  %s9429_s20 = sphi %s9480_s20, %s10911_s20   ;;  %s9425_s19 = sphi %s9478_s19, %s10910_s19   ;;  %s9421_s18 = sphi %s9476_s18, %s10909_s18   ;;  %s9417_s17 = sphi %s9474_s17, %s10908_s17   ;;  %s9413_s16 = sphi %s9472_s16, %s10907_s16   ;;  %s9409_s15 = sphi %s9470_s15, %s10906_s15   ;;  %s9405_s14 = sphi %s9468_s14, %s10905_s14   ;;  %s9401_s13 = sphi %s9466_s13, %s10904_s13   ;;  %s9397_s12 = sphi %s9464_s12, %s10903_s12  }
   0xa   : > { %s28_s25 = sadd.s32 1, %s9429_s20  ;;  %s31_s26 = sadd.s32 1, %s9433_s21 }
   0xb   : > { %p29_p0 = scmp.ge.s32.totalorder %s28_s25, 4  ;;  %s66_s27 = sadd.s32 1, %s9417_s17 }
   0xc   : > { %p73_p1 = scmp.ne.s32.totalorder %s9417_s17, %s9413_s16  ;;  %p74_p2 = scmp.eq.s32.totalorder %s9437_s22, 0 }
   0xd   : > { %s10914_s25 = smov (%p29_p0, %s28_s25), 0  ;;  %s10916_s26 = smov (!%p29_p0, %s31_s26), %s9433_s21 }
   0xe   : > { %10889 = sst [smem:[#allocation9_spill]] %s10914_s25  ;;  %s61_s28 = ssub.s32 %s9429_s20, %s10914_s25 }
   0xf   : > { %p9530_p3 = por %p74_p2, %p73_p1  ;;  %p33_p4 = scmp.ge.s32.totalorder %s10916_s26, 2 }
  0x10   : > { %p79_p5 = scmp.ne.s32.totalorder %s9413_s16, %s9409_s15  ;;  %p80_p6 = scmp.eq.s32.totalorder %s8116_s23, 0 }
  0x11   : > { %s118_s30 = sadd.s32 1, %s9405_s14  ;;  %s10918_s26 = smov (%p33_p4, %s10916_s26), 0 }
  0x12   : > { %10891 = sst [smem:[#allocation10_spill]] %s10918_s26  ;;  %p9538_p7 = por %p80_p6, %p79_p5 }
  0x13   : > { %p128_p8 = scmp.ne.s32.totalorder %s9405_s14, %s9401_s13  ;;  %s62_s5 = ssub.s32 %s9433_s21, %s10918_s26 }
  0x14   : > { %p129_p9 = scmp.eq.s32.totalorder %s8116_s23, 7  ;;  %s63_s6 = sor.u32 %s62_s5, %s61_s28 }
  0x15   : > { %p116_p10 = scmp.eq.s32.totalorder %s62_s5, 0  ;;  %p64_p11 = scmp.eq.s32.totalorder %s63_s6, 0 }
  0x16   : > { %p9546_p12 = por %p129_p9, %p128_p8  ;;  %p134_p13 = scmp.ne.s32.totalorder %s9401_s13, %s9397_s12 }
  0x17   : > { %s9551_s8 = scalar_select %p116_p10, %s9405_s14, %s118_s30  }
  0x18   : > { %s10893_s7 = scalar_select %p9546_p12, 1, 0 }
  0x19   : > { %s9554_s9 = scalar_select %p64_p11, %s9417_s17, %s66_s27  }
  0x1a   : > { %p135_p0 = scmp.eq.s32.totalorder %s8117_s24, 7  ;;  %p9184_p1 = scmp.lt.s32.totalorder %s9437_s22, 8 }
  0x1b   : > { %10894 = sst [smem:[#allocation11_spill]] %s9554_s9  ;;  %s164_s11 = sand.u32 1, %s9417_s17  }
  0x1c   : > { %p9559_p2 = por %p135_p0, %p134_p13  ;;  %s8120_s15 = sshll.u32 %s164_s11, 13 }
  0x1d   : > { %s8122_s23 = sshll.u32 %s9433_s21, 4  ;;  %s9170_s28 = sshll.u32 %s9429_s20, 12 }
  0x1e   : > { %s10895_s10 = scalar_select %p9559_p2, 1, 0 }
  0x1f   : > { %s168_s5 = scalar_lea.vmem [#allocation3], %s8120_s15  ;;  %s175_s26 = sadd.s32 %s9170_s28, %s8122_s23 }
  0x20   : > { %s178_s6 = sshll.u32 %s168_s5, 4  ;;  %s8124_s30 = sshll.u32 %s175_s26, 6  ;;  %s9566_s6 = int_to_ptr.vmem [resolvable:$true] %s178_s6 }
  0x21   : > { %p9570_p4 = pnand %p9184_p1, %p9530_p3  ;;  %s9577_s9 = scalar_lea.hbm %s10883_s1, %s8124_s30 }
  0x22   : > { %s9580_s15 = scalar_lea.sflag [#allocation4], %s164_s11  ;;  %s9285_s26 = scalar_lea.hbm %s9577_s9, 131072 }
  0x23   : > { %p9286_p6 = scmp.ne.s32.totalorder %s9577_s9, %s9285_s26  ;;  %p9287_p3 = pneg %p9570_p4 }
  0x24   : > { %s9290_s23 = scalar_lea.hbm %s10883_s1, 1048576  ;;  %p9291_p10 = scmp.lt.u32.totalorder %s9577_s9, %s10883_s1 }
  0x25   : > { %p9288_p8 = pnand %p9287_p3, %p9286_p6  ;;  %p9292_p11 = scmp.lt.u32.totalorder %s9290_s23, %s9285_s26 }
  0x26   : > { %p9294_p0 = scmp.lt.u32.totalorder %s9285_s26, %s9577_s9 }
  0x27   : > { %p9289_p9 = pneg %p9288_p8  ;;  %p9293_p13 = por %p9292_p11, %p9291_p10 }
  0x29   : > { %p9295_p1 = por %p9294_p0, %p9293_p13 }
  0x2b   : > { %p9296_p5 = pnand %p9295_p1, %p9289_p9 }
  0x2d   : > { %9299 = shalt.err (!%p9296_p5)
}
  0x2e   : > { %s9300_s11 = scalar_lea.vmem %s9566_s6, 131072  ;;  %s9439_s30 = smov [#allocation3]  }
  0x2f   : > { %p9301_p6 = scmp.ne.s32.totalorder %s9566_s6, %s9300_s11  ;;  %s9305_s24 = sshll.u32 %s9439_s30, 4  ;;  %s9306_s24 = int_to_ptr.vmem [resolvable:$false] %s9305_s24 }
  0x30   : > { %s9307_s25 = scalar_lea.vmem %s9306_s24, 262144  ;;  %p9308_p12 = scmp.lt.s32.totalorder %s9566_s6, %s9306_s24 }
  0x31   : > { %p9303_p8 = pnand %p9301_p6, %p9287_p3  ;;  %p9309_p10 = scmp.lt.s32.totalorder %s9307_s25, %s9300_s11 }
  0x33   : > { %p9304_p2 = pneg %p9303_p8  ;;  %p9310_p11 = por %p9309_p10, %p9308_p12 }
  0x35   : > { %p9311_p13 = pnand %p9310_p11, %p9304_p2 }
  0x37   : > { %9314 = shalt.err (!%p9311_p13)
}
  0x38   : > { %s9440_s26 = smov 2048   ;;  %s9441_s29 = smov 1024  }
  0x39   : > { %s9442_s23 = smov 64   ;;  %p194_p5 = scmp.lt.s32.totalorder %s9437_s22, 9 }
  0x3a   : > { %9179 = dma.hbm_to_vmem [thread:$0]  (!%p9570_p4), %s9577_s9, 131072, %s9566_s6, %s9580_s15, %s9440_s26, %s9441_s29, %s9442_s23  }
  0x3b   : > { %p10897_p3 = scmp.ge.s32.totalorder %s9437_s22, 1 }
  0x3d   : > { %p195_p9 = pnand %p10897_p3, %p194_p5 }
  0x3e   : > { %s200_s28 = sand.u32 (!%p195_p9), 1, %s9413_s16  }
  0x3f   : > { %198 = sbr.rel (%p195_p9) target bundleno = 1377 (0x561), region = 32  ;;  %s8126_s5 = sshll.u32 (!%p195_p9), %s200_s28, 13 }
  0x40   : > { %s201_s11 = scalar_lea.sflag (!%p195_p9), [#allocation4], %s200_s28  ;;  %s9612_s30 = scalar_lea.vmem (!%p195_p9), [#allocation3], %s8126_s5 }
  0x46   : > { %9388 = dma.done.wait (%p9538_p7), %s201_s11, 131072  }
  0x47   : > { %9390 = vsyncadd (%p9538_p7), %s201_s11, 4294836224  ;;  %s233_s9 = sand.u32 1, %s9401_s13   ;;  %s8128_s6 = sshll.u32 %s9421_s18, 3 }
  0x48   : > { %s8127_s27 = sshll.u32 %s233_s9, 7  ;;  %p237_p12 = scmp.lt.s32.totalorder %s8128_s6, 31 }
  0x49   : > { %s8130_s15 = sshll.u32 %s9425_s19, 4  ;;  %s9631_s5 = scalar_lea.vmem [#allocation6], %s8127_s27 }
  0x4a   : > { %s10920_s6 = smov (!%p237_p12, %s8128_s6), 31  ;;  %p245_p2 = scmp.lt.s32.totalorder %s8130_s15, 31 }
  0x4b   : > { %s8129_s24 = sshll.u32 %s10920_s6, 2  ;;  %p8131_p7 = scmp.ne.s32.totalorder %s9421_s18, 0 }
  0x4c   : > { %s9626_s29 = scalar_lea.vmem %s10882_s0, %s8129_s24  ;;  %s10922_s15 = smov (!%p245_p2, %s8130_s15), 31  ;;  %v264_v1 = vlaneseq (!%p8131_p7) }
  0x4d   : > { %s247_s28 = scalar_lea.vmem %s10884_s2, %s10922_s15  ;;  %253 = sbr.rel (%p8131_p7) target bundleno = 95 (0x5f), region = 40 }
  0x4e   : > { %v254_v0 = vld [vmem:[%s247_s28] sm:$0xff] (!%p8131_p7)  ;;  %v265_v3 = vshrl.u32 (!%p8131_p7), %v264_v1, 7  ;;  %v255_v4 = vld [vmem:[%s247_s28 + $0x8] sm:$0xff] (!%p8131_p7) }
  0x4f   : > { %v256_v2 = vunpack.c.l.bf16 (!%p8131_p7), %v254_v0  ;;  %v257_v5 = vunpack.c.h.bf16 (!%p8131_p7), %v254_v0  ;;  %v258_v10 = vunpack.c.l.bf16 (!%p8131_p7), %v255_v4  ;;  %v259_v11 = vunpack.c.h.bf16 (!%p8131_p7), %v255_v4 }
  0x50   : > { %v266_v6 = vsub.s32 (!%p8131_p7), 0, %v265_v3  ;;  %v270_v7 = vsub.s32 (!%p8131_p7), 2, %v265_v3  ;;  %v274_v8 = vsub.s32 (!%p8131_p7), 4, %v265_v3  ;;  %v278_v9 = vsub.s32 (!%p8131_p7), 6, %v265_v3 }
  0x52   : > { %v267_v12 = vrot.slane (!%p8131_p7), %v256_v2, %v266_v6  ;;  %v271_v13 = vrot.slane (!%p8131_p7), %v256_v2, %v270_v7  ;;  %v275_v14 = vrot.slane (!%p8131_p7), %v256_v2, %v274_v8  ;;  %v279_v15 = vrot.slane (!%p8131_p7), %v256_v2, %v278_v9 }
  0x53   : > { %v283_v16 = vrot.slane (!%p8131_p7), %v257_v5, %v266_v6  ;;  %v287_v17 = vrot.slane (!%p8131_p7), %v257_v5, %v270_v7  ;;  %v291_v18 = vrot.slane (!%p8131_p7), %v257_v5, %v274_v8  ;;  %v295_v19 = vrot.slane (!%p8131_p7), %v257_v5, %v278_v9 }
  0x54   : > { %v347_v20 = vrot.slane %v267_v12, %v266_v6  ;;  %v351_v21 = vrot.slane %v271_v13, %v266_v6  ;;  %v355_v22 = vrot.slane %v275_v14, %v266_v6  ;;  %v359_v23 = vrot.slane %v279_v15, %v266_v6 }
  0x55   : > { %v363_v24 = vrot.slane %v283_v16, %v266_v6  ;;  %v367_v25 = vrot.slane %v287_v17, %v266_v6  ;;  %v371_v26 = vrot.slane %v291_v18, %v266_v6  ;;  %v375_v27 = vrot.slane %v295_v19, %v266_v6 }
  0x56   : > { %408 = vst [vmem:[#allocation2] sm:$0xff] %v347_v20  ;;  %409 = vst [vmem:[#allocation2 + $0x8] sm:$0xff] %v351_v21  ;;  %v299_v28 = vrot.slane %v258_v10, %v266_v6  ;;  %v303_v29 = vrot.slane %v258_v10, %v270_v7  ;;  %v307_v30 = vrot.slane %v258_v10, %v274_v8 }
  0x57   : > { %410 = vst [vmem:[#allocation2 + $0x10] sm:$0xff] %v355_v22  ;;  %411 = vst [vmem:[#allocation2 + $0x18] sm:$0xff] %v359_v23  ;;  %v311_v31 = vrot.slane %v258_v10, %v278_v9  ;;  %v315_v32 = vrot.slane %v259_v11, %v266_v6  ;;  %v319_v33 = vrot.slane %v259_v11, %v270_v7 }
  0x58   : > { %412 = vst [vmem:[#allocation2 + $0x20] sm:$0xff] %v363_v24  ;;  %413 = vst [vmem:[#allocation2 + $0x28] sm:$0xff] %v367_v25  ;;  %v323_v34 = vrot.slane %v259_v11, %v274_v8  ;;  %v327_v35 = vrot.slane %v259_v11, %v278_v9  ;;  %v379_v36 = vrot.slane %v299_v28, %v266_v6 }
  0x59   : > { %414 = vst [vmem:[#allocation2 + $0x30] sm:$0xff] %v371_v26  ;;  %415 = vst [vmem:[#allocation2 + $0x38] sm:$0xff] %v375_v27  ;;  %v383_v37 = vrot.slane %v303_v29, %v266_v6  ;;  %v387_v38 = vrot.slane %v307_v30, %v266_v6  ;;  %v391_v39 = vrot.slane %v311_v31, %v266_v6 }
  0x5a   : > { %v395_v40 = vrot.slane %v315_v32, %v266_v6  ;;  %v399_v41 = vrot.slane %v319_v33, %v266_v6  ;;  %v403_v42 = vrot.slane %v323_v34, %v266_v6  ;;  %v407_v43 = vrot.slane %v327_v35, %v266_v6  ;;  %416 = vst [vmem:[#allocation2 + $0x40] sm:$0xff] %v379_v36 }
  0x5b   : > { %417 = vst [vmem:[#allocation2 + $0x48] sm:$0xff] %v383_v37  ;;  %418 = vst [vmem:[#allocation2 + $0x50] sm:$0xff] %v387_v38 }
  0x5c   : > { %419 = vst [vmem:[#allocation2 + $0x58] sm:$0xff] %v391_v39  ;;  %420 = vst [vmem:[#allocation2 + $0x60] sm:$0xff] %v395_v40 }
  0x5d   : > { %421 = vst [vmem:[#allocation2 + $0x68] sm:$0xff] %v399_v41  ;;  %422 = vst [vmem:[#allocation2 + $0x70] sm:$0xff] %v403_v42 }
  0x5e   : > { %423 = vst [vmem:[#allocation2 + $0x78] sm:$0xff] %v407_v43 }
  0x5f PF: > { %v444_v44 = vld [vmem:[%s9612_s30] sm:$0xff]  ;;  %v9666_v34 = vld [vmem:[%s9626_s29 + $0x8] sm:$0xff]  ;;  %p9164_p4 = scmp.ne.s32.totalorder %s9421_s18, 3 }
  0x60   : > { %v452_v45 = vld [vmem:[%s9612_s30 + $0x40] sm:$0xff]  ;;  %v9676_v39 = vcombine.high %v9666_v34, %v9666_v34 }
  0x61   : > { %v700_v46 = vld [vmem:[%s9612_s30 + $0x800] sm:$0xff]  ;;  %v8141_v47 = vcombine.high %v444_v44, %v452_v45  ;;  %v8140_v49 = vcombine.low %v444_v44, %v452_v45 }
  0x62   : > { %v708_v48 = vld [vmem:[%s9612_s30 + $0x840] sm:$0xff]  ;;  %6689 = vmatprep.mubr.bf16.mxu1 %v9676_v39 }
  0x63   : > { %v460_v50 = vld [vmem:[%s9612_s30 + $0x80] sm:$0xff]  ;;  %v8397_v52 = vcombine.high %v700_v46, %v708_v48  ;;  %v8396_v53 = vcombine.low %v700_v46, %v708_v48  ;;  %6616 = vmatprep.subr.bf16.mxu0 %v8141_v47 }
  0x64   : > { %v468_v51 = vld [vmem:[%s9612_s30 + $0xc0] sm:$0xff]  ;;  %6617 = vmatpush1.bf16.msra.mxu0 %v8140_v49 }
  0x65   : > { %v8157_v54 = vcombine.high %v460_v50, %v468_v51  ;;  %v716_v55 = vld [vmem:[%s9612_s30 + $0x880] sm:$0xff]  ;;  %6657 = vmatprep.subr.bf16.mxu1 %v8397_v52  ;;  %v8156_v62 = vcombine.low %v460_v50, %v468_v51 }
  0x66   : > { %v724_v56 = vld [vmem:[%s9612_s30 + $0x8c0] sm:$0xff]  ;;  %6658 = vmatpush1.bf16.msra.mxu1 %v8396_v53 }
  0x67   : > { %v476_v57 = vld [vmem:[%s9612_s30 + $0x100] sm:$0xff]  ;;  %v8413_v58 = vcombine.high %v716_v55, %v724_v56  ;;  %6618 = vmatprep.subr.bf16.mxu0 %v8157_v54  ;;  %v8412_v63 = vcombine.low %v716_v55, %v724_v56 }
  0x68   : > { %v484_v59 = vld [vmem:[%s9612_s30 + $0x140] sm:$0xff]  ;;  %6619 = vmatpush1.bf16.msra.mxu0 %v8156_v62 }
  0x69   : > { %v732_v60 = vld [vmem:[%s9612_s30 + $0x900] sm:$0xff]  ;;  %v8173_v0 = vcombine.high %v476_v57, %v484_v59  ;;  %6659 = vmatprep.subr.bf16.mxu1 %v8413_v58  ;;  %v8172_v6 = vcombine.low %v476_v57, %v484_v59 }
  0x6a   : > { %v740_v61 = vld [vmem:[%s9612_s30 + $0x940] sm:$0xff]  ;;  %6660 = vmatpush1.bf16.msra.mxu1 %v8412_v63 }
  0x6b   : > { %v8429_v1 = vcombine.high %v732_v60, %v740_v61  ;;  %v492_v2 = vld [vmem:[%s9612_s30 + $0x180] sm:$0xff]  ;;  %6620 = vmatprep.subr.bf16.mxu0 %v8173_v0  ;;  %v8428_v7 = vcombine.low %v732_v60, %v740_v61 }
  0x6c   : > { %v500_v3 = vld [vmem:[%s9612_s30 + $0x1c0] sm:$0xff]  ;;  %6621 = vmatpush1.bf16.msra.mxu0 %v8172_v6 }
  0x6d   : > { %v748_v4 = vld [vmem:[%s9612_s30 + $0x980] sm:$0xff]  ;;  %v8189_v8 = vcombine.high %v492_v2, %v500_v3  ;;  %6661 = vmatprep.subr.bf16.mxu1 %v8429_v1  ;;  %v8188_v14 = vcombine.low %v492_v2, %v500_v3 }
  0x6e   : > { %v756_v5 = vld [vmem:[%s9612_s30 + $0x9c0] sm:$0xff]  ;;  %6662 = vmatpush1.bf16.msra.mxu1 %v8428_v7 }
  0x6f   : > { %v8445_v9 = vcombine.high %v748_v4, %v756_v5  ;;  %v508_v10 = vld [vmem:[%s9612_s30 + $0x200] sm:$0xff]  ;;  %6622 = vmatprep.subr.bf16.mxu0 %v8189_v8  ;;  %v8444_v15 = vcombine.low %v748_v4, %v756_v5 }
  0x70   : > { %v516_v11 = vld [vmem:[%s9612_s30 + $0x240] sm:$0xff]  ;;  %6623 = vmatpush1.bf16.msra.mxu0 %v8188_v14 }
  0x71   : > { %v764_v12 = vld [vmem:[%s9612_s30 + $0xa00] sm:$0xff]  ;;  %v8205_v16 = vcombine.high %v508_v10, %v516_v11  ;;  %6663 = vmatprep.subr.bf16.mxu1 %v8445_v9  ;;  %v8204_v22 = vcombine.low %v508_v10, %v516_v11 }
  0x72   : > { %v772_v13 = vld [vmem:[%s9612_s30 + $0xa40] sm:$0xff]  ;;  %6664 = vmatpush1.bf16.msra.mxu1 %v8444_v15 }
  0x73   : > { %v8461_v17 = vcombine.high %v764_v12, %v772_v13  ;;  %v524_v18 = vld [vmem:[%s9612_s30 + $0x280] sm:$0xff]  ;;  %6624 = vmatprep.subr.bf16.mxu0 %v8205_v16  ;;  %v8460_v23 = vcombine.low %v764_v12, %v772_v13 }
  0x74   : > { %v532_v19 = vld [vmem:[%s9612_s30 + $0x2c0] sm:$0xff]  ;;  %6625 = vmatpush1.bf16.msra.mxu0 %v8204_v22 }
  0x75   : > { %v780_v20 = vld [vmem:[%s9612_s30 + $0xa80] sm:$0xff]  ;;  %v8221_v24 = vcombine.high %v524_v18, %v532_v19  ;;  %6665 = vmatprep.subr.bf16.mxu1 %v8461_v17  ;;  %v8220_v30 = vcombine.low %v524_v18, %v532_v19 }
  0x76   : > { %v788_v21 = vld [vmem:[%s9612_s30 + $0xac0] sm:$0xff]  ;;  %6666 = vmatpush1.bf16.msra.mxu1 %v8460_v23 }
  0x77   : > { %v8477_v25 = vcombine.high %v780_v20, %v788_v21  ;;  %v540_v26 = vld [vmem:[%s9612_s30 + $0x300] sm:$0xff]  ;;  %6626 = vmatprep.subr.bf16.mxu0 %v8221_v24  ;;  %v8476_v31 = vcombine.low %v780_v20, %v788_v21 }
  0x78   : > { %v548_v27 = vld [vmem:[%s9612_s30 + $0x340] sm:$0xff]  ;;  %6627 = vmatpush1.bf16.msra.mxu0 %v8220_v30 }
  0x79   : > { %v796_v28 = vld [vmem:[%s9612_s30 + $0xb00] sm:$0xff]  ;;  %v8237_v32 = vcombine.high %v540_v26, %v548_v27  ;;  %6667 = vmatprep.subr.bf16.mxu1 %v8477_v25  ;;  %v8236_v42 = vcombine.low %v540_v26, %v548_v27 }
  0x7a   : > { %v804_v29 = vld [vmem:[%s9612_s30 + $0xb40] sm:$0xff]  ;;  %6668 = vmatpush1.bf16.msra.mxu1 %v8476_v31 }
  0x7b   : > { %v9663_v33 = vld [vmem:[%s9626_s29] sm:$0xff]  ;;  %v8493_v35 = vcombine.high %v796_v28, %v804_v29  ;;  %6628 = vmatprep.subr.bf16.mxu0 %v8237_v32  ;;  %v8492_v43 = vcombine.low %v796_v28, %v804_v29 }
  0x7c   : > { %v556_v36 = vld [vmem:[%s9612_s30 + $0x380] sm:$0xff]  ;;  %v9672_v38 = vcombine.high %v9663_v33, %v9663_v33  ;;  %6629 = vmatpush1.bf16.msra.mxu0 %v8236_v42 }
  0x7d   : > { %v564_v37 = vld [vmem:[%s9612_s30 + $0x3c0] sm:$0xff]  ;;  %6669 = vmatprep.subr.bf16.mxu1 %v8493_v35 }
  0x7e   : > { %v812_v40 = vld [vmem:[%s9612_s30 + $0xb80] sm:$0xff]  ;;  %6648 = vmatprep.mubr.bf16.mxu0 %v9672_v38  ;;  %v8253_v44 = vcombine.high %v556_v36, %v564_v37  ;;  %v8252_v50 = vcombine.low %v556_v36, %v564_v37  ;;  %6670 = vmatpush1.bf16.msra.mxu1 %v8492_v43 }
  0x7f   : > { %v820_v41 = vld [vmem:[%s9612_s30 + $0xbc0] sm:$0xff] }
  0x80   : > { %v8509_v45 = vcombine.high %v812_v40, %v820_v41  ;;  %v572_v46 = vld [vmem:[%s9612_s30 + $0x400] sm:$0xff]  ;;  %6630 = vmatprep.subr.bf16.mxu0 %v8253_v44  ;;  %v8508_v51 = vcombine.low %v812_v40, %v820_v41 }
  0x81   : > { %v580_v47 = vld [vmem:[%s9612_s30 + $0x440] sm:$0xff]  ;;  %6631 = vmatpush1.bf16.msra.mxu0 %v8252_v50 }
  0x82   : > { %v828_v48 = vld [vmem:[%s9612_s30 + $0xc00] sm:$0xff]  ;;  %v8269_v52 = vcombine.high %v572_v46, %v580_v47  ;;  %6671 = vmatprep.subr.bf16.mxu1 %v8509_v45  ;;  %v8268_v58 = vcombine.low %v572_v46, %v580_v47 }
  0x83   : > { %v836_v49 = vld [vmem:[%s9612_s30 + $0xc40] sm:$0xff]  ;;  %6672 = vmatpush1.bf16.msra.mxu1 %v8508_v51 }
  0x84   : > { %v8525_v53 = vcombine.high %v828_v48, %v836_v49  ;;  %v588_v54 = vld [vmem:[%s9612_s30 + $0x480] sm:$0xff]  ;;  %6632 = vmatprep.subr.bf16.mxu0 %v8269_v52  ;;  %v8524_v59 = vcombine.low %v828_v48, %v836_v49 }
  0x85   : > { %v596_v55 = vld [vmem:[%s9612_s30 + $0x4c0] sm:$0xff]  ;;  %6633 = vmatpush1.bf16.msra.mxu0 %v8268_v58 }
  0x86   : > { %v844_v56 = vld [vmem:[%s9612_s30 + $0xc80] sm:$0xff]  ;;  %v8285_v60 = vcombine.high %v588_v54, %v596_v55  ;;  %6673 = vmatprep.subr.bf16.mxu1 %v8525_v53  ;;  %v8284_v2 = vcombine.low %v588_v54, %v596_v55 }
  0x87   : > { %v852_v57 = vld [vmem:[%s9612_s30 + $0xcc0] sm:$0xff]  ;;  %6674 = vmatpush1.bf16.msra.mxu1 %v8524_v59 }
  0x88   : > { %v8541_v61 = vcombine.high %v844_v56, %v852_v57  ;;  %v604_v62 = vld [vmem:[%s9612_s30 + $0x500] sm:$0xff]  ;;  %6634 = vmatprep.subr.bf16.mxu0 %v8285_v60  ;;  %v8540_v3 = vcombine.low %v844_v56, %v852_v57  ;;  %v9722_v60 = vcombine.low %v9663_v33, %v9663_v33 }
  0x89   : > { %v612_v63 = vld [vmem:[%s9612_s30 + $0x540] sm:$0xff]  ;;  %6635 = vmatpush1.bf16.msra.mxu0 %v8284_v2  ;;  %v9734_v2 = vld [vmem:[%s9626_s29 + $0x18] sm:$0xff] }
  0x8a   : > { %v860_v0 = vld [vmem:[%s9612_s30 + $0xd00] sm:$0xff]  ;;  %v8301_v4 = vcombine.high %v604_v62, %v612_v63  ;;  %6675 = vmatprep.subr.bf16.mxu1 %v8541_v61  ;;  %v8300_v10 = vcombine.low %v604_v62, %v612_v63  ;;  %v9727_v63 = vld [vmem:[%s9626_s29 + $0x10] sm:$0xff] }
  0x8b   : > { %v868_v1 = vld [vmem:[%s9612_s30 + $0xd40] sm:$0xff]  ;;  %6676 = vmatpush1.bf16.msra.mxu1 %v8540_v3 }
  0x8c   : > { %v8557_v5 = vcombine.high %v860_v0, %v868_v1  ;;  %v620_v6 = vld [vmem:[%s9612_s30 + $0x580] sm:$0xff]  ;;  %6636 = vmatprep.subr.bf16.mxu0 %v8301_v4  ;;  %v8556_v11 = vcombine.low %v860_v0, %v868_v1  ;;  %v9731_v0 = vcombine.low %v9666_v34, %v9666_v34 }
  0x8d   : > { %v628_v7 = vld [vmem:[%s9612_s30 + $0x5c0] sm:$0xff]  ;;  %6637 = vmatpush1.bf16.msra.mxu0 %v8300_v10 }
  0x8e   : > { %v876_v8 = vld [vmem:[%s9612_s30 + $0xd80] sm:$0xff]  ;;  %v8317_v12 = vcombine.high %v620_v6, %v628_v7  ;;  %6677 = vmatprep.subr.bf16.mxu1 %v8557_v5  ;;  %v8316_v18 = vcombine.low %v620_v6, %v628_v7  ;;  %v9740_v7 = vcombine.high %v9727_v63, %v9727_v63 }
  0x8f   : > { %v884_v9 = vld [vmem:[%s9612_s30 + $0xdc0] sm:$0xff]  ;;  %6678 = vmatpush1.bf16.msra.mxu1 %v8556_v11 }
  0x90   : > { %v8573_v13 = vcombine.high %v876_v8, %v884_v9  ;;  %v636_v14 = vld [vmem:[%s9612_s30 + $0x600] sm:$0xff]  ;;  %6638 = vmatprep.subr.bf16.mxu0 %v8317_v12  ;;  %v8572_v19 = vcombine.low %v876_v8, %v884_v9  ;;  %v9747_v9 = vcombine.high %v9734_v2, %v9734_v2 }
  0x91   : > { %v644_v15 = vld [vmem:[%s9612_s30 + $0x640] sm:$0xff]  ;;  %6639 = vmatpush1.bf16.msra.mxu0 %v8316_v18 }
  0x92   : > { %v892_v16 = vld [vmem:[%s9612_s30 + $0xe00] sm:$0xff]  ;;  %v8333_v20 = vcombine.high %v636_v14, %v644_v15  ;;  %6679 = vmatprep.subr.bf16.mxu1 %v8573_v13  ;;  %v8332_v26 = vcombine.low %v636_v14, %v644_v15 }
  0x93   : > { %v900_v17 = vld [vmem:[%s9612_s30 + $0xe40] sm:$0xff]  ;;  %6680 = vmatpush1.bf16.msra.mxu1 %v8572_v19 }
  0x94   : > { %v8589_v21 = vcombine.high %v892_v16, %v900_v17  ;;  %v652_v22 = vld [vmem:[%s9612_s30 + $0x680] sm:$0xff]  ;;  %6640 = vmatprep.subr.bf16.mxu0 %v8333_v20  ;;  %v8588_v27 = vcombine.low %v892_v16, %v900_v17 }
  0x95   : > { %v660_v23 = vld [vmem:[%s9612_s30 + $0x6c0] sm:$0xff]  ;;  %6641 = vmatpush1.bf16.msra.mxu0 %v8332_v26 }
  0x96   : > { %v908_v24 = vld [vmem:[%s9612_s30 + $0xe80] sm:$0xff]  ;;  %v8349_v28 = vcombine.high %v652_v22, %v660_v23  ;;  %6681 = vmatprep.subr.bf16.mxu1 %v8589_v21  ;;  %v8348_v36 = vcombine.low %v652_v22, %v660_v23 }
  0x97   : > { %v916_v25 = vld [vmem:[%s9612_s30 + $0xec0] sm:$0xff]  ;;  %6682 = vmatpush1.bf16.msra.mxu1 %v8588_v27 }
  0x98   : > { %v8605_v29 = vcombine.high %v908_v24, %v916_v25  ;;  %v668_v30 = vld [vmem:[%s9612_s30 + $0x700] sm:$0xff]  ;;  %6642 = vmatprep.subr.bf16.mxu0 %v8349_v28  ;;  %v8604_v37 = vcombine.low %v908_v24, %v916_v25 }
  0x99   : > { %v676_v31 = vld [vmem:[%s9612_s30 + $0x740] sm:$0xff]  ;;  %6643 = vmatpush1.bf16.msra.mxu0 %v8348_v36 }
  0x9a   : > { %v924_v32 = vld [vmem:[%s9612_s30 + $0xf00] sm:$0xff]  ;;  %v8365_v40 = vcombine.high %v668_v30, %v676_v31  ;;  %6683 = vmatprep.subr.bf16.mxu1 %v8605_v29  ;;  %v8364_v46 = vcombine.low %v668_v30, %v676_v31 }
  0x9b   : > { %v932_v35 = vld [vmem:[%s9612_s30 + $0xf40] sm:$0xff]  ;;  %6684 = vmatpush1.bf16.msra.mxu1 %v8604_v37 }
  0x9c   : > { %v8621_v41 = vcombine.high %v924_v32, %v932_v35  ;;  %v684_v42 = vld [vmem:[%s9612_s30 + $0x780] sm:$0xff]  ;;  %6644 = vmatprep.subr.bf16.mxu0 %v8365_v40  ;;  %v8620_v47 = vcombine.low %v924_v32, %v932_v35 }
  0x9d   : > { %v692_v43 = vld [vmem:[%s9612_s30 + $0x7c0] sm:$0xff]  ;;  %6645 = vmatpush1.bf16.msra.mxu0 %v8364_v46 }
  0x9e   : > { %v940_v44 = vld [vmem:[%s9612_s30 + $0xf80] sm:$0xff]  ;;  %v8381_v48 = vcombine.high %v684_v42, %v692_v43  ;;  %6685 = vmatprep.subr.bf16.mxu1 %v8621_v41  ;;  %v8380_v54 = vcombine.low %v684_v42, %v692_v43 }
  0x9f   : > { %v948_v45 = vld [vmem:[%s9612_s30 + $0xfc0] sm:$0xff]  ;;  %6686 = vmatpush1.bf16.msra.mxu1 %v8620_v47 }
  0xa0   : > { %v8637_v49 = vcombine.high %v940_v44, %v948_v45  ;;  %v956_v50 = vld [vmem:[%s9612_s30 + $0x1000] sm:$0xff]  ;;  %6646 = vmatprep.subr.bf16.mxu0 %v8381_v48  ;;  %v8636_v55 = vcombine.low %v940_v44, %v948_v45 }
  0xa1   : > { %v964_v51 = vld [vmem:[%s9612_s30 + $0x1040] sm:$0xff]  ;;  %6647 = vmatpush1.bf16.msra.mxu0 %v8380_v54 }
  0xa2   : > { %v1212_v52 = vld [vmem:[%s9612_s30 + $0x1800] sm:$0xff]  ;;  %v8653_v56 = vcombine.high %v956_v50, %v964_v51  ;;  %6687 = vmatprep.subr.bf16.mxu1 %v8637_v49  ;;  %v8652_v1 = vcombine.low %v956_v50, %v964_v51 }
  0xa3   : > { %v1220_v53 = vld [vmem:[%s9612_s30 + $0x1840] sm:$0xff]  ;;  %6688 = vmatpush1.bf16.msra.mxu1 %v8636_v55 }
  0xa4   : > { %v8909_v57 = vcombine.high %v1212_v52, %v1220_v53  ;;  %v972_v58 = vld [vmem:[%s9612_s30 + $0x1080] sm:$0xff]  ;;  %6698 = vmatprep.subr.bf16.mxu0 %v8653_v56  ;;  %v8908_v3 = vcombine.low %v1212_v52, %v1220_v53  ;;  %6649 = vmatmul.mubr.bf16.vlgmr.msra.gmra.mrb[0].mxu0 %v9722_v60 }
  0xa5   : > { %v980_v59 = vld [vmem:[%s9612_s30 + $0x10c0] sm:$0xff]  ;;  %6699 = vmatpush1.bf16.msra.mxu0 %v8652_v1  ;;  %6730 = vmatprep.mubr.bf16.mxu0 %v9740_v7 }
  0xa6   : > { %v1228_v61 = vld [vmem:[%s9612_s30 + $0x1880] sm:$0xff]  ;;  %v8669_v4 = vcombine.high %v972_v58, %v980_v59  ;;  %6739 = vmatprep.subr.bf16.mxu1 %v8909_v57  ;;  %6690 = vmatmul.mubr.bf16.vlgmr.msra.gmra.mrb[0].mxu1 %v9731_v0  ;;  %v8668_v10 = vcombine.low %v972_v58, %v980_v59 }
  0xa7   : > { %v1236_v62 = vld [vmem:[%s9612_s30 + $0x18c0] sm:$0xff]  ;;  %6740 = vmatpush1.bf16.msra.mxu1 %v8908_v3  ;;  %6771 = vmatprep.mubr.bf16.mxu1 %v9747_v9 }
  0xa8   : > { %v8925_v33 = vcombine.high %v1228_v61, %v1236_v62  ;;  %v988_v5 = vld [vmem:[%s9612_s30 + $0x1100] sm:$0xff]  ;;  %6700 = vmatprep.subr.bf16.mxu0 %v8669_v4  ;;  %v8924_v11 = vcombine.low %v1228_v61, %v1236_v62 }
  0xa9   : > { %v996_v6 = vld [vmem:[%s9612_s30 + $0x1140] sm:$0xff]  ;;  %6701 = vmatpush1.bf16.msra.mxu0 %v8668_v10 }
  0xaa   : > { %v1244_v34 = vld [vmem:[%s9612_s30 + $0x1900] sm:$0xff]  ;;  %v8685_v12 = vcombine.high %v988_v5, %v996_v6  ;;  %6741 = vmatprep.subr.bf16.mxu1 %v8925_v33  ;;  %v8684_v18 = vcombine.low %v988_v5, %v996_v6 }
  0xab   : > { %v1252_v8 = vld [vmem:[%s9612_s30 + $0x1940] sm:$0xff]  ;;  %6742 = vmatpush1.bf16.msra.mxu1 %v8924_v11 }
  0xac   : > { %v8941_v13 = vcombine.high %v1244_v34, %v1252_v8  ;;  %v1004_v14 = vld [vmem:[%s9612_s30 + $0x1180] sm:$0xff]  ;;  %6702 = vmatprep.subr.bf16.mxu0 %v8685_v12  ;;  %v8940_v19 = vcombine.low %v1244_v34, %v1252_v8 }
  0xad   : > { %v1012_v15 = vld [vmem:[%s9612_s30 + $0x11c0] sm:$0xff]  ;;  %6703 = vmatpush1.bf16.msra.mxu0 %v8684_v18 }
  0xae   : > { %v1260_v16 = vld [vmem:[%s9612_s30 + $0x1980] sm:$0xff]  ;;  %v8701_v20 = vcombine.high %v1004_v14, %v1012_v15  ;;  %6743 = vmatprep.subr.bf16.mxu1 %v8941_v13  ;;  %v8700_v26 = vcombine.low %v1004_v14, %v1012_v15 }
  0xaf   : > { %v1268_v17 = vld [vmem:[%s9612_s30 + $0x19c0] sm:$0xff]  ;;  %6744 = vmatpush1.bf16.msra.mxu1 %v8940_v19 }
  0xb0   : > { %v8957_v21 = vcombine.high %v1260_v16, %v1268_v17  ;;  %v1020_v22 = vld [vmem:[%s9612_s30 + $0x1200] sm:$0xff]  ;;  %6704 = vmatprep.subr.bf16.mxu0 %v8701_v20  ;;  %v8956_v27 = vcombine.low %v1260_v16, %v1268_v17 }
  0xb1   : > { %v1028_v23 = vld [vmem:[%s9612_s30 + $0x1240] sm:$0xff]  ;;  %6705 = vmatpush1.bf16.msra.mxu0 %v8700_v26 }
  0xb2   : > { %v1276_v24 = vld [vmem:[%s9612_s30 + $0x1a00] sm:$0xff]  ;;  %v8717_v28 = vcombine.high %v1020_v22, %v1028_v23  ;;  %6745 = vmatprep.subr.bf16.mxu1 %v8957_v21  ;;  %v8716_v36 = vcombine.low %v1020_v22, %v1028_v23 }
  0xb3   : > { %v1284_v25 = vld [vmem:[%s9612_s30 + $0x1a40] sm:$0xff]  ;;  %6746 = vmatpush1.bf16.msra.mxu1 %v8956_v27 }
  0xb4   : > { %v8973_v29 = vcombine.high %v1276_v24, %v1284_v25  ;;  %v1036_v30 = vld [vmem:[%s9612_s30 + $0x1280] sm:$0xff]  ;;  %6706 = vmatprep.subr.bf16.mxu0 %v8717_v28  ;;  %v8972_v37 = vcombine.low %v1276_v24, %v1284_v25 }
  0xb5   : > { %v1044_v31 = vld [vmem:[%s9612_s30 + $0x12c0] sm:$0xff]  ;;  %6707 = vmatpush1.bf16.msra.mxu0 %v8716_v36 }
  0xb6   : > { %v1292_v32 = vld [vmem:[%s9612_s30 + $0x1a80] sm:$0xff]  ;;  %v8733_v40 = vcombine.high %v1036_v30, %v1044_v31  ;;  %6747 = vmatprep.subr.bf16.mxu1 %v8973_v29  ;;  %v8732_v46 = vcombine.low %v1036_v30, %v1044_v31 }
  0xb7   : > { %v1300_v35 = vld [vmem:[%s9612_s30 + $0x1ac0] sm:$0xff]  ;;  %6748 = vmatpush1.bf16.msra.mxu1 %v8972_v37 }
  0xb8   : > { %v8989_v41 = vcombine.high %v1292_v32, %v1300_v35  ;;  %v1052_v42 = vld [vmem:[%s9612_s30 + $0x1300] sm:$0xff]  ;;  %6708 = vmatprep.subr.bf16.mxu0 %v8733_v40  ;;  %v8988_v47 = vcombine.low %v1292_v32, %v1300_v35 }
  0xb9   : > { %v1060_v43 = vld [vmem:[%s9612_s30 + $0x1340] sm:$0xff]  ;;  %6709 = vmatpush1.bf16.msra.mxu0 %v8732_v46 }
  0xba   : > { %v1308_v44 = vld [vmem:[%s9612_s30 + $0x1b00] sm:$0xff]  ;;  %v8749_v48 = vcombine.high %v1052_v42, %v1060_v43  ;;  %6749 = vmatprep.subr.bf16.mxu1 %v8989_v41  ;;  %v8748_v54 = vcombine.low %v1052_v42, %v1060_v43 }
  0xbb   : > { %v1316_v45 = vld [vmem:[%s9612_s30 + $0x1b40] sm:$0xff]  ;;  %6750 = vmatpush1.bf16.msra.mxu1 %v8988_v47 }
  0xbc   : > { %v9005_v49 = vcombine.high %v1308_v44, %v1316_v45  ;;  %v1068_v50 = vld [vmem:[%s9612_s30 + $0x1380] sm:$0xff]  ;;  %6710 = vmatprep.subr.bf16.mxu0 %v8749_v48  ;;  %v9004_v55 = vcombine.low %v1308_v44, %v1316_v45 }
  0xbd   : > { %v1076_v51 = vld [vmem:[%s9612_s30 + $0x13c0] sm:$0xff]  ;;  %6711 = vmatpush1.bf16.msra.mxu0 %v8748_v54 }
  0xbe   : > { %v1324_v52 = vld [vmem:[%s9612_s30 + $0x1b80] sm:$0xff]  ;;  %v8765_v56 = vcombine.high %v1068_v50, %v1076_v51  ;;  %6751 = vmatprep.subr.bf16.mxu1 %v9005_v49  ;;  %v8764_v1 = vcombine.low %v1068_v50, %v1076_v51 }
  0xbf   : > { %v1332_v53 = vld [vmem:[%s9612_s30 + $0x1bc0] sm:$0xff]  ;;  %6752 = vmatpush1.bf16.msra.mxu1 %v9004_v55 }
  0xc0   : > { %v9021_v57 = vcombine.high %v1324_v52, %v1332_v53  ;;  %v1084_v58 = vld [vmem:[%s9612_s30 + $0x1400] sm:$0xff]  ;;  %6712 = vmatprep.subr.bf16.mxu0 %v8765_v56  ;;  %v9020_v3 = vcombine.low %v1324_v52, %v1332_v53 }
  0xc1   : > { %v1092_v59 = vld [vmem:[%s9612_s30 + $0x1440] sm:$0xff]  ;;  %6713 = vmatpush1.bf16.msra.mxu0 %v8764_v1 }
  0xc2   : > { %v1340_v61 = vld [vmem:[%s9612_s30 + $0x1c00] sm:$0xff]  ;;  %v8781_v4 = vcombine.high %v1084_v58, %v1092_v59  ;;  %6753 = vmatprep.subr.bf16.mxu1 %v9021_v57  ;;  %v8780_v10 = vcombine.low %v1084_v58, %v1092_v59 }
  0xc3   : > { %v1348_v62 = vld [vmem:[%s9612_s30 + $0x1c40] sm:$0xff]  ;;  %6754 = vmatpush1.bf16.msra.mxu1 %v9020_v3 }
  0xc4   : > { %v9037_v33 = vcombine.high %v1340_v61, %v1348_v62  ;;  %v1100_v5 = vld [vmem:[%s9612_s30 + $0x1480] sm:$0xff]  ;;  %6714 = vmatprep.subr.bf16.mxu0 %v8781_v4  ;;  %v9036_v11 = vcombine.low %v1340_v61, %v1348_v62 }
  0xc5   : > { %v1108_v6 = vld [vmem:[%s9612_s30 + $0x14c0] sm:$0xff]  ;;  %6715 = vmatpush1.bf16.msra.mxu0 %v8780_v10 }
  0xc6   : > { %v1356_v34 = vld [vmem:[%s9612_s30 + $0x1c80] sm:$0xff]  ;;  %v8797_v12 = vcombine.high %v1100_v5, %v1108_v6  ;;  %6755 = vmatprep.subr.bf16.mxu1 %v9037_v33  ;;  %v8796_v18 = vcombine.low %v1100_v5, %v1108_v6  ;;  %v445_v5 = vld [vmem:[%s9612_s30 + $0x8] sm:$0xff] }
  0xc7   : > { %v1364_v8 = vld [vmem:[%s9612_s30 + $0x1cc0] sm:$0xff]  ;;  %6756 = vmatpush1.bf16.msra.mxu1 %v9036_v11  ;;  %v453_v6 = vld [vmem:[%s9612_s30 + $0x48] sm:$0xff] }
  0xc8   : > { %v9053_v13 = vcombine.high %v1356_v34, %v1364_v8  ;;  %v1116_v14 = vld [vmem:[%s9612_s30 + $0x1500] sm:$0xff]  ;;  %6716 = vmatprep.subr.bf16.mxu0 %v8797_v12  ;;  %v9052_v19 = vcombine.low %v1356_v34, %v1364_v8  ;;  %v701_v34 = vld [vmem:[%s9612_s30 + $0x808] sm:$0xff]  ;;  %v8143_v12 = vcombine.high %v445_v5, %v453_v6 }
  0xc9   : > { %v1124_v15 = vld [vmem:[%s9612_s30 + $0x1540] sm:$0xff]  ;;  %6717 = vmatpush1.bf16.msra.mxu0 %v8796_v18  ;;  %v709_v8 = vld [vmem:[%s9612_s30 + $0x848] sm:$0xff] }
  0xca   : > { %v1372_v16 = vld [vmem:[%s9612_s30 + $0x1d00] sm:$0xff]  ;;  %v8813_v20 = vcombine.high %v1116_v14, %v1124_v15  ;;  %6757 = vmatprep.subr.bf16.mxu1 %v9053_v13  ;;  %v8812_v26 = vcombine.low %v1116_v14, %v1124_v15  ;;  %v8399_v13 = vcombine.high %v701_v34, %v709_v8  ;;  %v461_v14 = vld [vmem:[%s9612_s30 + $0x88] sm:$0xff] }
  0xcb   : > { %v1380_v17 = vld [vmem:[%s9612_s30 + $0x1d40] sm:$0xff]  ;;  %6758 = vmatpush1.bf16.msra.mxu1 %v9052_v19  ;;  %v469_v15 = vld [vmem:[%s9612_s30 + $0xc8] sm:$0xff]  ;;  %v9818_v19 = vcombine.low %v9734_v2, %v9734_v2 }
  0xcc   : > { %v9069_v21 = vcombine.high %v1372_v16, %v1380_v17  ;;  %v1132_v22 = vld [vmem:[%s9612_s30 + $0x1580] sm:$0xff]  ;;  %6718 = vmatprep.subr.bf16.mxu0 %v8813_v20  ;;  %v9068_v27 = vcombine.low %v1372_v16, %v1380_v17  ;;  %v9812_v16 = vcombine.low %v9727_v63, %v9727_v63  ;;  %v717_v17 = vld [vmem:[%s9612_s30 + $0x888] sm:$0xff]  ;;  %v8142_v20 = vcombine.low %v445_v5, %v453_v6 }
  0xcd   : > { %v1140_v23 = vld [vmem:[%s9612_s30 + $0x15c0] sm:$0xff]  ;;  %6719 = vmatpush1.bf16.msra.mxu0 %v8812_v26  ;;  %v725_v18 = vld [vmem:[%s9612_s30 + $0x8c8] sm:$0xff]  ;;  %v8158_v2 = vcombine.low %v461_v14, %v469_v15 }
  0xce   : > { %v1388_v24 = vld [vmem:[%s9612_s30 + $0x1d80] sm:$0xff]  ;;  %v8829_v28 = vcombine.high %v1132_v22, %v1140_v23  ;;  %6759 = vmatprep.subr.bf16.mxu1 %v9069_v21  ;;  %v8828_v36 = vcombine.low %v1132_v22, %v1140_v23  ;;  %v8398_v21 = vcombine.low %v701_v34, %v709_v8  ;;  %v8159_v22 = vcombine.high %v461_v14, %v469_v15  ;;  %v485_v63 = vld [vmem:[%s9612_s30 + $0x148] sm:$0xff] }
  0xcf   : > { %v1396_v25 = vld [vmem:[%s9612_s30 + $0x1dc0] sm:$0xff]  ;;  %6760 = vmatpush1.bf16.msra.mxu1 %v9068_v27  ;;  %v8415_v23 = vcombine.high %v717_v17, %v725_v18  ;;  %v741_v26 = vld [vmem:[%s9612_s30 + $0x948] sm:$0xff]  ;;  %v8414_v27 = vcombine.low %v717_v17, %v725_v18 }
  0xd0   : > { %v9085_v29 = vcombine.high %v1388_v24, %v1396_v25  ;;  %v1148_v30 = vld [vmem:[%s9612_s30 + $0x1600] sm:$0xff]  ;;  %6720 = vmatprep.subr.bf16.mxu0 %v8829_v28  ;;  %v9084_v37 = vcombine.low %v1388_v24, %v1396_v25  ;;  %v477_v24 = vld [vmem:[%s9612_s30 + $0x108] sm:$0xff] }
  0xd1   : > { %v1156_v31 = vld [vmem:[%s9612_s30 + $0x1640] sm:$0xff]  ;;  %6721 = vmatpush1.bf16.msra.mxu0 %v8828_v36  ;;  %v733_v25 = vld [vmem:[%s9612_s30 + $0x908] sm:$0xff]  ;;  %v8175_v28 = vcombine.high %v477_v24, %v485_v63  ;;  %v8174_v36 = vcombine.low %v477_v24, %v485_v63 }
  0xd2   : > { %v1404_v32 = vld [vmem:[%s9612_s30 + $0x1e00] sm:$0xff]  ;;  %v8845_v40 = vcombine.high %v1148_v30, %v1156_v31  ;;  %6761 = vmatprep.subr.bf16.mxu1 %v9085_v29  ;;  %v8844_v46 = vcombine.low %v1148_v30, %v1156_v31  ;;  %v8431_v29 = vcombine.high %v733_v25, %v741_v26  ;;  %v493_v30 = vld [vmem:[%s9612_s30 + $0x188] sm:$0xff] }
  0xd3   : > { %v1412_v35 = vld [vmem:[%s9612_s30 + $0x1e40] sm:$0xff]  ;;  %6762 = vmatpush1.bf16.msra.mxu1 %v9084_v37  ;;  %v501_v31 = vld [vmem:[%s9612_s30 + $0x1c8] sm:$0xff]  ;;  %v8430_v37 = vcombine.low %v733_v25, %v741_v26 }
  0xd4   : > { %v9101_v41 = vcombine.high %v1404_v32, %v1412_v35  ;;  %v1164_v42 = vld [vmem:[%s9612_s30 + $0x1680] sm:$0xff]  ;;  %6722 = vmatprep.subr.bf16.mxu0 %v8845_v40  ;;  %v9100_v47 = vcombine.low %v1404_v32, %v1412_v35  ;;  %v749_v32 = vld [vmem:[%s9612_s30 + $0x988] sm:$0xff]  ;;  %v8191_v40 = vcombine.high %v493_v30, %v501_v31 }
  0xd5   : > { %v1172_v43 = vld [vmem:[%s9612_s30 + $0x16c0] sm:$0xff]  ;;  %6723 = vmatpush1.bf16.msra.mxu0 %v8844_v46  ;;  %v757_v35 = vld [vmem:[%s9612_s30 + $0x9c8] sm:$0xff]  ;;  %v8190_v46 = vcombine.low %v493_v30, %v501_v31 }
  0xd6   : > { %v1420_v44 = vld [vmem:[%s9612_s30 + $0x1e80] sm:$0xff]  ;;  %v8861_v48 = vcombine.high %v1164_v42, %v1172_v43  ;;  %6763 = vmatprep.subr.bf16.mxu1 %v9101_v41  ;;  %v8860_v54 = vcombine.low %v1164_v42, %v1172_v43  ;;  %v8447_v41 = vcombine.high %v749_v32, %v757_v35  ;;  %v509_v42 = vld [vmem:[%s9612_s30 + $0x208] sm:$0xff] }
  0xd7   : > { %v1428_v45 = vld [vmem:[%s9612_s30 + $0x1ec0] sm:$0xff]  ;;  %6764 = vmatpush1.bf16.msra.mxu1 %v9100_v47  ;;  %v517_v43 = vld [vmem:[%s9612_s30 + $0x248] sm:$0xff]  ;;  %v8446_v47 = vcombine.low %v749_v32, %v757_v35 }
  0xd8   : > { %v9117_v49 = vcombine.high %v1420_v44, %v1428_v45  ;;  %v1180_v50 = vld [vmem:[%s9612_s30 + $0x1700] sm:$0xff]  ;;  %6724 = vmatprep.subr.bf16.mxu0 %v8861_v48  ;;  %v9116_v55 = vcombine.low %v1420_v44, %v1428_v45  ;;  %v765_v44 = vld [vmem:[%s9612_s30 + $0xa08] sm:$0xff]  ;;  %v8207_v48 = vcombine.high %v509_v42, %v517_v43 }
  0xd9   : > { %v1188_v51 = vld [vmem:[%s9612_s30 + $0x1740] sm:$0xff]  ;;  %6725 = vmatpush1.bf16.msra.mxu0 %v8860_v54  ;;  %v773_v45 = vld [vmem:[%s9612_s30 + $0xa48] sm:$0xff]  ;;  %v8206_v54 = vcombine.low %v509_v42, %v517_v43 }
  0xda   : > { %v1436_v52 = vld [vmem:[%s9612_s30 + $0x1f00] sm:$0xff]  ;;  %v8877_v56 = vcombine.high %v1180_v50, %v1188_v51  ;;  %6765 = vmatprep.subr.bf16.mxu1 %v9117_v49  ;;  %v8876_v1 = vcombine.low %v1180_v50, %v1188_v51  ;;  %v8463_v49 = vcombine.high %v765_v44, %v773_v45  ;;  %v525_v50 = vld [vmem:[%s9612_s30 + $0x288] sm:$0xff] }
  0xdb   : > { %v1444_v53 = vld [vmem:[%s9612_s30 + $0x1f40] sm:$0xff]  ;;  %6766 = vmatpush1.bf16.msra.mxu1 %v9116_v55  ;;  %v533_v51 = vld [vmem:[%s9612_s30 + $0x2c8] sm:$0xff]  ;;  %v8462_v55 = vcombine.low %v765_v44, %v773_v45 }
  0xdc   : > { %v9133_v57 = vcombine.high %v1436_v52, %v1444_v53  ;;  %v1196_v58 = vld [vmem:[%s9612_s30 + $0x1780] sm:$0xff]  ;;  %6726 = vmatprep.subr.bf16.mxu0 %v8877_v56  ;;  %v9132_v3 = vcombine.low %v1436_v52, %v1444_v53  ;;  %v781_v52 = vld [vmem:[%s9612_s30 + $0xa88] sm:$0xff]  ;;  %v8223_v56 = vcombine.high %v525_v50, %v533_v51 }
  0xdd   : > { %v1204_v59 = vld [vmem:[%s9612_s30 + $0x17c0] sm:$0xff]  ;;  %6727 = vmatpush1.bf16.msra.mxu0 %v8876_v1  ;;  %v789_v53 = vld [vmem:[%s9612_s30 + $0xac8] sm:$0xff]  ;;  %v8222_v1 = vcombine.low %v525_v50, %v533_v51 }
  0xde   : > { %v1452_v61 = vld [vmem:[%s9612_s30 + $0x1f80] sm:$0xff]  ;;  %v8893_v4 = vcombine.high %v1196_v58, %v1204_v59  ;;  %6767 = vmatprep.subr.bf16.mxu1 %v9133_v57  ;;  %v8892_v10 = vcombine.low %v1196_v58, %v1204_v59  ;;  %v8479_v57 = vcombine.high %v781_v52, %v789_v53  ;;  %v541_v58 = vld [vmem:[%s9612_s30 + $0x308] sm:$0xff] }
  0xdf   : > { %v1460_v62 = vld [vmem:[%s9612_s30 + $0x1fc0] sm:$0xff]  ;;  %6768 = vmatpush1.bf16.msra.mxu1 %v9132_v3  ;;  %v549_v59 = vld [vmem:[%s9612_s30 + $0x348] sm:$0xff]  ;;  %v8478_v3 = vcombine.low %v781_v52, %v789_v53 }
  0xe0   : > { %v9149_v33 = vcombine.high %v1452_v61, %v1460_v62  ;;  %6728 = vmatprep.subr.bf16.mxu0 %v8893_v4  ;;  %v9148_v11 = vcombine.low %v1452_v61, %v1460_v62  ;;  %v797_v61 = vld [vmem:[%s9612_s30 + $0xb08] sm:$0xff]  ;;  %v8239_v4 = vcombine.high %v541_v58, %v549_v59 }
  0xe1   : > { %6729 = vmatpush1.bf16.msra.mxu0 %v8892_v10  ;;  %v805_v62 = vld [vmem:[%s9612_s30 + $0xb48] sm:$0xff]  ;;  %v8238_v10 = vcombine.low %v541_v58, %v549_v59 }
  0xe2   : > { %6769 = vmatprep.subr.bf16.mxu1 %v9149_v33  ;;  %6780 = vmatprep.subr.bf16.mxu0 %v8143_v12  ;;  %v8495_v33 = vcombine.high %v797_v61, %v805_v62  ;;  %v557_v5 = vld [vmem:[%s9612_s30 + $0x388] sm:$0xff] }
  0xe3   : > { %6770 = vmatpush1.bf16.msra.mxu1 %v9148_v11  ;;  %v565_v6 = vld [vmem:[%s9612_s30 + $0x3c8] sm:$0xff]  ;;  %v8494_v11 = vcombine.low %v797_v61, %v805_v62 }
  0xe4   : > { %6821 = vmatprep.subr.bf16.mxu1 %v8399_v13  ;;  %6731 = vmatmul.mubr.bf16.vlgmr.msra.gmra.mrb[4].mxu0 %v9812_v16  ;;  %v813_v34 = vld [vmem:[%s9612_s30 + $0xb88] sm:$0xff]  ;;  %v8255_v12 = vcombine.high %v557_v5, %v565_v6 }
  0xe5   : > { %6781 = vmatpush1.bf16.msra.mxu0 %v8142_v20  ;;  %6812 = vmatprep.mubr.bf16.mxu0 %v9672_v38  ;;  %v821_v8 = vld [vmem:[%s9612_s30 + $0xbc8] sm:$0xff]  ;;  %v8254_v20 = vcombine.low %v557_v5, %v565_v6 }
  0xe6   : > { %6772 = vmatmul.mubr.bf16.vlgmr.msra.gmra.mrb[4].mxu1 %v9818_v19  ;;  %6782 = vmatprep.subr.bf16.mxu0 %v8159_v22  ;;  %v8511_v13 = vcombine.high %v813_v34, %v821_v8  ;;  %v573_v14 = vld [vmem:[%s9612_s30 + $0x408] sm:$0xff] }
  0xe7   : > { %6822 = vmatpush1.bf16.msra.mxu1 %v8398_v21  ;;  %6853 = vmatprep.mubr.bf16.mxu1 %v9676_v39  ;;  %v581_v15 = vld [vmem:[%s9612_s30 + $0x448] sm:$0xff]  ;;  %v8510_v21 = vcombine.low %v813_v34, %v821_v8 }
  0xe8   : > { %6823 = vmatprep.subr.bf16.mxu1 %v8415_v23  ;;  %v829_v17 = vld [vmem:[%s9612_s30 + $0xc08] sm:$0xff]  ;;  %v8271_v22 = vcombine.high %v573_v14, %v581_v15 }
  0xe9   : > { %6783 = vmatpush1.bf16.msra.mxu0 %v8158_v2  ;;  %v837_v18 = vld [vmem:[%s9612_s30 + $0xc48] sm:$0xff]  ;;  %v8270_v2 = vcombine.low %v573_v14, %v581_v15 }
  0xea   : > { %6784 = vmatprep.subr.bf16.mxu0 %v8175_v28  ;;  %v8527_v23 = vcombine.high %v829_v17, %v837_v18  ;;  %v589_v24 = vld [vmem:[%s9612_s30 + $0x488] sm:$0xff] }
  0xeb   : > { %6824 = vmatpush1.bf16.msra.mxu1 %v8414_v27  ;;  %v597_v63 = vld [vmem:[%s9612_s30 + $0x4c8] sm:$0xff]  ;;  %v8526_v27 = vcombine.low %v829_v17, %v837_v18 }
  0xec   : > { %6825 = vmatprep.subr.bf16.mxu1 %v8431_v29  ;;  %v845_v25 = vld [vmem:[%s9612_s30 + $0xc88] sm:$0xff]  ;;  %v8287_v28 = vcombine.high %v589_v24, %v597_v63 }
  0xed   : > { %6785 = vmatpush1.bf16.msra.mxu0 %v8174_v36  ;;  %v853_v26 = vld [vmem:[%s9612_s30 + $0xcc8] sm:$0xff]  ;;  %v8286_v36 = vcombine.low %v589_v24, %v597_v63 }
  0xee   : > { %6786 = vmatprep.subr.bf16.mxu0 %v8191_v40  ;;  %v8543_v29 = vcombine.high %v845_v25, %v853_v26  ;;  %v605_v30 = vld [vmem:[%s9612_s30 + $0x508] sm:$0xff] }
  0xef   : > { %6826 = vmatpush1.bf16.msra.mxu1 %v8430_v37  ;;  %v613_v31 = vld [vmem:[%s9612_s30 + $0x548] sm:$0xff]  ;;  %v8542_v37 = vcombine.low %v845_v25, %v853_v26 }
  0xf0   : > { %6827 = vmatprep.subr.bf16.mxu1 %v8447_v41  ;;  %v861_v32 = vld [vmem:[%s9612_s30 + $0xd08] sm:$0xff]  ;;  %v8303_v40 = vcombine.high %v605_v30, %v613_v31 }
  0xf1   : > { %6787 = vmatpush1.bf16.msra.mxu0 %v8190_v46  ;;  %v869_v35 = vld [vmem:[%s9612_s30 + $0xd48] sm:$0xff]  ;;  %v8302_v46 = vcombine.low %v605_v30, %v613_v31 }
  0xf2   : > { %6788 = vmatprep.subr.bf16.mxu0 %v8207_v48  ;;  %v8559_v41 = vcombine.high %v861_v32, %v869_v35  ;;  %v621_v42 = vld [vmem:[%s9612_s30 + $0x588] sm:$0xff] }
  0xf3   : > { %6828 = vmatpush1.bf16.msra.mxu1 %v8446_v47  ;;  %v629_v43 = vld [vmem:[%s9612_s30 + $0x5c8] sm:$0xff]  ;;  %v8558_v47 = vcombine.low %v861_v32, %v869_v35 }
  0xf4   : > { %6829 = vmatprep.subr.bf16.mxu1 %v8463_v49  ;;  %v877_v44 = vld [vmem:[%s9612_s30 + $0xd88] sm:$0xff]  ;;  %v8319_v48 = vcombine.high %v621_v42, %v629_v43 }
  0xf5   : > { %6789 = vmatpush1.bf16.msra.mxu0 %v8206_v54  ;;  %v885_v45 = vld [vmem:[%s9612_s30 + $0xdc8] sm:$0xff]  ;;  %v8318_v54 = vcombine.low %v621_v42, %v629_v43 }
  0xf6   : > { %6790 = vmatprep.subr.bf16.mxu0 %v8223_v56  ;;  %v8575_v49 = vcombine.high %v877_v44, %v885_v45  ;;  %v637_v50 = vld [vmem:[%s9612_s30 + $0x608] sm:$0xff] }
  0xf7   : > { %6830 = vmatpush1.bf16.msra.mxu1 %v8462_v55  ;;  %v645_v51 = vld [vmem:[%s9612_s30 + $0x648] sm:$0xff]  ;;  %v8574_v55 = vcombine.low %v877_v44, %v885_v45 }
  0xf8   : > { %6831 = vmatprep.subr.bf16.mxu1 %v8479_v57  ;;  %v893_v52 = vld [vmem:[%s9612_s30 + $0xe08] sm:$0xff]  ;;  %v8335_v56 = vcombine.high %v637_v50, %v645_v51 }
  0xf9   : > { %6791 = vmatpush1.bf16.msra.mxu0 %v8222_v1  ;;  %v901_v53 = vld [vmem:[%s9612_s30 + $0xe48] sm:$0xff]  ;;  %v8334_v1 = vcombine.low %v637_v50, %v645_v51 }
  0xfa   : > { %6792 = vmatprep.subr.bf16.mxu0 %v8239_v4  ;;  %v8591_v57 = vcombine.high %v893_v52, %v901_v53  ;;  %v653_v58 = vld [vmem:[%s9612_s30 + $0x688] sm:$0xff] }
  0xfb   : > { %6832 = vmatpush1.bf16.msra.mxu1 %v8478_v3  ;;  %v661_v59 = vld [vmem:[%s9612_s30 + $0x6c8] sm:$0xff]  ;;  %v8590_v3 = vcombine.low %v893_v52, %v901_v53 }
  0xfc   : > { %6833 = vmatprep.subr.bf16.mxu1 %v8495_v33  ;;  %v909_v61 = vld [vmem:[%s9612_s30 + $0xe88] sm:$0xff]  ;;  %v8351_v4 = vcombine.high %v653_v58, %v661_v59 }
  0xfd   : > { %6793 = vmatpush1.bf16.msra.mxu0 %v8238_v10  ;;  %v917_v62 = vld [vmem:[%s9612_s30 + $0xec8] sm:$0xff]  ;;  %v8350_v10 = vcombine.low %v653_v58, %v661_v59 }
  0xfe   : > { %6794 = vmatprep.subr.bf16.mxu0 %v8255_v12  ;;  %v8607_v33 = vcombine.high %v909_v61, %v917_v62  ;;  %v669_v5 = vld [vmem:[%s9612_s30 + $0x708] sm:$0xff] }
  0xff   : > { %6834 = vmatpush1.bf16.msra.mxu1 %v8494_v11  ;;  %v677_v6 = vld [vmem:[%s9612_s30 + $0x748] sm:$0xff]  ;;  %v8606_v11 = vcombine.low %v909_v61, %v917_v62 }
 0x100   : > { %6835 = vmatprep.subr.bf16.mxu1 %v8511_v13  ;;  %v925_v34 = vld [vmem:[%s9612_s30 + $0xf08] sm:$0xff]  ;;  %v8367_v12 = vcombine.high %v669_v5, %v677_v6 }
 0x101   : > { %6795 = vmatpush1.bf16.msra.mxu0 %v8254_v20  ;;  %v933_v8 = vld [vmem:[%s9612_s30 + $0xf48] sm:$0xff]  ;;  %v8366_v20 = vcombine.low %v669_v5, %v677_v6 }
 0x102   : > { %6796 = vmatprep.subr.bf16.mxu0 %v8271_v22  ;;  %v8623_v13 = vcombine.high %v925_v34, %v933_v8  ;;  %v685_v14 = vld [vmem:[%s9612_s30 + $0x788] sm:$0xff] }
 0x103   : > { %6836 = vmatpush1.bf16.msra.mxu1 %v8510_v21  ;;  %v693_v15 = vld [vmem:[%s9612_s30 + $0x7c8] sm:$0xff]  ;;  %v8622_v21 = vcombine.low %v925_v34, %v933_v8 }
 0x104   : > { %6837 = vmatprep.subr.bf16.mxu1 %v8527_v23  ;;  %v941_v17 = vld [vmem:[%s9612_s30 + $0xf88] sm:$0xff]  ;;  %v8383_v22 = vcombine.high %v685_v14, %v693_v15 }
 0x105   : > { %6797 = vmatpush1.bf16.msra.mxu0 %v8270_v2  ;;  %v949_v18 = vld [vmem:[%s9612_s30 + $0xfc8] sm:$0xff]  ;;  %v8382_v2 = vcombine.low %v685_v14, %v693_v15 }
 0x106   : > { %6798 = vmatprep.subr.bf16.mxu0 %v8287_v28  ;;  %v8639_v23 = vcombine.high %v941_v17, %v949_v18  ;;  %v957_v24 = vld [vmem:[%s9612_s30 + $0x1008] sm:$0xff] }
 0x107   : > { %6838 = vmatpush1.bf16.msra.mxu1 %v8526_v27  ;;  %v965_v63 = vld [vmem:[%s9612_s30 + $0x1048] sm:$0xff]  ;;  %v8638_v27 = vcombine.low %v941_v17, %v949_v18 }
 0x108   : > { %6839 = vmatprep.subr.bf16.mxu1 %v8543_v29  ;;  %v1213_v25 = vld [vmem:[%s9612_s30 + $0x1808] sm:$0xff]  ;;  %v8655_v28 = vcombine.high %v957_v24, %v965_v63 }
 0x109   : > { %6799 = vmatpush1.bf16.msra.mxu0 %v8286_v36  ;;  %v1221_v26 = vld [vmem:[%s9612_s30 + $0x1848] sm:$0xff]  ;;  %v8654_v36 = vcombine.low %v957_v24, %v965_v63 }
 0x10a   : > { %6800 = vmatprep.subr.bf16.mxu0 %v8303_v40  ;;  %v8911_v29 = vcombine.high %v1213_v25, %v1221_v26  ;;  %v973_v30 = vld [vmem:[%s9612_s30 + $0x1088] sm:$0xff] }
 0x10b   : > { %6840 = vmatpush1.bf16.msra.mxu1 %v8542_v37  ;;  %v981_v31 = vld [vmem:[%s9612_s30 + $0x10c8] sm:$0xff]  ;;  %v8910_v37 = vcombine.low %v1213_v25, %v1221_v26 }
 0x10c   : > { %6841 = vmatprep.subr.bf16.mxu1 %v8559_v41  ;;  %v1229_v32 = vld [vmem:[%s9612_s30 + $0x1888] sm:$0xff]  ;;  %v8671_v40 = vcombine.high %v973_v30, %v981_v31 }
 0x10d   : > { %6801 = vmatpush1.bf16.msra.mxu0 %v8302_v46  ;;  %v1237_v35 = vld [vmem:[%s9612_s30 + $0x18c8] sm:$0xff]  ;;  %v8670_v46 = vcombine.low %v973_v30, %v981_v31 }
 0x10e   : > { %6802 = vmatprep.subr.bf16.mxu0 %v8319_v48  ;;  %v8927_v41 = vcombine.high %v1229_v32, %v1237_v35  ;;  %v989_v42 = vld [vmem:[%s9612_s30 + $0x1108] sm:$0xff] }
 0x10f   : > { %6842 = vmatpush1.bf16.msra.mxu1 %v8558_v47  ;;  %v997_v43 = vld [vmem:[%s9612_s30 + $0x1148] sm:$0xff]  ;;  %v8926_v47 = vcombine.low %v1229_v32, %v1237_v35 }
 0x110   : > { %6843 = vmatprep.subr.bf16.mxu1 %v8575_v49  ;;  %v1245_v44 = vld [vmem:[%s9612_s30 + $0x1908] sm:$0xff]  ;;  %v8687_v48 = vcombine.high %v989_v42, %v997_v43 }
 0x111   : > { %6803 = vmatpush1.bf16.msra.mxu0 %v8318_v54  ;;  %v1253_v45 = vld [vmem:[%s9612_s30 + $0x1948] sm:$0xff]  ;;  %v8686_v54 = vcombine.low %v989_v42, %v997_v43 }
 0x112   : > { %6804 = vmatprep.subr.bf16.mxu0 %v8335_v56  ;;  %v8943_v49 = vcombine.high %v1245_v44, %v1253_v45  ;;  %v1005_v50 = vld [vmem:[%s9612_s30 + $0x1188] sm:$0xff] }
 0x113   : > { %6844 = vmatpush1.bf16.msra.mxu1 %v8574_v55  ;;  %v1013_v51 = vld [vmem:[%s9612_s30 + $0x11c8] sm:$0xff]  ;;  %v8942_v55 = vcombine.low %v1245_v44, %v1253_v45 }
 0x114   : > { %6845 = vmatprep.subr.bf16.mxu1 %v8591_v57  ;;  %v1261_v52 = vld [vmem:[%s9612_s30 + $0x1988] sm:$0xff]  ;;  %v8703_v56 = vcombine.high %v1005_v50, %v1013_v51 }
 0x115   : > { %6805 = vmatpush1.bf16.msra.mxu0 %v8334_v1  ;;  %v1269_v53 = vld [vmem:[%s9612_s30 + $0x19c8] sm:$0xff]  ;;  %v8702_v1 = vcombine.low %v1005_v50, %v1013_v51 }
 0x116   : > { %6806 = vmatprep.subr.bf16.mxu0 %v8351_v4  ;;  %v8959_v57 = vcombine.high %v1261_v52, %v1269_v53  ;;  %v1021_v58 = vld [vmem:[%s9612_s30 + $0x1208] sm:$0xff] }
 0x117   : > { %6846 = vmatpush1.bf16.msra.mxu1 %v8590_v3  ;;  %v1029_v59 = vld [vmem:[%s9612_s30 + $0x1248] sm:$0xff]  ;;  %v8958_v3 = vcombine.low %v1261_v52, %v1269_v53 }
 0x118   : > { %6847 = vmatprep.subr.bf16.mxu1 %v8607_v33  ;;  %v1277_v61 = vld [vmem:[%s9612_s30 + $0x1a08] sm:$0xff]  ;;  %v8719_v4 = vcombine.high %v1021_v58, %v1029_v59 }
 0x119   : > { %6807 = vmatpush1.bf16.msra.mxu0 %v8350_v10  ;;  %v1285_v62 = vld [vmem:[%s9612_s30 + $0x1a48] sm:$0xff]  ;;  %v8718_v10 = vcombine.low %v1021_v58, %v1029_v59 }
 0x11a   : > { %6808 = vmatprep.subr.bf16.mxu0 %v8367_v12  ;;  %v8975_v33 = vcombine.high %v1277_v61, %v1285_v62  ;;  %v1037_v5 = vld [vmem:[%s9612_s30 + $0x1288] sm:$0xff] }
 0x11b   : > { %6848 = vmatpush1.bf16.msra.mxu1 %v8606_v11  ;;  %v1045_v6 = vld [vmem:[%s9612_s30 + $0x12c8] sm:$0xff]  ;;  %v8974_v11 = vcombine.low %v1277_v61, %v1285_v62 }
 0x11c   : > { %6849 = vmatprep.subr.bf16.mxu1 %v8623_v13  ;;  %v1293_v34 = vld [vmem:[%s9612_s30 + $0x1a88] sm:$0xff]  ;;  %v8735_v12 = vcombine.high %v1037_v5, %v1045_v6 }
 0x11d   : > { %6809 = vmatpush1.bf16.msra.mxu0 %v8366_v20  ;;  %v1301_v8 = vld [vmem:[%s9612_s30 + $0x1ac8] sm:$0xff]  ;;  %v8734_v20 = vcombine.low %v1037_v5, %v1045_v6 }
 0x11e   : > { %6810 = vmatprep.subr.bf16.mxu0 %v8383_v22  ;;  %v8991_v13 = vcombine.high %v1293_v34, %v1301_v8  ;;  %v1053_v14 = vld [vmem:[%s9612_s30 + $0x1308] sm:$0xff] }
 0x11f   : > { %6850 = vmatpush1.bf16.msra.mxu1 %v8622_v21  ;;  %v1061_v15 = vld [vmem:[%s9612_s30 + $0x1348] sm:$0xff]  ;;  %v8990_v21 = vcombine.low %v1293_v34, %v1301_v8 }
 0x120   : > { %6851 = vmatprep.subr.bf16.mxu1 %v8639_v23  ;;  %v1309_v17 = vld [vmem:[%s9612_s30 + $0x1b08] sm:$0xff]  ;;  %v8751_v22 = vcombine.high %v1053_v14, %v1061_v15 }
 0x121   : > { %6811 = vmatpush1.bf16.msra.mxu0 %v8382_v2  ;;  %v1317_v18 = vld [vmem:[%s9612_s30 + $0x1b48] sm:$0xff]  ;;  %v8750_v2 = vcombine.low %v1053_v14, %v1061_v15 }
 0x122   : > { %6862 = vmatprep.subr.bf16.mxu0 %v8655_v28  ;;  %v9007_v23 = vcombine.high %v1309_v17, %v1317_v18  ;;  %v1069_v24 = vld [vmem:[%s9612_s30 + $0x1388] sm:$0xff] }
 0x123   : > { %6852 = vmatpush1.bf16.msra.mxu1 %v8638_v27  ;;  %v1077_v63 = vld [vmem:[%s9612_s30 + $0x13c8] sm:$0xff]  ;;  %v9006_v27 = vcombine.low %v1309_v17, %v1317_v18 }
 0x124   : > { %6903 = vmatprep.subr.bf16.mxu1 %v8911_v29  ;;  %6813 = vmatmul.mubr.bf16.vlgmr.msra.gmra.mrb[8].mxu0 %v9722_v60  ;;  %v1325_v25 = vld [vmem:[%s9612_s30 + $0x1b88] sm:$0xff]  ;;  %v8767_v28 = vcombine.high %v1069_v24, %v1077_v63 }
 0x125   : > { %6863 = vmatpush1.bf16.msra.mxu0 %v8654_v36  ;;  %6894 = vmatprep.mubr.bf16.mxu0 %v9740_v7  ;;  %v1333_v26 = vld [vmem:[%s9612_s30 + $0x1bc8] sm:$0xff]  ;;  %v8766_v36 = vcombine.low %v1069_v24, %v1077_v63 }
 0x126   : > { %6854 = vmatmul.mubr.bf16.vlgmr.msra.gmra.mrb[8].mxu1 %v9731_v0  ;;  %6864 = vmatprep.subr.bf16.mxu0 %v8671_v40  ;;  %v9023_v29 = vcombine.high %v1325_v25, %v1333_v26  ;;  %v1085_v30 = vld [vmem:[%s9612_s30 + $0x1408] sm:$0xff] }
 0x127   : > { %6904 = vmatpush1.bf16.msra.mxu1 %v8910_v37  ;;  %6935 = vmatprep.mubr.bf16.mxu1 %v9747_v9  ;;  %v1093_v31 = vld [vmem:[%s9612_s30 + $0x1448] sm:$0xff]  ;;  %v9022_v37 = vcombine.low %v1325_v25, %v1333_v26 }
 0x128   : > { %6905 = vmatprep.subr.bf16.mxu1 %v8927_v41  ;;  %v1341_v32 = vld [vmem:[%s9612_s30 + $0x1c08] sm:$0xff]  ;;  %v8783_v40 = vcombine.high %v1085_v30, %v1093_v31 }
 0x129   : > { %6865 = vmatpush1.bf16.msra.mxu0 %v8670_v46  ;;  %v1349_v35 = vld [vmem:[%s9612_s30 + $0x1c48] sm:$0xff]  ;;  %v8782_v46 = vcombine.low %v1085_v30, %v1093_v31 }
 0x12a   : > { %6866 = vmatprep.subr.bf16.mxu0 %v8687_v48  ;;  %v9039_v41 = vcombine.high %v1341_v32, %v1349_v35  ;;  %v1101_v42 = vld [vmem:[%s9612_s30 + $0x1488] sm:$0xff] }
 0x12b   : > { %6906 = vmatpush1.bf16.msra.mxu1 %v8926_v47  ;;  %v1109_v43 = vld [vmem:[%s9612_s30 + $0x14c8] sm:$0xff]  ;;  %v9038_v47 = vcombine.low %v1341_v32, %v1349_v35 }
 0x12c   : > { %6907 = vmatprep.subr.bf16.mxu1 %v8943_v49  ;;  %v1357_v44 = vld [vmem:[%s9612_s30 + $0x1c88] sm:$0xff]  ;;  %v8799_v48 = vcombine.high %v1101_v42, %v1109_v43 }
 0x12d   : > { %6867 = vmatpush1.bf16.msra.mxu0 %v8686_v54  ;;  %v1365_v45 = vld [vmem:[%s9612_s30 + $0x1cc8] sm:$0xff]  ;;  %v8798_v54 = vcombine.low %v1101_v42, %v1109_v43  ;;  %v446_v42 = vld [vmem:[%s9612_s30 + $0x10] sm:$0xff] }
 0x12e   : > { %6868 = vmatprep.subr.bf16.mxu0 %v8703_v56  ;;  %v9055_v49 = vcombine.high %v1357_v44, %v1365_v45  ;;  %v1117_v50 = vld [vmem:[%s9612_s30 + $0x1508] sm:$0xff]  ;;  %v454_v43 = vld [vmem:[%s9612_s30 + $0x50] sm:$0xff] }
 0x12f   : > { %6908 = vmatpush1.bf16.msra.mxu1 %v8942_v55  ;;  %v1125_v51 = vld [vmem:[%s9612_s30 + $0x1548] sm:$0xff]  ;;  %v9054_v55 = vcombine.low %v1357_v44, %v1365_v45  ;;  %v702_v44 = vld [vmem:[%s9612_s30 + $0x810] sm:$0xff] }
 0x130   : > { %6909 = vmatprep.subr.bf16.mxu1 %v8959_v57  ;;  %v1373_v52 = vld [vmem:[%s9612_s30 + $0x1d08] sm:$0xff]  ;;  %v8815_v56 = vcombine.high %v1117_v50, %v1125_v51  ;;  %v710_v45 = vld [vmem:[%s9612_s30 + $0x850] sm:$0xff] }
 0x131   : > { %6869 = vmatpush1.bf16.msra.mxu0 %v8702_v1  ;;  %v1381_v53 = vld [vmem:[%s9612_s30 + $0x1d48] sm:$0xff]  ;;  %v8814_v1 = vcombine.low %v1117_v50, %v1125_v51  ;;  %v462_v50 = vld [vmem:[%s9612_s30 + $0x90] sm:$0xff] }
 0x132   : > { %6870 = vmatprep.subr.bf16.mxu0 %v8719_v4  ;;  %v9071_v57 = vcombine.high %v1373_v52, %v1381_v53  ;;  %v1133_v58 = vld [vmem:[%s9612_s30 + $0x1588] sm:$0xff]  ;;  %v470_v51 = vld [vmem:[%s9612_s30 + $0xd0] sm:$0xff] }
 0x133   : > { %6910 = vmatpush1.bf16.msra.mxu1 %v8958_v3  ;;  %v1141_v59 = vld [vmem:[%s9612_s30 + $0x15c8] sm:$0xff]  ;;  %v9070_v3 = vcombine.low %v1373_v52, %v1381_v53  ;;  %v718_v52 = vld [vmem:[%s9612_s30 + $0x890] sm:$0xff] }
 0x134   : > { %6911 = vmatprep.subr.bf16.mxu1 %v8975_v33  ;;  %v1389_v61 = vld [vmem:[%s9612_s30 + $0x1d88] sm:$0xff]  ;;  %v8831_v4 = vcombine.high %v1133_v58, %v1141_v59  ;;  %v726_v53 = vld [vmem:[%s9612_s30 + $0x8d0] sm:$0xff] }
 0x135   : > { %6871 = vmatpush1.bf16.msra.mxu0 %v8718_v10  ;;  %v1397_v62 = vld [vmem:[%s9612_s30 + $0x1dc8] sm:$0xff]  ;;  %v8830_v10 = vcombine.low %v1133_v58, %v1141_v59  ;;  %v478_v58 = vld [vmem:[%s9612_s30 + $0x110] sm:$0xff] }
 0x136   : > { %6872 = vmatprep.subr.bf16.mxu0 %v8735_v12  ;;  %v9087_v33 = vcombine.high %v1389_v61, %v1397_v62  ;;  %v1149_v5 = vld [vmem:[%s9612_s30 + $0x1608] sm:$0xff]  ;;  %v486_v59 = vld [vmem:[%s9612_s30 + $0x150] sm:$0xff] }
 0x137   : > { %6912 = vmatpush1.bf16.msra.mxu1 %v8974_v11  ;;  %v1157_v6 = vld [vmem:[%s9612_s30 + $0x1648] sm:$0xff]  ;;  %v9086_v11 = vcombine.low %v1389_v61, %v1397_v62  ;;  %v734_v61 = vld [vmem:[%s9612_s30 + $0x910] sm:$0xff] }
 0x138   : > { %6913 = vmatprep.subr.bf16.mxu1 %v8991_v13  ;;  %v1405_v34 = vld [vmem:[%s9612_s30 + $0x1e08] sm:$0xff]  ;;  %v8847_v12 = vcombine.high %v1149_v5, %v1157_v6  ;;  %v742_v62 = vld [vmem:[%s9612_s30 + $0x950] sm:$0xff] }
 0x139   : > { %6873 = vmatpush1.bf16.msra.mxu0 %v8734_v20  ;;  %v1413_v8 = vld [vmem:[%s9612_s30 + $0x1e48] sm:$0xff]  ;;  %v8846_v20 = vcombine.low %v1149_v5, %v1157_v6  ;;  %v494_v5 = vld [vmem:[%s9612_s30 + $0x190] sm:$0xff] }
 0x13a   : > { %6874 = vmatprep.subr.bf16.mxu0 %v8751_v22  ;;  %v9103_v13 = vcombine.high %v1405_v34, %v1413_v8  ;;  %v1165_v14 = vld [vmem:[%s9612_s30 + $0x1688] sm:$0xff]  ;;  %v502_v6 = vld [vmem:[%s9612_s30 + $0x1d0] sm:$0xff] }
 0x13b   : > { %6914 = vmatpush1.bf16.msra.mxu1 %v8990_v21  ;;  %v1173_v15 = vld [vmem:[%s9612_s30 + $0x16c8] sm:$0xff]  ;;  %v9102_v21 = vcombine.low %v1405_v34, %v1413_v8  ;;  %v750_v34 = vld [vmem:[%s9612_s30 + $0x990] sm:$0xff] }
 0x13c   : > { %6915 = vmatprep.subr.bf16.mxu1 %v9007_v23  ;;  %v1421_v17 = vld [vmem:[%s9612_s30 + $0x1e88] sm:$0xff]  ;;  %v8863_v22 = vcombine.high %v1165_v14, %v1173_v15  ;;  %v758_v8 = vld [vmem:[%s9612_s30 + $0x9d0] sm:$0xff] }
 0x13d   : > { %6875 = vmatpush1.bf16.msra.mxu0 %v8750_v2  ;;  %v1429_v18 = vld [vmem:[%s9612_s30 + $0x1ec8] sm:$0xff]  ;;  %v8862_v2 = vcombine.low %v1165_v14, %v1173_v15  ;;  %v510_v14 = vld [vmem:[%s9612_s30 + $0x210] sm:$0xff] }
 0x13e   : > { %6876 = vmatprep.subr.bf16.mxu0 %v8767_v28  ;;  %v9119_v23 = vcombine.high %v1421_v17, %v1429_v18  ;;  %v1181_v24 = vld [vmem:[%s9612_s30 + $0x1708] sm:$0xff]  ;;  %v518_v15 = vld [vmem:[%s9612_s30 + $0x250] sm:$0xff] }
 0x13f   : > { %6916 = vmatpush1.bf16.msra.mxu1 %v9006_v27  ;;  %v1189_v63 = vld [vmem:[%s9612_s30 + $0x1748] sm:$0xff]  ;;  %v9118_v27 = vcombine.low %v1421_v17, %v1429_v18  ;;  %v766_v17 = vld [vmem:[%s9612_s30 + $0xa10] sm:$0xff] }
 0x140   : > { %6917 = vmatprep.subr.bf16.mxu1 %v9023_v29  ;;  %v1437_v25 = vld [vmem:[%s9612_s30 + $0x1f08] sm:$0xff]  ;;  %v8879_v28 = vcombine.high %v1181_v24, %v1189_v63  ;;  %v774_v18 = vld [vmem:[%s9612_s30 + $0xa50] sm:$0xff] }
 0x141   : > { %6877 = vmatpush1.bf16.msra.mxu0 %v8766_v36  ;;  %v1445_v26 = vld [vmem:[%s9612_s30 + $0x1f48] sm:$0xff]  ;;  %v8878_v36 = vcombine.low %v1181_v24, %v1189_v63  ;;  %v526_v24 = vld [vmem:[%s9612_s30 + $0x290] sm:$0xff] }
 0x142   : > { %6878 = vmatprep.subr.bf16.mxu0 %v8783_v40  ;;  %v9135_v29 = vcombine.high %v1437_v25, %v1445_v26  ;;  %v1197_v30 = vld [vmem:[%s9612_s30 + $0x1788] sm:$0xff]  ;;  %v534_v63 = vld [vmem:[%s9612_s30 + $0x2d0] sm:$0xff] }
 0x143   : > { %6918 = vmatpush1.bf16.msra.mxu1 %v9022_v37  ;;  %v1205_v31 = vld [vmem:[%s9612_s30 + $0x17c8] sm:$0xff]  ;;  %v9134_v37 = vcombine.low %v1437_v25, %v1445_v26  ;;  %v782_v25 = vld [vmem:[%s9612_s30 + $0xa90] sm:$0xff] }
 0x144   : > { %6919 = vmatprep.subr.bf16.mxu1 %v9039_v41  ;;  %v1453_v32 = vld [vmem:[%s9612_s30 + $0x1f88] sm:$0xff]  ;;  %v8895_v40 = vcombine.high %v1197_v30, %v1205_v31  ;;  %v790_v26 = vld [vmem:[%s9612_s30 + $0xad0] sm:$0xff] }
 0x145   : > { %6879 = vmatpush1.bf16.msra.mxu0 %v8782_v46  ;;  %v1461_v35 = vld [vmem:[%s9612_s30 + $0x1fc8] sm:$0xff]  ;;  %v8894_v46 = vcombine.low %v1197_v30, %v1205_v31  ;;  %v542_v30 = vld [vmem:[%s9612_s30 + $0x310] sm:$0xff] }
 0x146   : > { %6880 = vmatprep.subr.bf16.mxu0 %v8799_v48  ;;  %v9151_v41 = vcombine.high %v1453_v32, %v1461_v35  ;;  %v8145_v48 = vcombine.high %v446_v42, %v454_v43  ;;  %v550_v31 = vld [vmem:[%s9612_s30 + $0x350] sm:$0xff] }
 0x147   : > { %6920 = vmatpush1.bf16.msra.mxu1 %v9038_v47  ;;  %v9150_v47 = vcombine.low %v1453_v32, %v1461_v35  ;;  %v798_v32 = vld [vmem:[%s9612_s30 + $0xb10] sm:$0xff] }
 0x148   : > { %6921 = vmatprep.subr.bf16.mxu1 %v9055_v49  ;;  %v8401_v49 = vcombine.high %v702_v44, %v710_v45  ;;  %v806_v35 = vld [vmem:[%s9612_s30 + $0xb50] sm:$0xff] }
 0x149   : > { %6881 = vmatpush1.bf16.msra.mxu0 %v8798_v54  ;;  %v8144_v54 = vcombine.low %v446_v42, %v454_v43  ;;  %v8497_v42 = vcombine.high %v798_v32, %v806_v35  ;;  %v558_v43 = vld [vmem:[%s9612_s30 + $0x390] sm:$0xff] }
 0x14a   : > { %6882 = vmatprep.subr.bf16.mxu0 %v8815_v56  ;;  %v8161_v56 = vcombine.high %v462_v50, %v470_v51 }
 0x14b   : > { %6922 = vmatpush1.bf16.msra.mxu1 %v9054_v55  ;;  %v8400_v55 = vcombine.low %v702_v44, %v710_v45  ;;  %v566_v44 = vld [vmem:[%s9612_s30 + $0x3d0] sm:$0xff] }
 0x14c   : > { %6923 = vmatprep.subr.bf16.mxu1 %v9071_v57  ;;  %v8417_v57 = vcombine.high %v718_v52, %v726_v53 }
 0x14d   : > { %6883 = vmatpush1.bf16.msra.mxu0 %v8814_v1  ;;  %v8160_v1 = vcombine.low %v462_v50, %v470_v51 }
 0x14e   : > { %6884 = vmatprep.subr.bf16.mxu0 %v8831_v4  ;;  %v8177_v4 = vcombine.high %v478_v58, %v486_v59 }
 0x14f   : > { %6924 = vmatpush1.bf16.msra.mxu1 %v9070_v3  ;;  %v8416_v3 = vcombine.low %v718_v52, %v726_v53  ;;  %v8240_v52 = vcombine.low %v542_v30, %v550_v31 }
 0x150   : > { %6925 = vmatprep.subr.bf16.mxu1 %v9087_v33  ;;  %v8433_v33 = vcombine.high %v734_v61, %v742_v62 }
 0x151   : > { %6885 = vmatpush1.bf16.msra.mxu0 %v8830_v10  ;;  %v8176_v10 = vcombine.low %v478_v58, %v486_v59 }
 0x152   : > { %6886 = vmatprep.subr.bf16.mxu0 %v8847_v12  ;;  %v8193_v12 = vcombine.high %v494_v5, %v502_v6 }
 0x153   : > { %6926 = vmatpush1.bf16.msra.mxu1 %v9086_v11  ;;  %v8432_v11 = vcombine.low %v734_v61, %v742_v62  ;;  %v574_v61 = vld [vmem:[%s9612_s30 + $0x410] sm:$0xff] }
 0x154   : > { %6927 = vmatprep.subr.bf16.mxu1 %v9103_v13  ;;  %v8449_v13 = vcombine.high %v750_v34, %v758_v8  ;;  %v582_v62 = vld [vmem:[%s9612_s30 + $0x450] sm:$0xff] }
 0x155   : > { %6887 = vmatpush1.bf16.msra.mxu0 %v8846_v20  ;;  %v8192_v20 = vcombine.low %v494_v5, %v502_v6  ;;  %v8273_v5 = vcombine.high %v574_v61, %v582_v62 }
 0x156   : > { %6888 = vmatprep.subr.bf16.mxu0 %v8863_v22  ;;  %v8209_v22 = vcombine.high %v510_v14, %v518_v15 }
 0x157   : > { %6928 = vmatpush1.bf16.msra.mxu1 %v9102_v21  ;;  %v8448_v21 = vcombine.low %v750_v34, %v758_v8  ;;  %v590_v34 = vld [vmem:[%s9612_s30 + $0x490] sm:$0xff] }
 0x158   : > { %6929 = vmatprep.subr.bf16.mxu1 %v9119_v23  ;;  %v8465_v23 = vcombine.high %v766_v17, %v774_v18  ;;  %v598_v8 = vld [vmem:[%s9612_s30 + $0x4d0] sm:$0xff] }
 0x159   : > { %6889 = vmatpush1.bf16.msra.mxu0 %v8862_v2  ;;  %v8208_v2 = vcombine.low %v510_v14, %v518_v15  ;;  %v8289_v14 = vcombine.high %v590_v34, %v598_v8 }
 0x15a   : > { %6890 = vmatprep.subr.bf16.mxu0 %v8879_v28  ;;  %v8225_v28 = vcombine.high %v526_v24, %v534_v63 }
 0x15b   : > { %6930 = vmatpush1.bf16.msra.mxu1 %v9118_v27  ;;  %v8464_v27 = vcombine.low %v766_v17, %v774_v18  ;;  %v606_v17 = vld [vmem:[%s9612_s30 + $0x510] sm:$0xff] }
 0x15c   : > { %6931 = vmatprep.subr.bf16.mxu1 %v9135_v29  ;;  %v8481_v29 = vcombine.high %v782_v25, %v790_v26  ;;  %v614_v18 = vld [vmem:[%s9612_s30 + $0x550] sm:$0xff] }
 0x15d   : > { %6891 = vmatpush1.bf16.msra.mxu0 %v8878_v36  ;;  %v8224_v36 = vcombine.low %v526_v24, %v534_v63  ;;  %v8305_v24 = vcombine.high %v606_v17, %v614_v18 }
 0x15e   : > { %6892 = vmatprep.subr.bf16.mxu0 %v8895_v40  ;;  %v8241_v40 = vcombine.high %v542_v30, %v550_v31 }
 0x15f   : > { %6932 = vmatpush1.bf16.msra.mxu1 %v9134_v37  ;;  %v8480_v37 = vcombine.low %v782_v25, %v790_v26  ;;  %v622_v25 = vld [vmem:[%s9612_s30 + $0x590] sm:$0xff] }
 0x160   : > { %6933 = vmatprep.subr.bf16.mxu1 %v9151_v41  ;;  %v630_v26 = vld [vmem:[%s9612_s30 + $0x5d0] sm:$0xff] }
 0x161   : > { %6893 = vmatpush1.bf16.msra.mxu0 %v8894_v46  ;;  %v8321_v30 = vcombine.high %v622_v25, %v630_v26 }
 0x162   : > { %6944 = vmatprep.subr.bf16.mxu0 %v8145_v48  ;;  %v822_v48 = vld [vmem:[%s9612_s30 + $0xbd0] sm:$0xff] }
 0x163   : > { %6934 = vmatpush1.bf16.msra.mxu1 %v9150_v47  ;;  %v814_v47 = vld [vmem:[%s9612_s30 + $0xb90] sm:$0xff] }
 0x164   : > { %6985 = vmatprep.subr.bf16.mxu1 %v8401_v49  ;;  %6895 = vmatmul.mubr.bf16.vlgmr.msra.gmra.mrb[12].mxu0 %v9812_v16  ;;  %v8513_v59 = vcombine.high %v814_v47, %v822_v48 }
 0x165   : > { %6945 = vmatpush1.bf16.msra.mxu0 %v8144_v54  ;;  %6976 = vmatprep.mubr.bf16.mxu0 %v9672_v38 }
 0x166   : > { %6936 = vmatmul.mubr.bf16.vlgmr.msra.gmra.mrb[12].mxu1 %v9818_v19  ;;  %6946 = vmatprep.subr.bf16.mxu0 %v8161_v56  ;;  %v8496_v56 = vcombine.low %v798_v32, %v806_v35  ;;  %v638_v32 = vld [vmem:[%s9612_s30 + $0x610] sm:$0xff] }
 0x167   : > { %6986 = vmatpush1.bf16.msra.mxu1 %v8400_v55  ;;  %7017 = vmatprep.mubr.bf16.mxu1 %v9676_v39  ;;  %v646_v35 = vld [vmem:[%s9612_s30 + $0x650] sm:$0xff] }
 0x168   : > { %6987 = vmatprep.subr.bf16.mxu1 %v8417_v57  ;;  %v8257_v57 = vcombine.high %v558_v43, %v566_v44 }
 0x169   : > { %6947 = vmatpush1.bf16.msra.mxu0 %v8160_v1  ;;  %v830_v1 = vld [vmem:[%s9612_s30 + $0xc10] sm:$0xff] }
 0x16a   : > { %6948 = vmatprep.subr.bf16.mxu0 %v8177_v4  ;;  %v8256_v4 = vcombine.low %v558_v43, %v566_v44  ;;  %v654_v44 = vld [vmem:[%s9612_s30 + $0x690] sm:$0xff] }
 0x16b   : > { %6988 = vmatpush1.bf16.msra.mxu1 %v8416_v3  ;;  %v838_v3 = vld [vmem:[%s9612_s30 + $0xc50] sm:$0xff] }
 0x16c   : > { %6989 = vmatprep.subr.bf16.mxu1 %v8433_v33  ;;  %v8512_v33 = vcombine.low %v814_v47, %v822_v48  ;;  %v8529_v6 = vcombine.high %v830_v1, %v838_v3  ;;  %v918_v47 = vld [vmem:[%s9612_s30 + $0xed0] sm:$0xff]  ;;  %v8336_v48 = vcombine.low %v638_v32, %v646_v35 }
 0x16d   : > { %6949 = vmatpush1.bf16.msra.mxu0 %v8176_v10  ;;  %v846_v10 = vld [vmem:[%s9612_s30 + $0xc90] sm:$0xff] }
 0x16e   : > { %6950 = vmatprep.subr.bf16.mxu0 %v8193_v12  ;;  %v8272_v12 = vcombine.low %v574_v61, %v582_v62 }
 0x16f   : > { %6990 = vmatpush1.bf16.msra.mxu1 %v8432_v11  ;;  %v854_v11 = vld [vmem:[%s9612_s30 + $0xcd0] sm:$0xff] }
 0x170   : > { %6991 = vmatprep.subr.bf16.mxu1 %v8449_v13  ;;  %v8528_v13 = vcombine.low %v830_v1, %v838_v3  ;;  %v8545_v15 = vcombine.high %v846_v10, %v854_v11  ;;  %v686_v1 = vld [vmem:[%s9612_s30 + $0x790] sm:$0xff] }
 0x171   : > { %6951 = vmatpush1.bf16.msra.mxu0 %v8192_v20  ;;  %v862_v20 = vld [vmem:[%s9612_s30 + $0xd10] sm:$0xff] }
 0x172   : > { %6952 = vmatprep.subr.bf16.mxu0 %v8209_v22  ;;  %v8288_v22 = vcombine.low %v590_v34, %v598_v8  ;;  %v694_v3 = vld [vmem:[%s9612_s30 + $0x7d0] sm:$0xff] }
 0x173   : > { %6992 = vmatpush1.bf16.msra.mxu1 %v8448_v21  ;;  %v870_v21 = vld [vmem:[%s9612_s30 + $0xd50] sm:$0xff]  ;;  %v8385_v34 = vcombine.high %v686_v1, %v694_v3 }
 0x174   : > { %6993 = vmatprep.subr.bf16.mxu1 %v8465_v23  ;;  %v8544_v23 = vcombine.low %v846_v10, %v854_v11  ;;  %v8561_v63 = vcombine.high %v862_v20, %v870_v21  ;;  %v958_v10 = vld [vmem:[%s9612_s30 + $0x1010] sm:$0xff] }
 0x175   : > { %6953 = vmatpush1.bf16.msra.mxu0 %v8208_v2  ;;  %v878_v2 = vld [vmem:[%s9612_s30 + $0xd90] sm:$0xff] }
 0x176   : > { %6954 = vmatprep.subr.bf16.mxu0 %v8225_v28  ;;  %v8304_v28 = vcombine.low %v606_v17, %v614_v18  ;;  %v966_v11 = vld [vmem:[%s9612_s30 + $0x1050] sm:$0xff] }
 0x177   : > { %6994 = vmatpush1.bf16.msra.mxu1 %v8464_v27  ;;  %v6650_v41 = vpop.f32.mrb[0].mxu0  ;;  %v886_v27 = vld [vmem:[%s9612_s30 + $0xdd0] sm:$0xff]  ;;  %v8657_v17 = vcombine.high %v958_v10, %v966_v11 }
 0x178   : > { %6995 = vmatprep.subr.bf16.mxu1 %v8481_v29  ;;  %v6652_v46 = vpop.f32.mrb[1].mxu0  ;;  %v8560_v29 = vcombine.low %v862_v20, %v870_v21  ;;  %v8577_v31 = vcombine.high %v878_v2, %v886_v27  ;;  %v974_v20 = vld [vmem:[%s9612_s30 + $0x1090] sm:$0xff] }
 0x179   : > { %v6691_v45 = vpop.f32.mrb[0].mxu1  ;;  %v6654_v51 = vpop.f32.mrb[2].mxu0  ;;  %6955 = vmatpush1.bf16.msra.mxu0 %v8224_v36  ;;  %v894_v36 = vld [vmem:[%s9612_s30 + $0xe10] sm:$0xff] }
 0x17a   : > { %v9984_v49 = vadd.f32 %v6691_v45, %v6650_v41  ;;  %v6693_v50 = vpop.f32.mrb[1].mxu1  ;;  %v6655_v55 = vpop.f32.mrb[3].mxu0  ;;  %6956 = vmatprep.subr.bf16.mxu0 %v8241_v40  ;;  %v8320_v40 = vcombine.low %v622_v25, %v630_v26  ;;  %v8576_v41 = vcombine.low %v878_v2, %v886_v27  ;;  %v662_v45 = vld [vmem:[%s9612_s30 + $0x6d0] sm:$0xff] }
 0x17b   : > { %v9986_v53 = vadd.f32 %v6693_v50, %v6652_v46  ;;  %v6695_v54 = vpop.f32.mrb[2].mxu1  ;;  %6996 = vmatpush1.bf16.msra.mxu1 %v8480_v37  ;;  %v902_v37 = vld [vmem:[%s9612_s30 + $0xe50] sm:$0xff]  ;;  %v8353_v51 = vcombine.high %v654_v44, %v662_v45 }
 0x17c   : > { %v6696_v58 = vpop.f32.mrb[3].mxu1  ;;  %6997 = vmatprep.subr.bf16.mxu1 %v8497_v42  ;;  %v8337_v42 = vcombine.high %v638_v32, %v646_v35  ;;  %v8593_v43 = vcombine.high %v894_v36, %v902_v37  ;;  %v910_v46 = vld [vmem:[%s9612_s30 + $0xe90] sm:$0xff]  ;;  %v8592_v50 = vcombine.low %v894_v36, %v902_v37 }
 0x17d   : > { %6957 = vmatpush1.bf16.msra.mxu0 %v8240_v52  ;;  %v8609_v52 = vcombine.high %v910_v46, %v918_v47  ;;  %v670_v54 = vld [vmem:[%s9612_s30 + $0x710] sm:$0xff]  ;;  %v8352_v58 = vcombine.low %v654_v44, %v662_v45 }
 0x17e   : > { %6958 = vmatprep.subr.bf16.mxu0 %v8257_v57  ;;  %v678_v55 = vld [vmem:[%s9612_s30 + $0x750] sm:$0xff] }
 0x17f   : > { %6998 = vmatpush1.bf16.msra.mxu1 %v8496_v56  ;;  %v926_v56 = vld [vmem:[%s9612_s30 + $0xf10] sm:$0xff]  ;;  %v8369_v61 = vcombine.high %v670_v54, %v678_v55 }
 0x180   : > { %6999 = vmatprep.subr.bf16.mxu1 %v8513_v59  ;;  %v934_v57 = vld [vmem:[%s9612_s30 + $0xf50] sm:$0xff]  ;;  %v8608_v59 = vcombine.low %v910_v46, %v918_v47 }
 0x181   : > { %6959 = vmatpush1.bf16.msra.mxu0 %v8256_v4  ;;  %v8625_v62 = vcombine.high %v926_v56, %v934_v57  ;;  %v942_v4 = vld [vmem:[%s9612_s30 + $0xf90] sm:$0xff] }
 0x182   : > { %6960 = vmatprep.subr.bf16.mxu0 %v8273_v5  ;;  %v8368_v5 = vcombine.low %v670_v54, %v678_v55  ;;  %v982_v21 = vld [vmem:[%s9612_s30 + $0x10d0] sm:$0xff] }
 0x183   : > { %7000 = vmatpush1.bf16.msra.mxu1 %v8512_v33  ;;  %v950_v33 = vld [vmem:[%s9612_s30 + $0xfd0] sm:$0xff]  ;;  %v8673_v25 = vcombine.high %v974_v20, %v982_v21 }
 0x184   : > { %7001 = vmatprep.subr.bf16.mxu1 %v8529_v6  ;;  %v8624_v6 = vcombine.low %v926_v56, %v934_v57  ;;  %v8641_v8 = vcombine.high %v942_v4, %v950_v33  ;;  %v990_v2 = vld [vmem:[%s9612_s30 + $0x1110] sm:$0xff] }
 0x185   : > { %6961 = vmatpush1.bf16.msra.mxu0 %v8272_v12  ;;  %v1214_v12 = vld [vmem:[%s9612_s30 + $0x1810] sm:$0xff] }
 0x186   : > { %6962 = vmatprep.subr.bf16.mxu0 %v8289_v14  ;;  %v8384_v14 = vcombine.low %v686_v1, %v694_v3  ;;  %v998_v27 = vld [vmem:[%s9612_s30 + $0x1150] sm:$0xff] }
 0x187   : > { %7002 = vmatpush1.bf16.msra.mxu1 %v8528_v13  ;;  %v1222_v13 = vld [vmem:[%s9612_s30 + $0x1850] sm:$0xff]  ;;  %v8689_v32 = vcombine.high %v990_v2, %v998_v27 }
 0x188   : > { %7003 = vmatprep.subr.bf16.mxu1 %v8545_v15  ;;  %v8640_v15 = vcombine.low %v942_v4, %v950_v33  ;;  %v8913_v18 = vcombine.high %v1214_v12, %v1222_v13  ;;  %v1006_v36 = vld [vmem:[%s9612_s30 + $0x1190] sm:$0xff] }
 0x189   : > { %6963 = vmatpush1.bf16.msra.mxu0 %v8288_v22  ;;  %v1230_v22 = vld [vmem:[%s9612_s30 + $0x1890] sm:$0xff] }
 0x18a   : > { %6964 = vmatprep.subr.bf16.mxu0 %v8305_v24  ;;  %v8656_v24 = vcombine.low %v958_v10, %v966_v11  ;;  %v1014_v37 = vld [vmem:[%s9612_s30 + $0x11d0] sm:$0xff] }
 0x18b   : > { %7004 = vmatpush1.bf16.msra.mxu1 %v8544_v23  ;;  %v1238_v23 = vld [vmem:[%s9612_s30 + $0x18d0] sm:$0xff]  ;;  %v8705_v44 = vcombine.high %v1006_v36, %v1014_v37 }
 0x18c   : > { %7005 = vmatprep.subr.bf16.mxu1 %v8561_v63  ;;  %v8912_v63 = vcombine.low %v1214_v12, %v1222_v13  ;;  %v8929_v26 = vcombine.high %v1230_v22, %v1238_v23  ;;  %v1022_v46 = vld [vmem:[%s9612_s30 + $0x1210] sm:$0xff] }
 0x18d   : > { %6965 = vmatpush1.bf16.msra.mxu0 %v8304_v28  ;;  %v1246_v28 = vld [vmem:[%s9612_s30 + $0x1910] sm:$0xff] }
 0x18e   : > { %6966 = vmatprep.subr.bf16.mxu0 %v8321_v30  ;;  %v8672_v30 = vcombine.low %v974_v20, %v982_v21  ;;  %v1030_v47 = vld [vmem:[%s9612_s30 + $0x1250] sm:$0xff] }
 0x18f   : > { %7006 = vmatpush1.bf16.msra.mxu1 %v8560_v29  ;;  %v1254_v29 = vld [vmem:[%s9612_s30 + $0x1950] sm:$0xff]  ;;  %v8721_v54 = vcombine.high %v1022_v46, %v1030_v47 }
 0x190   : > { %7007 = vmatprep.subr.bf16.mxu1 %v8577_v31  ;;  %v8928_v31 = vcombine.low %v1230_v22, %v1238_v23  ;;  %v8945_v35 = vcombine.high %v1246_v28, %v1254_v29  ;;  %v1038_v56 = vld [vmem:[%s9612_s30 + $0x1290] sm:$0xff]  ;;  %v424_v22 = vld [vmem:[#allocation2] sm:$0xff] }
 0x191   : > { %6967 = vmatpush1.bf16.msra.mxu0 %v8320_v40  ;;  %v1262_v40 = vld [vmem:[%s9612_s30 + $0x1990] sm:$0xff] }
 0x192   : > { %6968 = vmatprep.subr.bf16.mxu0 %v8337_v42  ;;  %v8688_v42 = vcombine.low %v990_v2, %v998_v27  ;;  %v1046_v57 = vld [vmem:[%s9612_s30 + $0x12d0] sm:$0xff]  ;;  %v425_v2 = vld [vmem:[#allocation2 + $0x8] sm:$0xff] }
 0x193   : > { %7008 = vmatpush1.bf16.msra.mxu1 %v8576_v41  ;;  %v1270_v41 = vld [vmem:[%s9612_s30 + $0x19d0] sm:$0xff]  ;;  %v8737_v1 = vcombine.high %v1038_v56, %v1046_v57 }
 0x194   : > { %7009 = vmatprep.subr.bf16.mxu1 %v8593_v43  ;;  %v8944_v43 = vcombine.low %v1246_v28, %v1254_v29  ;;  %v8961_v45 = vcombine.high %v1262_v40, %v1270_v41  ;;  %v1054_v4 = vld [vmem:[%s9612_s30 + $0x1310] sm:$0xff] }
 0x195   : > { %6969 = vmatpush1.bf16.msra.mxu0 %v8336_v48  ;;  %v1278_v48 = vld [vmem:[%s9612_s30 + $0x1a10] sm:$0xff] }
 0x196   : > { %6970 = vmatprep.subr.bf16.mxu0 %v8353_v51  ;;  %v8704_v51 = vcombine.low %v1006_v36, %v1014_v37  ;;  %v1062_v33 = vld [vmem:[%s9612_s30 + $0x1350] sm:$0xff] }
 0x197   : > { %7010 = vmatpush1.bf16.msra.mxu1 %v8592_v50  ;;  %v1286_v50 = vld [vmem:[%s9612_s30 + $0x1a50] sm:$0xff]  ;;  %v8753_v10 = vcombine.high %v1054_v4, %v1062_v33 }
 0x198   : > { %7011 = vmatprep.subr.bf16.mxu1 %v8609_v52  ;;  %v8960_v52 = vcombine.low %v1262_v40, %v1270_v41  ;;  %v8977_v55 = vcombine.high %v1278_v48, %v1286_v50  ;;  %v1070_v13 = vld [vmem:[%s9612_s30 + $0x1390] sm:$0xff] }
 0x199   : > { %6971 = vmatpush1.bf16.msra.mxu0 %v8352_v58  ;;  %v1294_v58 = vld [vmem:[%s9612_s30 + $0x1a90] sm:$0xff] }
 0x19a   : > { %6972 = vmatprep.subr.bf16.mxu0 %v8369_v61  ;;  %v8720_v61 = vcombine.low %v1022_v46, %v1030_v47  ;;  %v1326_v20 = vld [vmem:[%s9612_s30 + $0x1b90] sm:$0xff] }
 0x19b   : > { %7012 = vmatpush1.bf16.msra.mxu1 %v8608_v59  ;;  %v1302_v59 = vld [vmem:[%s9612_s30 + $0x1ad0] sm:$0xff] }
 0x19c   : > { %7013 = vmatprep.subr.bf16.mxu1 %v8625_v62  ;;  %v8976_v62 = vcombine.low %v1278_v48, %v1286_v50  ;;  %v8993_v3 = vcombine.high %v1294_v58, %v1302_v59  ;;  %v1334_v21 = vld [vmem:[%s9612_s30 + $0x1bd0] sm:$0xff] }
 0x19d   : > { %6973 = vmatpush1.bf16.msra.mxu0 %v8368_v5  ;;  %v1310_v5 = vld [vmem:[%s9612_s30 + $0x1b10] sm:$0xff] }
 0x19e   : > { %6974 = vmatprep.subr.bf16.mxu0 %v8385_v34  ;;  %v8736_v34 = vcombine.low %v1038_v56, %v1046_v57  ;;  %v1342_v37 = vld [vmem:[%s9612_s30 + $0x1c10] sm:$0xff] }
 0x19f   : > { %7014 = vmatpush1.bf16.msra.mxu1 %v8624_v6  ;;  %v1318_v6 = vld [vmem:[%s9612_s30 + $0x1b50] sm:$0xff] }
 0x1a0   : > { %7015 = vmatprep.subr.bf16.mxu1 %v8641_v8  ;;  %v8992_v8 = vcombine.low %v1294_v58, %v1302_v59  ;;  %v9009_v12 = vcombine.high %v1310_v5, %v1318_v6  ;;  %v9008_v28 = vcombine.low %v1310_v5, %v1318_v6  ;;  %v1350_v40 = vld [vmem:[%s9612_s30 + $0x1c50] sm:$0xff] }
 0x1a1   : > { %6975 = vmatpush1.bf16.msra.mxu0 %v8384_v14  ;;  %v1078_v14 = vld [vmem:[%s9612_s30 + $0x13d0] sm:$0xff] }
 0x1a2   : > { %7026 = vmatprep.subr.bf16.mxu0 %v8657_v17  ;;  %v8769_v29 = vcombine.high %v1070_v13, %v1078_v14  ;;  %v1102_v46 = vld [vmem:[%s9612_s30 + $0x1490] sm:$0xff] }
 0x1a3   : > { %7016 = vmatpush1.bf16.msra.mxu1 %v8640_v15  ;;  %v1110_v47 = vld [vmem:[%s9612_s30 + $0x14d0] sm:$0xff] }
 0x1a4   : > { %7067 = vmatprep.subr.bf16.mxu1 %v8913_v18  ;;  %6977 = vmatmul.mubr.bf16.vlgmr.msra.gmra.mrb[16].mxu0 %v9722_v60  ;;  %v1358_v48 = vld [vmem:[%s9612_s30 + $0x1c90] sm:$0xff] }
 0x1a5   : > { %7027 = vmatpush1.bf16.msra.mxu0 %v8656_v24  ;;  %7058 = vmatprep.mubr.bf16.mxu0 %v9740_v7  ;;  %v1366_v50 = vld [vmem:[%s9612_s30 + $0x1cd0] sm:$0xff] }
 0x1a6   : > { %7018 = vmatmul.mubr.bf16.vlgmr.msra.gmra.mrb[16].mxu1 %v9731_v0  ;;  %7028 = vmatprep.subr.bf16.mxu0 %v8673_v25  ;;  %v8752_v25 = vcombine.low %v1054_v4, %v1062_v33  ;;  %v1118_v56 = vld [vmem:[%s9612_s30 + $0x1510] sm:$0xff] }
 0x1a7   : > { %7068 = vmatpush1.bf16.msra.mxu1 %v8912_v63  ;;  %7099 = vmatprep.mubr.bf16.mxu1 %v9747_v9  ;;  %v1126_v57 = vld [vmem:[%s9612_s30 + $0x1550] sm:$0xff] }
 0x1a8   : > { %7069 = vmatprep.subr.bf16.mxu1 %v8929_v26  ;;  %v1374_v58 = vld [vmem:[%s9612_s30 + $0x1d10] sm:$0xff] }
 0x1a9   : > { %7029 = vmatpush1.bf16.msra.mxu0 %v8672_v30  ;;  %v1382_v59 = vld [vmem:[%s9612_s30 + $0x1d50] sm:$0xff] }
 0x1aa   : > { %7030 = vmatprep.subr.bf16.mxu0 %v8689_v32  ;;  %v1086_v32 = vld [vmem:[%s9612_s30 + $0x1410] sm:$0xff] }
 0x1ab   : > { %7070 = vmatpush1.bf16.msra.mxu1 %v8928_v31  ;;  %v1134_v4 = vld [vmem:[%s9612_s30 + $0x1590] sm:$0xff] }
 0x1ac   : > { %7071 = vmatprep.subr.bf16.mxu1 %v8945_v35  ;;  %v1094_v35 = vld [vmem:[%s9612_s30 + $0x1450] sm:$0xff] }
 0x1ad   : > { %7031 = vmatpush1.bf16.msra.mxu0 %v8688_v42  ;;  %v8768_v42 = vcombine.low %v1070_v13, %v1078_v14  ;;  %v1142_v33 = vld [vmem:[%s9612_s30 + $0x15d0] sm:$0xff] }
 0x1ae   : > { %7032 = vmatprep.subr.bf16.mxu0 %v8705_v44  ;;  %v8785_v44 = vcombine.high %v1086_v32, %v1094_v35  ;;  %v1390_v5 = vld [vmem:[%s9612_s30 + $0x1d90] sm:$0xff] }
 0x1af   : > { %7072 = vmatpush1.bf16.msra.mxu1 %v8944_v43  ;;  %v9024_v43 = vcombine.low %v1326_v20, %v1334_v21  ;;  %v1398_v6 = vld [vmem:[%s9612_s30 + $0x1dd0] sm:$0xff] }
 0x1b0   : > { %7073 = vmatprep.subr.bf16.mxu1 %v8961_v45  ;;  %v9041_v45 = vcombine.high %v1342_v37, %v1350_v40  ;;  %v1158_v13 = vld [vmem:[%s9612_s30 + $0x1650] sm:$0xff] }
 0x1b1   : > { %7033 = vmatpush1.bf16.msra.mxu0 %v8704_v51  ;;  %v8784_v51 = vcombine.low %v1086_v32, %v1094_v35  ;;  %v1406_v14 = vld [vmem:[%s9612_s30 + $0x1e10] sm:$0xff] }
 0x1b2   : > { %7034 = vmatprep.subr.bf16.mxu0 %v8721_v54  ;;  %v8801_v54 = vcombine.high %v1102_v46, %v1110_v47 }
 0x1b3   : > { %7074 = vmatpush1.bf16.msra.mxu1 %v8960_v52  ;;  %v9040_v52 = vcombine.low %v1342_v37, %v1350_v40  ;;  %v1206_v37 = vld [vmem:[%s9612_s30 + $0x17d0] sm:$0xff] }
 0x1b4   : > { %7075 = vmatprep.subr.bf16.mxu1 %v8977_v55  ;;  %v9057_v55 = vcombine.high %v1358_v48, %v1366_v50  ;;  %v1454_v40 = vld [vmem:[%s9612_s30 + $0x1f90] sm:$0xff] }
 0x1b5   : > { %7035 = vmatpush1.bf16.msra.mxu0 %v8720_v61  ;;  %v8800_v61 = vcombine.low %v1102_v46, %v1110_v47  ;;  %v447_v46 = vld [vmem:[%s9612_s30 + $0x18] sm:$0xff] }
 0x1b6   : > { %7036 = vmatprep.subr.bf16.mxu0 %v8737_v1  ;;  %v8817_v1 = vcombine.high %v1118_v56, %v1126_v57  ;;  %v455_v47 = vld [vmem:[%s9612_s30 + $0x58] sm:$0xff] }
 0x1b7   : > { %7076 = vmatpush1.bf16.msra.mxu1 %v8976_v62  ;;  %v6732_v11 = vpop.f32.mrb[4].mxu0  ;;  %v9056_v62 = vcombine.low %v1358_v48, %v1366_v50  ;;  %v703_v48 = vld [vmem:[%s9612_s30 + $0x818] sm:$0xff] }
 0x1b8   : > { %7077 = vmatprep.subr.bf16.mxu1 %v8993_v3  ;;  %v6733_v15 = vadd.f32 %v6732_v11, %v9984_v49  ;;  %v6734_v18 = vpop.f32.mrb[5].mxu0  ;;  %v9073_v3 = vcombine.high %v1374_v58, %v1382_v59  ;;  %v9089_v11 = vcombine.high %v1390_v5, %v1398_v6  ;;  %v711_v50 = vld [vmem:[%s9612_s30 + $0x858] sm:$0xff] }
 0x1b9   : > { %v6773_v17 = vpop.f32.mrb[4].mxu1  ;;  %v6735_v23 = vadd.f32 %v6734_v18, %v9986_v53  ;;  %v6736_v63 = vpop.f32.mrb[6].mxu0  ;;  %7037 = vmatpush1.bf16.msra.mxu0 %v8736_v34  ;;  %v9025_v53 = vcombine.high %v1326_v20, %v1334_v21  ;;  %v8816_v34 = vcombine.low %v1118_v56, %v1126_v57  ;;  %v9088_v18 = vcombine.low %v1390_v5, %v1398_v6  ;;  %v463_v56 = vld [vmem:[%s9612_s30 + $0x98] sm:$0xff] }
 0x1ba   : > { %v6775_v24 = vpop.f32.mrb[5].mxu1  ;;  %v6774_v26 = vadd.f32 %v6773_v17, %v6733_v15  ;;  %v6737_v49 = vpop.f32.mrb[7].mxu0  ;;  %7038 = vmatprep.subr.bf16.mxu0 %v8753_v10  ;;  %v8833_v10 = vcombine.high %v1134_v4, %v1142_v33  ;;  %v1414_v15 = vld [vmem:[%s9612_s30 + $0x1e50] sm:$0xff]  ;;  %v8832_v17 = vcombine.low %v1134_v4, %v1142_v33  ;;  %v471_v57 = vld [vmem:[%s9612_s30 + $0xd8] sm:$0xff] }
 0x1bb   : > { %v6777_v27 = vpop.f32.mrb[6].mxu1  ;;  %7078 = vmatpush1.bf16.msra.mxu1 %v8992_v8  ;;  %v6776_v30 = vadd.f32 %v6775_v24, %v6735_v23  ;;  %v9072_v8 = vcombine.low %v1374_v58, %v1382_v59  ;;  %v9105_v21 = vcombine.high %v1406_v14, %v1414_v15  ;;  %v1174_v23 = vld [vmem:[%s9612_s30 + $0x16d0] sm:$0xff]  ;;  %v719_v58 = vld [vmem:[%s9612_s30 + $0x898] sm:$0xff] }
 0x1bc   : > { %v6778_v31 = vpop.f32.mrb[7].mxu1  ;;  %7079 = vmatprep.subr.bf16.mxu1 %v9009_v12  ;;  %v7928_v36 = vadd.f32 %v6774_v26, %v424_v22  ;;  %v1150_v12 = vld [vmem:[%s9612_s30 + $0x1610] sm:$0xff]  ;;  %v9104_v26 = vcombine.low %v1406_v14, %v1414_v15  ;;  %v727_v59 = vld [vmem:[%s9612_s30 + $0x8d8] sm:$0xff] }
 0x1bd   : > { %v7929_v41 = vadd.f32 %v6776_v30, %v425_v2  ;;  %7039 = vmatpush1.bf16.msra.mxu0 %v8752_v25  ;;  %v8849_v20 = vcombine.high %v1150_v12, %v1158_v13  ;;  %v1166_v22 = vld [vmem:[%s9612_s30 + $0x1690] sm:$0xff]  ;;  %v8848_v25 = vcombine.low %v1150_v12, %v1158_v13  ;;  %v479_v4 = vld [vmem:[%s9612_s30 + $0x118] sm:$0xff] }
 0x1be   : > { %7944 = vst [vmem:[#allocation2] sm:$0xff] %v7928_v36  ;;  %7040 = vmatprep.subr.bf16.mxu0 %v8769_v29  ;;  %v1422_v24 = vld [vmem:[%s9612_s30 + $0x1e90] sm:$0xff]  ;;  %v8865_v2 = vcombine.high %v1166_v22, %v1174_v23  ;;  %v8864_v31 = vcombine.low %v1166_v22, %v1174_v23  ;;  %v487_v33 = vld [vmem:[%s9612_s30 + $0x158] sm:$0xff] }
 0x1bf   : > { %7080 = vmatpush1.bf16.msra.mxu1 %v9008_v28  ;;  %7945 = vst [vmem:[#allocation2 + $0x8] sm:$0xff] %v7929_v41  ;;  %v1430_v63 = vld [vmem:[%s9612_s30 + $0x1ed0] sm:$0xff]  ;;  %v735_v5 = vld [vmem:[%s9612_s30 + $0x918] sm:$0xff] }
 0x1c0   : > { %7081 = vmatprep.subr.bf16.mxu1 %v9025_v53  ;;  %v9121_v27 = vcombine.high %v1422_v24, %v1430_v63  ;;  %v1182_v49 = vld [vmem:[%s9612_s30 + $0x1710] sm:$0xff]  ;;  %v9120_v53 = vcombine.low %v1422_v24, %v1430_v63  ;;  %v743_v6 = vld [vmem:[%s9612_s30 + $0x958] sm:$0xff] }
 0x1c1   : > { %7041 = vmatpush1.bf16.msra.mxu0 %v8768_v42  ;;  %v1190_v28 = vld [vmem:[%s9612_s30 + $0x1750] sm:$0xff]  ;;  %v495_v12 = vld [vmem:[%s9612_s30 + $0x198] sm:$0xff] }
 0x1c2   : > { %7042 = vmatprep.subr.bf16.mxu0 %v8785_v44  ;;  %v1438_v29 = vld [vmem:[%s9612_s30 + $0x1f10] sm:$0xff]  ;;  %v8881_v32 = vcombine.high %v1182_v49, %v1190_v28  ;;  %v8880_v42 = vcombine.low %v1182_v49, %v1190_v28  ;;  %v503_v13 = vld [vmem:[%s9612_s30 + $0x1d8] sm:$0xff] }
 0x1c3   : > { %7082 = vmatpush1.bf16.msra.mxu1 %v9024_v43  ;;  %v1446_v30 = vld [vmem:[%s9612_s30 + $0x1f50] sm:$0xff]  ;;  %v751_v14 = vld [vmem:[%s9612_s30 + $0x998] sm:$0xff] }
 0x1c4   : > { %7083 = vmatprep.subr.bf16.mxu1 %v9041_v45  ;;  %v9137_v35 = vcombine.high %v1438_v29, %v1446_v30  ;;  %v1198_v36 = vld [vmem:[%s9612_s30 + $0x1790] sm:$0xff]  ;;  %v9136_v43 = vcombine.low %v1438_v29, %v1446_v30  ;;  %v759_v15 = vld [vmem:[%s9612_s30 + $0x9d8] sm:$0xff] }
 0x1c5   : > { %7043 = vmatpush1.bf16.msra.mxu0 %v8784_v51  ;;  %v1462_v41 = vld [vmem:[%s9612_s30 + $0x1fd0] sm:$0xff]  ;;  %v8897_v44 = vcombine.high %v1198_v36, %v1206_v37  ;;  %v8896_v51 = vcombine.low %v1198_v36, %v1206_v37  ;;  %v511_v22 = vld [vmem:[%s9612_s30 + $0x218] sm:$0xff] }
 0x1c6   : > { %7044 = vmatprep.subr.bf16.mxu0 %v8801_v54  ;;  %v9153_v45 = vcombine.high %v1454_v40, %v1462_v41  ;;  %v8147_v54 = vcombine.high %v447_v46, %v455_v47  ;;  %v519_v23 = vld [vmem:[%s9612_s30 + $0x258] sm:$0xff] }
 0x1c7   : > { %7084 = vmatpush1.bf16.msra.mxu1 %v9040_v52  ;;  %v9152_v52 = vcombine.low %v1454_v40, %v1462_v41  ;;  %v767_v24 = vld [vmem:[%s9612_s30 + $0xa18] sm:$0xff] }
 0x1c8   : > { %7085 = vmatprep.subr.bf16.mxu1 %v9057_v55  ;;  %v8403_v55 = vcombine.high %v703_v48, %v711_v50  ;;  %v775_v63 = vld [vmem:[%s9612_s30 + $0xa58] sm:$0xff] }
 0x1c9   : > { %7045 = vmatpush1.bf16.msra.mxu0 %v8800_v61  ;;  %v8146_v61 = vcombine.low %v447_v46, %v455_v47  ;;  %v527_v49 = vld [vmem:[%s9612_s30 + $0x298] sm:$0xff] }
 0x1ca   : > { %7046 = vmatprep.subr.bf16.mxu0 %v8817_v1  ;;  %v8163_v1 = vcombine.high %v463_v56, %v471_v57  ;;  %v535_v28 = vld [vmem:[%s9612_s30 + $0x2d8] sm:$0xff] }
 0x1cb   : > { %7086 = vmatpush1.bf16.msra.mxu1 %v9056_v62  ;;  %v8402_v62 = vcombine.low %v703_v48, %v711_v50  ;;  %v783_v29 = vld [vmem:[%s9612_s30 + $0xa98] sm:$0xff] }
 0x1cc   : > { %7087 = vmatprep.subr.bf16.mxu1 %v9073_v3  ;;  %v8419_v3 = vcombine.high %v719_v58, %v727_v59  ;;  %v791_v30 = vld [vmem:[%s9612_s30 + $0xad8] sm:$0xff] }
 0x1cd   : > { %7047 = vmatpush1.bf16.msra.mxu0 %v8816_v34  ;;  %v8162_v34 = vcombine.low %v463_v56, %v471_v57  ;;  %v543_v36 = vld [vmem:[%s9612_s30 + $0x318] sm:$0xff] }
 0x1ce   : > { %7048 = vmatprep.subr.bf16.mxu0 %v8833_v10  ;;  %v8179_v10 = vcombine.high %v479_v4, %v487_v33  ;;  %v551_v37 = vld [vmem:[%s9612_s30 + $0x358] sm:$0xff] }
 0x1cf   : > { %7088 = vmatpush1.bf16.msra.mxu1 %v9072_v8  ;;  %v8418_v8 = vcombine.low %v719_v58, %v727_v59  ;;  %v799_v40 = vld [vmem:[%s9612_s30 + $0xb18] sm:$0xff]  ;;  %v8242_v58 = vcombine.low %v543_v36, %v551_v37 }
 0x1d0   : > { %7089 = vmatprep.subr.bf16.mxu1 %v9089_v11  ;;  %v8435_v11 = vcombine.high %v735_v5, %v743_v6  ;;  %v807_v41 = vld [vmem:[%s9612_s30 + $0xb58] sm:$0xff] }
 0x1d1   : > { %7049 = vmatpush1.bf16.msra.mxu0 %v8832_v17  ;;  %v8178_v17 = vcombine.low %v479_v4, %v487_v33  ;;  %v8499_v46 = vcombine.high %v799_v40, %v807_v41  ;;  %v559_v47 = vld [vmem:[%s9612_s30 + $0x398] sm:$0xff] }
 0x1d2   : > { %7050 = vmatprep.subr.bf16.mxu0 %v8849_v20  ;;  %v8195_v20 = vcombine.high %v495_v12, %v503_v13  ;;  %v567_v48 = vld [vmem:[%s9612_s30 + $0x3d8] sm:$0xff] }
 0x1d3   : > { %7090 = vmatpush1.bf16.msra.mxu1 %v9088_v18  ;;  %v8434_v18 = vcombine.low %v735_v5, %v743_v6  ;;  %v575_v5 = vld [vmem:[%s9612_s30 + $0x418] sm:$0xff] }
 0x1d4   : > { %7091 = vmatprep.subr.bf16.mxu1 %v9105_v21  ;;  %v8451_v21 = vcombine.high %v751_v14, %v759_v15  ;;  %v583_v6 = vld [vmem:[%s9612_s30 + $0x458] sm:$0xff] }
 0x1d5   : > { %7051 = vmatpush1.bf16.msra.mxu0 %v8848_v25  ;;  %v8194_v25 = vcombine.low %v495_v12, %v503_v13  ;;  %v8275_v12 = vcombine.high %v575_v5, %v583_v6 }
 0x1d6   : > { %7052 = vmatprep.subr.bf16.mxu0 %v8865_v2  ;;  %v8211_v2 = vcombine.high %v511_v22, %v519_v23 }
 0x1d7   : > { %7092 = vmatpush1.bf16.msra.mxu1 %v9104_v26  ;;  %v8450_v26 = vcombine.low %v751_v14, %v759_v15  ;;  %v591_v14 = vld [vmem:[%s9612_s30 + $0x498] sm:$0xff] }
 0x1d8   : > { %7093 = vmatprep.subr.bf16.mxu1 %v9121_v27  ;;  %v8467_v27 = vcombine.high %v767_v24, %v775_v63  ;;  %v599_v15 = vld [vmem:[%s9612_s30 + $0x4d8] sm:$0xff] }
 0x1d9   : > { %7053 = vmatpush1.bf16.msra.mxu0 %v8864_v31  ;;  %v8210_v31 = vcombine.low %v511_v22, %v519_v23  ;;  %v8291_v22 = vcombine.high %v591_v14, %v599_v15 }
 0x1da   : > { %7054 = vmatprep.subr.bf16.mxu0 %v8881_v32  ;;  %v8227_v32 = vcombine.high %v527_v49, %v535_v28 }
 0x1db   : > { %7094 = vmatpush1.bf16.msra.mxu1 %v9120_v53  ;;  %v8466_v53 = vcombine.low %v767_v24, %v775_v63  ;;  %v607_v24 = vld [vmem:[%s9612_s30 + $0x518] sm:$0xff] }
 0x1dc   : > { %7095 = vmatprep.subr.bf16.mxu1 %v9137_v35  ;;  %v8483_v35 = vcombine.high %v783_v29, %v791_v30  ;;  %v615_v63 = vld [vmem:[%s9612_s30 + $0x558] sm:$0xff] }
 0x1dd   : > { %7055 = vmatpush1.bf16.msra.mxu0 %v8880_v42  ;;  %v8226_v42 = vcombine.low %v527_v49, %v535_v28  ;;  %v8307_v49 = vcombine.high %v607_v24, %v615_v63 }
 0x1de   : > { %7056 = vmatprep.subr.bf16.mxu0 %v8897_v44  ;;  %v8243_v44 = vcombine.high %v543_v36, %v551_v37 }
 0x1df   : > { %7096 = vmatpush1.bf16.msra.mxu1 %v9136_v43  ;;  %v8482_v43 = vcombine.low %v783_v29, %v791_v30  ;;  %v623_v29 = vld [vmem:[%s9612_s30 + $0x598] sm:$0xff] }
 0x1e0   : > { %7097 = vmatprep.subr.bf16.mxu1 %v9153_v45  ;;  %v631_v30 = vld [vmem:[%s9612_s30 + $0x5d8] sm:$0xff] }
 0x1e1   : > { %7057 = vmatpush1.bf16.msra.mxu0 %v8896_v51  ;;  %v8323_v36 = vcombine.high %v623_v29, %v631_v30 }
 0x1e2   : > { %7108 = vmatprep.subr.bf16.mxu0 %v8147_v54  ;;  %v823_v54 = vld [vmem:[%s9612_s30 + $0xbd8] sm:$0xff] }
 0x1e3   : > { %7098 = vmatpush1.bf16.msra.mxu1 %v9152_v52  ;;  %v815_v52 = vld [vmem:[%s9612_s30 + $0xb98] sm:$0xff] }
 0x1e4   : > { %7149 = vmatprep.subr.bf16.mxu1 %v8403_v55  ;;  %7059 = vmatmul.mubr.bf16.vlgmr.msra.gmra.mrb[20].mxu0 %v9812_v16  ;;  %v8515_v33 = vcombine.high %v815_v52, %v823_v54 }
 0x1e5   : > { %7109 = vmatpush1.bf16.msra.mxu0 %v8146_v61  ;;  %7140 = vmatprep.mubr.bf16.mxu0 %v9672_v38 }
 0x1e6   : > { %7100 = vmatmul.mubr.bf16.vlgmr.msra.gmra.mrb[20].mxu1 %v9818_v19  ;;  %7110 = vmatprep.subr.bf16.mxu0 %v8163_v1  ;;  %v8498_v1 = vcombine.low %v799_v40, %v807_v41  ;;  %v639_v40 = vld [vmem:[%s9612_s30 + $0x618] sm:$0xff] }
 0x1e7   : > { %7150 = vmatpush1.bf16.msra.mxu1 %v8402_v62  ;;  %7181 = vmatprep.mubr.bf16.mxu1 %v9676_v39  ;;  %v647_v41 = vld [vmem:[%s9612_s30 + $0x658] sm:$0xff] }
 0x1e8   : > { %7151 = vmatprep.subr.bf16.mxu1 %v8419_v3  ;;  %v8259_v3 = vcombine.high %v559_v47, %v567_v48 }
 0x1e9   : > { %7111 = vmatpush1.bf16.msra.mxu0 %v8162_v34  ;;  %v831_v34 = vld [vmem:[%s9612_s30 + $0xc18] sm:$0xff] }
 0x1ea   : > { %7112 = vmatprep.subr.bf16.mxu0 %v8179_v10  ;;  %v8258_v10 = vcombine.low %v559_v47, %v567_v48  ;;  %v655_v48 = vld [vmem:[%s9612_s30 + $0x698] sm:$0xff] }
 0x1eb   : > { %7152 = vmatpush1.bf16.msra.mxu1 %v8418_v8  ;;  %v839_v8 = vld [vmem:[%s9612_s30 + $0xc58] sm:$0xff] }
 0x1ec   : > { %7153 = vmatprep.subr.bf16.mxu1 %v8435_v11  ;;  %v8514_v11 = vcombine.low %v815_v52, %v823_v54  ;;  %v8531_v13 = vcombine.high %v831_v34, %v839_v8  ;;  %v919_v52 = vld [vmem:[%s9612_s30 + $0xed8] sm:$0xff]  ;;  %v8338_v54 = vcombine.low %v639_v40, %v647_v41 }
 0x1ed   : > { %7113 = vmatpush1.bf16.msra.mxu0 %v8178_v17  ;;  %v847_v17 = vld [vmem:[%s9612_s30 + $0xc98] sm:$0xff] }
 0x1ee   : > { %7114 = vmatprep.subr.bf16.mxu0 %v8195_v20  ;;  %v8274_v20 = vcombine.low %v575_v5, %v583_v6 }
 0x1ef   : > { %7154 = vmatpush1.bf16.msra.mxu1 %v8434_v18  ;;  %v855_v18 = vld [vmem:[%s9612_s30 + $0xcd8] sm:$0xff] }
 0x1f0   : > { %7155 = vmatprep.subr.bf16.mxu1 %v8451_v21  ;;  %v8530_v21 = vcombine.low %v831_v34, %v839_v8  ;;  %v8547_v23 = vcombine.high %v847_v17, %v855_v18  ;;  %v687_v34 = vld [vmem:[%s9612_s30 + $0x798] sm:$0xff] }
 0x1f1   : > { %7115 = vmatpush1.bf16.msra.mxu0 %v8194_v25  ;;  %v863_v25 = vld [vmem:[%s9612_s30 + $0xd18] sm:$0xff] }
 0x1f2   : > { %7116 = vmatprep.subr.bf16.mxu0 %v8211_v2  ;;  %v8290_v2 = vcombine.low %v591_v14, %v599_v15  ;;  %v695_v8 = vld [vmem:[%s9612_s30 + $0x7d8] sm:$0xff] }
 0x1f3   : > { %7156 = vmatpush1.bf16.msra.mxu1 %v8450_v26  ;;  %v871_v26 = vld [vmem:[%s9612_s30 + $0xd58] sm:$0xff]  ;;  %v8387_v14 = vcombine.high %v687_v34, %v695_v8 }
 0x1f4   : > { %7157 = vmatprep.subr.bf16.mxu1 %v8467_v27  ;;  %v8546_v27 = vcombine.low %v847_v17, %v855_v18  ;;  %v8563_v28 = vcombine.high %v863_v25, %v871_v26  ;;  %v959_v17 = vld [vmem:[%s9612_s30 + $0x1018] sm:$0xff] }
 0x1f5   : > { %7117 = vmatpush1.bf16.msra.mxu0 %v8210_v31  ;;  %v879_v31 = vld [vmem:[%s9612_s30 + $0xd98] sm:$0xff] }
 0x1f6   : > { %7118 = vmatprep.subr.bf16.mxu0 %v8227_v32  ;;  %v8306_v32 = vcombine.low %v607_v24, %v615_v63  ;;  %v967_v18 = vld [vmem:[%s9612_s30 + $0x1058] sm:$0xff] }
 0x1f7   : > { %7158 = vmatpush1.bf16.msra.mxu1 %v8466_v53  ;;  %v6814_v45 = vpop.f32.mrb[8].mxu0  ;;  %v887_v53 = vld [vmem:[%s9612_s30 + $0xdd8] sm:$0xff]  ;;  %v8659_v24 = vcombine.high %v959_v17, %v967_v18 }
 0x1f8   : > { %7159 = vmatprep.subr.bf16.mxu1 %v8483_v35  ;;  %v6816_v51 = vpop.f32.mrb[9].mxu0  ;;  %v8562_v35 = vcombine.low %v863_v25, %v871_v26  ;;  %v8579_v37 = vcombine.high %v879_v31, %v887_v53  ;;  %v975_v25 = vld [vmem:[%s9612_s30 + $0x1098] sm:$0xff] }
 0x1f9   : > { %v6855_v50 = vpop.f32.mrb[8].mxu1  ;;  %v6818_v57 = vpop.f32.mrb[10].mxu0  ;;  %7119 = vmatpush1.bf16.msra.mxu0 %v8226_v42  ;;  %v895_v42 = vld [vmem:[%s9612_s30 + $0xe18] sm:$0xff] }
 0x1fa   : > { %v10126_v55 = vadd.f32 %v6855_v50, %v6814_v45  ;;  %v6857_v56 = vpop.f32.mrb[9].mxu1  ;;  %v6819_v62 = vpop.f32.mrb[11].mxu0  ;;  %7120 = vmatprep.subr.bf16.mxu0 %v8243_v44  ;;  %v8322_v44 = vcombine.low %v623_v29, %v631_v30  ;;  %v8578_v45 = vcombine.low %v879_v31, %v887_v53  ;;  %v663_v50 = vld [vmem:[%s9612_s30 + $0x6d8] sm:$0xff] }
 0x1fb   : > { %v10128_v59 = vadd.f32 %v6857_v56, %v6816_v51  ;;  %v6859_v61 = vpop.f32.mrb[10].mxu1  ;;  %7160 = vmatpush1.bf16.msra.mxu1 %v8482_v43  ;;  %v903_v43 = vld [vmem:[%s9612_s30 + $0xe58] sm:$0xff]  ;;  %v8355_v57 = vcombine.high %v655_v48, %v663_v50 }
 0x1fc   : > { %v6860_v4 = vpop.f32.mrb[11].mxu1  ;;  %7161 = vmatprep.subr.bf16.mxu1 %v8499_v46  ;;  %v8339_v46 = vcombine.high %v639_v40, %v647_v41  ;;  %v8595_v47 = vcombine.high %v895_v42, %v903_v43  ;;  %v911_v51 = vld [vmem:[%s9612_s30 + $0xe98] sm:$0xff]  ;;  %v8594_v56 = vcombine.low %v895_v42, %v903_v43 }
 0x1fd   : > { %7121 = vmatpush1.bf16.msra.mxu0 %v8242_v58  ;;  %v8611_v58 = vcombine.high %v911_v51, %v919_v52  ;;  %v671_v61 = vld [vmem:[%s9612_s30 + $0x718] sm:$0xff]  ;;  %v8354_v4 = vcombine.low %v655_v48, %v663_v50 }
 0x1fe   : > { %7122 = vmatprep.subr.bf16.mxu0 %v8259_v3  ;;  %v679_v62 = vld [vmem:[%s9612_s30 + $0x758] sm:$0xff] }
 0x1ff   : > { %7162 = vmatpush1.bf16.msra.mxu1 %v8498_v1  ;;  %v927_v1 = vld [vmem:[%s9612_s30 + $0xf18] sm:$0xff]  ;;  %v8371_v5 = vcombine.high %v671_v61, %v679_v62 }
 0x200   : > { %7163 = vmatprep.subr.bf16.mxu1 %v8515_v33  ;;  %v935_v3 = vld [vmem:[%s9612_s30 + $0xf58] sm:$0xff]  ;;  %v8610_v33 = vcombine.low %v911_v51, %v919_v52 }
 0x201   : > { %7123 = vmatpush1.bf16.msra.mxu0 %v8258_v10  ;;  %v8627_v6 = vcombine.high %v927_v1, %v935_v3  ;;  %v943_v10 = vld [vmem:[%s9612_s30 + $0xf98] sm:$0xff] }
 0x202   : > { %7124 = vmatprep.subr.bf16.mxu0 %v8275_v12  ;;  %v8370_v12 = vcombine.low %v671_v61, %v679_v62  ;;  %v983_v26 = vld [vmem:[%s9612_s30 + $0x10d8] sm:$0xff] }
 0x203   : > { %7164 = vmatpush1.bf16.msra.mxu1 %v8514_v11  ;;  %v951_v11 = vld [vmem:[%s9612_s30 + $0xfd8] sm:$0xff]  ;;  %v8675_v29 = vcombine.high %v975_v25, %v983_v26 }
 0x204   : > { %7165 = vmatprep.subr.bf16.mxu1 %v8531_v13  ;;  %v8626_v13 = vcombine.low %v927_v1, %v935_v3  ;;  %v8643_v15 = vcombine.high %v943_v10, %v951_v11  ;;  %v991_v31 = vld [vmem:[%s9612_s30 + $0x1118] sm:$0xff] }
 0x205   : > { %7125 = vmatpush1.bf16.msra.mxu0 %v8274_v20  ;;  %v1215_v20 = vld [vmem:[%s9612_s30 + $0x1818] sm:$0xff] }
 0x206   : > { %7126 = vmatprep.subr.bf16.mxu0 %v8291_v22  ;;  %v8386_v22 = vcombine.low %v687_v34, %v695_v8  ;;  %v999_v53 = vld [vmem:[%s9612_s30 + $0x1158] sm:$0xff] }
 0x207   : > { %7166 = vmatpush1.bf16.msra.mxu1 %v8530_v21  ;;  %v1223_v21 = vld [vmem:[%s9612_s30 + $0x1858] sm:$0xff]  ;;  %v8691_v40 = vcombine.high %v991_v31, %v999_v53 }
 0x208   : > { %7167 = vmatprep.subr.bf16.mxu1 %v8547_v23  ;;  %v8642_v23 = vcombine.low %v943_v10, %v951_v11  ;;  %v8915_v63 = vcombine.high %v1215_v20, %v1223_v21  ;;  %v1007_v42 = vld [vmem:[%s9612_s30 + $0x1198] sm:$0xff] }
 0x209   : > { %7127 = vmatpush1.bf16.msra.mxu0 %v8290_v2  ;;  %v1231_v2 = vld [vmem:[%s9612_s30 + $0x1898] sm:$0xff] }
 0x20a   : > { %7128 = vmatprep.subr.bf16.mxu0 %v8307_v49  ;;  %v8658_v49 = vcombine.low %v959_v17, %v967_v18  ;;  %v1015_v43 = vld [vmem:[%s9612_s30 + $0x11d8] sm:$0xff] }
 0x20b   : > { %7168 = vmatpush1.bf16.msra.mxu1 %v8546_v27  ;;  %v1239_v27 = vld [vmem:[%s9612_s30 + $0x18d8] sm:$0xff]  ;;  %v8707_v48 = vcombine.high %v1007_v42, %v1015_v43 }
 0x20c   : > { %7169 = vmatprep.subr.bf16.mxu1 %v8563_v28  ;;  %v8914_v28 = vcombine.low %v1215_v20, %v1223_v21  ;;  %v8931_v30 = vcombine.high %v1231_v2, %v1239_v27  ;;  %v1023_v51 = vld [vmem:[%s9612_s30 + $0x1218] sm:$0xff] }
 0x20d   : > { %7129 = vmatpush1.bf16.msra.mxu0 %v8306_v32  ;;  %v1247_v32 = vld [vmem:[%s9612_s30 + $0x1918] sm:$0xff] }
 0x20e   : > { %7130 = vmatprep.subr.bf16.mxu0 %v8323_v36  ;;  %v8674_v36 = vcombine.low %v975_v25, %v983_v26  ;;  %v1031_v52 = vld [vmem:[%s9612_s30 + $0x1258] sm:$0xff] }
 0x20f   : > { %7170 = vmatpush1.bf16.msra.mxu1 %v8562_v35  ;;  %v1255_v35 = vld [vmem:[%s9612_s30 + $0x1958] sm:$0xff]  ;;  %v8723_v61 = vcombine.high %v1023_v51, %v1031_v52 }
 0x210   : > { %7171 = vmatprep.subr.bf16.mxu1 %v8579_v37  ;;  %v8930_v37 = vcombine.low %v1231_v2, %v1239_v27  ;;  %v8947_v41 = vcombine.high %v1247_v32, %v1255_v35  ;;  %v1039_v1 = vld [vmem:[%s9612_s30 + $0x1298] sm:$0xff]  ;;  %v426_v2 = vld [vmem:[#allocation2 + $0x10] sm:$0xff] }
 0x211   : > { %7131 = vmatpush1.bf16.msra.mxu0 %v8322_v44  ;;  %v1263_v44 = vld [vmem:[%s9612_s30 + $0x1998] sm:$0xff] }
 0x212   : > { %7132 = vmatprep.subr.bf16.mxu0 %v8339_v46  ;;  %v8690_v46 = vcombine.low %v991_v31, %v999_v53  ;;  %v1047_v3 = vld [vmem:[%s9612_s30 + $0x12d8] sm:$0xff] }
 0x213   : > { %7172 = vmatpush1.bf16.msra.mxu1 %v8578_v45  ;;  %v1271_v45 = vld [vmem:[%s9612_s30 + $0x19d8] sm:$0xff]  ;;  %v8739_v34 = vcombine.high %v1039_v1, %v1047_v3 }
 0x214   : > { %7173 = vmatprep.subr.bf16.mxu1 %v8595_v47  ;;  %v8946_v47 = vcombine.low %v1247_v32, %v1255_v35  ;;  %v8963_v50 = vcombine.high %v1263_v44, %v1271_v45  ;;  %v1055_v10 = vld [vmem:[%s9612_s30 + $0x1318] sm:$0xff] }
 0x215   : > { %7133 = vmatpush1.bf16.msra.mxu0 %v8338_v54  ;;  %v1279_v54 = vld [vmem:[%s9612_s30 + $0x1a18] sm:$0xff] }
 0x216   : > { %7134 = vmatprep.subr.bf16.mxu0 %v8355_v57  ;;  %v8706_v57 = vcombine.low %v1007_v42, %v1015_v43  ;;  %v1063_v11 = vld [vmem:[%s9612_s30 + $0x1358] sm:$0xff] }
 0x217   : > { %7174 = vmatpush1.bf16.msra.mxu1 %v8594_v56  ;;  %v1287_v56 = vld [vmem:[%s9612_s30 + $0x1a58] sm:$0xff]  ;;  %v8755_v17 = vcombine.high %v1055_v10, %v1063_v11 }
 0x218   : > { %7175 = vmatprep.subr.bf16.mxu1 %v8611_v58  ;;  %v8962_v58 = vcombine.low %v1263_v44, %v1271_v45  ;;  %v8979_v62 = vcombine.high %v1279_v54, %v1287_v56  ;;  %v1071_v21 = vld [vmem:[%s9612_s30 + $0x1398] sm:$0xff] }
 0x219   : > { %7135 = vmatpush1.bf16.msra.mxu0 %v8354_v4  ;;  %v1295_v4 = vld [vmem:[%s9612_s30 + $0x1a98] sm:$0xff] }
 0x21a   : > { %7136 = vmatprep.subr.bf16.mxu0 %v8371_v5  ;;  %v8722_v5 = vcombine.low %v1023_v51, %v1031_v52  ;;  %v1327_v25 = vld [vmem:[%s9612_s30 + $0x1b98] sm:$0xff] }
 0x21b   : > { %7176 = vmatpush1.bf16.msra.mxu1 %v8610_v33  ;;  %v1303_v33 = vld [vmem:[%s9612_s30 + $0x1ad8] sm:$0xff] }
 0x21c   : > { %7177 = vmatprep.subr.bf16.mxu1 %v8627_v6  ;;  %v8978_v6 = vcombine.low %v1279_v54, %v1287_v56  ;;  %v8995_v8 = vcombine.high %v1295_v4, %v1303_v33  ;;  %v1335_v26 = vld [vmem:[%s9612_s30 + $0x1bd8] sm:$0xff] }
 0x21d   : > { %7137 = vmatpush1.bf16.msra.mxu0 %v8370_v12  ;;  %v1311_v12 = vld [vmem:[%s9612_s30 + $0x1b18] sm:$0xff] }
 0x21e   : > { %7138 = vmatprep.subr.bf16.mxu0 %v8387_v14  ;;  %v8738_v14 = vcombine.low %v1039_v1, %v1047_v3  ;;  %v427_v31 = vld [vmem:[#allocation2 + $0x18] sm:$0xff] }
 0x21f   : > { %7178 = vmatpush1.bf16.msra.mxu1 %v8626_v13  ;;  %v1319_v13 = vld [vmem:[%s9612_s30 + $0x1b58] sm:$0xff] }
 0x220   : > { %7179 = vmatprep.subr.bf16.mxu1 %v8643_v15  ;;  %v8994_v15 = vcombine.low %v1295_v4, %v1303_v33  ;;  %v9011_v20 = vcombine.high %v1311_v12, %v1319_v13  ;;  %v9010_v32 = vcombine.low %v1311_v12, %v1319_v13  ;;  %v1343_v43 = vld [vmem:[%s9612_s30 + $0x1c18] sm:$0xff] }
 0x221   : > { %7139 = vmatpush1.bf16.msra.mxu0 %v8386_v22  ;;  %v1079_v22 = vld [vmem:[%s9612_s30 + $0x13d8] sm:$0xff] }
 0x222   : > { %7190 = vmatprep.subr.bf16.mxu0 %v8659_v24  ;;  %v8771_v35 = vcombine.high %v1071_v21, %v1079_v22  ;;  %v1351_v44 = vld [vmem:[%s9612_s30 + $0x1c58] sm:$0xff] }
 0x223   : > { %7180 = vmatpush1.bf16.msra.mxu1 %v8642_v23  ;;  %v1103_v51 = vld [vmem:[%s9612_s30 + $0x1498] sm:$0xff] }
 0x224   : > { %7231 = vmatprep.subr.bf16.mxu1 %v8915_v63  ;;  %7141 = vmatmul.mubr.bf16.vlgmr.msra.gmra.mrb[24].mxu0 %v9722_v60  ;;  %v1111_v52 = vld [vmem:[%s9612_s30 + $0x14d8] sm:$0xff] }
 0x225   : > { %7191 = vmatpush1.bf16.msra.mxu0 %v8658_v49  ;;  %7222 = vmatprep.mubr.bf16.mxu0 %v9740_v7  ;;  %v1359_v54 = vld [vmem:[%s9612_s30 + $0x1c98] sm:$0xff] }
 0x226   : > { %7182 = vmatmul.mubr.bf16.vlgmr.msra.gmra.mrb[24].mxu1 %v9731_v0  ;;  %7192 = vmatprep.subr.bf16.mxu0 %v8675_v29  ;;  %v8754_v29 = vcombine.low %v1055_v10, %v1063_v11  ;;  %v1367_v56 = vld [vmem:[%s9612_s30 + $0x1cd8] sm:$0xff] }
 0x227   : > { %7232 = vmatpush1.bf16.msra.mxu1 %v8914_v28  ;;  %7263 = vmatprep.mubr.bf16.mxu1 %v9747_v9  ;;  %v1119_v1 = vld [vmem:[%s9612_s30 + $0x1518] sm:$0xff] }
 0x228   : > { %7233 = vmatprep.subr.bf16.mxu1 %v8931_v30  ;;  %v1127_v3 = vld [vmem:[%s9612_s30 + $0x1558] sm:$0xff] }
 0x229   : > { %7193 = vmatpush1.bf16.msra.mxu0 %v8674_v36  ;;  %v1375_v4 = vld [vmem:[%s9612_s30 + $0x1d18] sm:$0xff] }
 0x22a   : > { %7194 = vmatprep.subr.bf16.mxu0 %v8691_v40  ;;  %v1087_v40 = vld [vmem:[%s9612_s30 + $0x1418] sm:$0xff] }
 0x22b   : > { %7234 = vmatpush1.bf16.msra.mxu1 %v8930_v37  ;;  %v1383_v33 = vld [vmem:[%s9612_s30 + $0x1d58] sm:$0xff] }
 0x22c   : > { %7235 = vmatprep.subr.bf16.mxu1 %v8947_v41  ;;  %v1095_v41 = vld [vmem:[%s9612_s30 + $0x1458] sm:$0xff] }
 0x22d   : > { %7195 = vmatpush1.bf16.msra.mxu0 %v8690_v46  ;;  %v8770_v46 = vcombine.low %v1071_v21, %v1079_v22  ;;  %v1135_v10 = vld [vmem:[%s9612_s30 + $0x1598] sm:$0xff] }
 0x22e   : > { %7196 = vmatprep.subr.bf16.mxu0 %v8707_v48  ;;  %v8787_v48 = vcombine.high %v1087_v40, %v1095_v41  ;;  %v1143_v11 = vld [vmem:[%s9612_s30 + $0x15d8] sm:$0xff] }
 0x22f   : > { %7236 = vmatpush1.bf16.msra.mxu1 %v8946_v47  ;;  %v9026_v47 = vcombine.low %v1327_v25, %v1335_v26  ;;  %v1391_v12 = vld [vmem:[%s9612_s30 + $0x1d98] sm:$0xff] }
 0x230   : > { %7237 = vmatprep.subr.bf16.mxu1 %v8963_v50  ;;  %v9043_v50 = vcombine.high %v1343_v43, %v1351_v44  ;;  %v1399_v13 = vld [vmem:[%s9612_s30 + $0x1dd8] sm:$0xff] }
 0x231   : > { %7197 = vmatpush1.bf16.msra.mxu0 %v8706_v57  ;;  %v8786_v57 = vcombine.low %v1087_v40, %v1095_v41  ;;  %v1159_v21 = vld [vmem:[%s9612_s30 + $0x1658] sm:$0xff] }
 0x232   : > { %7198 = vmatprep.subr.bf16.mxu0 %v8723_v61  ;;  %v8803_v61 = vcombine.high %v1103_v51, %v1111_v52  ;;  %v1407_v22 = vld [vmem:[%s9612_s30 + $0x1e18] sm:$0xff] }
 0x233   : > { %7238 = vmatpush1.bf16.msra.mxu1 %v8962_v58  ;;  %v9042_v58 = vcombine.low %v1343_v43, %v1351_v44  ;;  %v1207_v43 = vld [vmem:[%s9612_s30 + $0x17d8] sm:$0xff] }
 0x234   : > { %7239 = vmatprep.subr.bf16.mxu1 %v8979_v62  ;;  %v9059_v62 = vcombine.high %v1359_v54, %v1367_v56  ;;  %v1455_v44 = vld [vmem:[%s9612_s30 + $0x1f98] sm:$0xff] }
 0x235   : > { %7199 = vmatpush1.bf16.msra.mxu0 %v8722_v5  ;;  %v8802_v5 = vcombine.low %v1103_v51, %v1111_v52  ;;  %v448_v51 = vld [vmem:[%s9612_s30 + $0x20] sm:$0xff] }
 0x236   : > { %7200 = vmatprep.subr.bf16.mxu0 %v8739_v34  ;;  %v8819_v34 = vcombine.high %v1119_v1, %v1127_v3  ;;  %v456_v52 = vld [vmem:[%s9612_s30 + $0x60] sm:$0xff] }
 0x237   : > { %7240 = vmatpush1.bf16.msra.mxu1 %v8978_v6  ;;  %v6896_v18 = vpop.f32.mrb[12].mxu0  ;;  %v9058_v6 = vcombine.low %v1359_v54, %v1367_v56  ;;  %v704_v54 = vld [vmem:[%s9612_s30 + $0x820] sm:$0xff] }
 0x238   : > { %7241 = vmatprep.subr.bf16.mxu1 %v8995_v8  ;;  %v6897_v23 = vadd.f32 %v6896_v18, %v10126_v55  ;;  %v6898_v63 = vpop.f32.mrb[13].mxu0  ;;  %v9075_v8 = vcombine.high %v1375_v4, %v1383_v33  ;;  %v9091_v18 = vcombine.high %v1391_v12, %v1399_v13  ;;  %v712_v56 = vld [vmem:[%s9612_s30 + $0x860] sm:$0xff] }
 0x239   : > { %v6937_v24 = vpop.f32.mrb[12].mxu1  ;;  %v6899_v27 = vadd.f32 %v6898_v63, %v10128_v59  ;;  %v6900_v28 = vpop.f32.mrb[14].mxu0  ;;  %7201 = vmatpush1.bf16.msra.mxu0 %v8738_v14  ;;  %v9027_v59 = vcombine.high %v1327_v25, %v1335_v26  ;;  %v8818_v14 = vcombine.low %v1119_v1, %v1127_v3  ;;  %v9090_v63 = vcombine.low %v1391_v12, %v1399_v13  ;;  %v464_v1 = vld [vmem:[%s9612_s30 + $0xa0] sm:$0xff] }
 0x23a   : > { %v6939_v49 = vpop.f32.mrb[13].mxu1  ;;  %v6938_v30 = vadd.f32 %v6937_v24, %v6897_v23  ;;  %v6901_v55 = vpop.f32.mrb[15].mxu0  ;;  %7202 = vmatprep.subr.bf16.mxu0 %v8755_v17  ;;  %v8835_v17 = vcombine.high %v1135_v10, %v1143_v11  ;;  %v1415_v23 = vld [vmem:[%s9612_s30 + $0x1e58] sm:$0xff]  ;;  %v8834_v24 = vcombine.low %v1135_v10, %v1143_v11  ;;  %v472_v3 = vld [vmem:[%s9612_s30 + $0xe0] sm:$0xff] }
 0x23b   : > { %v6941_v53 = vpop.f32.mrb[14].mxu1  ;;  %7242 = vmatpush1.bf16.msra.mxu1 %v8994_v15  ;;  %v6940_v36 = vadd.f32 %v6939_v49, %v6899_v27  ;;  %v9074_v15 = vcombine.low %v1375_v4, %v1383_v33  ;;  %v9107_v26 = vcombine.high %v1407_v22, %v1415_v23  ;;  %v1175_v27 = vld [vmem:[%s9612_s30 + $0x16d8] sm:$0xff]  ;;  %v720_v4 = vld [vmem:[%s9612_s30 + $0x8a0] sm:$0xff] }
 0x23c   : > { %v6942_v37 = vpop.f32.mrb[15].mxu1  ;;  %7243 = vmatprep.subr.bf16.mxu1 %v9011_v20  ;;  %v7930_v42 = vadd.f32 %v6938_v30, %v426_v2  ;;  %v1151_v20 = vld [vmem:[%s9612_s30 + $0x1618] sm:$0xff]  ;;  %v9106_v30 = vcombine.low %v1407_v22, %v1415_v23  ;;  %v728_v33 = vld [vmem:[%s9612_s30 + $0x8e0] sm:$0xff] }
 0x23d   : > { %v7931_v45 = vadd.f32 %v6940_v36, %v427_v31  ;;  %7203 = vmatpush1.bf16.msra.mxu0 %v8754_v29  ;;  %v8851_v25 = vcombine.high %v1151_v20, %v1159_v21  ;;  %v1167_v2 = vld [vmem:[%s9612_s30 + $0x1698] sm:$0xff]  ;;  %v8850_v29 = vcombine.low %v1151_v20, %v1159_v21  ;;  %v480_v10 = vld [vmem:[%s9612_s30 + $0x120] sm:$0xff] }
 0x23e   : > { %7946 = vst [vmem:[#allocation2 + $0x10] sm:$0xff] %v7930_v42  ;;  %7204 = vmatprep.subr.bf16.mxu0 %v8771_v35  ;;  %v1423_v49 = vld [vmem:[%s9612_s30 + $0x1e98] sm:$0xff]  ;;  %v8867_v31 = vcombine.high %v1167_v2, %v1175_v27  ;;  %v8866_v37 = vcombine.low %v1167_v2, %v1175_v27  ;;  %v488_v11 = vld [vmem:[%s9612_s30 + $0x160] sm:$0xff] }
 0x23f   : > { %7244 = vmatpush1.bf16.msra.mxu1 %v9010_v32  ;;  %7947 = vst [vmem:[#allocation2 + $0x18] sm:$0xff] %v7931_v45  ;;  %v1431_v28 = vld [vmem:[%s9612_s30 + $0x1ed8] sm:$0xff]  ;;  %v736_v12 = vld [vmem:[%s9612_s30 + $0x920] sm:$0xff] }
 0x240   : > { %7245 = vmatprep.subr.bf16.mxu1 %v9027_v59  ;;  %v9123_v53 = vcombine.high %v1423_v49, %v1431_v28  ;;  %v1183_v55 = vld [vmem:[%s9612_s30 + $0x1718] sm:$0xff]  ;;  %v9122_v59 = vcombine.low %v1423_v49, %v1431_v28  ;;  %v744_v13 = vld [vmem:[%s9612_s30 + $0x960] sm:$0xff] }
 0x241   : > { %7205 = vmatpush1.bf16.msra.mxu0 %v8770_v46  ;;  %v1191_v32 = vld [vmem:[%s9612_s30 + $0x1758] sm:$0xff]  ;;  %v496_v20 = vld [vmem:[%s9612_s30 + $0x1a0] sm:$0xff] }
 0x242   : > { %7206 = vmatprep.subr.bf16.mxu0 %v8787_v48  ;;  %v1439_v35 = vld [vmem:[%s9612_s30 + $0x1f18] sm:$0xff]  ;;  %v8883_v40 = vcombine.high %v1183_v55, %v1191_v32  ;;  %v8882_v46 = vcombine.low %v1183_v55, %v1191_v32  ;;  %v504_v21 = vld [vmem:[%s9612_s30 + $0x1e0] sm:$0xff] }
 0x243   : > { %7246 = vmatpush1.bf16.msra.mxu1 %v9026_v47  ;;  %v1447_v36 = vld [vmem:[%s9612_s30 + $0x1f58] sm:$0xff]  ;;  %v752_v22 = vld [vmem:[%s9612_s30 + $0x9a0] sm:$0xff] }
 0x244   : > { %7247 = vmatprep.subr.bf16.mxu1 %v9043_v50  ;;  %v9139_v41 = vcombine.high %v1439_v35, %v1447_v36  ;;  %v1199_v42 = vld [vmem:[%s9612_s30 + $0x1798] sm:$0xff]  ;;  %v9138_v47 = vcombine.low %v1439_v35, %v1447_v36  ;;  %v760_v23 = vld [vmem:[%s9612_s30 + $0x9e0] sm:$0xff] }
 0x245   : > { %7207 = vmatpush1.bf16.msra.mxu0 %v8786_v57  ;;  %v1463_v45 = vld [vmem:[%s9612_s30 + $0x1fd8] sm:$0xff]  ;;  %v8899_v48 = vcombine.high %v1199_v42, %v1207_v43  ;;  %v8898_v57 = vcombine.low %v1199_v42, %v1207_v43  ;;  %v512_v2 = vld [vmem:[%s9612_s30 + $0x220] sm:$0xff] }
 0x246   : > { %7208 = vmatprep.subr.bf16.mxu0 %v8803_v61  ;;  %v9155_v50 = vcombine.high %v1455_v44, %v1463_v45  ;;  %v8149_v61 = vcombine.high %v448_v51, %v456_v52  ;;  %v520_v27 = vld [vmem:[%s9612_s30 + $0x260] sm:$0xff] }
 0x247   : > { %7248 = vmatpush1.bf16.msra.mxu1 %v9042_v58  ;;  %v9154_v58 = vcombine.low %v1455_v44, %v1463_v45  ;;  %v768_v49 = vld [vmem:[%s9612_s30 + $0xa20] sm:$0xff] }
 0x248   : > { %7249 = vmatprep.subr.bf16.mxu1 %v9059_v62  ;;  %v8405_v62 = vcombine.high %v704_v54, %v712_v56  ;;  %v776_v28 = vld [vmem:[%s9612_s30 + $0xa60] sm:$0xff] }
 0x249   : > { %7209 = vmatpush1.bf16.msra.mxu0 %v8802_v5  ;;  %v8148_v5 = vcombine.low %v448_v51, %v456_v52  ;;  %v528_v55 = vld [vmem:[%s9612_s30 + $0x2a0] sm:$0xff] }
 0x24a   : > { %7210 = vmatprep.subr.bf16.mxu0 %v8819_v34  ;;  %v8165_v34 = vcombine.high %v464_v1, %v472_v3  ;;  %v536_v32 = vld [vmem:[%s9612_s30 + $0x2e0] sm:$0xff] }
 0x24b   : > { %7250 = vmatpush1.bf16.msra.mxu1 %v9058_v6  ;;  %v8404_v6 = vcombine.low %v704_v54, %v712_v56  ;;  %v784_v35 = vld [vmem:[%s9612_s30 + $0xaa0] sm:$0xff] }
 0x24c   : > { %7251 = vmatprep.subr.bf16.mxu1 %v9075_v8  ;;  %v8421_v8 = vcombine.high %v720_v4, %v728_v33  ;;  %v792_v36 = vld [vmem:[%s9612_s30 + $0xae0] sm:$0xff] }
 0x24d   : > { %7211 = vmatpush1.bf16.msra.mxu0 %v8818_v14  ;;  %v8164_v14 = vcombine.low %v464_v1, %v472_v3  ;;  %v544_v42 = vld [vmem:[%s9612_s30 + $0x320] sm:$0xff] }
 0x24e   : > { %7212 = vmatprep.subr.bf16.mxu0 %v8835_v17  ;;  %v8181_v17 = vcombine.high %v480_v10, %v488_v11  ;;  %v552_v43 = vld [vmem:[%s9612_s30 + $0x360] sm:$0xff] }
 0x24f   : > { %7252 = vmatpush1.bf16.msra.mxu1 %v9074_v15  ;;  %v8420_v15 = vcombine.low %v720_v4, %v728_v33  ;;  %v800_v44 = vld [vmem:[%s9612_s30 + $0xb20] sm:$0xff]  ;;  %v8244_v4 = vcombine.low %v544_v42, %v552_v43 }
 0x250   : > { %7253 = vmatprep.subr.bf16.mxu1 %v9091_v18  ;;  %v8437_v18 = vcombine.high %v736_v12, %v744_v13  ;;  %v808_v45 = vld [vmem:[%s9612_s30 + $0xb60] sm:$0xff] }
 0x251   : > { %7213 = vmatpush1.bf16.msra.mxu0 %v8834_v24  ;;  %v8180_v24 = vcombine.low %v480_v10, %v488_v11  ;;  %v8501_v51 = vcombine.high %v800_v44, %v808_v45  ;;  %v560_v52 = vld [vmem:[%s9612_s30 + $0x3a0] sm:$0xff] }
 0x252   : > { %7214 = vmatprep.subr.bf16.mxu0 %v8851_v25  ;;  %v8197_v25 = vcombine.high %v496_v20, %v504_v21  ;;  %v568_v54 = vld [vmem:[%s9612_s30 + $0x3e0] sm:$0xff] }
 0x253   : > { %7254 = vmatpush1.bf16.msra.mxu1 %v9090_v63  ;;  %v8436_v63 = vcombine.low %v736_v12, %v744_v13  ;;  %v576_v12 = vld [vmem:[%s9612_s30 + $0x420] sm:$0xff] }
 0x254   : > { %7255 = vmatprep.subr.bf16.mxu1 %v9107_v26  ;;  %v8453_v26 = vcombine.high %v752_v22, %v760_v23  ;;  %v584_v13 = vld [vmem:[%s9612_s30 + $0x460] sm:$0xff] }
 0x255   : > { %7215 = vmatpush1.bf16.msra.mxu0 %v8850_v29  ;;  %v8196_v29 = vcombine.low %v496_v20, %v504_v21  ;;  %v8277_v20 = vcombine.high %v576_v12, %v584_v13 }
 0x256   : > { %7216 = vmatprep.subr.bf16.mxu0 %v8867_v31  ;;  %v8213_v31 = vcombine.high %v512_v2, %v520_v27 }
 0x257   : > { %7256 = vmatpush1.bf16.msra.mxu1 %v9106_v30  ;;  %v8452_v30 = vcombine.low %v752_v22, %v760_v23  ;;  %v592_v22 = vld [vmem:[%s9612_s30 + $0x4a0] sm:$0xff] }
 0x258   : > { %7257 = vmatprep.subr.bf16.mxu1 %v9123_v53  ;;  %v8469_v53 = vcombine.high %v768_v49, %v776_v28  ;;  %v600_v23 = vld [vmem:[%s9612_s30 + $0x4e0] sm:$0xff] }
 0x259   : > { %7217 = vmatpush1.bf16.msra.mxu0 %v8866_v37  ;;  %v8212_v37 = vcombine.low %v512_v2, %v520_v27  ;;  %v8293_v2 = vcombine.high %v592_v22, %v600_v23 }
 0x25a   : > { %7218 = vmatprep.subr.bf16.mxu0 %v8883_v40  ;;  %v8229_v40 = vcombine.high %v528_v55, %v536_v32 }
 0x25b   : > { %7258 = vmatpush1.bf16.msra.mxu1 %v9122_v59  ;;  %v8468_v59 = vcombine.low %v768_v49, %v776_v28  ;;  %v608_v49 = vld [vmem:[%s9612_s30 + $0x520] sm:$0xff] }
 0x25c   : > { %7259 = vmatprep.subr.bf16.mxu1 %v9139_v41  ;;  %v8485_v41 = vcombine.high %v784_v35, %v792_v36  ;;  %v616_v28 = vld [vmem:[%s9612_s30 + $0x560] sm:$0xff] }
 0x25d   : > { %7219 = vmatpush1.bf16.msra.mxu0 %v8882_v46  ;;  %v8228_v46 = vcombine.low %v528_v55, %v536_v32  ;;  %v8309_v55 = vcombine.high %v608_v49, %v616_v28 }
 0x25e   : > { %7220 = vmatprep.subr.bf16.mxu0 %v8899_v48  ;;  %v8245_v48 = vcombine.high %v544_v42, %v552_v43 }
 0x25f   : > { %7260 = vmatpush1.bf16.msra.mxu1 %v9138_v47  ;;  %v8484_v47 = vcombine.low %v784_v35, %v792_v36  ;;  %v624_v35 = vld [vmem:[%s9612_s30 + $0x5a0] sm:$0xff] }
 0x260   : > { %7261 = vmatprep.subr.bf16.mxu1 %v9155_v50  ;;  %v632_v36 = vld [vmem:[%s9612_s30 + $0x5e0] sm:$0xff] }
 0x261   : > { %7221 = vmatpush1.bf16.msra.mxu0 %v8898_v57  ;;  %v8325_v42 = vcombine.high %v624_v35, %v632_v36 }
 0x262   : > { %7272 = vmatprep.subr.bf16.mxu0 %v8149_v61  ;;  %v824_v61 = vld [vmem:[%s9612_s30 + $0xbe0] sm:$0xff] }
 0x263   : > { %7262 = vmatpush1.bf16.msra.mxu1 %v9154_v58  ;;  %v816_v58 = vld [vmem:[%s9612_s30 + $0xba0] sm:$0xff] }
 0x264   : > { %7313 = vmatprep.subr.bf16.mxu1 %v8405_v62  ;;  %7223 = vmatmul.mubr.bf16.vlgmr.msra.gmra.mrb[28].mxu0 %v9812_v16  ;;  %v8517_v11 = vcombine.high %v816_v58, %v824_v61 }
 0x265   : > { %7273 = vmatpush1.bf16.msra.mxu0 %v8148_v5  ;;  %7304 = vmatprep.mubr.bf16.mxu0 %v9672_v38 }
 0x266   : > { %7264 = vmatmul.mubr.bf16.vlgmr.msra.gmra.mrb[28].mxu1 %v9818_v19  ;;  %7274 = vmatprep.subr.bf16.mxu0 %v8165_v34  ;;  %v8500_v34 = vcombine.low %v800_v44, %v808_v45  ;;  %v640_v44 = vld [vmem:[%s9612_s30 + $0x620] sm:$0xff] }
 0x267   : > { %7314 = vmatpush1.bf16.msra.mxu1 %v8404_v6  ;;  %7345 = vmatprep.mubr.bf16.mxu1 %v9676_v39  ;;  %v648_v45 = vld [vmem:[%s9612_s30 + $0x660] sm:$0xff] }
 0x268   : > { %7315 = vmatprep.subr.bf16.mxu1 %v8421_v8  ;;  %v8261_v8 = vcombine.high %v560_v52, %v568_v54 }
 0x269   : > { %7275 = vmatpush1.bf16.msra.mxu0 %v8164_v14  ;;  %v832_v14 = vld [vmem:[%s9612_s30 + $0xc20] sm:$0xff] }
 0x26a   : > { %7276 = vmatprep.subr.bf16.mxu0 %v8181_v17  ;;  %v8260_v17 = vcombine.low %v560_v52, %v568_v54  ;;  %v656_v54 = vld [vmem:[%s9612_s30 + $0x6a0] sm:$0xff] }
 0x26b   : > { %7316 = vmatpush1.bf16.msra.mxu1 %v8420_v15  ;;  %v840_v15 = vld [vmem:[%s9612_s30 + $0xc60] sm:$0xff] }
 0x26c   : > { %7317 = vmatprep.subr.bf16.mxu1 %v8437_v18  ;;  %v8516_v18 = vcombine.low %v816_v58, %v824_v61  ;;  %v8533_v21 = vcombine.high %v832_v14, %v840_v15  ;;  %v920_v58 = vld [vmem:[%s9612_s30 + $0xee0] sm:$0xff]  ;;  %v8340_v61 = vcombine.low %v640_v44, %v648_v45 }
 0x26d   : > { %7277 = vmatpush1.bf16.msra.mxu0 %v8180_v24  ;;  %v848_v24 = vld [vmem:[%s9612_s30 + $0xca0] sm:$0xff] }
 0x26e   : > { %7278 = vmatprep.subr.bf16.mxu0 %v8197_v25  ;;  %v8276_v25 = vcombine.low %v576_v12, %v584_v13 }
 0x26f   : > { %7318 = vmatpush1.bf16.msra.mxu1 %v8436_v63  ;;  %v856_v63 = vld [vmem:[%s9612_s30 + $0xce0] sm:$0xff] }
 0x270   : > { %7319 = vmatprep.subr.bf16.mxu1 %v8453_v26  ;;  %v8532_v26 = vcombine.low %v832_v14, %v840_v15  ;;  %v8549_v27 = vcombine.high %v848_v24, %v856_v63  ;;  %v688_v14 = vld [vmem:[%s9612_s30 + $0x7a0] sm:$0xff] }
 0x271   : > { %7279 = vmatpush1.bf16.msra.mxu0 %v8196_v29  ;;  %v864_v29 = vld [vmem:[%s9612_s30 + $0xd20] sm:$0xff] }
 0x272   : > { %7280 = vmatprep.subr.bf16.mxu0 %v8213_v31  ;;  %v8292_v31 = vcombine.low %v592_v22, %v600_v23  ;;  %v696_v15 = vld [vmem:[%s9612_s30 + $0x7e0] sm:$0xff] }
 0x273   : > { %7320 = vmatpush1.bf16.msra.mxu1 %v8452_v30  ;;  %v872_v30 = vld [vmem:[%s9612_s30 + $0xd60] sm:$0xff]  ;;  %v8389_v22 = vcombine.high %v688_v14, %v696_v15 }
 0x274   : > { %7321 = vmatprep.subr.bf16.mxu1 %v8469_v53  ;;  %v8548_v53 = vcombine.low %v848_v24, %v856_v63  ;;  %v8565_v32 = vcombine.high %v864_v29, %v872_v30  ;;  %v960_v24 = vld [vmem:[%s9612_s30 + $0x1020] sm:$0xff] }
 0x275   : > { %7281 = vmatpush1.bf16.msra.mxu0 %v8212_v37  ;;  %v880_v37 = vld [vmem:[%s9612_s30 + $0xda0] sm:$0xff] }
 0x276   : > { %7282 = vmatprep.subr.bf16.mxu0 %v8229_v40  ;;  %v8308_v40 = vcombine.low %v608_v49, %v616_v28  ;;  %v968_v63 = vld [vmem:[%s9612_s30 + $0x1060] sm:$0xff] }
 0x277   : > { %7322 = vmatpush1.bf16.msra.mxu1 %v8468_v59  ;;  %v6978_v50 = vpop.f32.mrb[16].mxu0  ;;  %v888_v59 = vld [vmem:[%s9612_s30 + $0xde0] sm:$0xff]  ;;  %v8661_v49 = vcombine.high %v960_v24, %v968_v63 }
 0x278   : > { %7323 = vmatprep.subr.bf16.mxu1 %v8485_v41  ;;  %v6980_v57 = vpop.f32.mrb[17].mxu0  ;;  %v8564_v41 = vcombine.low %v864_v29, %v872_v30  ;;  %v8581_v43 = vcombine.high %v880_v37, %v888_v59  ;;  %v976_v29 = vld [vmem:[%s9612_s30 + $0x10a0] sm:$0xff] }
 0x279   : > { %v7019_v56 = vpop.f32.mrb[16].mxu1  ;;  %v6982_v3 = vpop.f32.mrb[18].mxu0  ;;  %7283 = vmatpush1.bf16.msra.mxu0 %v8228_v46  ;;  %v896_v46 = vld [vmem:[%s9612_s30 + $0xe20] sm:$0xff] }
 0x27a   : > { %v10268_v62 = vadd.f32 %v7019_v56, %v6978_v50  ;;  %v7021_v1 = vpop.f32.mrb[17].mxu1  ;;  %v6983_v6 = vpop.f32.mrb[19].mxu0  ;;  %7284 = vmatprep.subr.bf16.mxu0 %v8245_v48  ;;  %v8324_v48 = vcombine.low %v624_v35, %v632_v36  ;;  %v8580_v50 = vcombine.low %v880_v37, %v888_v59  ;;  %v664_v56 = vld [vmem:[%s9612_s30 + $0x6e0] sm:$0xff] }
 0x27b   : > { %v10270_v33 = vadd.f32 %v7021_v1, %v6980_v57  ;;  %v7023_v5 = vpop.f32.mrb[18].mxu1  ;;  %7324 = vmatpush1.bf16.msra.mxu1 %v8484_v47  ;;  %v904_v47 = vld [vmem:[%s9612_s30 + $0xe60] sm:$0xff]  ;;  %v8357_v3 = vcombine.high %v656_v54, %v664_v56 }
 0x27c   : > { %v7024_v10 = vpop.f32.mrb[19].mxu1  ;;  %7325 = vmatprep.subr.bf16.mxu1 %v8501_v51  ;;  %v8341_v51 = vcombine.high %v640_v44, %v648_v45  ;;  %v8597_v52 = vcombine.high %v896_v46, %v904_v47  ;;  %v912_v57 = vld [vmem:[%s9612_s30 + $0xea0] sm:$0xff]  ;;  %v8596_v1 = vcombine.low %v896_v46, %v904_v47 }
 0x27d   : > { %7285 = vmatpush1.bf16.msra.mxu0 %v8244_v4  ;;  %v8613_v4 = vcombine.high %v912_v57, %v920_v58  ;;  %v672_v5 = vld [vmem:[%s9612_s30 + $0x720] sm:$0xff]  ;;  %v8356_v10 = vcombine.low %v656_v54, %v664_v56 }
 0x27e   : > { %7286 = vmatprep.subr.bf16.mxu0 %v8261_v8  ;;  %v680_v6 = vld [vmem:[%s9612_s30 + $0x760] sm:$0xff] }
 0x27f   : > { %7326 = vmatpush1.bf16.msra.mxu1 %v8500_v34  ;;  %v928_v34 = vld [vmem:[%s9612_s30 + $0xf20] sm:$0xff]  ;;  %v8373_v12 = vcombine.high %v672_v5, %v680_v6 }
 0x280   : > { %7327 = vmatprep.subr.bf16.mxu1 %v8517_v11  ;;  %v936_v8 = vld [vmem:[%s9612_s30 + $0xf60] sm:$0xff]  ;;  %v8612_v11 = vcombine.low %v912_v57, %v920_v58 }
 0x281   : > { %7287 = vmatpush1.bf16.msra.mxu0 %v8260_v17  ;;  %v8629_v13 = vcombine.high %v928_v34, %v936_v8  ;;  %v944_v17 = vld [vmem:[%s9612_s30 + $0xfa0] sm:$0xff] }
 0x282   : > { %7288 = vmatprep.subr.bf16.mxu0 %v8277_v20  ;;  %v8372_v20 = vcombine.low %v672_v5, %v680_v6  ;;  %v984_v30 = vld [vmem:[%s9612_s30 + $0x10e0] sm:$0xff] }
 0x283   : > { %7328 = vmatpush1.bf16.msra.mxu1 %v8516_v18  ;;  %v952_v18 = vld [vmem:[%s9612_s30 + $0xfe0] sm:$0xff]  ;;  %v8677_v35 = vcombine.high %v976_v29, %v984_v30 }
 0x284   : > { %7329 = vmatprep.subr.bf16.mxu1 %v8533_v21  ;;  %v8628_v21 = vcombine.low %v928_v34, %v936_v8  ;;  %v8645_v23 = vcombine.high %v944_v17, %v952_v18  ;;  %v992_v37 = vld [vmem:[%s9612_s30 + $0x1120] sm:$0xff] }
 0x285   : > { %7289 = vmatpush1.bf16.msra.mxu0 %v8276_v25  ;;  %v1216_v25 = vld [vmem:[%s9612_s30 + $0x1820] sm:$0xff] }
 0x286   : > { %7290 = vmatprep.subr.bf16.mxu0 %v8293_v2  ;;  %v8388_v2 = vcombine.low %v688_v14, %v696_v15  ;;  %v1000_v59 = vld [vmem:[%s9612_s30 + $0x1160] sm:$0xff] }
 0x287   : > { %7330 = vmatpush1.bf16.msra.mxu1 %v8532_v26  ;;  %v1224_v26 = vld [vmem:[%s9612_s30 + $0x1860] sm:$0xff]  ;;  %v8693_v44 = vcombine.high %v992_v37, %v1000_v59 }
 0x288   : > { %7331 = vmatprep.subr.bf16.mxu1 %v8549_v27  ;;  %v8644_v27 = vcombine.low %v944_v17, %v952_v18  ;;  %v8917_v28 = vcombine.high %v1216_v25, %v1224_v26  ;;  %v1008_v46 = vld [vmem:[%s9612_s30 + $0x11a0] sm:$0xff] }
 0x289   : > { %7291 = vmatpush1.bf16.msra.mxu0 %v8292_v31  ;;  %v1232_v31 = vld [vmem:[%s9612_s30 + $0x18a0] sm:$0xff] }
 0x28a   : > { %7292 = vmatprep.subr.bf16.mxu0 %v8309_v55  ;;  %v8660_v55 = vcombine.low %v960_v24, %v968_v63  ;;  %v1016_v47 = vld [vmem:[%s9612_s30 + $0x11e0] sm:$0xff] }
 0x28b   : > { %7332 = vmatpush1.bf16.msra.mxu1 %v8548_v53  ;;  %v1240_v53 = vld [vmem:[%s9612_s30 + $0x18e0] sm:$0xff]  ;;  %v8709_v54 = vcombine.high %v1008_v46, %v1016_v47 }
 0x28c   : > { %7333 = vmatprep.subr.bf16.mxu1 %v8565_v32  ;;  %v8916_v32 = vcombine.low %v1216_v25, %v1224_v26  ;;  %v8933_v36 = vcombine.high %v1232_v31, %v1240_v53  ;;  %v1024_v57 = vld [vmem:[%s9612_s30 + $0x1220] sm:$0xff] }
 0x28d   : > { %7293 = vmatpush1.bf16.msra.mxu0 %v8308_v40  ;;  %v1248_v40 = vld [vmem:[%s9612_s30 + $0x1920] sm:$0xff] }
 0x28e   : > { %7294 = vmatprep.subr.bf16.mxu0 %v8325_v42  ;;  %v8676_v42 = vcombine.low %v976_v29, %v984_v30  ;;  %v1032_v58 = vld [vmem:[%s9612_s30 + $0x1260] sm:$0xff] }
 0x28f   : > { %7334 = vmatpush1.bf16.msra.mxu1 %v8564_v41  ;;  %v1256_v41 = vld [vmem:[%s9612_s30 + $0x1960] sm:$0xff]  ;;  %v8725_v5 = vcombine.high %v1024_v57, %v1032_v58 }
 0x290   : > { %7335 = vmatprep.subr.bf16.mxu1 %v8581_v43  ;;  %v8932_v43 = vcombine.low %v1232_v31, %v1240_v53  ;;  %v8949_v45 = vcombine.high %v1248_v40, %v1256_v41  ;;  %v1040_v34 = vld [vmem:[%s9612_s30 + $0x12a0] sm:$0xff] }
 0x291   : > { %7295 = vmatpush1.bf16.msra.mxu0 %v8324_v48  ;;  %v1264_v48 = vld [vmem:[%s9612_s30 + $0x19a0] sm:$0xff] }
 0x292   : > { %7296 = vmatprep.subr.bf16.mxu0 %v8341_v51  ;;  %v8692_v51 = vcombine.low %v992_v37, %v1000_v59  ;;  %v1048_v8 = vld [vmem:[%s9612_s30 + $0x12e0] sm:$0xff]  ;;  %v429_v37 = vld [vmem:[#allocation2 + $0x28] sm:$0xff] }
 0x293   : > { %7336 = vmatpush1.bf16.msra.mxu1 %v8580_v50  ;;  %v1272_v50 = vld [vmem:[%s9612_s30 + $0x19e0] sm:$0xff]  ;;  %v8741_v14 = vcombine.high %v1040_v34, %v1048_v8 }
 0x294   : > { %7337 = vmatprep.subr.bf16.mxu1 %v8597_v52  ;;  %v8948_v52 = vcombine.low %v1248_v40, %v1256_v41  ;;  %v8965_v56 = vcombine.high %v1264_v48, %v1272_v50  ;;  %v1056_v17 = vld [vmem:[%s9612_s30 + $0x1320] sm:$0xff] }
 0x295   : > { %7297 = vmatpush1.bf16.msra.mxu0 %v8340_v61  ;;  %v1280_v61 = vld [vmem:[%s9612_s30 + $0x1a20] sm:$0xff] }
 0x296   : > { %7298 = vmatprep.subr.bf16.mxu0 %v8357_v3  ;;  %v8708_v3 = vcombine.low %v1008_v46, %v1016_v47  ;;  %v1064_v18 = vld [vmem:[%s9612_s30 + $0x1360] sm:$0xff] }
 0x297   : > { %7338 = vmatpush1.bf16.msra.mxu1 %v8596_v1  ;;  %v1288_v1 = vld [vmem:[%s9612_s30 + $0x1a60] sm:$0xff]  ;;  %v8757_v24 = vcombine.high %v1056_v17, %v1064_v18 }
 0x298   : > { %7339 = vmatprep.subr.bf16.mxu1 %v8613_v4  ;;  %v8964_v4 = vcombine.low %v1264_v48, %v1272_v50  ;;  %v8981_v6 = vcombine.high %v1280_v61, %v1288_v1  ;;  %v1072_v26 = vld [vmem:[%s9612_s30 + $0x13a0] sm:$0xff] }
 0x299   : > { %7299 = vmatpush1.bf16.msra.mxu0 %v8356_v10  ;;  %v1296_v10 = vld [vmem:[%s9612_s30 + $0x1aa0] sm:$0xff] }
 0x29a   : > { %7300 = vmatprep.subr.bf16.mxu0 %v8373_v12  ;;  %v8724_v12 = vcombine.low %v1024_v57, %v1032_v58  ;;  %v1328_v29 = vld [vmem:[%s9612_s30 + $0x1ba0] sm:$0xff] }
 0x29b   : > { %7340 = vmatpush1.bf16.msra.mxu1 %v8612_v11  ;;  %v1304_v11 = vld [vmem:[%s9612_s30 + $0x1ae0] sm:$0xff] }
 0x29c   : > { %7341 = vmatprep.subr.bf16.mxu1 %v8629_v13  ;;  %v8980_v13 = vcombine.low %v1280_v61, %v1288_v1  ;;  %v8997_v15 = vcombine.high %v1296_v10, %v1304_v11  ;;  %v1336_v30 = vld [vmem:[%s9612_s30 + $0x1be0] sm:$0xff] }
 0x29d   : > { %7301 = vmatpush1.bf16.msra.mxu0 %v8372_v20  ;;  %v1312_v20 = vld [vmem:[%s9612_s30 + $0x1b20] sm:$0xff] }
 0x29e   : > { %7302 = vmatprep.subr.bf16.mxu0 %v8389_v22  ;;  %v8740_v22 = vcombine.low %v1040_v34, %v1048_v8  ;;  %v428_v31 = vld [vmem:[#allocation2 + $0x20] sm:$0xff] }
 0x29f   : > { %7342 = vmatpush1.bf16.msra.mxu1 %v8628_v21  ;;  %v1320_v21 = vld [vmem:[%s9612_s30 + $0x1b60] sm:$0xff] }
 0x2a0   : > { %7343 = vmatprep.subr.bf16.mxu1 %v8645_v23  ;;  %v8996_v23 = vcombine.low %v1296_v10, %v1304_v11  ;;  %v9013_v25 = vcombine.high %v1312_v20, %v1320_v21  ;;  %v9012_v40 = vcombine.low %v1312_v20, %v1320_v21  ;;  %v1344_v47 = vld [vmem:[%s9612_s30 + $0x1c20] sm:$0xff] }
 0x2a1   : > { %7303 = vmatpush1.bf16.msra.mxu0 %v8388_v2  ;;  %v1080_v2 = vld [vmem:[%s9612_s30 + $0x13e0] sm:$0xff] }
 0x2a2   : > { %7354 = vmatprep.subr.bf16.mxu0 %v8661_v49  ;;  %v8773_v41 = vcombine.high %v1072_v26, %v1080_v2  ;;  %v1352_v48 = vld [vmem:[%s9612_s30 + $0x1c60] sm:$0xff] }
 0x2a3   : > { %7344 = vmatpush1.bf16.msra.mxu1 %v8644_v27  ;;  %v1104_v57 = vld [vmem:[%s9612_s30 + $0x14a0] sm:$0xff] }
 0x2a4   : > { %7395 = vmatprep.subr.bf16.mxu1 %v8917_v28  ;;  %7305 = vmatmul.mubr.bf16.vlgmr.msra.gmra.mrb[32].mxu0 %v9722_v60  ;;  %v1112_v58 = vld [vmem:[%s9612_s30 + $0x14e0] sm:$0xff] }
 0x2a5   : > { %7355 = vmatpush1.bf16.msra.mxu0 %v8660_v55  ;;  %7386 = vmatprep.mubr.bf16.mxu0 %v9740_v7  ;;  %v1360_v61 = vld [vmem:[%s9612_s30 + $0x1ca0] sm:$0xff] }
 0x2a6   : > { %7346 = vmatmul.mubr.bf16.vlgmr.msra.gmra.mrb[32].mxu1 %v9731_v0  ;;  %7356 = vmatprep.subr.bf16.mxu0 %v8677_v35  ;;  %v8756_v35 = vcombine.low %v1056_v17, %v1064_v18  ;;  %v1368_v1 = vld [vmem:[%s9612_s30 + $0x1ce0] sm:$0xff] }
 0x2a7   : > { %7396 = vmatpush1.bf16.msra.mxu1 %v8916_v32  ;;  %7427 = vmatprep.mubr.bf16.mxu1 %v9747_v9  ;;  %v1120_v34 = vld [vmem:[%s9612_s30 + $0x1520] sm:$0xff] }
 0x2a8   : > { %7397 = vmatprep.subr.bf16.mxu1 %v8933_v36  ;;  %v1128_v8 = vld [vmem:[%s9612_s30 + $0x1560] sm:$0xff] }
 0x2a9   : > { %7357 = vmatpush1.bf16.msra.mxu0 %v8676_v42  ;;  %v1376_v10 = vld [vmem:[%s9612_s30 + $0x1d20] sm:$0xff] }
 0x2aa   : > { %7358 = vmatprep.subr.bf16.mxu0 %v8693_v44  ;;  %v1088_v44 = vld [vmem:[%s9612_s30 + $0x1420] sm:$0xff] }
 0x2ab   : > { %7398 = vmatpush1.bf16.msra.mxu1 %v8932_v43  ;;  %v1384_v11 = vld [vmem:[%s9612_s30 + $0x1d60] sm:$0xff] }
 0x2ac   : > { %7399 = vmatprep.subr.bf16.mxu1 %v8949_v45  ;;  %v1096_v45 = vld [vmem:[%s9612_s30 + $0x1460] sm:$0xff] }
 0x2ad   : > { %7359 = vmatpush1.bf16.msra.mxu0 %v8692_v51  ;;  %v8772_v51 = vcombine.low %v1072_v26, %v1080_v2  ;;  %v1136_v17 = vld [vmem:[%s9612_s30 + $0x15a0] sm:$0xff] }
 0x2ae   : > { %7360 = vmatprep.subr.bf16.mxu0 %v8709_v54  ;;  %v8789_v54 = vcombine.high %v1088_v44, %v1096_v45  ;;  %v1144_v18 = vld [vmem:[%s9612_s30 + $0x15e0] sm:$0xff] }
 0x2af   : > { %7400 = vmatpush1.bf16.msra.mxu1 %v8948_v52  ;;  %v9028_v52 = vcombine.low %v1328_v29, %v1336_v30  ;;  %v1392_v20 = vld [vmem:[%s9612_s30 + $0x1da0] sm:$0xff] }
 0x2b0   : > { %7401 = vmatprep.subr.bf16.mxu1 %v8965_v56  ;;  %v9045_v56 = vcombine.high %v1344_v47, %v1352_v48  ;;  %v1400_v21 = vld [vmem:[%s9612_s30 + $0x1de0] sm:$0xff] }
 0x2b1   : > { %7361 = vmatpush1.bf16.msra.mxu0 %v8708_v3  ;;  %v8788_v3 = vcombine.low %v1088_v44, %v1096_v45  ;;  %v1160_v26 = vld [vmem:[%s9612_s30 + $0x1660] sm:$0xff] }
 0x2b2   : > { %7362 = vmatprep.subr.bf16.mxu0 %v8725_v5  ;;  %v8805_v5 = vcombine.high %v1104_v57, %v1112_v58  ;;  %v1408_v2 = vld [vmem:[%s9612_s30 + $0x1e20] sm:$0xff] }
 0x2b3   : > { %7402 = vmatpush1.bf16.msra.mxu1 %v8964_v4  ;;  %v9044_v4 = vcombine.low %v1344_v47, %v1352_v48  ;;  %v1208_v47 = vld [vmem:[%s9612_s30 + $0x17e0] sm:$0xff] }
 0x2b4   : > { %7403 = vmatprep.subr.bf16.mxu1 %v8981_v6  ;;  %v9061_v6 = vcombine.high %v1360_v61, %v1368_v1  ;;  %v1456_v48 = vld [vmem:[%s9612_s30 + $0x1fa0] sm:$0xff] }
 0x2b5   : > { %7363 = vmatpush1.bf16.msra.mxu0 %v8724_v12  ;;  %v8804_v12 = vcombine.low %v1104_v57, %v1112_v58  ;;  %v449_v57 = vld [vmem:[%s9612_s30 + $0x28] sm:$0xff] }
 0x2b6   : > { %7364 = vmatprep.subr.bf16.mxu0 %v8741_v14  ;;  %v8821_v14 = vcombine.high %v1120_v34, %v1128_v8  ;;  %v457_v58 = vld [vmem:[%s9612_s30 + $0x68] sm:$0xff] }
 0x2b7   : > { %7404 = vmatpush1.bf16.msra.mxu1 %v8980_v13  ;;  %v7060_v63 = vpop.f32.mrb[20].mxu0  ;;  %v9060_v13 = vcombine.low %v1360_v61, %v1368_v1  ;;  %v705_v61 = vld [vmem:[%s9612_s30 + $0x828] sm:$0xff] }
 0x2b8   : > { %7405 = vmatprep.subr.bf16.mxu1 %v8997_v15  ;;  %v7061_v27 = vadd.f32 %v7060_v63, %v10268_v62  ;;  %v7062_v28 = vpop.f32.mrb[21].mxu0  ;;  %v9077_v15 = vcombine.high %v1376_v10, %v1384_v11  ;;  %v9093_v63 = vcombine.high %v1392_v20, %v1400_v21  ;;  %v713_v1 = vld [vmem:[%s9612_s30 + $0x868] sm:$0xff] }
 0x2b9   : > { %v7101_v49 = vpop.f32.mrb[20].mxu1  ;;  %v7063_v53 = vadd.f32 %v7062_v28, %v10270_v33  ;;  %v7064_v32 = vpop.f32.mrb[22].mxu0  ;;  %7365 = vmatpush1.bf16.msra.mxu0 %v8740_v22  ;;  %v9029_v33 = vcombine.high %v1328_v29, %v1336_v30  ;;  %v8820_v22 = vcombine.low %v1120_v34, %v1128_v8  ;;  %v9092_v28 = vcombine.low %v1392_v20, %v1400_v21  ;;  %v465_v34 = vld [vmem:[%s9612_s30 + $0xa8] sm:$0xff] }
 0x2ba   : > { %v7103_v55 = vpop.f32.mrb[21].mxu1  ;;  %v7102_v36 = vadd.f32 %v7101_v49, %v7061_v27  ;;  %v7065_v62 = vpop.f32.mrb[23].mxu0  ;;  %7366 = vmatprep.subr.bf16.mxu0 %v8757_v24  ;;  %v8837_v24 = vcombine.high %v1136_v17, %v1144_v18  ;;  %v1416_v27 = vld [vmem:[%s9612_s30 + $0x1e60] sm:$0xff]  ;;  %v8836_v49 = vcombine.low %v1136_v17, %v1144_v18  ;;  %v473_v8 = vld [vmem:[%s9612_s30 + $0xe8] sm:$0xff] }
 0x2bb   : > { %v7105_v59 = vpop.f32.mrb[22].mxu1  ;;  %7406 = vmatpush1.bf16.msra.mxu1 %v8996_v23  ;;  %v7104_v42 = vadd.f32 %v7103_v55, %v7063_v53  ;;  %v9076_v23 = vcombine.low %v1376_v10, %v1384_v11  ;;  %v9109_v30 = vcombine.high %v1408_v2, %v1416_v27  ;;  %v1176_v53 = vld [vmem:[%s9612_s30 + $0x16e0] sm:$0xff]  ;;  %v721_v10 = vld [vmem:[%s9612_s30 + $0x8a8] sm:$0xff] }
 0x2bc   : > { %v7106_v43 = vpop.f32.mrb[23].mxu1  ;;  %7407 = vmatprep.subr.bf16.mxu1 %v9013_v25  ;;  %v7932_v46 = vadd.f32 %v7102_v36, %v428_v31  ;;  %v1152_v25 = vld [vmem:[%s9612_s30 + $0x1620] sm:$0xff]  ;;  %v9108_v36 = vcombine.low %v1408_v2, %v1416_v27  ;;  %v729_v11 = vld [vmem:[%s9612_s30 + $0x8e8] sm:$0xff] }
 0x2bd   : > { %v7933_v50 = vadd.f32 %v7104_v42, %v429_v37  ;;  %7367 = vmatpush1.bf16.msra.mxu0 %v8756_v35  ;;  %v8853_v29 = vcombine.high %v1152_v25, %v1160_v26  ;;  %v1168_v31 = vld [vmem:[%s9612_s30 + $0x16a0] sm:$0xff]  ;;  %v8852_v35 = vcombine.low %v1152_v25, %v1160_v26  ;;  %v481_v17 = vld [vmem:[%s9612_s30 + $0x128] sm:$0xff] }
 0x2be   : > { %7948 = vst [vmem:[#allocation2 + $0x20] sm:$0xff] %v7932_v46  ;;  %7368 = vmatprep.subr.bf16.mxu0 %v8773_v41  ;;  %v1424_v55 = vld [vmem:[%s9612_s30 + $0x1ea0] sm:$0xff]  ;;  %v8869_v37 = vcombine.high %v1168_v31, %v1176_v53  ;;  %v8868_v43 = vcombine.low %v1168_v31, %v1176_v53  ;;  %v489_v18 = vld [vmem:[%s9612_s30 + $0x168] sm:$0xff] }
 0x2bf   : > { %7408 = vmatpush1.bf16.msra.mxu1 %v9012_v40  ;;  %7949 = vst [vmem:[#allocation2 + $0x28] sm:$0xff] %v7933_v50  ;;  %v1432_v32 = vld [vmem:[%s9612_s30 + $0x1ee0] sm:$0xff]  ;;  %v737_v20 = vld [vmem:[%s9612_s30 + $0x928] sm:$0xff] }
 0x2c0   : > { %7409 = vmatprep.subr.bf16.mxu1 %v9029_v33  ;;  %v9125_v59 = vcombine.high %v1424_v55, %v1432_v32  ;;  %v1184_v62 = vld [vmem:[%s9612_s30 + $0x1720] sm:$0xff]  ;;  %v9124_v33 = vcombine.low %v1424_v55, %v1432_v32  ;;  %v745_v21 = vld [vmem:[%s9612_s30 + $0x968] sm:$0xff] }
 0x2c1   : > { %7369 = vmatpush1.bf16.msra.mxu0 %v8772_v51  ;;  %v1192_v40 = vld [vmem:[%s9612_s30 + $0x1760] sm:$0xff]  ;;  %v497_v25 = vld [vmem:[%s9612_s30 + $0x1a8] sm:$0xff] }
 0x2c2   : > { %7370 = vmatprep.subr.bf16.mxu0 %v8789_v54  ;;  %v1440_v41 = vld [vmem:[%s9612_s30 + $0x1f20] sm:$0xff]  ;;  %v8885_v44 = vcombine.high %v1184_v62, %v1192_v40  ;;  %v8884_v51 = vcombine.low %v1184_v62, %v1192_v40  ;;  %v505_v26 = vld [vmem:[%s9612_s30 + $0x1e8] sm:$0xff] }
 0x2c3   : > { %7410 = vmatpush1.bf16.msra.mxu1 %v9028_v52  ;;  %v1448_v42 = vld [vmem:[%s9612_s30 + $0x1f60] sm:$0xff]  ;;  %v753_v2 = vld [vmem:[%s9612_s30 + $0x9a8] sm:$0xff] }
 0x2c4   : > { %7411 = vmatprep.subr.bf16.mxu1 %v9045_v56  ;;  %v9141_v45 = vcombine.high %v1440_v41, %v1448_v42  ;;  %v1200_v46 = vld [vmem:[%s9612_s30 + $0x17a0] sm:$0xff]  ;;  %v9140_v52 = vcombine.low %v1440_v41, %v1448_v42  ;;  %v761_v27 = vld [vmem:[%s9612_s30 + $0x9e8] sm:$0xff] }
 0x2c5   : > { %7371 = vmatpush1.bf16.msra.mxu0 %v8788_v3  ;;  %v1464_v50 = vld [vmem:[%s9612_s30 + $0x1fe0] sm:$0xff]  ;;  %v8901_v54 = vcombine.high %v1200_v46, %v1208_v47  ;;  %v8900_v3 = vcombine.low %v1200_v46, %v1208_v47  ;;  %v513_v31 = vld [vmem:[%s9612_s30 + $0x228] sm:$0xff] }
 0x2c6   : > { %7372 = vmatprep.subr.bf16.mxu0 %v8805_v5  ;;  %v9157_v56 = vcombine.high %v1456_v48, %v1464_v50  ;;  %v8151_v5 = vcombine.high %v449_v57, %v457_v58  ;;  %v521_v53 = vld [vmem:[%s9612_s30 + $0x268] sm:$0xff] }
 0x2c7   : > { %7412 = vmatpush1.bf16.msra.mxu1 %v9044_v4  ;;  %v9156_v4 = vcombine.low %v1456_v48, %v1464_v50  ;;  %v769_v55 = vld [vmem:[%s9612_s30 + $0xa28] sm:$0xff] }
 0x2c8   : > { %7413 = vmatprep.subr.bf16.mxu1 %v9061_v6  ;;  %v8407_v6 = vcombine.high %v705_v61, %v713_v1  ;;  %v777_v32 = vld [vmem:[%s9612_s30 + $0xa68] sm:$0xff] }
 0x2c9   : > { %7373 = vmatpush1.bf16.msra.mxu0 %v8804_v12  ;;  %v8150_v12 = vcombine.low %v449_v57, %v457_v58  ;;  %v529_v62 = vld [vmem:[%s9612_s30 + $0x2a8] sm:$0xff] }
 0x2ca   : > { %7374 = vmatprep.subr.bf16.mxu0 %v8821_v14  ;;  %v8167_v14 = vcombine.high %v465_v34, %v473_v8  ;;  %v537_v40 = vld [vmem:[%s9612_s30 + $0x2e8] sm:$0xff] }
 0x2cb   : > { %7414 = vmatpush1.bf16.msra.mxu1 %v9060_v13  ;;  %v8406_v13 = vcombine.low %v705_v61, %v713_v1  ;;  %v785_v41 = vld [vmem:[%s9612_s30 + $0xaa8] sm:$0xff] }
 0x2cc   : > { %7415 = vmatprep.subr.bf16.mxu1 %v9077_v15  ;;  %v8423_v15 = vcombine.high %v721_v10, %v729_v11  ;;  %v793_v42 = vld [vmem:[%s9612_s30 + $0xae8] sm:$0xff] }
 0x2cd   : > { %7375 = vmatpush1.bf16.msra.mxu0 %v8820_v22  ;;  %v8166_v22 = vcombine.low %v465_v34, %v473_v8  ;;  %v545_v46 = vld [vmem:[%s9612_s30 + $0x328] sm:$0xff] }
 0x2ce   : > { %7376 = vmatprep.subr.bf16.mxu0 %v8837_v24  ;;  %v8183_v24 = vcombine.high %v481_v17, %v489_v18  ;;  %v553_v47 = vld [vmem:[%s9612_s30 + $0x368] sm:$0xff] }
 0x2cf   : > { %7416 = vmatpush1.bf16.msra.mxu1 %v9076_v23  ;;  %v8422_v23 = vcombine.low %v721_v10, %v729_v11  ;;  %v801_v48 = vld [vmem:[%s9612_s30 + $0xb28] sm:$0xff]  ;;  %v8246_v10 = vcombine.low %v545_v46, %v553_v47 }
 0x2d0   : > { %7417 = vmatprep.subr.bf16.mxu1 %v9093_v63  ;;  %v8439_v63 = vcombine.high %v737_v20, %v745_v21  ;;  %v809_v50 = vld [vmem:[%s9612_s30 + $0xb68] sm:$0xff] }
 0x2d1   : > { %7377 = vmatpush1.bf16.msra.mxu0 %v8836_v49  ;;  %v8182_v49 = vcombine.low %v481_v17, %v489_v18  ;;  %v8503_v57 = vcombine.high %v801_v48, %v809_v50  ;;  %v561_v58 = vld [vmem:[%s9612_s30 + $0x3a8] sm:$0xff] }
 0x2d2   : > { %7378 = vmatprep.subr.bf16.mxu0 %v8853_v29  ;;  %v8199_v29 = vcombine.high %v497_v25, %v505_v26  ;;  %v569_v61 = vld [vmem:[%s9612_s30 + $0x3e8] sm:$0xff] }
 0x2d3   : > { %7418 = vmatpush1.bf16.msra.mxu1 %v9092_v28  ;;  %v8438_v28 = vcombine.low %v737_v20, %v745_v21  ;;  %v577_v20 = vld [vmem:[%s9612_s30 + $0x428] sm:$0xff] }
 0x2d4   : > { %7419 = vmatprep.subr.bf16.mxu1 %v9109_v30  ;;  %v8455_v30 = vcombine.high %v753_v2, %v761_v27  ;;  %v585_v21 = vld [vmem:[%s9612_s30 + $0x468] sm:$0xff] }
 0x2d5   : > { %7379 = vmatpush1.bf16.msra.mxu0 %v8852_v35  ;;  %v8198_v35 = vcombine.low %v497_v25, %v505_v26  ;;  %v8279_v25 = vcombine.high %v577_v20, %v585_v21 }
 0x2d6   : > { %7380 = vmatprep.subr.bf16.mxu0 %v8869_v37  ;;  %v8215_v37 = vcombine.high %v513_v31, %v521_v53 }
 0x2d7   : > { %7420 = vmatpush1.bf16.msra.mxu1 %v9108_v36  ;;  %v8454_v36 = vcombine.low %v753_v2, %v761_v27  ;;  %v593_v2 = vld [vmem:[%s9612_s30 + $0x4a8] sm:$0xff] }
 0x2d8   : > { %7421 = vmatprep.subr.bf16.mxu1 %v9125_v59  ;;  %v8471_v59 = vcombine.high %v769_v55, %v777_v32  ;;  %v601_v27 = vld [vmem:[%s9612_s30 + $0x4e8] sm:$0xff] }
 0x2d9   : > { %7381 = vmatpush1.bf16.msra.mxu0 %v8868_v43  ;;  %v8214_v43 = vcombine.low %v513_v31, %v521_v53  ;;  %v8295_v31 = vcombine.high %v593_v2, %v601_v27 }
 0x2da   : > { %7382 = vmatprep.subr.bf16.mxu0 %v8885_v44  ;;  %v8231_v44 = vcombine.high %v529_v62, %v537_v40 }
 0x2db   : > { %7422 = vmatpush1.bf16.msra.mxu1 %v9124_v33  ;;  %v8470_v33 = vcombine.low %v769_v55, %v777_v32  ;;  %v609_v55 = vld [vmem:[%s9612_s30 + $0x528] sm:$0xff] }
 0x2dc   : > { %7423 = vmatprep.subr.bf16.mxu1 %v9141_v45  ;;  %v8487_v45 = vcombine.high %v785_v41, %v793_v42  ;;  %v617_v32 = vld [vmem:[%s9612_s30 + $0x568] sm:$0xff] }
 0x2dd   : > { %7383 = vmatpush1.bf16.msra.mxu0 %v8884_v51  ;;  %v8230_v51 = vcombine.low %v529_v62, %v537_v40  ;;  %v8311_v62 = vcombine.high %v609_v55, %v617_v32 }
 0x2de   : > { %7384 = vmatprep.subr.bf16.mxu0 %v8901_v54  ;;  %v8247_v54 = vcombine.high %v545_v46, %v553_v47 }
 0x2df   : > { %7424 = vmatpush1.bf16.msra.mxu1 %v9140_v52  ;;  %v8486_v52 = vcombine.low %v785_v41, %v793_v42  ;;  %v625_v41 = vld [vmem:[%s9612_s30 + $0x5a8] sm:$0xff] }
 0x2e0   : > { %7425 = vmatprep.subr.bf16.mxu1 %v9157_v56  ;;  %v633_v42 = vld [vmem:[%s9612_s30 + $0x5e8] sm:$0xff] }
 0x2e1   : > { %7385 = vmatpush1.bf16.msra.mxu0 %v8900_v3  ;;  %v8327_v46 = vcombine.high %v625_v41, %v633_v42 }
 0x2e2   : > { %7436 = vmatprep.subr.bf16.mxu0 %v8151_v5  ;;  %v825_v5 = vld [vmem:[%s9612_s30 + $0xbe8] sm:$0xff] }
 0x2e3   : > { %7426 = vmatpush1.bf16.msra.mxu1 %v9156_v4  ;;  %v817_v4 = vld [vmem:[%s9612_s30 + $0xba8] sm:$0xff] }
 0x2e4   : > { %7477 = vmatprep.subr.bf16.mxu1 %v8407_v6  ;;  %7387 = vmatmul.mubr.bf16.vlgmr.msra.gmra.mrb[36].mxu0 %v9812_v16  ;;  %v8519_v18 = vcombine.high %v817_v4, %v825_v5 }
 0x2e5   : > { %7437 = vmatpush1.bf16.msra.mxu0 %v8150_v12  ;;  %7468 = vmatprep.mubr.bf16.mxu0 %v9672_v38 }
 0x2e6   : > { %7428 = vmatmul.mubr.bf16.vlgmr.msra.gmra.mrb[36].mxu1 %v9818_v19  ;;  %7438 = vmatprep.subr.bf16.mxu0 %v8167_v14  ;;  %v8502_v14 = vcombine.low %v801_v48, %v809_v50  ;;  %v641_v48 = vld [vmem:[%s9612_s30 + $0x628] sm:$0xff] }
 0x2e7   : > { %7478 = vmatpush1.bf16.msra.mxu1 %v8406_v13  ;;  %7509 = vmatprep.mubr.bf16.mxu1 %v9676_v39  ;;  %v649_v50 = vld [vmem:[%s9612_s30 + $0x668] sm:$0xff] }
 0x2e8   : > { %7479 = vmatprep.subr.bf16.mxu1 %v8423_v15  ;;  %v8263_v15 = vcombine.high %v561_v58, %v569_v61 }
 0x2e9   : > { %7439 = vmatpush1.bf16.msra.mxu0 %v8166_v22  ;;  %v833_v22 = vld [vmem:[%s9612_s30 + $0xc28] sm:$0xff] }
 0x2ea   : > { %7440 = vmatprep.subr.bf16.mxu0 %v8183_v24  ;;  %v8262_v24 = vcombine.low %v561_v58, %v569_v61  ;;  %v657_v61 = vld [vmem:[%s9612_s30 + $0x6a8] sm:$0xff] }
 0x2eb   : > { %7480 = vmatpush1.bf16.msra.mxu1 %v8422_v23  ;;  %v841_v23 = vld [vmem:[%s9612_s30 + $0xc68] sm:$0xff] }
 0x2ec   : > { %7481 = vmatprep.subr.bf16.mxu1 %v8439_v63  ;;  %v8518_v63 = vcombine.low %v817_v4, %v825_v5  ;;  %v8535_v26 = vcombine.high %v833_v22, %v841_v23  ;;  %v921_v4 = vld [vmem:[%s9612_s30 + $0xee8] sm:$0xff]  ;;  %v8342_v5 = vcombine.low %v641_v48, %v649_v50 }
 0x2ed   : > { %7441 = vmatpush1.bf16.msra.mxu0 %v8182_v49  ;;  %v849_v49 = vld [vmem:[%s9612_s30 + $0xca8] sm:$0xff] }
 0x2ee   : > { %7442 = vmatprep.subr.bf16.mxu0 %v8199_v29  ;;  %v8278_v29 = vcombine.low %v577_v20, %v585_v21 }
 0x2ef   : > { %7482 = vmatpush1.bf16.msra.mxu1 %v8438_v28  ;;  %v857_v28 = vld [vmem:[%s9612_s30 + $0xce8] sm:$0xff] }
 0x2f0   : > { %7483 = vmatprep.subr.bf16.mxu1 %v8455_v30  ;;  %v8534_v30 = vcombine.low %v833_v22, %v841_v23  ;;  %v8551_v53 = vcombine.high %v849_v49, %v857_v28  ;;  %v689_v22 = vld [vmem:[%s9612_s30 + $0x7a8] sm:$0xff] }
 0x2f1   : > { %7443 = vmatpush1.bf16.msra.mxu0 %v8198_v35  ;;  %v865_v35 = vld [vmem:[%s9612_s30 + $0xd28] sm:$0xff] }
 0x2f2   : > { %7444 = vmatprep.subr.bf16.mxu0 %v8215_v37  ;;  %v8294_v37 = vcombine.low %v593_v2, %v601_v27  ;;  %v697_v23 = vld [vmem:[%s9612_s30 + $0x7e8] sm:$0xff] }
 0x2f3   : > { %7484 = vmatpush1.bf16.msra.mxu1 %v8454_v36  ;;  %v873_v36 = vld [vmem:[%s9612_s30 + $0xd68] sm:$0xff]  ;;  %v8391_v2 = vcombine.high %v689_v22, %v697_v23 }
 0x2f4   : > { %7485 = vmatprep.subr.bf16.mxu1 %v8471_v59  ;;  %v8550_v59 = vcombine.low %v849_v49, %v857_v28  ;;  %v8567_v40 = vcombine.high %v865_v35, %v873_v36  ;;  %v961_v49 = vld [vmem:[%s9612_s30 + $0x1028] sm:$0xff] }
 0x2f5   : > { %7445 = vmatpush1.bf16.msra.mxu0 %v8214_v43  ;;  %v881_v43 = vld [vmem:[%s9612_s30 + $0xda8] sm:$0xff] }
 0x2f6   : > { %7446 = vmatprep.subr.bf16.mxu0 %v8231_v44  ;;  %v8310_v44 = vcombine.low %v609_v55, %v617_v32  ;;  %v969_v28 = vld [vmem:[%s9612_s30 + $0x1068] sm:$0xff] }
 0x2f7   : > { %7486 = vmatpush1.bf16.msra.mxu1 %v8470_v33  ;;  %v7142_v56 = vpop.f32.mrb[24].mxu0  ;;  %v889_v33 = vld [vmem:[%s9612_s30 + $0xde8] sm:$0xff]  ;;  %v8663_v55 = vcombine.high %v961_v49, %v969_v28 }
 0x2f8   : > { %7487 = vmatprep.subr.bf16.mxu1 %v8487_v45  ;;  %v7144_v3 = vpop.f32.mrb[25].mxu0  ;;  %v8566_v45 = vcombine.low %v865_v35, %v873_v36  ;;  %v8583_v47 = vcombine.high %v881_v43, %v889_v33  ;;  %v977_v35 = vld [vmem:[%s9612_s30 + $0x10a8] sm:$0xff] }
 0x2f9   : > { %v7183_v1 = vpop.f32.mrb[24].mxu1  ;;  %v7146_v8 = vpop.f32.mrb[26].mxu0  ;;  %7447 = vmatpush1.bf16.msra.mxu0 %v8230_v51  ;;  %v897_v51 = vld [vmem:[%s9612_s30 + $0xe28] sm:$0xff] }
 0x2fa   : > { %v10410_v6 = vadd.f32 %v7183_v1, %v7142_v56  ;;  %v7185_v34 = vpop.f32.mrb[25].mxu1  ;;  %v7147_v13 = vpop.f32.mrb[27].mxu0  ;;  %7448 = vmatprep.subr.bf16.mxu0 %v8247_v54  ;;  %v8326_v54 = vcombine.low %v625_v41, %v633_v42  ;;  %v8582_v56 = vcombine.low %v881_v43, %v889_v33  ;;  %v665_v1 = vld [vmem:[%s9612_s30 + $0x6e8] sm:$0xff] }
 0x2fb   : > { %v10412_v11 = vadd.f32 %v7185_v34, %v7144_v3  ;;  %v7187_v12 = vpop.f32.mrb[26].mxu1  ;;  %7488 = vmatpush1.bf16.msra.mxu1 %v8486_v52  ;;  %v905_v52 = vld [vmem:[%s9612_s30 + $0xe68] sm:$0xff]  ;;  %v8359_v8 = vcombine.high %v657_v61, %v665_v1 }
 0x2fc   : > { %v7188_v17 = vpop.f32.mrb[27].mxu1  ;;  %7489 = vmatprep.subr.bf16.mxu1 %v8503_v57  ;;  %v8343_v57 = vcombine.high %v641_v48, %v649_v50  ;;  %v8599_v58 = vcombine.high %v897_v51, %v905_v52  ;;  %v913_v3 = vld [vmem:[%s9612_s30 + $0xea8] sm:$0xff]  ;;  %v8598_v34 = vcombine.low %v897_v51, %v905_v52 }
 0x2fd   : > { %7449 = vmatpush1.bf16.msra.mxu0 %v8246_v10  ;;  %v8615_v10 = vcombine.high %v913_v3, %v921_v4  ;;  %v673_v12 = vld [vmem:[%s9612_s30 + $0x728] sm:$0xff]  ;;  %v8358_v17 = vcombine.low %v657_v61, %v665_v1 }
 0x2fe   : > { %7450 = vmatprep.subr.bf16.mxu0 %v8263_v15  ;;  %v681_v13 = vld [vmem:[%s9612_s30 + $0x768] sm:$0xff] }
 0x2ff   : > { %7490 = vmatpush1.bf16.msra.mxu1 %v8502_v14  ;;  %v929_v14 = vld [vmem:[%s9612_s30 + $0xf28] sm:$0xff]  ;;  %v8375_v20 = vcombine.high %v673_v12, %v681_v13 }
 0x300   : > { %7491 = vmatprep.subr.bf16.mxu1 %v8519_v18  ;;  %v937_v15 = vld [vmem:[%s9612_s30 + $0xf68] sm:$0xff]  ;;  %v8614_v18 = vcombine.low %v913_v3, %v921_v4 }
 0x301   : > { %7451 = vmatpush1.bf16.msra.mxu0 %v8262_v24  ;;  %v8631_v21 = vcombine.high %v929_v14, %v937_v15  ;;  %v945_v24 = vld [vmem:[%s9612_s30 + $0xfa8] sm:$0xff] }
 0x302   : > { %7452 = vmatprep.subr.bf16.mxu0 %v8279_v25  ;;  %v8374_v25 = vcombine.low %v673_v12, %v681_v13  ;;  %v985_v36 = vld [vmem:[%s9612_s30 + $0x10e8] sm:$0xff] }
 0x303   : > { %7492 = vmatpush1.bf16.msra.mxu1 %v8518_v63  ;;  %v953_v63 = vld [vmem:[%s9612_s30 + $0xfe8] sm:$0xff]  ;;  %v8679_v41 = vcombine.high %v977_v35, %v985_v36 }
 0x304   : > { %7493 = vmatprep.subr.bf16.mxu1 %v8535_v26  ;;  %v8630_v26 = vcombine.low %v929_v14, %v937_v15  ;;  %v8647_v27 = vcombine.high %v945_v24, %v953_v63  ;;  %v993_v43 = vld [vmem:[%s9612_s30 + $0x1128] sm:$0xff] }
 0x305   : > { %7453 = vmatpush1.bf16.msra.mxu0 %v8278_v29  ;;  %v1217_v29 = vld [vmem:[%s9612_s30 + $0x1828] sm:$0xff] }
 0x306   : > { %7454 = vmatprep.subr.bf16.mxu0 %v8295_v31  ;;  %v8390_v31 = vcombine.low %v689_v22, %v697_v23  ;;  %v1001_v33 = vld [vmem:[%s9612_s30 + $0x1168] sm:$0xff] }
 0x307   : > { %7494 = vmatpush1.bf16.msra.mxu1 %v8534_v30  ;;  %v1225_v30 = vld [vmem:[%s9612_s30 + $0x1868] sm:$0xff]  ;;  %v8695_v48 = vcombine.high %v993_v43, %v1001_v33 }
 0x308   : > { %7495 = vmatprep.subr.bf16.mxu1 %v8551_v53  ;;  %v8646_v53 = vcombine.low %v945_v24, %v953_v63  ;;  %v8919_v32 = vcombine.high %v1217_v29, %v1225_v30  ;;  %v1009_v51 = vld [vmem:[%s9612_s30 + $0x11a8] sm:$0xff] }
 0x309   : > { %7455 = vmatpush1.bf16.msra.mxu0 %v8294_v37  ;;  %v1233_v37 = vld [vmem:[%s9612_s30 + $0x18a8] sm:$0xff] }
 0x30a   : > { %7456 = vmatprep.subr.bf16.mxu0 %v8311_v62  ;;  %v8662_v62 = vcombine.low %v961_v49, %v969_v28  ;;  %v1017_v52 = vld [vmem:[%s9612_s30 + $0x11e8] sm:$0xff] }
 0x30b   : > { %7496 = vmatpush1.bf16.msra.mxu1 %v8550_v59  ;;  %v1241_v59 = vld [vmem:[%s9612_s30 + $0x18e8] sm:$0xff]  ;;  %v8711_v61 = vcombine.high %v1009_v51, %v1017_v52 }
 0x30c   : > { %7497 = vmatprep.subr.bf16.mxu1 %v8567_v40  ;;  %v8918_v40 = vcombine.low %v1217_v29, %v1225_v30  ;;  %v8935_v42 = vcombine.high %v1233_v37, %v1241_v59  ;;  %v1025_v3 = vld [vmem:[%s9612_s30 + $0x1228] sm:$0xff] }
 0x30d   : > { %7457 = vmatpush1.bf16.msra.mxu0 %v8310_v44  ;;  %v1249_v44 = vld [vmem:[%s9612_s30 + $0x1928] sm:$0xff] }
 0x30e   : > { %7458 = vmatprep.subr.bf16.mxu0 %v8327_v46  ;;  %v8678_v46 = vcombine.low %v977_v35, %v985_v36  ;;  %v1033_v4 = vld [vmem:[%s9612_s30 + $0x1268] sm:$0xff] }
 0x30f   : > { %7498 = vmatpush1.bf16.msra.mxu1 %v8566_v45  ;;  %v1257_v45 = vld [vmem:[%s9612_s30 + $0x1968] sm:$0xff]  ;;  %v8727_v12 = vcombine.high %v1025_v3, %v1033_v4 }
 0x310   : > { %7499 = vmatprep.subr.bf16.mxu1 %v8583_v47  ;;  %v8934_v47 = vcombine.low %v1233_v37, %v1241_v59  ;;  %v8951_v50 = vcombine.high %v1249_v44, %v1257_v45  ;;  %v1041_v14 = vld [vmem:[%s9612_s30 + $0x12a8] sm:$0xff]  ;;  %v430_v37 = vld [vmem:[#allocation2 + $0x30] sm:$0xff] }
 0x311   : > { %7459 = vmatpush1.bf16.msra.mxu0 %v8326_v54  ;;  %v1265_v54 = vld [vmem:[%s9612_s30 + $0x19a8] sm:$0xff] }
 0x312   : > { %7460 = vmatprep.subr.bf16.mxu0 %v8343_v57  ;;  %v8694_v57 = vcombine.low %v993_v43, %v1001_v33  ;;  %v1049_v15 = vld [vmem:[%s9612_s30 + $0x12e8] sm:$0xff]  ;;  %v431_v43 = vld [vmem:[#allocation2 + $0x38] sm:$0xff] }
 0x313   : > { %7500 = vmatpush1.bf16.msra.mxu1 %v8582_v56  ;;  %v1273_v56 = vld [vmem:[%s9612_s30 + $0x19e8] sm:$0xff]  ;;  %v8743_v22 = vcombine.high %v1041_v14, %v1049_v15 }
 0x314   : > { %7501 = vmatprep.subr.bf16.mxu1 %v8599_v58  ;;  %v8950_v58 = vcombine.low %v1249_v44, %v1257_v45  ;;  %v8967_v1 = vcombine.high %v1265_v54, %v1273_v56  ;;  %v1057_v24 = vld [vmem:[%s9612_s30 + $0x1328] sm:$0xff] }
 0x315   : > { %7461 = vmatpush1.bf16.msra.mxu0 %v8342_v5  ;;  %v1281_v5 = vld [vmem:[%s9612_s30 + $0x1a28] sm:$0xff] }
 0x316   : > { %7462 = vmatprep.subr.bf16.mxu0 %v8359_v8  ;;  %v8710_v8 = vcombine.low %v1009_v51, %v1017_v52  ;;  %v1065_v63 = vld [vmem:[%s9612_s30 + $0x1368] sm:$0xff] }
 0x317   : > { %7502 = vmatpush1.bf16.msra.mxu1 %v8598_v34  ;;  %v1289_v34 = vld [vmem:[%s9612_s30 + $0x1a68] sm:$0xff]  ;;  %v8759_v49 = vcombine.high %v1057_v24, %v1065_v63 }
 0x318   : > { %7503 = vmatprep.subr.bf16.mxu1 %v8615_v10  ;;  %v8966_v10 = vcombine.low %v1265_v54, %v1273_v56  ;;  %v8983_v13 = vcombine.high %v1281_v5, %v1289_v34  ;;  %v1073_v30 = vld [vmem:[%s9612_s30 + $0x13a8] sm:$0xff] }
 0x319   : > { %7463 = vmatpush1.bf16.msra.mxu0 %v8358_v17  ;;  %v1297_v17 = vld [vmem:[%s9612_s30 + $0x1aa8] sm:$0xff] }
 0x31a   : > { %7464 = vmatprep.subr.bf16.mxu0 %v8375_v20  ;;  %v8726_v20 = vcombine.low %v1025_v3, %v1033_v4  ;;  %v1329_v35 = vld [vmem:[%s9612_s30 + $0x1ba8] sm:$0xff] }
 0x31b   : > { %7504 = vmatpush1.bf16.msra.mxu1 %v8614_v18  ;;  %v1305_v18 = vld [vmem:[%s9612_s30 + $0x1ae8] sm:$0xff] }
 0x31c   : > { %7505 = vmatprep.subr.bf16.mxu1 %v8631_v21  ;;  %v8982_v21 = vcombine.low %v1281_v5, %v1289_v34  ;;  %v8999_v23 = vcombine.high %v1297_v17, %v1305_v18  ;;  %v1337_v36 = vld [vmem:[%s9612_s30 + $0x1be8] sm:$0xff] }
 0x31d   : > { %7465 = vmatpush1.bf16.msra.mxu0 %v8374_v25  ;;  %v1313_v25 = vld [vmem:[%s9612_s30 + $0x1b28] sm:$0xff] }
 0x31e   : > { %7466 = vmatprep.subr.bf16.mxu0 %v8391_v2  ;;  %v8742_v2 = vcombine.low %v1041_v14, %v1049_v15  ;;  %v1345_v52 = vld [vmem:[%s9612_s30 + $0x1c28] sm:$0xff] }
 0x31f   : > { %7506 = vmatpush1.bf16.msra.mxu1 %v8630_v26  ;;  %v1321_v26 = vld [vmem:[%s9612_s30 + $0x1b68] sm:$0xff] }
 0x320   : > { %7507 = vmatprep.subr.bf16.mxu1 %v8647_v27  ;;  %v8998_v27 = vcombine.low %v1297_v17, %v1305_v18  ;;  %v9015_v29 = vcombine.high %v1313_v25, %v1321_v26  ;;  %v9014_v44 = vcombine.low %v1313_v25, %v1321_v26  ;;  %v1353_v54 = vld [vmem:[%s9612_s30 + $0x1c68] sm:$0xff] }
 0x321   : > { %7467 = vmatpush1.bf16.msra.mxu0 %v8390_v31  ;;  %v1081_v31 = vld [vmem:[%s9612_s30 + $0x13e8] sm:$0xff] }
 0x322   : > { %7518 = vmatprep.subr.bf16.mxu0 %v8663_v55  ;;  %v8775_v45 = vcombine.high %v1073_v30, %v1081_v31  ;;  %v1105_v3 = vld [vmem:[%s9612_s30 + $0x14a8] sm:$0xff] }
 0x323   : > { %7508 = vmatpush1.bf16.msra.mxu1 %v8646_v53  ;;  %v1113_v4 = vld [vmem:[%s9612_s30 + $0x14e8] sm:$0xff] }
 0x324   : > { %7559 = vmatprep.subr.bf16.mxu1 %v8919_v32  ;;  %7469 = vmatmul.mubr.bf16.vlgmr.msra.gmra.mrb[40].mxu0 %v9722_v60  ;;  %v1361_v5 = vld [vmem:[%s9612_s30 + $0x1ca8] sm:$0xff] }
 0x325   : > { %7519 = vmatpush1.bf16.msra.mxu0 %v8662_v62  ;;  %7550 = vmatprep.mubr.bf16.mxu0 %v9740_v7  ;;  %v1369_v34 = vld [vmem:[%s9612_s30 + $0x1ce8] sm:$0xff] }
 0x326   : > { %7510 = vmatmul.mubr.bf16.vlgmr.msra.gmra.mrb[40].mxu1 %v9731_v0  ;;  %7520 = vmatprep.subr.bf16.mxu0 %v8679_v41  ;;  %v8758_v41 = vcombine.low %v1057_v24, %v1065_v63  ;;  %v1121_v14 = vld [vmem:[%s9612_s30 + $0x1528] sm:$0xff] }
 0x327   : > { %7560 = vmatpush1.bf16.msra.mxu1 %v8918_v40  ;;  %7591 = vmatprep.mubr.bf16.mxu1 %v9747_v9  ;;  %v1129_v15 = vld [vmem:[%s9612_s30 + $0x1568] sm:$0xff] }
 0x328   : > { %7561 = vmatprep.subr.bf16.mxu1 %v8935_v42  ;;  %v1377_v17 = vld [vmem:[%s9612_s30 + $0x1d28] sm:$0xff] }
 0x329   : > { %7521 = vmatpush1.bf16.msra.mxu0 %v8678_v46  ;;  %v1385_v18 = vld [vmem:[%s9612_s30 + $0x1d68] sm:$0xff] }
 0x32a   : > { %7522 = vmatprep.subr.bf16.mxu0 %v8695_v48  ;;  %v1089_v48 = vld [vmem:[%s9612_s30 + $0x1428] sm:$0xff] }
 0x32b   : > { %7562 = vmatpush1.bf16.msra.mxu1 %v8934_v47  ;;  %v1137_v24 = vld [vmem:[%s9612_s30 + $0x15a8] sm:$0xff] }
 0x32c   : > { %7563 = vmatprep.subr.bf16.mxu1 %v8951_v50  ;;  %v1097_v50 = vld [vmem:[%s9612_s30 + $0x1468] sm:$0xff] }
 0x32d   : > { %7523 = vmatpush1.bf16.msra.mxu0 %v8694_v57  ;;  %v8774_v57 = vcombine.low %v1073_v30, %v1081_v31  ;;  %v1145_v63 = vld [vmem:[%s9612_s30 + $0x15e8] sm:$0xff] }
 0x32e   : > { %7524 = vmatprep.subr.bf16.mxu0 %v8711_v61  ;;  %v8791_v61 = vcombine.high %v1089_v48, %v1097_v50  ;;  %v1393_v25 = vld [vmem:[%s9612_s30 + $0x1da8] sm:$0xff] }
 0x32f   : > { %7564 = vmatpush1.bf16.msra.mxu1 %v8950_v58  ;;  %v9030_v58 = vcombine.low %v1329_v35, %v1337_v36  ;;  %v1401_v26 = vld [vmem:[%s9612_s30 + $0x1de8] sm:$0xff] }
 0x330   : > { %7565 = vmatprep.subr.bf16.mxu1 %v8967_v1  ;;  %v9047_v1 = vcombine.high %v1345_v52, %v1353_v54  ;;  %v1161_v30 = vld [vmem:[%s9612_s30 + $0x1668] sm:$0xff] }
 0x331   : > { %7525 = vmatpush1.bf16.msra.mxu0 %v8710_v8  ;;  %v8790_v8 = vcombine.low %v1089_v48, %v1097_v50  ;;  %v1409_v31 = vld [vmem:[%s9612_s30 + $0x1e28] sm:$0xff] }
 0x332   : > { %7526 = vmatprep.subr.bf16.mxu0 %v8727_v12  ;;  %v8807_v12 = vcombine.high %v1105_v3, %v1113_v4 }
 0x333   : > { %7566 = vmatpush1.bf16.msra.mxu1 %v8966_v10  ;;  %v9046_v10 = vcombine.low %v1345_v52, %v1353_v54  ;;  %v1209_v52 = vld [vmem:[%s9612_s30 + $0x17e8] sm:$0xff] }
 0x334   : > { %7567 = vmatprep.subr.bf16.mxu1 %v8983_v13  ;;  %v9063_v13 = vcombine.high %v1361_v5, %v1369_v34  ;;  %v1457_v54 = vld [vmem:[%s9612_s30 + $0x1fa8] sm:$0xff] }
 0x335   : > { %7527 = vmatpush1.bf16.msra.mxu0 %v8726_v20  ;;  %v8806_v20 = vcombine.low %v1105_v3, %v1113_v4  ;;  %v450_v3 = vld [vmem:[%s9612_s30 + $0x30] sm:$0xff] }
 0x336   : > { %7528 = vmatprep.subr.bf16.mxu0 %v8743_v22  ;;  %v8823_v22 = vcombine.high %v1121_v14, %v1129_v15  ;;  %v458_v4 = vld [vmem:[%s9612_s30 + $0x70] sm:$0xff] }
 0x337   : > { %7568 = vmatpush1.bf16.msra.mxu1 %v8982_v21  ;;  %v7224_v28 = vpop.f32.mrb[28].mxu0  ;;  %v9062_v21 = vcombine.low %v1361_v5, %v1369_v34  ;;  %v706_v5 = vld [vmem:[%s9612_s30 + $0x830] sm:$0xff] }
 0x338   : > { %7569 = vmatprep.subr.bf16.mxu1 %v8999_v23  ;;  %v7225_v53 = vadd.f32 %v7224_v28, %v10410_v6  ;;  %v7226_v32 = vpop.f32.mrb[29].mxu0  ;;  %v9079_v23 = vcombine.high %v1377_v17, %v1385_v18  ;;  %v9095_v28 = vcombine.high %v1393_v25, %v1401_v26  ;;  %v714_v34 = vld [vmem:[%s9612_s30 + $0x870] sm:$0xff] }
 0x339   : > { %v7265_v55 = vpop.f32.mrb[28].mxu1  ;;  %v7227_v59 = vadd.f32 %v7226_v32, %v10412_v11  ;;  %v7228_v40 = vpop.f32.mrb[30].mxu0  ;;  %7529 = vmatpush1.bf16.msra.mxu0 %v8742_v2  ;;  %v9031_v11 = vcombine.high %v1329_v35, %v1337_v36  ;;  %v8822_v2 = vcombine.low %v1121_v14, %v1129_v15  ;;  %v9094_v32 = vcombine.low %v1393_v25, %v1401_v26  ;;  %v466_v14 = vld [vmem:[%s9612_s30 + $0xb0] sm:$0xff] }
 0x33a   : > { %v7267_v62 = vpop.f32.mrb[29].mxu1  ;;  %v7266_v42 = vadd.f32 %v7265_v55, %v7225_v53  ;;  %v7229_v6 = vpop.f32.mrb[31].mxu0  ;;  %7530 = vmatprep.subr.bf16.mxu0 %v8759_v49  ;;  %v8839_v49 = vcombine.high %v1137_v24, %v1145_v63  ;;  %v1417_v53 = vld [vmem:[%s9612_s30 + $0x1e68] sm:$0xff]  ;;  %v8838_v55 = vcombine.low %v1137_v24, %v1145_v63  ;;  %v474_v15 = vld [vmem:[%s9612_s30 + $0xf0] sm:$0xff] }
 0x33b   : > { %v7269_v33 = vpop.f32.mrb[30].mxu1  ;;  %7570 = vmatpush1.bf16.msra.mxu1 %v8998_v27  ;;  %v7268_v46 = vadd.f32 %v7267_v62, %v7227_v59  ;;  %v9078_v27 = vcombine.low %v1377_v17, %v1385_v18  ;;  %v9111_v36 = vcombine.high %v1409_v31, %v1417_v53  ;;  %v1177_v59 = vld [vmem:[%s9612_s30 + $0x16e8] sm:$0xff]  ;;  %v722_v17 = vld [vmem:[%s9612_s30 + $0x8b0] sm:$0xff] }
 0x33c   : > { %v7270_v47 = vpop.f32.mrb[31].mxu1  ;;  %7571 = vmatprep.subr.bf16.mxu1 %v9015_v29  ;;  %v7934_v51 = vadd.f32 %v7266_v42, %v430_v37  ;;  %v1153_v29 = vld [vmem:[%s9612_s30 + $0x1628] sm:$0xff]  ;;  %v9110_v42 = vcombine.low %v1409_v31, %v1417_v53  ;;  %v730_v18 = vld [vmem:[%s9612_s30 + $0x8f0] sm:$0xff] }
 0x33d   : > { %v7935_v56 = vadd.f32 %v7268_v46, %v431_v43  ;;  %7531 = vmatpush1.bf16.msra.mxu0 %v8758_v41  ;;  %v8855_v35 = vcombine.high %v1153_v29, %v1161_v30  ;;  %v1169_v37 = vld [vmem:[%s9612_s30 + $0x16a8] sm:$0xff]  ;;  %v8854_v41 = vcombine.low %v1153_v29, %v1161_v30  ;;  %v482_v24 = vld [vmem:[%s9612_s30 + $0x130] sm:$0xff] }
 0x33e   : > { %7950 = vst [vmem:[#allocation2 + $0x30] sm:$0xff] %v7934_v51  ;;  %7532 = vmatprep.subr.bf16.mxu0 %v8775_v45  ;;  %v1425_v62 = vld [vmem:[%s9612_s30 + $0x1ea8] sm:$0xff]  ;;  %v8871_v43 = vcombine.high %v1169_v37, %v1177_v59  ;;  %v8870_v47 = vcombine.low %v1169_v37, %v1177_v59  ;;  %v490_v63 = vld [vmem:[%s9612_s30 + $0x170] sm:$0xff] }
 0x33f   : > { %7572 = vmatpush1.bf16.msra.mxu1 %v9014_v44  ;;  %7951 = vst [vmem:[#allocation2 + $0x38] sm:$0xff] %v7935_v56  ;;  %v1433_v40 = vld [vmem:[%s9612_s30 + $0x1ee8] sm:$0xff]  ;;  %v738_v25 = vld [vmem:[%s9612_s30 + $0x930] sm:$0xff] }
 0x340   : > { %7573 = vmatprep.subr.bf16.mxu1 %v9031_v11  ;;  %v9127_v33 = vcombine.high %v1425_v62, %v1433_v40  ;;  %v1185_v6 = vld [vmem:[%s9612_s30 + $0x1728] sm:$0xff]  ;;  %v9126_v11 = vcombine.low %v1425_v62, %v1433_v40  ;;  %v746_v26 = vld [vmem:[%s9612_s30 + $0x970] sm:$0xff] }
 0x341   : > { %7533 = vmatpush1.bf16.msra.mxu0 %v8774_v57  ;;  %v1193_v44 = vld [vmem:[%s9612_s30 + $0x1768] sm:$0xff]  ;;  %v498_v29 = vld [vmem:[%s9612_s30 + $0x1b0] sm:$0xff] }
 0x342   : > { %7534 = vmatprep.subr.bf16.mxu0 %v8791_v61  ;;  %v1441_v45 = vld [vmem:[%s9612_s30 + $0x1f28] sm:$0xff]  ;;  %v8887_v48 = vcombine.high %v1185_v6, %v1193_v44  ;;  %v8886_v57 = vcombine.low %v1185_v6, %v1193_v44  ;;  %v506_v30 = vld [vmem:[%s9612_s30 + $0x1f0] sm:$0xff] }
 0x343   : > { %7574 = vmatpush1.bf16.msra.mxu1 %v9030_v58  ;;  %v1449_v46 = vld [vmem:[%s9612_s30 + $0x1f68] sm:$0xff]  ;;  %v754_v31 = vld [vmem:[%s9612_s30 + $0x9b0] sm:$0xff] }
 0x344   : > { %7575 = vmatprep.subr.bf16.mxu1 %v9047_v1  ;;  %v9143_v50 = vcombine.high %v1441_v45, %v1449_v46  ;;  %v1201_v51 = vld [vmem:[%s9612_s30 + $0x17a8] sm:$0xff]  ;;  %v9142_v58 = vcombine.low %v1441_v45, %v1449_v46  ;;  %v762_v53 = vld [vmem:[%s9612_s30 + $0x9f0] sm:$0xff] }
 0x345   : > { %7535 = vmatpush1.bf16.msra.mxu0 %v8790_v8  ;;  %v1465_v56 = vld [vmem:[%s9612_s30 + $0x1fe8] sm:$0xff]  ;;  %v8903_v61 = vcombine.high %v1201_v51, %v1209_v52  ;;  %v8902_v8 = vcombine.low %v1201_v51, %v1209_v52  ;;  %v514_v37 = vld [vmem:[%s9612_s30 + $0x230] sm:$0xff] }
 0x346   : > { %7536 = vmatprep.subr.bf16.mxu0 %v8807_v12  ;;  %v9159_v1 = vcombine.high %v1457_v54, %v1465_v56  ;;  %v8153_v12 = vcombine.high %v450_v3, %v458_v4  ;;  %v522_v59 = vld [vmem:[%s9612_s30 + $0x270] sm:$0xff] }
 0x347   : > { %7576 = vmatpush1.bf16.msra.mxu1 %v9046_v10  ;;  %v9158_v10 = vcombine.low %v1457_v54, %v1465_v56  ;;  %v770_v62 = vld [vmem:[%s9612_s30 + $0xa30] sm:$0xff] }
 0x348   : > { %7577 = vmatprep.subr.bf16.mxu1 %v9063_v13  ;;  %v8409_v13 = vcombine.high %v706_v5, %v714_v34  ;;  %v778_v40 = vld [vmem:[%s9612_s30 + $0xa70] sm:$0xff] }
 0x349   : > { %7537 = vmatpush1.bf16.msra.mxu0 %v8806_v20  ;;  %v8152_v20 = vcombine.low %v450_v3, %v458_v4  ;;  %v530_v6 = vld [vmem:[%s9612_s30 + $0x2b0] sm:$0xff] }
 0x34a   : > { %7538 = vmatprep.subr.bf16.mxu0 %v8823_v22  ;;  %v8169_v22 = vcombine.high %v466_v14, %v474_v15  ;;  %v538_v44 = vld [vmem:[%s9612_s30 + $0x2f0] sm:$0xff] }
 0x34b   : > { %7578 = vmatpush1.bf16.msra.mxu1 %v9062_v21  ;;  %v8408_v21 = vcombine.low %v706_v5, %v714_v34  ;;  %v786_v45 = vld [vmem:[%s9612_s30 + $0xab0] sm:$0xff] }
 0x34c   : > { %7579 = vmatprep.subr.bf16.mxu1 %v9079_v23  ;;  %v8425_v23 = vcombine.high %v722_v17, %v730_v18  ;;  %v794_v46 = vld [vmem:[%s9612_s30 + $0xaf0] sm:$0xff] }
 0x34d   : > { %7539 = vmatpush1.bf16.msra.mxu0 %v8822_v2  ;;  %v8168_v2 = vcombine.low %v466_v14, %v474_v15  ;;  %v546_v51 = vld [vmem:[%s9612_s30 + $0x330] sm:$0xff] }
 0x34e   : > { %7540 = vmatprep.subr.bf16.mxu0 %v8839_v49  ;;  %v8185_v49 = vcombine.high %v482_v24, %v490_v63  ;;  %v554_v52 = vld [vmem:[%s9612_s30 + $0x370] sm:$0xff] }
 0x34f   : > { %7580 = vmatpush1.bf16.msra.mxu1 %v9078_v27  ;;  %v8424_v27 = vcombine.low %v722_v17, %v730_v18  ;;  %v802_v54 = vld [vmem:[%s9612_s30 + $0xb30] sm:$0xff]  ;;  %v8248_v17 = vcombine.low %v546_v51, %v554_v52 }
 0x350   : > { %7581 = vmatprep.subr.bf16.mxu1 %v9095_v28  ;;  %v8441_v28 = vcombine.high %v738_v25, %v746_v26  ;;  %v810_v56 = vld [vmem:[%s9612_s30 + $0xb70] sm:$0xff] }
 0x351   : > { %7541 = vmatpush1.bf16.msra.mxu0 %v8838_v55  ;;  %v8184_v55 = vcombine.low %v482_v24, %v490_v63  ;;  %v8505_v3 = vcombine.high %v802_v54, %v810_v56  ;;  %v562_v4 = vld [vmem:[%s9612_s30 + $0x3b0] sm:$0xff] }
 0x352   : > { %7542 = vmatprep.subr.bf16.mxu0 %v8855_v35  ;;  %v8201_v35 = vcombine.high %v498_v29, %v506_v30  ;;  %v570_v5 = vld [vmem:[%s9612_s30 + $0x3f0] sm:$0xff] }
 0x353   : > { %7582 = vmatpush1.bf16.msra.mxu1 %v9094_v32  ;;  %v8440_v32 = vcombine.low %v738_v25, %v746_v26  ;;  %v578_v25 = vld [vmem:[%s9612_s30 + $0x430] sm:$0xff] }
 0x354   : > { %7583 = vmatprep.subr.bf16.mxu1 %v9111_v36  ;;  %v8457_v36 = vcombine.high %v754_v31, %v762_v53  ;;  %v586_v26 = vld [vmem:[%s9612_s30 + $0x470] sm:$0xff] }
 0x355   : > { %7543 = vmatpush1.bf16.msra.mxu0 %v8854_v41  ;;  %v8200_v41 = vcombine.low %v498_v29, %v506_v30  ;;  %v8281_v29 = vcombine.high %v578_v25, %v586_v26 }
 0x356   : > { %7544 = vmatprep.subr.bf16.mxu0 %v8871_v43  ;;  %v8217_v43 = vcombine.high %v514_v37, %v522_v59 }
 0x357   : > { %7584 = vmatpush1.bf16.msra.mxu1 %v9110_v42  ;;  %v8456_v42 = vcombine.low %v754_v31, %v762_v53  ;;  %v594_v31 = vld [vmem:[%s9612_s30 + $0x4b0] sm:$0xff] }
 0x358   : > { %7585 = vmatprep.subr.bf16.mxu1 %v9127_v33  ;;  %v8473_v33 = vcombine.high %v770_v62, %v778_v40  ;;  %v602_v53 = vld [vmem:[%s9612_s30 + $0x4f0] sm:$0xff] }
 0x359   : > { %7545 = vmatpush1.bf16.msra.mxu0 %v8870_v47  ;;  %v8216_v47 = vcombine.low %v514_v37, %v522_v59  ;;  %v8297_v37 = vcombine.high %v594_v31, %v602_v53 }
 0x35a   : > { %7546 = vmatprep.subr.bf16.mxu0 %v8887_v48  ;;  %v8233_v48 = vcombine.high %v530_v6, %v538_v44 }
 0x35b   : > { %7586 = vmatpush1.bf16.msra.mxu1 %v9126_v11  ;;  %v8472_v11 = vcombine.low %v770_v62, %v778_v40  ;;  %v610_v62 = vld [vmem:[%s9612_s30 + $0x530] sm:$0xff] }
 0x35c   : > { %7587 = vmatprep.subr.bf16.mxu1 %v9143_v50  ;;  %v8489_v50 = vcombine.high %v786_v45, %v794_v46  ;;  %v618_v40 = vld [vmem:[%s9612_s30 + $0x570] sm:$0xff] }
 0x35d   : > { %7547 = vmatpush1.bf16.msra.mxu0 %v8886_v57  ;;  %v8232_v57 = vcombine.low %v530_v6, %v538_v44  ;;  %v8313_v6 = vcombine.high %v610_v62, %v618_v40 }
 0x35e   : > { %7548 = vmatprep.subr.bf16.mxu0 %v8903_v61  ;;  %v8249_v61 = vcombine.high %v546_v51, %v554_v52 }
 0x35f   : > { %7588 = vmatpush1.bf16.msra.mxu1 %v9142_v58  ;;  %v8488_v58 = vcombine.low %v786_v45, %v794_v46  ;;  %v626_v45 = vld [vmem:[%s9612_s30 + $0x5b0] sm:$0xff] }
 0x360   : > { %7589 = vmatprep.subr.bf16.mxu1 %v9159_v1  ;;  %v634_v46 = vld [vmem:[%s9612_s30 + $0x5f0] sm:$0xff] }
 0x361   : > { %7549 = vmatpush1.bf16.msra.mxu0 %v8902_v8  ;;  %v8329_v51 = vcombine.high %v626_v45, %v634_v46 }
 0x362   : > { %7600 = vmatprep.subr.bf16.mxu0 %v8153_v12  ;;  %v826_v12 = vld [vmem:[%s9612_s30 + $0xbf0] sm:$0xff] }
 0x363   : > { %7590 = vmatpush1.bf16.msra.mxu1 %v9158_v10  ;;  %v818_v10 = vld [vmem:[%s9612_s30 + $0xbb0] sm:$0xff] }
 0x364   : > { %7641 = vmatprep.subr.bf16.mxu1 %v8409_v13  ;;  %7551 = vmatmul.mubr.bf16.vlgmr.msra.gmra.mrb[44].mxu0 %v9812_v16  ;;  %v8521_v63 = vcombine.high %v818_v10, %v826_v12 }
 0x365   : > { %7601 = vmatpush1.bf16.msra.mxu0 %v8152_v20  ;;  %7632 = vmatprep.mubr.bf16.mxu0 %v9672_v38 }
 0x366   : > { %7592 = vmatmul.mubr.bf16.vlgmr.msra.gmra.mrb[44].mxu1 %v9818_v19  ;;  %7602 = vmatprep.subr.bf16.mxu0 %v8169_v22  ;;  %v8504_v22 = vcombine.low %v802_v54, %v810_v56  ;;  %v642_v54 = vld [vmem:[%s9612_s30 + $0x630] sm:$0xff] }
 0x367   : > { %7642 = vmatpush1.bf16.msra.mxu1 %v8408_v21  ;;  %7673 = vmatprep.mubr.bf16.mxu1 %v9676_v39  ;;  %v650_v56 = vld [vmem:[%s9612_s30 + $0x670] sm:$0xff] }
 0x368   : > { %7643 = vmatprep.subr.bf16.mxu1 %v8425_v23  ;;  %v8265_v23 = vcombine.high %v562_v4, %v570_v5 }
 0x369   : > { %7603 = vmatpush1.bf16.msra.mxu0 %v8168_v2  ;;  %v834_v2 = vld [vmem:[%s9612_s30 + $0xc30] sm:$0xff] }
 0x36a   : > { %7604 = vmatprep.subr.bf16.mxu0 %v8185_v49  ;;  %v8264_v49 = vcombine.low %v562_v4, %v570_v5  ;;  %v658_v5 = vld [vmem:[%s9612_s30 + $0x6b0] sm:$0xff] }
 0x36b   : > { %7644 = vmatpush1.bf16.msra.mxu1 %v8424_v27  ;;  %v842_v27 = vld [vmem:[%s9612_s30 + $0xc70] sm:$0xff] }
 0x36c   : > { %7645 = vmatprep.subr.bf16.mxu1 %v8441_v28  ;;  %v8520_v28 = vcombine.low %v818_v10, %v826_v12  ;;  %v8537_v30 = vcombine.high %v834_v2, %v842_v27  ;;  %v922_v10 = vld [vmem:[%s9612_s30 + $0xef0] sm:$0xff]  ;;  %v8344_v12 = vcombine.low %v642_v54, %v650_v56 }
 0x36d   : > { %7605 = vmatpush1.bf16.msra.mxu0 %v8184_v55  ;;  %v850_v55 = vld [vmem:[%s9612_s30 + $0xcb0] sm:$0xff] }
 0x36e   : > { %7606 = vmatprep.subr.bf16.mxu0 %v8201_v35  ;;  %v8280_v35 = vcombine.low %v578_v25, %v586_v26 }
 0x36f   : > { %7646 = vmatpush1.bf16.msra.mxu1 %v8440_v32  ;;  %v858_v32 = vld [vmem:[%s9612_s30 + $0xcf0] sm:$0xff] }
 0x370   : > { %7647 = vmatprep.subr.bf16.mxu1 %v8457_v36  ;;  %v8536_v36 = vcombine.low %v834_v2, %v842_v27  ;;  %v8553_v59 = vcombine.high %v850_v55, %v858_v32  ;;  %v690_v2 = vld [vmem:[%s9612_s30 + $0x7b0] sm:$0xff] }
 0x371   : > { %7607 = vmatpush1.bf16.msra.mxu0 %v8200_v41  ;;  %v866_v41 = vld [vmem:[%s9612_s30 + $0xd30] sm:$0xff] }
 0x372   : > { %7608 = vmatprep.subr.bf16.mxu0 %v8217_v43  ;;  %v8296_v43 = vcombine.low %v594_v31, %v602_v53  ;;  %v698_v27 = vld [vmem:[%s9612_s30 + $0x7f0] sm:$0xff] }
 0x373   : > { %7648 = vmatpush1.bf16.msra.mxu1 %v8456_v42  ;;  %v874_v42 = vld [vmem:[%s9612_s30 + $0xd70] sm:$0xff]  ;;  %v8393_v31 = vcombine.high %v690_v2, %v698_v27 }
 0x374   : > { %7649 = vmatprep.subr.bf16.mxu1 %v8473_v33  ;;  %v8552_v33 = vcombine.low %v850_v55, %v858_v32  ;;  %v8569_v44 = vcombine.high %v866_v41, %v874_v42  ;;  %v962_v55 = vld [vmem:[%s9612_s30 + $0x1030] sm:$0xff] }
 0x375   : > { %7609 = vmatpush1.bf16.msra.mxu0 %v8216_v47  ;;  %v882_v47 = vld [vmem:[%s9612_s30 + $0xdb0] sm:$0xff] }
 0x376   : > { %7610 = vmatprep.subr.bf16.mxu0 %v8233_v48  ;;  %v8312_v48 = vcombine.low %v610_v62, %v618_v40  ;;  %v970_v32 = vld [vmem:[%s9612_s30 + $0x1070] sm:$0xff] }
 0x377   : > { %7650 = vmatpush1.bf16.msra.mxu1 %v8472_v11  ;;  %v7306_v1 = vpop.f32.mrb[32].mxu0  ;;  %v890_v11 = vld [vmem:[%s9612_s30 + $0xdf0] sm:$0xff]  ;;  %v8665_v62 = vcombine.high %v962_v55, %v970_v32 }
 0x378   : > { %7651 = vmatprep.subr.bf16.mxu1 %v8489_v50  ;;  %v7308_v8 = vpop.f32.mrb[33].mxu0  ;;  %v8568_v50 = vcombine.low %v866_v41, %v874_v42  ;;  %v8585_v52 = vcombine.high %v882_v47, %v890_v11  ;;  %v978_v41 = vld [vmem:[%s9612_s30 + $0x10b0] sm:$0xff] }
 0x379   : > { %v7347_v34 = vpop.f32.mrb[32].mxu1  ;;  %v7310_v15 = vpop.f32.mrb[34].mxu0  ;;  %7611 = vmatpush1.bf16.msra.mxu0 %v8232_v57  ;;  %v898_v57 = vld [vmem:[%s9612_s30 + $0xe30] sm:$0xff] }
 0x37a   : > { %v10552_v13 = vadd.f32 %v7347_v34, %v7306_v1  ;;  %v7349_v14 = vpop.f32.mrb[33].mxu1  ;;  %v7311_v21 = vpop.f32.mrb[35].mxu0  ;;  %7612 = vmatprep.subr.bf16.mxu0 %v8249_v61  ;;  %v8328_v61 = vcombine.low %v626_v45, %v634_v46  ;;  %v8584_v1 = vcombine.low %v882_v47, %v890_v11  ;;  %v666_v34 = vld [vmem:[%s9612_s30 + $0x6f0] sm:$0xff] }
 0x37b   : > { %v10554_v18 = vadd.f32 %v7349_v14, %v7308_v8  ;;  %v7351_v20 = vpop.f32.mrb[34].mxu1  ;;  %7652 = vmatpush1.bf16.msra.mxu1 %v8488_v58  ;;  %v906_v58 = vld [vmem:[%s9612_s30 + $0xe70] sm:$0xff]  ;;  %v8361_v15 = vcombine.high %v658_v5, %v666_v34 }
 0x37c   : > { %v7352_v24 = vpop.f32.mrb[35].mxu1  ;;  %7653 = vmatprep.subr.bf16.mxu1 %v8505_v3  ;;  %v8345_v3 = vcombine.high %v642_v54, %v650_v56  ;;  %v8601_v4 = vcombine.high %v898_v57, %v906_v58  ;;  %v914_v8 = vld [vmem:[%s9612_s30 + $0xeb0] sm:$0xff]  ;;  %v8600_v14 = vcombine.low %v898_v57, %v906_v58 }
 0x37d   : > { %7613 = vmatpush1.bf16.msra.mxu0 %v8248_v17  ;;  %v8617_v17 = vcombine.high %v914_v8, %v922_v10  ;;  %v674_v20 = vld [vmem:[%s9612_s30 + $0x730] sm:$0xff]  ;;  %v8360_v24 = vcombine.low %v658_v5, %v666_v34 }
 0x37e   : > { %7614 = vmatprep.subr.bf16.mxu0 %v8265_v23  ;;  %v682_v21 = vld [vmem:[%s9612_s30 + $0x770] sm:$0xff] }
 0x37f   : > { %7654 = vmatpush1.bf16.msra.mxu1 %v8504_v22  ;;  %v930_v22 = vld [vmem:[%s9612_s30 + $0xf30] sm:$0xff]  ;;  %v8377_v25 = vcombine.high %v674_v20, %v682_v21 }
 0x380   : > { %7655 = vmatprep.subr.bf16.mxu1 %v8521_v63  ;;  %v938_v23 = vld [vmem:[%s9612_s30 + $0xf70] sm:$0xff]  ;;  %v8616_v63 = vcombine.low %v914_v8, %v922_v10 }
 0x381   : > { %7615 = vmatpush1.bf16.msra.mxu0 %v8264_v49  ;;  %v8633_v26 = vcombine.high %v930_v22, %v938_v23  ;;  %v946_v49 = vld [vmem:[%s9612_s30 + $0xfb0] sm:$0xff] }
 0x382   : > { %7616 = vmatprep.subr.bf16.mxu0 %v8281_v29  ;;  %v8376_v29 = vcombine.low %v674_v20, %v682_v21  ;;  %v986_v42 = vld [vmem:[%s9612_s30 + $0x10f0] sm:$0xff] }
 0x383   : > { %7656 = vmatpush1.bf16.msra.mxu1 %v8520_v28  ;;  %v954_v28 = vld [vmem:[%s9612_s30 + $0xff0] sm:$0xff]  ;;  %v8681_v45 = vcombine.high %v978_v41, %v986_v42 }
 0x384   : > { %7657 = vmatprep.subr.bf16.mxu1 %v8537_v30  ;;  %v8632_v30 = vcombine.low %v930_v22, %v938_v23  ;;  %v8649_v53 = vcombine.high %v946_v49, %v954_v28  ;;  %v994_v47 = vld [vmem:[%s9612_s30 + $0x1130] sm:$0xff] }
 0x385   : > { %7617 = vmatpush1.bf16.msra.mxu0 %v8280_v35  ;;  %v1218_v35 = vld [vmem:[%s9612_s30 + $0x1830] sm:$0xff] }
 0x386   : > { %7618 = vmatprep.subr.bf16.mxu0 %v8297_v37  ;;  %v8392_v37 = vcombine.low %v690_v2, %v698_v27  ;;  %v1002_v11 = vld [vmem:[%s9612_s30 + $0x1170] sm:$0xff] }
 0x387   : > { %7658 = vmatpush1.bf16.msra.mxu1 %v8536_v36  ;;  %v1226_v36 = vld [vmem:[%s9612_s30 + $0x1870] sm:$0xff]  ;;  %v8697_v54 = vcombine.high %v994_v47, %v1002_v11 }
 0x388   : > { %7659 = vmatprep.subr.bf16.mxu1 %v8553_v59  ;;  %v8648_v59 = vcombine.low %v946_v49, %v954_v28  ;;  %v8921_v40 = vcombine.high %v1218_v35, %v1226_v36  ;;  %v1010_v57 = vld [vmem:[%s9612_s30 + $0x11b0] sm:$0xff] }
 0x389   : > { %7619 = vmatpush1.bf16.msra.mxu0 %v8296_v43  ;;  %v1234_v43 = vld [vmem:[%s9612_s30 + $0x18b0] sm:$0xff] }
 0x38a   : > { %7620 = vmatprep.subr.bf16.mxu0 %v8313_v6  ;;  %v8664_v6 = vcombine.low %v962_v55, %v970_v32  ;;  %v1018_v58 = vld [vmem:[%s9612_s30 + $0x11f0] sm:$0xff] }
 0x38b   : > { %7660 = vmatpush1.bf16.msra.mxu1 %v8552_v33  ;;  %v1242_v33 = vld [vmem:[%s9612_s30 + $0x18f0] sm:$0xff]  ;;  %v8713_v5 = vcombine.high %v1010_v57, %v1018_v58 }
 0x38c   : > { %7661 = vmatprep.subr.bf16.mxu1 %v8569_v44  ;;  %v8920_v44 = vcombine.low %v1218_v35, %v1226_v36  ;;  %v8937_v46 = vcombine.high %v1234_v43, %v1242_v33  ;;  %v1026_v8 = vld [vmem:[%s9612_s30 + $0x1230] sm:$0xff] }
 0x38d   : > { %7621 = vmatpush1.bf16.msra.mxu0 %v8312_v48  ;;  %v1250_v48 = vld [vmem:[%s9612_s30 + $0x1930] sm:$0xff] }
 0x38e   : > { %7622 = vmatprep.subr.bf16.mxu0 %v8329_v51  ;;  %v8680_v51 = vcombine.low %v978_v41, %v986_v42  ;;  %v1034_v10 = vld [vmem:[%s9612_s30 + $0x1270] sm:$0xff] }
 0x38f   : > { %7662 = vmatpush1.bf16.msra.mxu1 %v8568_v50  ;;  %v1258_v50 = vld [vmem:[%s9612_s30 + $0x1970] sm:$0xff]  ;;  %v8729_v20 = vcombine.high %v1026_v8, %v1034_v10 }
 0x390   : > { %7663 = vmatprep.subr.bf16.mxu1 %v8585_v52  ;;  %v8936_v52 = vcombine.low %v1234_v43, %v1242_v33  ;;  %v8953_v56 = vcombine.high %v1250_v48, %v1258_v50  ;;  %v1042_v22 = vld [vmem:[%s9612_s30 + $0x12b0] sm:$0xff]  ;;  %v432_v43 = vld [vmem:[#allocation2 + $0x40] sm:$0xff] }
 0x391   : > { %7623 = vmatpush1.bf16.msra.mxu0 %v8328_v61  ;;  %v1266_v61 = vld [vmem:[%s9612_s30 + $0x19b0] sm:$0xff] }
 0x392   : > { %7624 = vmatprep.subr.bf16.mxu0 %v8345_v3  ;;  %v8696_v3 = vcombine.low %v994_v47, %v1002_v11  ;;  %v1050_v23 = vld [vmem:[%s9612_s30 + $0x12f0] sm:$0xff]  ;;  %v433_v47 = vld [vmem:[#allocation2 + $0x48] sm:$0xff] }
 0x393   : > { %7664 = vmatpush1.bf16.msra.mxu1 %v8584_v1  ;;  %v1274_v1 = vld [vmem:[%s9612_s30 + $0x19f0] sm:$0xff]  ;;  %v8745_v2 = vcombine.high %v1042_v22, %v1050_v23 }
 0x394   : > { %7665 = vmatprep.subr.bf16.mxu1 %v8601_v4  ;;  %v8952_v4 = vcombine.low %v1250_v48, %v1258_v50  ;;  %v8969_v34 = vcombine.high %v1266_v61, %v1274_v1  ;;  %v1058_v49 = vld [vmem:[%s9612_s30 + $0x1330] sm:$0xff] }
 0x395   : > { %7625 = vmatpush1.bf16.msra.mxu0 %v8344_v12  ;;  %v1282_v12 = vld [vmem:[%s9612_s30 + $0x1a30] sm:$0xff] }
 0x396   : > { %7626 = vmatprep.subr.bf16.mxu0 %v8361_v15  ;;  %v8712_v15 = vcombine.low %v1010_v57, %v1018_v58  ;;  %v1066_v28 = vld [vmem:[%s9612_s30 + $0x1370] sm:$0xff] }
 0x397   : > { %7666 = vmatpush1.bf16.msra.mxu1 %v8600_v14  ;;  %v1290_v14 = vld [vmem:[%s9612_s30 + $0x1a70] sm:$0xff]  ;;  %v8761_v55 = vcombine.high %v1058_v49, %v1066_v28 }
 0x398   : > { %7667 = vmatprep.subr.bf16.mxu1 %v8617_v17  ;;  %v8968_v17 = vcombine.low %v1266_v61, %v1274_v1  ;;  %v8985_v21 = vcombine.high %v1282_v12, %v1290_v14  ;;  %v1074_v36 = vld [vmem:[%s9612_s30 + $0x13b0] sm:$0xff] }
 0x399   : > { %7627 = vmatpush1.bf16.msra.mxu0 %v8360_v24  ;;  %v1298_v24 = vld [vmem:[%s9612_s30 + $0x1ab0] sm:$0xff] }
 0x39a   : > { %7628 = vmatprep.subr.bf16.mxu0 %v8377_v25  ;;  %v8728_v25 = vcombine.low %v1026_v8, %v1034_v10  ;;  %v1330_v41 = vld [vmem:[%s9612_s30 + $0x1bb0] sm:$0xff] }
 0x39b   : > { %7668 = vmatpush1.bf16.msra.mxu1 %v8616_v63  ;;  %v1306_v63 = vld [vmem:[%s9612_s30 + $0x1af0] sm:$0xff] }
 0x39c   : > { %7669 = vmatprep.subr.bf16.mxu1 %v8633_v26  ;;  %v8984_v26 = vcombine.low %v1282_v12, %v1290_v14  ;;  %v9001_v27 = vcombine.high %v1298_v24, %v1306_v63  ;;  %v1338_v42 = vld [vmem:[%s9612_s30 + $0x1bf0] sm:$0xff] }
 0x39d   : > { %7629 = vmatpush1.bf16.msra.mxu0 %v8376_v29  ;;  %v1314_v29 = vld [vmem:[%s9612_s30 + $0x1b30] sm:$0xff] }
 0x39e   : > { %7630 = vmatprep.subr.bf16.mxu0 %v8393_v31  ;;  %v8744_v31 = vcombine.low %v1042_v22, %v1050_v23  ;;  %v1346_v58 = vld [vmem:[%s9612_s30 + $0x1c30] sm:$0xff] }
 0x39f   : > { %7670 = vmatpush1.bf16.msra.mxu1 %v8632_v30  ;;  %v1322_v30 = vld [vmem:[%s9612_s30 + $0x1b70] sm:$0xff] }
 0x3a0   : > { %7671 = vmatprep.subr.bf16.mxu1 %v8649_v53  ;;  %v9000_v53 = vcombine.low %v1298_v24, %v1306_v63  ;;  %v9017_v35 = vcombine.high %v1314_v29, %v1322_v30  ;;  %v9016_v48 = vcombine.low %v1314_v29, %v1322_v30  ;;  %v1354_v61 = vld [vmem:[%s9612_s30 + $0x1c70] sm:$0xff] }
 0x3a1   : > { %7631 = vmatpush1.bf16.msra.mxu0 %v8392_v37  ;;  %v1082_v37 = vld [vmem:[%s9612_s30 + $0x13f0] sm:$0xff] }
 0x3a2   : > { %7682 = vmatprep.subr.bf16.mxu0 %v8665_v62  ;;  %v8777_v50 = vcombine.high %v1074_v36, %v1082_v37  ;;  %v1106_v8 = vld [vmem:[%s9612_s30 + $0x14b0] sm:$0xff] }
 0x3a3   : > { %7672 = vmatpush1.bf16.msra.mxu1 %v8648_v59  ;;  %v1114_v10 = vld [vmem:[%s9612_s30 + $0x14f0] sm:$0xff] }
 0x3a4   : > { %7723 = vmatprep.subr.bf16.mxu1 %v8921_v40  ;;  %7633 = vmatmul.mubr.bf16.vlgmr.msra.gmra.mrb[48].mxu0 %v9722_v60  ;;  %v1362_v12 = vld [vmem:[%s9612_s30 + $0x1cb0] sm:$0xff] }
 0x3a5   : > { %7683 = vmatpush1.bf16.msra.mxu0 %v8664_v6  ;;  %7714 = vmatprep.mubr.bf16.mxu0 %v9740_v7  ;;  %v1370_v14 = vld [vmem:[%s9612_s30 + $0x1cf0] sm:$0xff] }
 0x3a6   : > { %7674 = vmatmul.mubr.bf16.vlgmr.msra.gmra.mrb[48].mxu1 %v9731_v0  ;;  %7684 = vmatprep.subr.bf16.mxu0 %v8681_v45  ;;  %v8760_v45 = vcombine.low %v1058_v49, %v1066_v28  ;;  %v1122_v22 = vld [vmem:[%s9612_s30 + $0x1530] sm:$0xff] }
 0x3a7   : > { %7724 = vmatpush1.bf16.msra.mxu1 %v8920_v44  ;;  %7755 = vmatprep.mubr.bf16.mxu1 %v9747_v9  ;;  %v1130_v23 = vld [vmem:[%s9612_s30 + $0x1570] sm:$0xff] }
 0x3a8   : > { %7725 = vmatprep.subr.bf16.mxu1 %v8937_v46  ;;  %v1378_v24 = vld [vmem:[%s9612_s30 + $0x1d30] sm:$0xff] }
 0x3a9   : > { %7685 = vmatpush1.bf16.msra.mxu0 %v8680_v51  ;;  %v1386_v63 = vld [vmem:[%s9612_s30 + $0x1d70] sm:$0xff] }
 0x3aa   : > { %7686 = vmatprep.subr.bf16.mxu0 %v8697_v54  ;;  %v1090_v54 = vld [vmem:[%s9612_s30 + $0x1430] sm:$0xff] }
 0x3ab   : > { %7726 = vmatpush1.bf16.msra.mxu1 %v8936_v52  ;;  %v1138_v49 = vld [vmem:[%s9612_s30 + $0x15b0] sm:$0xff] }
 0x3ac   : > { %7727 = vmatprep.subr.bf16.mxu1 %v8953_v56  ;;  %v1098_v56 = vld [vmem:[%s9612_s30 + $0x1470] sm:$0xff] }
 0x3ad   : > { %7687 = vmatpush1.bf16.msra.mxu0 %v8696_v3  ;;  %v8776_v3 = vcombine.low %v1074_v36, %v1082_v37  ;;  %v1146_v28 = vld [vmem:[%s9612_s30 + $0x15f0] sm:$0xff] }
 0x3ae   : > { %7688 = vmatprep.subr.bf16.mxu0 %v8713_v5  ;;  %v8793_v5 = vcombine.high %v1090_v54, %v1098_v56  ;;  %v1394_v29 = vld [vmem:[%s9612_s30 + $0x1db0] sm:$0xff] }
 0x3af   : > { %7728 = vmatpush1.bf16.msra.mxu1 %v8952_v4  ;;  %v9032_v4 = vcombine.low %v1330_v41, %v1338_v42  ;;  %v1402_v30 = vld [vmem:[%s9612_s30 + $0x1df0] sm:$0xff] }
 0x3b0   : > { %7729 = vmatprep.subr.bf16.mxu1 %v8969_v34  ;;  %v9049_v34 = vcombine.high %v1346_v58, %v1354_v61  ;;  %v1162_v36 = vld [vmem:[%s9612_s30 + $0x1670] sm:$0xff] }
 0x3b1   : > { %7689 = vmatpush1.bf16.msra.mxu0 %v8712_v15  ;;  %v8792_v15 = vcombine.low %v1090_v54, %v1098_v56  ;;  %v1410_v37 = vld [vmem:[%s9612_s30 + $0x1e30] sm:$0xff] }
 0x3b2   : > { %7690 = vmatprep.subr.bf16.mxu0 %v8729_v20  ;;  %v8809_v20 = vcombine.high %v1106_v8, %v1114_v10 }
 0x3b3   : > { %7730 = vmatpush1.bf16.msra.mxu1 %v8968_v17  ;;  %v9048_v17 = vcombine.low %v1346_v58, %v1354_v61  ;;  %v1210_v58 = vld [vmem:[%s9612_s30 + $0x17f0] sm:$0xff] }
 0x3b4   : > { %7731 = vmatprep.subr.bf16.mxu1 %v8985_v21  ;;  %v9065_v21 = vcombine.high %v1362_v12, %v1370_v14  ;;  %v1458_v61 = vld [vmem:[%s9612_s30 + $0x1fb0] sm:$0xff] }
 0x3b5   : > { %7691 = vmatpush1.bf16.msra.mxu0 %v8728_v25  ;;  %v8808_v25 = vcombine.low %v1106_v8, %v1114_v10  ;;  %v451_v8 = vld [vmem:[%s9612_s30 + $0x38] sm:$0xff] }
 0x3b6   : > { %7692 = vmatprep.subr.bf16.mxu0 %v8745_v2  ;;  %v8825_v2 = vcombine.high %v1122_v22, %v1130_v23  ;;  %v459_v10 = vld [vmem:[%s9612_s30 + $0x78] sm:$0xff] }
 0x3b7   : > { %7732 = vmatpush1.bf16.msra.mxu1 %v8984_v26  ;;  %v7388_v32 = vpop.f32.mrb[36].mxu0  ;;  %v9064_v26 = vcombine.low %v1362_v12, %v1370_v14  ;;  %v707_v12 = vld [vmem:[%s9612_s30 + $0x838] sm:$0xff] }
 0x3b8   : > { %7733 = vmatprep.subr.bf16.mxu1 %v9001_v27  ;;  %v7389_v59 = vadd.f32 %v7388_v32, %v10552_v13  ;;  %v7390_v40 = vpop.f32.mrb[37].mxu0  ;;  %v9081_v27 = vcombine.high %v1378_v24, %v1386_v63  ;;  %v9097_v32 = vcombine.high %v1394_v29, %v1402_v30  ;;  %v715_v14 = vld [vmem:[%s9612_s30 + $0x878] sm:$0xff] }
 0x3b9   : > { %v7429_v62 = vpop.f32.mrb[36].mxu1  ;;  %v7391_v33 = vadd.f32 %v7390_v40, %v10554_v18  ;;  %v7392_v44 = vpop.f32.mrb[38].mxu0  ;;  %7693 = vmatpush1.bf16.msra.mxu0 %v8744_v31  ;;  %v9033_v18 = vcombine.high %v1330_v41, %v1338_v42  ;;  %v8824_v31 = vcombine.low %v1122_v22, %v1130_v23  ;;  %v9096_v40 = vcombine.low %v1394_v29, %v1402_v30  ;;  %v467_v22 = vld [vmem:[%s9612_s30 + $0xb8] sm:$0xff] }
 0x3ba   : > { %v7431_v6 = vpop.f32.mrb[37].mxu1  ;;  %v7430_v46 = vadd.f32 %v7429_v62, %v7389_v59  ;;  %v7393_v13 = vpop.f32.mrb[39].mxu0  ;;  %7694 = vmatprep.subr.bf16.mxu0 %v8761_v55  ;;  %v8841_v55 = vcombine.high %v1138_v49, %v1146_v28  ;;  %v1418_v59 = vld [vmem:[%s9612_s30 + $0x1e70] sm:$0xff]  ;;  %v8840_v62 = vcombine.low %v1138_v49, %v1146_v28  ;;  %v475_v23 = vld [vmem:[%s9612_s30 + $0xf8] sm:$0xff] }
 0x3bb   : > { %v7433_v11 = vpop.f32.mrb[38].mxu1  ;;  %7734 = vmatpush1.bf16.msra.mxu1 %v9000_v53  ;;  %v7432_v51 = vadd.f32 %v7431_v6, %v7391_v33  ;;  %v9080_v53 = vcombine.low %v1378_v24, %v1386_v63  ;;  %v9113_v42 = vcombine.high %v1410_v37, %v1418_v59  ;;  %v1178_v33 = vld [vmem:[%s9612_s30 + $0x16f0] sm:$0xff]  ;;  %v723_v24 = vld [vmem:[%s9612_s30 + $0x8b8] sm:$0xff] }
 0x3bc   : > { %v7434_v52 = vpop.f32.mrb[39].mxu1  ;;  %7735 = vmatprep.subr.bf16.mxu1 %v9017_v35  ;;  %v7936_v57 = vadd.f32 %v7430_v46, %v432_v43  ;;  %v1154_v35 = vld [vmem:[%s9612_s30 + $0x1630] sm:$0xff]  ;;  %v9112_v46 = vcombine.low %v1410_v37, %v1418_v59  ;;  %v731_v63 = vld [vmem:[%s9612_s30 + $0x8f8] sm:$0xff] }
 0x3bd   : > { %v7937_v1 = vadd.f32 %v7432_v51, %v433_v47  ;;  %7695 = vmatpush1.bf16.msra.mxu0 %v8760_v45  ;;  %v8857_v41 = vcombine.high %v1154_v35, %v1162_v36  ;;  %v1170_v43 = vld [vmem:[%s9612_s30 + $0x16b0] sm:$0xff]  ;;  %v8856_v45 = vcombine.low %v1154_v35, %v1162_v36  ;;  %v483_v49 = vld [vmem:[%s9612_s30 + $0x138] sm:$0xff] }
 0x3be   : > { %7952 = vst [vmem:[#allocation2 + $0x40] sm:$0xff] %v7936_v57  ;;  %7696 = vmatprep.subr.bf16.mxu0 %v8777_v50  ;;  %v1426_v6 = vld [vmem:[%s9612_s30 + $0x1eb0] sm:$0xff]  ;;  %v8873_v47 = vcombine.high %v1170_v43, %v1178_v33  ;;  %v8872_v52 = vcombine.low %v1170_v43, %v1178_v33  ;;  %v491_v28 = vld [vmem:[%s9612_s30 + $0x178] sm:$0xff] }
 0x3bf   : > { %7736 = vmatpush1.bf16.msra.mxu1 %v9016_v48  ;;  %7953 = vst [vmem:[#allocation2 + $0x48] sm:$0xff] %v7937_v1  ;;  %v1434_v44 = vld [vmem:[%s9612_s30 + $0x1ef0] sm:$0xff]  ;;  %v739_v29 = vld [vmem:[%s9612_s30 + $0x938] sm:$0xff] }
 0x3c0   : > { %7737 = vmatprep.subr.bf16.mxu1 %v9033_v18  ;;  %v9129_v11 = vcombine.high %v1426_v6, %v1434_v44  ;;  %v1186_v13 = vld [vmem:[%s9612_s30 + $0x1730] sm:$0xff]  ;;  %v9128_v18 = vcombine.low %v1426_v6, %v1434_v44  ;;  %v747_v30 = vld [vmem:[%s9612_s30 + $0x978] sm:$0xff] }
 0x3c1   : > { %7697 = vmatpush1.bf16.msra.mxu0 %v8776_v3  ;;  %v1194_v48 = vld [vmem:[%s9612_s30 + $0x1770] sm:$0xff]  ;;  %v499_v35 = vld [vmem:[%s9612_s30 + $0x1b8] sm:$0xff] }
 0x3c2   : > { %7698 = vmatprep.subr.bf16.mxu0 %v8793_v5  ;;  %v1442_v50 = vld [vmem:[%s9612_s30 + $0x1f30] sm:$0xff]  ;;  %v8889_v54 = vcombine.high %v1186_v13, %v1194_v48  ;;  %v8888_v3 = vcombine.low %v1186_v13, %v1194_v48  ;;  %v507_v36 = vld [vmem:[%s9612_s30 + $0x1f8] sm:$0xff] }
 0x3c3   : > { %7738 = vmatpush1.bf16.msra.mxu1 %v9032_v4  ;;  %v1450_v51 = vld [vmem:[%s9612_s30 + $0x1f70] sm:$0xff]  ;;  %v755_v37 = vld [vmem:[%s9612_s30 + $0x9b8] sm:$0xff]  ;;  %v8202_v44 = vcombine.low %v499_v35, %v507_v36 }
 0x3c4   : > { %7739 = vmatprep.subr.bf16.mxu1 %v9049_v34  ;;  %v9145_v56 = vcombine.high %v1442_v50, %v1450_v51  ;;  %v1202_v57 = vld [vmem:[%s9612_s30 + $0x17b0] sm:$0xff]  ;;  %v9144_v4 = vcombine.low %v1442_v50, %v1450_v51  ;;  %v763_v59 = vld [vmem:[%s9612_s30 + $0x9f8] sm:$0xff] }
 0x3c5   : > { %7699 = vmatpush1.bf16.msra.mxu0 %v8792_v15  ;;  %v1466_v1 = vld [vmem:[%s9612_s30 + $0x1ff0] sm:$0xff]  ;;  %v8905_v5 = vcombine.high %v1202_v57, %v1210_v58  ;;  %v8904_v15 = vcombine.low %v1202_v57, %v1210_v58  ;;  %v515_v43 = vld [vmem:[%s9612_s30 + $0x238] sm:$0xff] }
 0x3c6   : > { %7700 = vmatprep.subr.bf16.mxu0 %v8809_v20  ;;  %v9161_v34 = vcombine.high %v1458_v61, %v1466_v1  ;;  %v8155_v20 = vcombine.high %v451_v8, %v459_v10  ;;  %v523_v33 = vld [vmem:[%s9612_s30 + $0x278] sm:$0xff] }
 0x3c7   : > { %7740 = vmatpush1.bf16.msra.mxu1 %v9048_v17  ;;  %v9160_v17 = vcombine.low %v1458_v61, %v1466_v1  ;;  %v771_v6 = vld [vmem:[%s9612_s30 + $0xa38] sm:$0xff]  ;;  %v8218_v50 = vcombine.low %v515_v43, %v523_v33 }
 0x3c8   : > { %7741 = vmatprep.subr.bf16.mxu1 %v9065_v21  ;;  %v8411_v21 = vcombine.high %v707_v12, %v715_v14  ;;  %v787_v13 = vld [vmem:[%s9612_s30 + $0xab8] sm:$0xff] }
 0x3c9   : > { %7701 = vmatpush1.bf16.msra.mxu0 %v8808_v25  ;;  %v8154_v25 = vcombine.low %v451_v8, %v459_v10  ;;  %v795_v48 = vld [vmem:[%s9612_s30 + $0xaf8] sm:$0xff] }
 0x3ca   : > { %7702 = vmatprep.subr.bf16.mxu0 %v8825_v2  ;;  %v8171_v2 = vcombine.high %v467_v22, %v475_v23  ;;  %v803_v57 = vld [vmem:[%s9612_s30 + $0xb38] sm:$0xff]  ;;  %v8490_v1 = vcombine.low %v787_v13, %v795_v48 }
 0x3cb   : > { %7742 = vmatpush1.bf16.msra.mxu1 %v9064_v26  ;;  %v8410_v26 = vcombine.low %v707_v12, %v715_v14  ;;  %v811_v58 = vld [vmem:[%s9612_s30 + $0xb78] sm:$0xff] }
 0x3cc   : > { %7743 = vmatprep.subr.bf16.mxu1 %v9081_v27  ;;  %v8427_v27 = vcombine.high %v723_v24, %v731_v63  ;;  %v571_v8 = vld [vmem:[%s9612_s30 + $0x3f8] sm:$0xff] }
 0x3cd   : > { %7703 = vmatpush1.bf16.msra.mxu0 %v8824_v31  ;;  %v8170_v31 = vcombine.low %v467_v22, %v475_v23  ;;  %v819_v14 = vld [vmem:[%s9612_s30 + $0xbb8] sm:$0xff] }
 0x3ce   : > { %7704 = vmatprep.subr.bf16.mxu0 %v8841_v55  ;;  %v8187_v55 = vcombine.high %v483_v49, %v491_v28 }
 0x3cf   : > { %7744 = vmatpush1.bf16.msra.mxu1 %v9080_v53  ;;  %v8426_v53 = vcombine.low %v723_v24, %v731_v63 }
 0x3d0   : > { %7745 = vmatprep.subr.bf16.mxu1 %v9097_v32  ;;  %v8443_v32 = vcombine.high %v739_v29, %v747_v30 }
 0x3d1   : > { %7705 = vmatpush1.bf16.msra.mxu0 %v8840_v62  ;;  %v8186_v62 = vcombine.low %v483_v49, %v491_v28  ;;  %v579_v49 = vld [vmem:[%s9612_s30 + $0x438] sm:$0xff] }
 0x3d2   : > { %7706 = vmatprep.subr.bf16.mxu0 %v8857_v41  ;;  %v8203_v41 = vcombine.high %v499_v35, %v507_v36  ;;  %v587_v28 = vld [vmem:[%s9612_s30 + $0x478] sm:$0xff] }
 0x3d3   : > { %7746 = vmatpush1.bf16.msra.mxu1 %v9096_v40  ;;  %v8442_v40 = vcombine.low %v739_v29, %v747_v30  ;;  %v835_v29 = vld [vmem:[%s9612_s30 + $0xc38] sm:$0xff] }
 0x3d4   : > { %7747 = vmatprep.subr.bf16.mxu1 %v9113_v42  ;;  %v8459_v42 = vcombine.high %v755_v37, %v763_v59  ;;  %v843_v30 = vld [vmem:[%s9612_s30 + $0xc78] sm:$0xff] }
 0x3d5   : > { %7707 = vmatpush1.bf16.msra.mxu0 %v8856_v45  ;;  %v8219_v45 = vcombine.high %v515_v43, %v523_v33  ;;  %v595_v35 = vld [vmem:[%s9612_s30 + $0x4b8] sm:$0xff] }
 0x3d6   : > { %7708 = vmatprep.subr.bf16.mxu0 %v8873_v47  ;;  %v531_v47 = vld [vmem:[%s9612_s30 + $0x2b8] sm:$0xff] }
 0x3d7   : > { %7748 = vmatpush1.bf16.msra.mxu1 %v9112_v46  ;;  %v603_v36 = vld [vmem:[%s9612_s30 + $0x4f8] sm:$0xff] }
 0x3d8   : > { %7749 = vmatprep.subr.bf16.mxu1 %v9129_v11  ;;  %v539_v11 = vld [vmem:[%s9612_s30 + $0x2f8] sm:$0xff] }
 0x3d9   : > { %7709 = vmatpush1.bf16.msra.mxu0 %v8872_v52  ;;  %v8235_v52 = vcombine.high %v531_v47, %v539_v11  ;;  %v8234_v61 = vcombine.low %v531_v47, %v539_v11  ;;  %v611_v43 = vld [vmem:[%s9612_s30 + $0x538] sm:$0xff] }
 0x3da   : > { %7710 = vmatprep.subr.bf16.mxu0 %v8889_v54  ;;  %v547_v54 = vld [vmem:[%s9612_s30 + $0x338] sm:$0xff] }
 0x3db   : > { %7750 = vmatpush1.bf16.msra.mxu1 %v9128_v18  ;;  %v8491_v18 = vcombine.high %v787_v13, %v795_v48  ;;  %v619_v33 = vld [vmem:[%s9612_s30 + $0x578] sm:$0xff] }
 0x3dc   : > { %7751 = vmatprep.subr.bf16.mxu1 %v9145_v56  ;;  %v555_v56 = vld [vmem:[%s9612_s30 + $0x378] sm:$0xff] }
 0x3dd   : > { %7711 = vmatpush1.bf16.msra.mxu0 %v8888_v3  ;;  %v8251_v3 = vcombine.high %v547_v54, %v555_v56  ;;  %v8250_v22 = vcombine.low %v547_v54, %v555_v56  ;;  %v627_v47 = vld [vmem:[%s9612_s30 + $0x5b8] sm:$0xff] }
 0x3de   : > { %7712 = vmatprep.subr.bf16.mxu0 %v8905_v5  ;;  %v8507_v5 = vcombine.high %v803_v57, %v811_v58  ;;  %v635_v11 = vld [vmem:[%s9612_s30 + $0x5f8] sm:$0xff] }
 0x3df   : > { %7752 = vmatpush1.bf16.msra.mxu1 %v9144_v4  ;;  %v883_v13 = vld [vmem:[%s9612_s30 + $0xdb8] sm:$0xff] }
 0x3e0   : > { %7753 = vmatprep.subr.bf16.mxu1 %v9161_v34  ;;  %v563_v34 = vld [vmem:[%s9612_s30 + $0x3b8] sm:$0xff] }
 0x3e1   : > { %7713 = vmatpush1.bf16.msra.mxu0 %v8904_v15  ;;  %v827_v15 = vld [vmem:[%s9612_s30 + $0xbf8] sm:$0xff] }
 0x3e2   : > { %7764 = vmatprep.subr.bf16.mxu0 %v8155_v20  ;;  %v891_v48 = vld [vmem:[%s9612_s30 + $0xdf8] sm:$0xff] }
 0x3e3   : > { %7754 = vmatpush1.bf16.msra.mxu1 %v9160_v17  ;;  %v643_v54 = vld [vmem:[%s9612_s30 + $0x638] sm:$0xff] }
 0x3e4   : > { %7805 = vmatprep.subr.bf16.mxu1 %v8411_v21  ;;  %7715 = vmatmul.mubr.bf16.vlgmr.msra.gmra.mrb[52].mxu0 %v9812_v16  ;;  %v651_v56 = vld [vmem:[%s9612_s30 + $0x678] sm:$0xff] }
 0x3e5   : > { %7765 = vmatpush1.bf16.msra.mxu0 %v8154_v25  ;;  %7796 = vmatprep.mubr.bf16.mxu0 %v9672_v38  ;;  %v779_v38 = vld [vmem:[%s9612_s30 + $0xa78] sm:$0xff]  ;;  %v8506_v25 = vcombine.low %v803_v57, %v811_v58 }
 0x3e6   : > { %7756 = vmatmul.mubr.bf16.vlgmr.msra.gmra.mrb[52].mxu1 %v9818_v19  ;;  %7766 = vmatprep.subr.bf16.mxu0 %v8171_v2  ;;  %v8475_v46 = vcombine.high %v771_v6, %v779_v38  ;;  %v8474_v51 = vcombine.low %v771_v6, %v779_v38  ;;  %v867_v6 = vld [vmem:[%s9612_s30 + $0xd38] sm:$0xff] }
 0x3e7   : > { %7806 = vmatpush1.bf16.msra.mxu1 %v8410_v26  ;;  %7837 = vmatprep.mubr.bf16.mxu1 %v9676_v39  ;;  %v8458_v39 = vcombine.low %v755_v37, %v763_v59  ;;  %v8267_v26 = vcombine.high %v563_v34, %v571_v8  ;;  %v851_v37 = vld [vmem:[%s9612_s30 + $0xcb8] sm:$0xff] }
 0x3e8   : > { %7807 = vmatprep.subr.bf16.mxu1 %v8427_v27  ;;  %v8523_v27 = vcombine.high %v819_v14, %v827_v15  ;;  %v859_v59 = vld [vmem:[%s9612_s30 + $0xcf8] sm:$0xff] }
 0x3e9   : > { %7767 = vmatpush1.bf16.msra.mxu0 %v8170_v31  ;;  %v8266_v31 = vcombine.low %v563_v34, %v571_v8  ;;  %v875_v38 = vld [vmem:[%s9612_s30 + $0xd78] sm:$0xff] }
 0x3ea   : > { %7768 = vmatprep.subr.bf16.mxu0 %v8187_v55  ;;  %v8283_v55 = vcombine.high %v579_v49, %v587_v28  ;;  %v899_v57 = vld [vmem:[%s9612_s30 + $0xe38] sm:$0xff] }
 0x3eb   : > { %7808 = vmatpush1.bf16.msra.mxu1 %v8426_v53  ;;  %v8522_v53 = vcombine.low %v819_v14, %v827_v15  ;;  %v907_v58 = vld [vmem:[%s9612_s30 + $0xe78] sm:$0xff] }
 0x3ec   : > { %7809 = vmatprep.subr.bf16.mxu1 %v8443_v32  ;;  %v8539_v32 = vcombine.high %v835_v29, %v843_v30  ;;  %v667_v34 = vld [vmem:[%s9612_s30 + $0x6f8] sm:$0xff]  ;;  %v8602_v14 = vcombine.low %v899_v57, %v907_v58 }
 0x3ed   : > { %7769 = vmatpush1.bf16.msra.mxu0 %v8186_v62  ;;  %v8282_v62 = vcombine.low %v579_v49, %v587_v28  ;;  %v915_v8 = vld [vmem:[%s9612_s30 + $0xeb8] sm:$0xff] }
 0x3ee   : > { %7770 = vmatprep.subr.bf16.mxu0 %v8203_v41  ;;  %v8299_v41 = vcombine.high %v595_v35, %v603_v36  ;;  %v691_v49 = vld [vmem:[%s9612_s30 + $0x7b8] sm:$0xff] }
 0x3ef   : > { %7810 = vmatpush1.bf16.msra.mxu1 %v8442_v40  ;;  %v8538_v40 = vcombine.low %v835_v29, %v843_v30  ;;  %v699_v28 = vld [vmem:[%s9612_s30 + $0x7f8] sm:$0xff] }
 0x3f0   : > { %7811 = vmatprep.subr.bf16.mxu1 %v8459_v42  ;;  %v8555_v42 = vcombine.high %v851_v37, %v859_v59  ;;  %v947_v29 = vld [vmem:[%s9612_s30 + $0xfb8] sm:$0xff] }
 0x3f1   : > { %7771 = vmatpush1.bf16.msra.mxu0 %v8202_v44  ;;  %v8298_v44 = vcombine.low %v595_v35, %v603_v36  ;;  %v955_v30 = vld [vmem:[%s9612_s30 + $0xff8] sm:$0xff] }
 0x3f2   : > { %7772 = vmatprep.subr.bf16.mxu0 %v8219_v45  ;;  %v8315_v45 = vcombine.high %v611_v43, %v619_v33  ;;  %v963_v35 = vld [vmem:[%s9612_s30 + $0x1038] sm:$0xff] }
 0x3f3   : > { %7812 = vmatpush1.bf16.msra.mxu1 %v8458_v39  ;;  %v8554_v39 = vcombine.low %v851_v37, %v859_v59  ;;  %v971_v36 = vld [vmem:[%s9612_s30 + $0x1078] sm:$0xff] }
 0x3f4   : > { %7813 = vmatprep.subr.bf16.mxu1 %v8475_v46  ;;  %v8571_v46 = vcombine.high %v867_v6, %v875_v38  ;;  %v1219_v37 = vld [vmem:[%s9612_s30 + $0x1838] sm:$0xff] }
 0x3f5   : > { %7773 = vmatpush1.bf16.msra.mxu0 %v8218_v50  ;;  %v8314_v50 = vcombine.low %v611_v43, %v619_v33  ;;  %v1227_v59 = vld [vmem:[%s9612_s30 + $0x1878] sm:$0xff] }
 0x3f6   : > { %7774 = vmatprep.subr.bf16.mxu0 %v8235_v52  ;;  %v8331_v52 = vcombine.high %v627_v47, %v635_v11  ;;  %v979_v43 = vld [vmem:[%s9612_s30 + $0x10b8] sm:$0xff] }
 0x3f7   : > { %7814 = vmatpush1.bf16.msra.mxu1 %v8474_v51  ;;  %v7470_v4 = vpop.f32.mrb[40].mxu0  ;;  %v8570_v51 = vcombine.low %v867_v6, %v875_v38  ;;  %v987_v33 = vld [vmem:[%s9612_s30 + $0x10f8] sm:$0xff] }
 0x3f8   : > { %7815 = vmatprep.subr.bf16.mxu1 %v8491_v18  ;;  %v7472_v12 = vpop.f32.mrb[41].mxu0  ;;  %v8587_v18 = vcombine.high %v883_v13, %v891_v48  ;;  %v1235_v6 = vld [vmem:[%s9612_s30 + $0x18b8] sm:$0xff] }
 0x3f9   : > { %v7511_v10 = vpop.f32.mrb[40].mxu1  ;;  %v7474_v21 = vpop.f32.mrb[42].mxu0  ;;  %7775 = vmatpush1.bf16.msra.mxu0 %v8234_v61  ;;  %v8330_v61 = vcombine.low %v627_v47, %v635_v11  ;;  %v1243_v38 = vld [vmem:[%s9612_s30 + $0x18f8] sm:$0xff] }
 0x3fa   : > { %v10694_v17 = vadd.f32 %v7511_v10, %v7470_v4  ;;  %v7513_v20 = vpop.f32.mrb[41].mxu1  ;;  %v7475_v63 = vpop.f32.mrb[43].mxu0  ;;  %7776 = vmatprep.subr.bf16.mxu0 %v8251_v3  ;;  %v8347_v3 = vcombine.high %v643_v54, %v651_v56  ;;  %v8603_v4 = vcombine.high %v899_v57, %v907_v58  ;;  %v923_v10 = vld [vmem:[%s9612_s30 + $0xef8] sm:$0xff] }
 0x3fb   : > { %v10696_v23 = vadd.f32 %v7513_v20, %v7472_v12  ;;  %v7515_v24 = vpop.f32.mrb[42].mxu1  ;;  %7816 = vmatpush1.bf16.msra.mxu1 %v8490_v1  ;;  %v8586_v1 = vcombine.low %v883_v13, %v891_v48  ;;  %v8346_v12 = vcombine.low %v643_v54, %v651_v56  ;;  %v8619_v20 = vcombine.high %v915_v8, %v923_v10  ;;  %v675_v21 = vld [vmem:[%s9612_s30 + $0x738] sm:$0xff] }
 0x3fc   : > { %v7516_v2 = vpop.f32.mrb[43].mxu1  ;;  %7817 = vmatprep.subr.bf16.mxu1 %v8507_v5  ;;  %v659_v5 = vld [vmem:[%s9612_s30 + $0x6b8] sm:$0xff] }
 0x3fd   : > { %7777 = vmatpush1.bf16.msra.mxu0 %v8250_v22  ;;  %v8363_v15 = vcombine.high %v659_v5, %v667_v34  ;;  %v683_v22 = vld [vmem:[%s9612_s30 + $0x778] sm:$0xff] }
 0x3fe   : > { %7778 = vmatprep.subr.bf16.mxu0 %v8267_v26  ;;  %v931_v24 = vld [vmem:[%s9612_s30 + $0xf38] sm:$0xff]  ;;  %v8618_v26 = vcombine.low %v915_v8, %v923_v10  ;;  %v8379_v2 = vcombine.high %v675_v21, %v683_v22 }
 0x3ff   : > { %7818 = vmatpush1.bf16.msra.mxu1 %v8506_v25  ;;  %v939_v63 = vld [vmem:[%s9612_s30 + $0xf78] sm:$0xff]  ;;  %v8362_v25 = vcombine.low %v659_v5, %v667_v34 }
 0x400   : > { %7819 = vmatprep.subr.bf16.mxu1 %v8523_v27  ;;  %v8635_v27 = vcombine.high %v931_v24, %v939_v63  ;;  %v995_v47 = vld [vmem:[%s9612_s30 + $0x1138] sm:$0xff] }
 0x401   : > { %7779 = vmatpush1.bf16.msra.mxu0 %v8266_v31  ;;  %v8378_v31 = vcombine.low %v675_v21, %v683_v22  ;;  %v1003_v11 = vld [vmem:[%s9612_s30 + $0x1178] sm:$0xff] }
 0x402   : > { %7780 = vmatprep.subr.bf16.mxu0 %v8283_v55  ;;  %v8395_v55 = vcombine.high %v691_v49, %v699_v28  ;;  %v1251_v13 = vld [vmem:[%s9612_s30 + $0x1938] sm:$0xff] }
 0x403   : > { %7820 = vmatpush1.bf16.msra.mxu1 %v8522_v53  ;;  %v8634_v53 = vcombine.low %v931_v24, %v939_v63  ;;  %v1259_v48 = vld [vmem:[%s9612_s30 + $0x1978] sm:$0xff] }
 0x404   : > { %7821 = vmatprep.subr.bf16.mxu1 %v8539_v32  ;;  %v8651_v32 = vcombine.high %v947_v29, %v955_v30  ;;  %v1011_v54 = vld [vmem:[%s9612_s30 + $0x11b8] sm:$0xff]  ;;  %v8954_v58 = vcombine.low %v1251_v13, %v1259_v48 }
 0x405   : > { %7781 = vmatpush1.bf16.msra.mxu0 %v8282_v62  ;;  %v8394_v62 = vcombine.low %v691_v49, %v699_v28  ;;  %v1019_v56 = vld [vmem:[%s9612_s30 + $0x11f8] sm:$0xff] }
 0x406   : > { %7782 = vmatprep.subr.bf16.mxu0 %v8299_v41  ;;  %v8667_v41 = vcombine.high %v963_v35, %v971_v36  ;;  %v1275_v57 = vld [vmem:[%s9612_s30 + $0x19f8] sm:$0xff]  ;;  %v8714_v34 = vcombine.low %v1011_v54, %v1019_v56 }
 0x407   : > { %7822 = vmatpush1.bf16.msra.mxu1 %v8538_v40  ;;  %v8650_v40 = vcombine.low %v947_v29, %v955_v30  ;;  %v1283_v5 = vld [vmem:[%s9612_s30 + $0x1a38] sm:$0xff] }
 0x408   : > { %7823 = vmatprep.subr.bf16.mxu1 %v8555_v42  ;;  %v8923_v42 = vcombine.high %v1219_v37, %v1227_v59 }
 0x409   : > { %7783 = vmatpush1.bf16.msra.mxu0 %v8298_v44  ;;  %v8666_v44 = vcombine.low %v963_v35, %v971_v36 }
 0x40a   : > { %7784 = vmatprep.subr.bf16.mxu0 %v8315_v45  ;;  %v8683_v45 = vcombine.high %v979_v43, %v987_v33 }
 0x40b   : > { %7824 = vmatpush1.bf16.msra.mxu1 %v8554_v39  ;;  %v8922_v39 = vcombine.low %v1219_v37, %v1227_v59  ;;  %v1331_v37 = vld [vmem:[%s9612_s30 + $0x1bb8] sm:$0xff] }
 0x40c   : > { %7825 = vmatprep.subr.bf16.mxu1 %v8571_v46  ;;  %v8939_v46 = vcombine.high %v1235_v6, %v1243_v38  ;;  %v1339_v59 = vld [vmem:[%s9612_s30 + $0x1bf8] sm:$0xff] }
 0x40d   : > { %7785 = vmatpush1.bf16.msra.mxu0 %v8314_v50  ;;  %v8682_v50 = vcombine.low %v979_v43, %v987_v33 }
 0x40e   : > { %7786 = vmatprep.subr.bf16.mxu0 %v8331_v52  ;;  %v8699_v52 = vcombine.high %v995_v47, %v1003_v11 }
 0x40f   : > { %7826 = vmatpush1.bf16.msra.mxu1 %v8570_v51  ;;  %v8938_v51 = vcombine.low %v1235_v6, %v1243_v38  ;;  %v435_v6 = vld [vmem:[#allocation2 + $0x58] sm:$0xff] }
 0x410   : > { %7827 = vmatprep.subr.bf16.mxu1 %v8587_v18  ;;  %v8955_v18 = vcombine.high %v1251_v13, %v1259_v48  ;;  %v1347_v48 = vld [vmem:[%s9612_s30 + $0x1c38] sm:$0xff] }
 0x411   : > { %7787 = vmatpush1.bf16.msra.mxu0 %v8330_v61  ;;  %v8715_v61 = vcombine.high %v1011_v54, %v1019_v56 }
 0x412   : > { %7788 = vmatprep.subr.bf16.mxu0 %v8347_v3  ;;  %v1027_v3 = vld [vmem:[%s9612_s30 + $0x1238] sm:$0xff] }
 0x413   : > { %7828 = vmatpush1.bf16.msra.mxu1 %v8586_v1 }
 0x414   : > { %7829 = vmatprep.subr.bf16.mxu1 %v8603_v4  ;;  %v1035_v4 = vld [vmem:[%s9612_s30 + $0x1278] sm:$0xff] }
 0x415   : > { %7789 = vmatpush1.bf16.msra.mxu0 %v8346_v12  ;;  %v8731_v8 = vcombine.high %v1027_v3, %v1035_v4  ;;  %v1043_v12 = vld [vmem:[%s9612_s30 + $0x12b8] sm:$0xff]  ;;  %v8730_v21 = vcombine.low %v1027_v3, %v1035_v4 }
 0x416   : > { %7790 = vmatprep.subr.bf16.mxu0 %v8363_v15  ;;  %v1299_v15 = vld [vmem:[%s9612_s30 + $0x1ab8] sm:$0xff] }
 0x417   : > { %7830 = vmatpush1.bf16.msra.mxu1 %v8602_v14  ;;  %v1051_v14 = vld [vmem:[%s9612_s30 + $0x12f8] sm:$0xff] }
 0x418   : > { %7831 = vmatprep.subr.bf16.mxu1 %v8619_v20  ;;  %v1307_v20 = vld [vmem:[%s9612_s30 + $0x1af8] sm:$0xff]  ;;  %v8747_v24 = vcombine.high %v1043_v12, %v1051_v14  ;;  %v8746_v49 = vcombine.low %v1043_v12, %v1051_v14 }
 0x419   : > { %7791 = vmatpush1.bf16.msra.mxu0 %v8362_v25  ;;  %v9003_v63 = vcombine.high %v1299_v15, %v1307_v20  ;;  %v1059_v25 = vld [vmem:[%s9612_s30 + $0x1338] sm:$0xff]  ;;  %v9002_v28 = vcombine.low %v1299_v15, %v1307_v20 }
 0x41a   : > { %7792 = vmatprep.subr.bf16.mxu0 %v8379_v2  ;;  %v1315_v2 = vld [vmem:[%s9612_s30 + $0x1b38] sm:$0xff] }
 0x41b   : > { %7832 = vmatpush1.bf16.msra.mxu1 %v8618_v26  ;;  %v1067_v26 = vld [vmem:[%s9612_s30 + $0x1378] sm:$0xff] }
 0x41c   : > { %7833 = vmatprep.subr.bf16.mxu1 %v8635_v27  ;;  %v1323_v27 = vld [vmem:[%s9612_s30 + $0x1b78] sm:$0xff]  ;;  %v8763_v29 = vcombine.high %v1059_v25, %v1067_v26  ;;  %v8762_v43 = vcombine.low %v1059_v25, %v1067_v26 }
 0x41d   : > { %7793 = vmatpush1.bf16.msra.mxu0 %v8378_v31  ;;  %v9019_v31 = vcombine.high %v1315_v2, %v1323_v27  ;;  %v1139_v15 = vld [vmem:[%s9612_s30 + $0x15b8] sm:$0xff] }
 0x41e   : > { %7794 = vmatprep.subr.bf16.mxu0 %v8395_v55  ;;  %v1083_v55 = vld [vmem:[%s9612_s30 + $0x13f8] sm:$0xff] }
 0x41f   : > { %7834 = vmatpush1.bf16.msra.mxu1 %v8634_v53  ;;  %v1075_v53 = vld [vmem:[%s9612_s30 + $0x13b8] sm:$0xff] }
 0x420   : > { %7835 = vmatprep.subr.bf16.mxu1 %v8651_v32  ;;  %v1147_v20 = vld [vmem:[%s9612_s30 + $0x15f8] sm:$0xff] }
 0x421   : > { %7795 = vmatpush1.bf16.msra.mxu0 %v8394_v62  ;;  %v434_v62 = vld [vmem:[#allocation2 + $0x50] sm:$0xff]  ;;  %v8843_v25 = vcombine.high %v1139_v15, %v1147_v20 }
 0x422   : > { %7846 = vmatprep.subr.bf16.mxu0 %v8667_v41 }
 0x423   : > { %7836 = vmatpush1.bf16.msra.mxu1 %v8650_v40 }
 0x424   : > { %7887 = vmatprep.subr.bf16.mxu1 %v8923_v42  ;;  %7797 = vmatmul.mubr.bf16.vlgmr.msra.gmra.mrb[56].mxu0 %v9722_v60  ;;  %v1267_v60 = vld [vmem:[%s9612_s30 + $0x19b8] sm:$0xff] }
 0x425   : > { %7847 = vmatpush1.bf16.msra.mxu0 %v8666_v44  ;;  %7878 = vmatprep.mubr.bf16.mxu0 %v9740_v7  ;;  %v8971_v1 = vcombine.high %v1267_v60, %v1275_v57  ;;  %v1291_v7 = vld [vmem:[%s9612_s30 + $0x1a78] sm:$0xff]  ;;  %v9018_v44 = vcombine.low %v1315_v2, %v1323_v27 }
 0x426   : > { %7838 = vmatmul.mubr.bf16.vlgmr.msra.gmra.mrb[56].mxu1 %v9731_v0  ;;  %7848 = vmatprep.subr.bf16.mxu0 %v8683_v45  ;;  %v8698_v0 = vcombine.low %v995_v47, %v1003_v11  ;;  %v8987_v10 = vcombine.high %v1283_v5, %v1291_v7  ;;  %v8986_v22 = vcombine.low %v1283_v5, %v1291_v7  ;;  %v1091_v47 = vld [vmem:[%s9612_s30 + $0x1438] sm:$0xff] }
 0x427   : > { %7888 = vmatpush1.bf16.msra.mxu1 %v8922_v39  ;;  %7919 = vmatprep.mubr.bf16.mxu1 %v9747_v9  ;;  %v8970_v9 = vcombine.low %v1267_v60, %v1275_v57  ;;  %v8779_v39 = vcombine.high %v1075_v53, %v1083_v55  ;;  %v1099_v11 = vld [vmem:[%s9612_s30 + $0x1478] sm:$0xff] }
 0x428   : > { %7889 = vmatprep.subr.bf16.mxu1 %v8939_v46  ;;  %v8795_v54 = vcombine.high %v1091_v47, %v1099_v11  ;;  %v1107_v60 = vld [vmem:[%s9612_s30 + $0x14b8] sm:$0xff] }
 0x429   : > { %7849 = vmatpush1.bf16.msra.mxu0 %v8682_v50  ;;  %v1355_v50 = vld [vmem:[%s9612_s30 + $0x1c78] sm:$0xff] }
 0x42a   : > { %7850 = vmatprep.subr.bf16.mxu0 %v8699_v52  ;;  %v8778_v52 = vcombine.low %v1075_v53, %v1083_v55  ;;  %v9051_v56 = vcombine.high %v1347_v48, %v1355_v50  ;;  %v1115_v57 = vld [vmem:[%s9612_s30 + $0x14f8] sm:$0xff] }
 0x42b   : > { %7890 = vmatpush1.bf16.msra.mxu1 %v8938_v51  ;;  %v8811_v3 = vcombine.high %v1107_v60, %v1115_v57  ;;  %v1123_v5 = vld [vmem:[%s9612_s30 + $0x1538] sm:$0xff] }
 0x42c   : > { %7891 = vmatprep.subr.bf16.mxu1 %v8955_v18  ;;  %v9034_v18 = vcombine.low %v1331_v37, %v1339_v59  ;;  %v1131_v7 = vld [vmem:[%s9612_s30 + $0x1578] sm:$0xff] }
 0x42d   : > { %7851 = vmatpush1.bf16.msra.mxu0 %v8698_v0  ;;  %v1363_v0 = vld [vmem:[%s9612_s30 + $0x1cb8] sm:$0xff]  ;;  %v8827_v12 = vcombine.high %v1123_v5, %v1131_v7 }
 0x42e   : > { %7852 = vmatprep.subr.bf16.mxu0 %v8715_v61  ;;  %v8794_v61 = vcombine.low %v1091_v47, %v1099_v11  ;;  %v1155_v2 = vld [vmem:[%s9612_s30 + $0x1638] sm:$0xff] }
 0x42f   : > { %7892 = vmatpush1.bf16.msra.mxu1 %v8954_v58  ;;  %v1371_v58 = vld [vmem:[%s9612_s30 + $0x1cf8] sm:$0xff] }
 0x430   : > { %7893 = vmatprep.subr.bf16.mxu1 %v8971_v1  ;;  %v9050_v1 = vcombine.low %v1347_v48, %v1355_v50  ;;  %v9067_v4 = vcombine.high %v1363_v0, %v1371_v58  ;;  %v1163_v27 = vld [vmem:[%s9612_s30 + $0x1678] sm:$0xff] }
 0x431   : > { %7853 = vmatpush1.bf16.msra.mxu0 %v8714_v34  ;;  %v1379_v34 = vld [vmem:[%s9612_s30 + $0x1d38] sm:$0xff] }
 0x432   : > { %7854 = vmatprep.subr.bf16.mxu0 %v8731_v8  ;;  %v8810_v8 = vcombine.low %v1107_v60, %v1115_v57  ;;  %v1171_v55 = vld [vmem:[%s9612_s30 + $0x16b8] sm:$0xff] }
 0x433   : > { %7894 = vmatpush1.bf16.msra.mxu1 %v8970_v9  ;;  %v1387_v9 = vld [vmem:[%s9612_s30 + $0x1d78] sm:$0xff] }
 0x434   : > { %7895 = vmatprep.subr.bf16.mxu1 %v8987_v10  ;;  %v9066_v10 = vcombine.low %v1363_v0, %v1371_v58  ;;  %v9083_v14 = vcombine.high %v1379_v34, %v1387_v9 }
 0x435   : > { %7855 = vmatpush1.bf16.msra.mxu0 %v8730_v21  ;;  %v1395_v21 = vld [vmem:[%s9612_s30 + $0x1db8] sm:$0xff] }
 0x436   : > { %7856 = vmatprep.subr.bf16.mxu0 %v8747_v24  ;;  %v8826_v24 = vcombine.low %v1123_v5, %v1131_v7 }
 0x437   : > { %7896 = vmatpush1.bf16.msra.mxu1 %v8986_v22  ;;  %v7552_v30 = vpop.f32.mrb[44].mxu0  ;;  %v1403_v22 = vld [vmem:[%s9612_s30 + $0x1df8] sm:$0xff] }
 0x438   : > { %7897 = vmatprep.subr.bf16.mxu1 %v9003_v63  ;;  %v7553_v32 = vadd.f32 %v7552_v30, %v10694_v17  ;;  %v7554_v36 = vpop.f32.mrb[45].mxu0  ;;  %v9082_v63 = vcombine.low %v1379_v34, %v1387_v9  ;;  %v9099_v26 = vcombine.high %v1395_v21, %v1403_v22  ;;  %v9098_v30 = vcombine.low %v1395_v21, %v1403_v22  ;;  %v436_v34 = vld [vmem:[#allocation2 + $0x60] sm:$0xff] }
 0x439   : > { %v7593_v35 = vpop.f32.mrb[44].mxu1  ;;  %v7555_v40 = vadd.f32 %v7554_v36, %v10696_v23  ;;  %v7556_v42 = vpop.f32.mrb[46].mxu0  ;;  %7857 = vmatpush1.bf16.msra.mxu0 %v8746_v49  ;;  %v9035_v23 = vcombine.high %v1331_v37, %v1339_v59  ;;  %v1411_v49 = vld [vmem:[%s9612_s30 + $0x1e38] sm:$0xff]  ;;  %v8858_v37 = vcombine.low %v1155_v2, %v1163_v27 }
 0x43a   : > { %v7595_v41 = vpop.f32.mrb[45].mxu1  ;;  %v7594_v33 = vadd.f32 %v7593_v35, %v7553_v32  ;;  %v7557_v17 = vpop.f32.mrb[47].mxu0  ;;  %7858 = vmatprep.subr.bf16.mxu0 %v8763_v29  ;;  %v8842_v29 = vcombine.low %v1139_v15, %v1147_v20  ;;  %v1179_v32 = vld [vmem:[%s9612_s30 + $0x16f8] sm:$0xff] }
 0x43b   : > { %v7597_v38 = vpop.f32.mrb[46].mxu1  ;;  %7898 = vmatpush1.bf16.msra.mxu1 %v9002_v28  ;;  %v7596_v45 = vadd.f32 %v7595_v41, %v7555_v40  ;;  %v1419_v28 = vld [vmem:[%s9612_s30 + $0x1e78] sm:$0xff] }
 0x43c   : > { %v7598_v46 = vpop.f32.mrb[47].mxu1  ;;  %7899 = vmatprep.subr.bf16.mxu1 %v9019_v31  ;;  %v7938_v13 = vadd.f32 %v7594_v33, %v434_v62  ;;  %v8859_v31 = vcombine.high %v1155_v2, %v1163_v27  ;;  %v9115_v53 = vcombine.high %v1411_v49, %v1419_v28  ;;  %v1427_v35 = vld [vmem:[%s9612_s30 + $0x1eb8] sm:$0xff]  ;;  %v9114_v59 = vcombine.low %v1411_v49, %v1419_v28 }
 0x43d   : > { %v7939_v51 = vadd.f32 %v7596_v45, %v435_v6  ;;  %7859 = vmatpush1.bf16.msra.mxu0 %v8762_v43  ;;  %v1435_v36 = vld [vmem:[%s9612_s30 + $0x1ef8] sm:$0xff]  ;;  %v8875_v62 = vcombine.high %v1171_v55, %v1179_v32  ;;  %v8874_v6 = vcombine.low %v1171_v55, %v1179_v32 }
 0x43e   : > { %7954 = vst [vmem:[#allocation2 + $0x50] sm:$0xff] %v7938_v13  ;;  %7860 = vmatprep.subr.bf16.mxu0 %v8779_v39  ;;  %v9131_v40 = vcombine.high %v1427_v35, %v1435_v36  ;;  %v1187_v41 = vld [vmem:[%s9612_s30 + $0x1738] sm:$0xff]  ;;  %v9130_v38 = vcombine.low %v1427_v35, %v1435_v36  ;;  %v438_v35 = vld [vmem:[#allocation2 + $0x70] sm:$0xff] }
 0x43f   : > { %7900 = vmatpush1.bf16.msra.mxu1 %v9018_v44  ;;  %7955 = vst [vmem:[#allocation2 + $0x58] sm:$0xff] %v7939_v51  ;;  %v1195_v42 = vld [vmem:[%s9612_s30 + $0x1778] sm:$0xff] }
 0x440   : > { %7901 = vmatprep.subr.bf16.mxu1 %v9035_v23  ;;  %v1443_v43 = vld [vmem:[%s9612_s30 + $0x1f38] sm:$0xff]  ;;  %v8891_v17 = vcombine.high %v1187_v41, %v1195_v42  ;;  %v8890_v47 = vcombine.low %v1187_v41, %v1195_v42 }
 0x441   : > { %7861 = vmatpush1.bf16.msra.mxu0 %v8778_v52  ;;  %v1451_v33 = vld [vmem:[%s9612_s30 + $0x1f78] sm:$0xff] }
 0x442   : > { %7862 = vmatprep.subr.bf16.mxu0 %v8795_v54  ;;  %v9147_v44 = vcombine.high %v1443_v43, %v1451_v33  ;;  %v1203_v39 = vld [vmem:[%s9612_s30 + $0x17b8] sm:$0xff]  ;;  %v9146_v11 = vcombine.low %v1443_v43, %v1451_v33 }
 0x443   : > { %7902 = vmatpush1.bf16.msra.mxu1 %v9034_v18  ;;  %v1211_v45 = vld [vmem:[%s9612_s30 + $0x17f8] sm:$0xff] }
 0x444   : > { %7903 = vmatprep.subr.bf16.mxu1 %v9051_v56  ;;  %v1459_v46 = vld [vmem:[%s9612_s30 + $0x1fb8] sm:$0xff]  ;;  %v8907_v13 = vcombine.high %v1203_v39, %v1211_v45  ;;  %v8906_v50 = vcombine.low %v1203_v39, %v1211_v45  ;;  %v7966_v39 = vld [vmem:[#allocation2 + $0x10] sm:$0xff] (!%p9164_p4) }
 0x445   : > { %7863 = vmatpush1.bf16.msra.mxu0 %v8794_v61  ;;  %v1467_v23 = vld [vmem:[%s9612_s30 + $0x1ff8] sm:$0xff]  ;;  %7982 = vst [vmem:[%s9631_s5 + $0x10] sm:$0xff] (!%p9164_p4), %v7966_v39 }
 0x446   : > { %7864 = vmatprep.subr.bf16.mxu0 %v8811_v3  ;;  %v9163_v48 = vcombine.high %v1459_v46, %v1467_v23  ;;  %v9162_v51 = vcombine.low %v1459_v46, %v1467_v23  ;;  %v7967_v45 = vld [vmem:[#allocation2 + $0x18] sm:$0xff] (!%p9164_p4)  ;;  %v7968_v46 = vld [vmem:[#allocation2 + $0x20] sm:$0xff] (!%p9164_p4)  ;;  %v7969_v23 = vld [vmem:[#allocation2 + $0x28] sm:$0xff] (!%p9164_p4) }
 0x447   : > { %7904 = vmatpush1.bf16.msra.mxu1 %v9050_v1  ;;  %7983 = vst [vmem:[%s9631_s5 + $0x18] sm:$0xff] (!%p9164_p4), %v7967_v45  ;;  %7984 = vst [vmem:[%s9631_s5 + $0x20] sm:$0xff] (!%p9164_p4), %v7968_v46 }
 0x448   : > { %7905 = vmatprep.subr.bf16.mxu1 %v9067_v4  ;;  %7985 = vst [vmem:[%s9631_s5 + $0x28] sm:$0xff] (!%p9164_p4), %v7969_v23 }
 0x449   : > { %7865 = vmatpush1.bf16.msra.mxu0 %v8810_v8 }
 0x44a   : > { %7866 = vmatprep.subr.bf16.mxu0 %v8827_v12 }
 0x44b   : > { %7906 = vmatpush1.bf16.msra.mxu1 %v9066_v10 }
 0x44c   : > { %7907 = vmatprep.subr.bf16.mxu1 %v9083_v14 }
 0x44d   : > { %7867 = vmatpush1.bf16.msra.mxu0 %v8826_v24 }
 0x44e   : > { %7868 = vmatprep.subr.bf16.mxu0 %v8843_v25 }
 0x44f   : > { %7908 = vmatpush1.bf16.msra.mxu1 %v9082_v63 }
 0x450   : > { %7909 = vmatprep.subr.bf16.mxu1 %v9099_v26 }
 0x451   : > { %7869 = vmatpush1.bf16.msra.mxu0 %v8842_v29 }
 0x452   : > { %7870 = vmatprep.subr.bf16.mxu0 %v8859_v31 }
 0x453   : > { %7910 = vmatpush1.bf16.msra.mxu1 %v9098_v30 }
 0x454   : > { %7911 = vmatprep.subr.bf16.mxu1 %v9115_v53 }
 0x455   : > { %7871 = vmatpush1.bf16.msra.mxu0 %v8858_v37 }
 0x456   : > { %7872 = vmatprep.subr.bf16.mxu0 %v8875_v62 }
 0x457   : > { %7912 = vmatpush1.bf16.msra.mxu1 %v9114_v59 }
 0x458   : > { %7913 = vmatprep.subr.bf16.mxu1 %v9131_v40  ;;  %v439_v40 = vld [vmem:[#allocation2 + $0x78] sm:$0xff] }
 0x459   : > { %7873 = vmatpush1.bf16.msra.mxu0 %v8874_v6 }
 0x45a   : > { %7874 = vmatprep.subr.bf16.mxu0 %v8891_v17  ;;  %v7964_v17 = vld [vmem:[#allocation2] sm:$0xff] (!%p9164_p4) }
 0x45b   : > { %7914 = vmatpush1.bf16.msra.mxu1 %v9130_v38  ;;  %7980 = vst [vmem:[%s9631_s5] sm:$0xff] (!%p9164_p4), %v7964_v17 }
 0x45c   : > { %7915 = vmatprep.subr.bf16.mxu1 %v9147_v44  ;;  %v7965_v44 = vld [vmem:[#allocation2 + $0x8] sm:$0xff] (!%p9164_p4) }
 0x45d   : > { %7875 = vmatpush1.bf16.msra.mxu0 %v8890_v47  ;;  %7981 = vst [vmem:[%s9631_s5 + $0x8] sm:$0xff] (!%p9164_p4), %v7965_v44  ;;  %v7970_v47 = vld [vmem:[#allocation2 + $0x30] sm:$0xff] (!%p9164_p4) }
 0x45e   : > { %7876 = vmatprep.subr.bf16.mxu0 %v8907_v13  ;;  %v7972_v13 = vld [vmem:[#allocation2 + $0x40] sm:$0xff] (!%p9164_p4)  ;;  %7986 = vst [vmem:[%s9631_s5 + $0x30] sm:$0xff] (!%p9164_p4), %v7970_v47 }
 0x45f   : > { %7916 = vmatpush1.bf16.msra.mxu1 %v9146_v11  ;;  %v7971_v11 = vld [vmem:[#allocation2 + $0x38] sm:$0xff] (!%p9164_p4)  ;;  %7988 = vst [vmem:[%s9631_s5 + $0x40] sm:$0xff] (!%p9164_p4), %v7972_v13 }
 0x460   : > { %7917 = vmatprep.subr.bf16.mxu1 %v9163_v48  ;;  %7987 = vst [vmem:[%s9631_s5 + $0x38] sm:$0xff] (!%p9164_p4), %v7971_v11  ;;  %v7973_v48 = vld [vmem:[#allocation2 + $0x48] sm:$0xff] (!%p9164_p4) }
 0x461   : > { %7877 = vmatpush1.bf16.msra.mxu0 %v8906_v50  ;;  %v7974_v50 = vld [vmem:[#allocation2 + $0x50] sm:$0xff] (!%p9164_p4)  ;;  %7989 = vst [vmem:[%s9631_s5 + $0x48] sm:$0xff] (!%p9164_p4), %v7973_v48 }
 0x462   : > { %7990 = vst [vmem:[%s9631_s5 + $0x50] sm:$0xff] (!%p9164_p4), %v7974_v50 }
 0x463   : > { %7918 = vmatpush1.bf16.msra.mxu1 %v9162_v51  ;;  %v7975_v51 = vld [vmem:[#allocation2 + $0x58] sm:$0xff] (!%p9164_p4) }
 0x464   : > { %7879 = vmatmul.mubr.bf16.vlgmr.msra.gmra.mrb[60].mxu0 %v9812_v16  ;;  %7991 = vst [vmem:[%s9631_s5 + $0x58] sm:$0xff] (!%p9164_p4), %v7975_v51 }
 0x466   : > { %7920 = vmatmul.mubr.bf16.vlgmr.msra.gmra.mrb[60].mxu1 %v9818_v19  ;;  %v437_v19 = vld [vmem:[#allocation2 + $0x68] sm:$0xff] }
 0x477   : > { %v7634_v52 = vpop.f32.mrb[48].mxu0 }
 0x478   : > { %v7636_v54 = vpop.f32.mrb[49].mxu0 }
 0x479   : > { %v7675_v18 = vpop.f32.mrb[48].mxu1  ;;  %v7638_v57 = vpop.f32.mrb[50].mxu0 }
 0x47a   : > { %v7676_v56 = vadd.f32 %v7675_v18, %v7634_v52  ;;  %v7677_v60 = vpop.f32.mrb[49].mxu1  ;;  %v7639_v61 = vpop.f32.mrb[51].mxu0 }
 0x47b   : > { %v7678_v0 = vadd.f32 %v7677_v60, %v7636_v54  ;;  %v7679_v58 = vpop.f32.mrb[50].mxu1 }
 0x47c   : > { %v7680_v1 = vpop.f32.mrb[51].mxu1 }
 0x4b7   : > { %v7716_v3 = vpop.f32.mrb[52].mxu0 }
 0x4b8   : > { %v7717_v4 = vadd.f32 %v7716_v3, %v7676_v56  ;;  %v7718_v7 = vpop.f32.mrb[53].mxu0 }
 0x4b9   : > { %v7757_v5 = vpop.f32.mrb[52].mxu1  ;;  %v7719_v9 = vadd.f32 %v7718_v7, %v7678_v0  ;;  %v7720_v16 = vpop.f32.mrb[54].mxu0 }
 0x4ba   : > { %v7759_v8 = vpop.f32.mrb[53].mxu1  ;;  %v7758_v10 = vadd.f32 %v7757_v5, %v7717_v4  ;;  %v7721_v14 = vpop.f32.mrb[55].mxu0 }
 0x4bb   : > { %v7761_v12 = vpop.f32.mrb[54].mxu1  ;;  %v7760_v15 = vadd.f32 %v7759_v8, %v7719_v9 }
 0x4bc   : > { %v7762_v20 = vpop.f32.mrb[55].mxu1  ;;  %v7940_v21 = vadd.f32 %v7758_v10, %v436_v34 }
 0x4bd   : > { %v7941_v22 = vadd.f32 %v7760_v15, %v437_v19 }
 0x4be   : > { %7956 = vst [vmem:[#allocation2 + $0x60] sm:$0xff] %v7940_v21 }
 0x4bf   : > { %7957 = vst [vmem:[#allocation2 + $0x68] sm:$0xff] %v7941_v22 }
 0x4c5   : > { %v7976_v52 = vld [vmem:[#allocation2 + $0x60] sm:$0xff] (!%p9164_p4) }
 0x4c6   : > { %v7977_v18 = vld [vmem:[#allocation2 + $0x68] sm:$0xff] (!%p9164_p4)  ;;  %7992 = vst [vmem:[%s9631_s5 + $0x60] sm:$0xff] (!%p9164_p4), %v7976_v52 }
 0x4c7   : > { %7993 = vst [vmem:[%s9631_s5 + $0x68] sm:$0xff] (!%p9164_p4), %v7977_v18 }
 0x4f7   : > { %v7798_v24 = vpop.f32.mrb[56].mxu0 }
 0x4f8   : > { %v7800_v25 = vpop.f32.mrb[57].mxu0 }
 0x4f9   : > { %v7839_v63 = vpop.f32.mrb[56].mxu1  ;;  %v7802_v27 = vpop.f32.mrb[58].mxu0 }
 0x4fa   : > { %v7840_v26 = vadd.f32 %v7839_v63, %v7798_v24  ;;  %v7841_v2 = vpop.f32.mrb[57].mxu1  ;;  %v7803_v29 = vpop.f32.mrb[59].mxu0 }
 0x4fb   : > { %v7842_v49 = vadd.f32 %v7841_v2, %v7800_v25  ;;  %v7843_v28 = vpop.f32.mrb[58].mxu1 }
 0x4fc   : > { %v7844_v30 = vpop.f32.mrb[59].mxu1 }
 0x537   : > { %v7880_v31 = vpop.f32.mrb[60].mxu0 }
 0x538   : > { %v7881_v53 = vadd.f32 %v7880_v31, %v7840_v26  ;;  %v7882_v32 = vpop.f32.mrb[61].mxu0 }
 0x539   : > { %v7921_v55 = vpop.f32.mrb[60].mxu1  ;;  %v7883_v36 = vadd.f32 %v7882_v32, %v7842_v49  ;;  %v7884_v59 = vpop.f32.mrb[62].mxu0  ;;  %7963 = sbr.rel (%p9164_p4) target bundleno = 1352 (0x548), region = 44 }
 0x53a   : > { %v7923_v37 = vpop.f32.mrb[61].mxu1  ;;  %v7922_v62 = vadd.f32 %v7921_v55, %v7881_v53  ;;  %v7885_v42 = vpop.f32.mrb[63].mxu0 }
 0x53b   : > { %v7925_v41 = vpop.f32.mrb[62].mxu1  ;;  %v7924_v43 = vadd.f32 %v7923_v37, %v7883_v36 }
 0x53c   : > { %v7926_v33 = vpop.f32.mrb[63].mxu1  ;;  %v7942_v6 = vadd.f32 %v7922_v62, %v438_v35 }
 0x53d   : > { %v7943_v38 = vadd.f32 %v7924_v43, %v439_v40 }
 0x53e   : > { %7958 = vst [vmem:[#allocation2 + $0x70] sm:$0xff] %v7942_v6 }
 0x53f   : > { %7959 = vst [vmem:[#allocation2 + $0x78] sm:$0xff] %v7943_v38 }
 0x545   : > { %v7978_v54 = vld [vmem:[#allocation2 + $0x70] sm:$0xff] }
 0x546   : > { %7994 = vst [vmem:[%s9631_s5 + $0x70] sm:$0xff] %v7978_v54  ;;  %v7979_v56 = vld [vmem:[#allocation2 + $0x78] sm:$0xff] }
 0x547   : > { %7995 = vst [vmem:[%s9631_s5 + $0x78] sm:$0xff] %v7979_v56 }
 0x548 PF: > { %s9171_s18 = sshll.u32 %s9425_s19, 11  ;;  %s8011_s27 = sshll.u32 %s9631_s5, 4  ;;  %s8012_s27 = int_to_ptr.vmem [resolvable:$true] %s8011_s27 }
 0x549   : > { %s10823_s6 = scalar_lea.hbm %s10885_s3, %s9171_s18  ;;  %s7997_s15 = scalar_lea.sflag [#allocation5], %s233_s9 }
 0x54a   : > { %s9315_s24 = scalar_lea.vmem %s8012_s27, 2048  ;;  %p10898_p1 = scmp.ne.s32.totalorder %s10893_s7, 0 }
 0x54b   : > { %p9316_p0 = scmp.ne.s32.totalorder %s8012_s27, %s9315_s24  ;;  %s9443_s25 = smov [#allocation6]  }
 0x54c   : > { %s9319_s26 = sshll.u32 %s9443_s25, 4  ;;  %s9320_s26 = int_to_ptr.vmem [resolvable:$false] %s9319_s26 }
 0x54d   : > { %p9317_p6 = pnand %p9316_p0, %p10898_p1  ;;  %s9321_s29 = scalar_lea.vmem %s9320_s26, 4096 }
 0x54e   : > { %p9322_p10 = scmp.lt.s32.totalorder %s8012_s27, %s9320_s26  ;;  %p9323_p11 = scmp.lt.s32.totalorder %s9321_s29, %s9315_s24 }
 0x54f   : > { %p9318_p8 = pneg %p9317_p6 }
 0x550   : > { %p9324_p13 = por %p9323_p11, %p9322_p10 }
 0x552   : > { %p9325_p5 = pnand %p9324_p13, %p9318_p8 }
 0x554   : > { %9328 = shalt.err (!%p9325_p5)
}
 0x555   : > { %s9329_s19 = scalar_lea.hbm %s10823_s6, 2048  ;;  %s9333_s23 = scalar_lea.hbm %s10885_s3, 4096 }
 0x556   : > { %p9330_p3 = scmp.ne.s32.totalorder %s10823_s6, %s9329_s19  ;;  %p9334_p2 = scmp.lt.u32.totalorder %s10823_s6, %s10885_s3 }
 0x557   : > { %p9335_p7 = scmp.lt.u32.totalorder %s9333_s23, %s9329_s19  ;;  %p9337_p0 = scmp.lt.u32.totalorder %s9329_s19, %s10823_s6 }
 0x558   : > { %p9331_p9 = pnand %p9330_p3, %p10898_p1 }
 0x559   : > { %p9336_p4 = por %p9335_p7, %p9334_p2 }
 0x55a   : > { %p9332_p12 = pneg %p9331_p9 }
 0x55b   : > { %p9338_p6 = por %p9337_p0, %p9336_p4 }
 0x55d   : > { %p9339_p8 = pnand %p9338_p6, %p9332_p12 }
 0x55f   : > { %9342 = shalt.err (!%p9339_p8)
}
 0x560   : > { %9174 = dma.vmem_to_hbm [thread:$0]  (%p10898_p1), %s8012_s27, 2048, %s10823_s6, %s7997_s15  }
 0x561 PF: > { %p9185_p10 = scmp.ge.s32.totalorder %s9437_s22, 2  ;;  %s8023_s18 = sand.u32 1, %s9397_s12  }
 0x562   : > { %p10899_p11 = scmp.ne.s32.totalorder %s10895_s10, 0  ;;  %s8024_s11 = scalar_lea.sflag [#allocation5], %s8023_s18 }
 0x564   : > { %p9181_p13 = pnand %p9185_p10, %p10899_p11 }
 0x566   : > { %9392 = dma.done.wait (!%p9181_p13), %s8024_s11, 2048  }
 0x567   : > { %9394 = vsyncadd (!%p9181_p13), %s8024_s11, 4294965248  ;;  %s19_s22 = sadd.s32 1, %s9437_s22   ;;  %s10900_s7 = sld [smem:[#allocation11_spill]] }
 0x568   : > { %p16_p5 = scmp.ge.s32.totalorder %s19_s22, 10   ;;  %s10901_s30 = sld [smem:[#allocation9_spill]] }
 0x569   : > { %s10902_s6 = sld [smem:[#allocation10_spill]]  ;;  %s10903_s12 = smov %s9401_s13 }
 0x56a   : > { %s10904_s13 = smov %s9405_s14  ;;  %s10905_s14 = smov %s9551_s8 }
 0x56b   : > { %s10906_s15 = smov %s9413_s16  ;;  %s10907_s16 = smov %s9417_s17 }
 0x56c   : > { %s10909_s18 = smov %s9429_s20  ;;  %s10910_s19 = smov %s9433_s21 }
 0x56d   : > { %s10908_s17 = smov %s10900_s7  ;;  %18 = sbr.rel (!%p16_p5) target bundleno = 9 (0x9), region = 91 }
 0x56e   : > { %s10911_s20 = smov %s10901_s30 }
 0x56f   : > { %s10912_s21 = smov %s10902_s6 }
 0x574   :  { %8029 = vsyncpa [#allocation4], 1 }
 0x575   :  { %8031 = vsyncpa [#allocation4 + $0x1], 1 }
 0x576   :  { %8032 = vsyncpa [#allocation5], 1 }
 0x577   :  { %8034 = vsyncpa [#allocation5 + $0x1], 1 }

// kernel: prompt_encoder_forward.2
= control target key start
LH: loop header
LB: loop body
LE: loop exit
PB: predicated region body
PF: predicated region fallthrough
CT: control target
= control target key end

     0   :  { %s11265_s0 = inlined_call_operand.vmem [shape: bf16[8,4096], index: 0, kind: input, shape index: {}]   ;;  %s11266_s1 = inlined_call_operand.hbm [shape: bf16[4096,4096], index: 1, kind: input, shape index: {}]   ;;  %s11267_s2 = inlined_call_operand.hbm [shape: bf16[1,4096], index: 2, kind: input, shape index: {}]   ;;  %s11268_s3 = inlined_call_operand.vmem [shape: bf16[8,4096], index: 3, kind: output, shape index: {}]  }
   0x1   :  { %11274 = sst [smem:[#allocation10_spill]] %s11266_s1 }
   0x2   :  { %8 = vsyncpa [#allocation4], 0 }
   0x3   :  { %10 = vsyncpa [#allocation4 + $0x1], 0 }
   0x4   :  { %11 = vsyncpa [#allocation6], 0 }
   0x5   :  { %13 = vsyncpa [#allocation6 + $0x1], 0  ;;  %s9748_s12 = smov 0   ;;  %s9750_s13 = smov 0  }
   0x6   :  { %s9752_s14 = smov 0   ;;  %s9754_s15 = smov 0  }
   0x7   :  { %s9756_s16 = smov 0   ;;  %s9758_s17 = smov 0  }
   0x8   :  { %s9760_s18 = smov 0   ;;  %s9762_s19 = smov 0  }
   0x9   :  { %s9764_s20 = smov 0   ;;  %s9766_s21 = smov 0  }
   0xa   :  { %s9768_s22 = smov 0  }
   0xb LB: > { %s28_s23 = sadd.s32 1, %s9713_s20  ;;  %s66_s24 = sadd.s32 1, %s9701_s17  ;;  %s9721_s22 = sphi %s9768_s22, %s19_s22   ;;  %s9717_s21 = sphi %s9766_s21, %s11300_s21   ;;  %s9713_s20 = sphi %s9764_s20, %s11299_s20   ;;  %s9709_s19 = sphi %s9762_s19, %s11298_s19   ;;  %s9705_s18 = sphi %s9760_s18, %s11297_s18   ;;  %s9701_s17 = sphi %s9758_s17, %s11296_s17   ;;  %s9697_s16 = sphi %s9756_s16, %s11295_s16   ;;  %s9693_s15 = sphi %s9754_s15, %s11294_s15   ;;  %s9689_s14 = sphi %s9752_s14, %s11293_s14   ;;  %s9685_s13 = sphi %s9750_s13, %s11292_s13   ;;  %s9681_s12 = sphi %s9748_s12, %s11291_s12  }
   0xc   : > { %p9805_p0 = scmp.ge.s32.totalorder %s28_s23, 4  ;;  %p73_p1 = scmp.ne.s32.totalorder %s9701_s17, %s9697_s16 }
   0xd   : > { %p11270_p2 = scmp.eq.s32.totalorder %s9721_s22, 0  ;;  %p11269_p4 = scmp.lt.s32.totalorder %s9721_s22, 8 }
   0xe   : > { %s11302_s23 = smov (%p9805_p0, %s28_s23), 0  ;;  %s164_s27 = sand.u32 1, %s9701_s17  }
   0xf   : > { %p75_p3 = por %p11270_p2, %p73_p1  ;;  %s61_s26 = ssub.s32 %s9713_s20, %s11302_s23 }
  0x10   : > { %s8307_s28 = sshll.u32 %s164_s27, 13  ;;  %s8309_s29 = sshll.u32 %s9717_s21, 4 }
  0x11   : > { %s9382_s30 = sshll.u32 %s9713_s20, 12  ;;  %s168_s4 = scalar_lea.vmem [#allocation3], %s8307_s28 }
  0x12   : > { %s178_s5 = sshll.u32 %s168_s4, 4  ;;  %s175_s6 = sadd.s32 %s9382_s30, %s8309_s29  ;;  %s9824_s5 = int_to_ptr.vmem [resolvable:$true] %s178_s5 }
  0x13   : > { %s8311_s7 = sshll.u32 %s175_s6, 6  ;;  %p9828_p5 = pnand %p11269_p4, %p75_p3 }
  0x14   : > { %s11277_s1 = sld [smem:[#allocation10_spill]]  ;;  %s9838_s28 = scalar_lea.sflag [#allocation4], %s164_s27 }
  0x15   : > { %p9569_p8 = pneg %p9828_p5 }
  0x1a   : > { %s9835_s11 = scalar_lea.hbm %s11277_s1, %s8311_s7  ;;  %s9572_s6 = scalar_lea.hbm %s11277_s1, 1048576 }
  0x1b   : > { %s9567_s29 = scalar_lea.hbm %s9835_s11, 131072  ;;  %p9573_p11 = scmp.lt.u32.totalorder %s9835_s11, %s11277_s1 }
  0x1c   : > { %p9568_p7 = scmp.ne.s32.totalorder %s9835_s11, %s9567_s29  ;;  %p9574_p12 = scmp.lt.u32.totalorder %s9572_s6, %s9567_s29 }
  0x1d   : > { %p9576_p1 = scmp.lt.u32.totalorder %s9567_s29, %s9835_s11 }
  0x1e   : > { %p9570_p9 = pnand %p9569_p8, %p9568_p7  ;;  %p9575_p13 = por %p9574_p12, %p9573_p11 }
  0x20   : > { %p9571_p10 = pneg %p9570_p9  ;;  %p9577_p3 = por %p9576_p1, %p9575_p13 }
  0x22   : > { %p9578_p4 = pnand %p9577_p3, %p9571_p10 }
  0x24   : > { %9581 = shalt.err (!%p9578_p4)
}
  0x25   : > { %s9582_s27 = scalar_lea.vmem %s9824_s5, 131072  ;;  %s9723_s10 = smov [#allocation3]  }
  0x26   : > { %p9583_p7 = scmp.ne.s32.totalorder %s9824_s5, %s9582_s27  ;;  %s9587_s30 = sshll.u32 %s9723_s10, 4  ;;  %s9588_s30 = int_to_ptr.vmem [resolvable:$false] %s9587_s30 }
  0x27   : > { %s9589_s4 = scalar_lea.vmem %s9588_s30, 262144  ;;  %p9590_p6 = scmp.lt.s32.totalorder %s9824_s5, %s9588_s30 }
  0x28   : > { %p9585_p9 = pnand %p9583_p7, %p9569_p8  ;;  %p9591_p11 = scmp.lt.s32.totalorder %s9589_s4, %s9582_s27 }
  0x2a   : > { %p9586_p2 = pneg %p9585_p9  ;;  %p9592_p12 = por %p9591_p11, %p9590_p6 }
  0x2c   : > { %p9593_p13 = pnand %p9592_p12, %p9586_p2 }
  0x2e   : > { %9596 = shalt.err (!%p9593_p13)
}
  0x2f   : > { %s9724_s29 = smov 2048   ;;  %s9725_s6 = smov 1024  }
  0x30   : > { %s9726_s7 = smov 64   ;;  %p205_p2 = scmp.lt.s32.totalorder %s9721_s22, 9 }
  0x31   : > { %9399 = dma.hbm_to_vmem [thread:$0]  (!%p9828_p5), %s9835_s11, 131072, %s9824_s5, %s9838_s28, %s9724_s29, %s9725_s6, %s9726_s7  }
  0x32   : > { %p11278_p4 = scmp.ge.s32.totalorder %s9721_s22, 1  ;;  %s8303_s27 = sadd.s32 4294967295, %s9721_s22  }
  0x33   : > { %s31_s10 = sadd.s32 1, %s9717_s21  ;;  %p79_p8 = scmp.ne.s32.totalorder %s9697_s16, %s9693_s15 }
  0x34   : > { %p9869_p6 = pnand %p11278_p4, %p205_p2  ;;  %s11304_s10 = smov (!%p9805_p0, %s31_s10), %s9717_s21 }
  0x35   : > { %p9880_p10 = scmp.eq.s32.totalorder %s8303_s27, 0  ;;  %p33_p5 = scmp.ge.s32.totalorder %s11304_s10, 2 }
  0x36   : > { %s92_s5 = sadd.s32 1, %s9689_s14  ;;  %p99_p3 = scmp.ne.s32.totalorder %s9689_s14, %s9685_s13 }
  0x37   : > { %p9887_p1 = por %p9880_p10, %p79_p8  ;;  %s11306_s10 = smov (%p33_p5, %s11304_s10), 0 }
  0x38   : > { %11282 = sst [smem:[#allocation9_spill]] %s11306_s10  ;;  %p11283_p0 = scmp.eq.s32.totalorder %s9721_s22, 0 }
  0x39   : > { %s11281_s11 = scalar_select %p9887_p1, 1, 0 }
  0x3a   : > { %p9897_p7 = por %p99_p3, %p11283_p0  ;;  %p105_p9 = scmp.ne.s32.totalorder %s9685_s13, %s9681_s12 }
  0x3b   : > { %s62_s25 = ssub.s32 %s9717_s21, %s11306_s10  ;;  %s188_s28 = sand.u32 1, %s9689_s14  }
  0x3c   : > { %s63_s30 = sor.u32 %s62_s25, %s61_s26  ;;  %p90_p11 = scmp.eq.s32.totalorder %s62_s25, 0 }
  0x3d   : > { %p64_p12 = scmp.eq.s32.totalorder %s63_s30, 0  ;;  %p9911_p13 = por %p105_p9, %p9880_p10 }
  0x3e   : > { %s9916_s29 = scalar_select %p90_p11, %s9689_s14, %s92_s5  }
  0x3f   : > { %s11285_s4 = scalar_select %p9911_p13, 1, 0 }
  0x40   : > { %s9921_s6 = scalar_select %p64_p12, %s9701_s17, %s66_s24  }
  0x41   : > { %s8312_s7 = sshll.u32 %s188_s28, 4  ;;  %s9383_s27 = sshll.u32 %s9717_s21, 8 }
  0x42   : > { %s9927_s10 = scalar_lea.hbm %s11267_s2, %s9383_s27  ;;  %s192_s26 = scalar_lea.vmem [#allocation5], %s8312_s7 }
  0x43   : > { %s200_s8 = sshll.u32 %s192_s26, 4  ;;  %p11286_p2 = scmp.lt.s32.totalorder %s9721_s22, 8  ;;  %s9929_s8 = int_to_ptr.vmem [resolvable:$true] %s200_s8 }
  0x44   : > { %s189_s5 = scalar_lea.sflag [#allocation6], %s188_s28  ;;  %s9597_s1 = scalar_lea.hbm %s9927_s10, 256 }
  0x45   : > { %p9935_p4 = pnand %p11286_p2, %p9897_p7  ;;  %p9598_p8 = scmp.ne.s32.totalorder %s9927_s10, %s9597_s1 }
  0x46   : > { %s9602_s15 = scalar_lea.hbm %s11267_s2, 512  ;;  %p9603_p0 = scmp.lt.u32.totalorder %s9927_s10, %s11267_s2 }
  0x47   : > { %p9599_p10 = pneg %p9935_p4  ;;  %p9604_p7 = scmp.lt.u32.totalorder %s9602_s15, %s9597_s1 }
  0x48   : > { %p9606_p11 = scmp.lt.u32.totalorder %s9597_s1, %s9927_s10 }
  0x49   : > { %p9600_p5 = pnand %p9599_p10, %p9598_p8  ;;  %p9605_p9 = por %p9604_p7, %p9603_p0 }
  0x4b   : > { %p9601_p3 = pneg %p9600_p5  ;;  %p9607_p12 = por %p9606_p11, %p9605_p9 }
  0x4d   : > { %p9608_p2 = pnand %p9607_p12, %p9601_p3 }
  0x4f   : > { %9611 = shalt.err (!%p9608_p2)
}
  0x50   : > { %s9612_s28 = scalar_lea.vmem %s9929_s8, 256  ;;  %s9727_s12 = smov [#allocation5]  }
  0x51   : > { %p9613_p8 = scmp.ne.s32.totalorder %s9929_s8, %s9612_s28  ;;  %s9617_s26 = sshll.u32 %s9727_s12, 4  ;;  %s9618_s26 = int_to_ptr.vmem [resolvable:$false] %s9617_s26 }
  0x52   : > { %s9619_s25 = scalar_lea.vmem %s9618_s26, 512  ;;  %p9620_p1 = scmp.lt.s32.totalorder %s9929_s8, %s9618_s26 }
  0x53   : > { %p9615_p5 = pnand %p9613_p8, %p9599_p10  ;;  %p9621_p0 = scmp.lt.s32.totalorder %s9619_s25, %s9612_s28 }
  0x55   : > { %p9616_p13 = pneg %p9615_p5  ;;  %p9622_p7 = por %p9621_p0, %p9620_p1 }
  0x57   : > { %p9623_p9 = pnand %p9622_p7, %p9616_p13 }
  0x59   : > { %9626 = shalt.err (!%p9623_p9)
}
  0x5a   : > { %9402 = dma.hbm_to_vmem [thread:$0]  (!%p9935_p4), %s9927_s10, 256, %s9929_s8, %s189_s5  }
  0x5b   : > { %209 = sbr.rel (%p9869_p6) target bundleno = 1413 (0x585), region = 32  ;;  %s211_s1 = sand.u32 (!%p9869_p6), 1, %s9697_s16  }
  0x5c   : > { %s8316_s30 = sshll.u32 (!%p9869_p6), %s211_s1, 13  ;;  %s212_s15 = scalar_lea.sflag (!%p9869_p6), [#allocation4], %s211_s1 }
  0x5d   : > { %s9967_s7 = scalar_lea.vmem (!%p9869_p6), [#allocation3], %s8316_s30  ;;  %p11288_p10 = scmp.ne.s32.totalorder (!%p9869_p6), %s11281_s11, 0 }
  0x62   : > { %9672 = dma.done.wait (%p11288_p10), %s212_s15, 131072  }
  0x63   : > { %9674 = vsyncadd (%p11288_p10), %s212_s15, 4294836224  ;;  %s220_s24 = sand.u32 1, %s9685_s13   ;;  %p11289_p1 = scmp.ne.s32.totalorder %s11285_s4, 0 }
  0x64   : > { %s8317_s27 = sshll.u32 %s220_s24, 4  ;;  %s221_s10 = scalar_lea.sflag [#allocation6], %s220_s24 }
  0x65   : > { %s224_s8 = scalar_lea.vmem [#allocation5], %s8317_s27 }
  0x66   : > { %9676 = dma.done.wait (%p11289_p1), %s221_s10, 256  }
  0x67   : > { %9678 = vsyncadd (%p11289_p1), %s221_s10, 4294967040  ;;  %s8318_s9 = sshll.u32 %s9705_s18, 3  ;;  %s8320_s5 = sshll.u32 %s9709_s19, 4 }
  0x68   : > { %p258_p6 = scmp.lt.s32.totalorder %s8318_s9, 31  ;;  %p267_p13 = scmp.lt.s32.totalorder %s8320_s5, 31 }
  0x69   : > { %p8322_p4 = scmp.ne.s32.totalorder %s9705_s18, 0 }
  0x6a   : > { %s11308_s9 = smov (!%p258_p6, %s8318_s9), 31  ;;  %s11310_s5 = smov (!%p267_p13, %s8320_s5), 31 }
  0x6b   : > { %s8319_s11 = sshll.u32 %s11308_s9, 2  ;;  %s8321_s25 = sshll.u32 %s11310_s5, 2  ;;  %v276_v0 = vld [vmem:[%s224_s8] sm:$0xff] (!%p8322_p4)  ;;  %v286_v1 = vlaneseq (!%p8322_p4)  ;;  %v277_v4 = vld [vmem:[%s224_s8 + $0x8] sm:$0xff] (!%p8322_p4) }
  0x6c   : > { %s9983_s26 = scalar_lea.vmem %s11265_s0, %s8319_s11  ;;  %s9988_s4 = scalar_lea.vmem %s11268_s3, %s8321_s25  ;;  %v278_v2 = vunpack.c.l.bf16 (!%p8322_p4), %v276_v0  ;;  %v279_v5 = vunpack.c.h.bf16 (!%p8322_p4), %v276_v0  ;;  %v280_v10 = vunpack.c.l.bf16 (!%p8322_p4), %v277_v4  ;;  %v281_v11 = vunpack.c.h.bf16 (!%p8322_p4), %v277_v4 }
  0x6d   : > { %275 = sbr.rel (%p8322_p4) target bundleno = 126 (0x7e), region = 44  ;;  %v287_v3 = vshrl.u32 (!%p8322_p4), %v286_v1, 7 }
  0x6f   : > { %v288_v6 = vsub.s32 (!%p8322_p4), 0, %v287_v3  ;;  %v292_v7 = vsub.s32 (!%p8322_p4), 2, %v287_v3  ;;  %v296_v8 = vsub.s32 (!%p8322_p4), 4, %v287_v3  ;;  %v300_v9 = vsub.s32 (!%p8322_p4), 6, %v287_v3 }
  0x71   : > { %v289_v12 = vrot.slane (!%p8322_p4), %v278_v2, %v288_v6  ;;  %v293_v13 = vrot.slane (!%p8322_p4), %v278_v2, %v292_v7  ;;  %v297_v14 = vrot.slane (!%p8322_p4), %v278_v2, %v296_v8  ;;  %v301_v15 = vrot.slane (!%p8322_p4), %v278_v2, %v300_v9 }
  0x72   : > { %v305_v16 = vrot.slane (!%p8322_p4), %v279_v5, %v288_v6  ;;  %v309_v17 = vrot.slane (!%p8322_p4), %v279_v5, %v292_v7  ;;  %v313_v18 = vrot.slane (!%p8322_p4), %v279_v5, %v296_v8  ;;  %v317_v19 = vrot.slane (!%p8322_p4), %v279_v5, %v300_v9 }
  0x73   : > { %v369_v20 = vrot.slane (!%p8322_p4), %v289_v12, %v288_v6  ;;  %v373_v21 = vrot.slane (!%p8322_p4), %v293_v13, %v288_v6  ;;  %v377_v22 = vrot.slane (!%p8322_p4), %v297_v14, %v288_v6  ;;  %v381_v23 = vrot.slane (!%p8322_p4), %v301_v15, %v288_v6 }
  0x74   : > { %v385_v24 = vrot.slane %v305_v16, %v288_v6  ;;  %v389_v25 = vrot.slane %v309_v17, %v288_v6  ;;  %v393_v26 = vrot.slane %v313_v18, %v288_v6  ;;  %v397_v27 = vrot.slane %v317_v19, %v288_v6 }
  0x75   : > { %430 = vst [vmem:[#allocation2] sm:$0xff] %v369_v20  ;;  %431 = vst [vmem:[#allocation2 + $0x8] sm:$0xff] %v373_v21  ;;  %v321_v28 = vrot.slane %v280_v10, %v288_v6  ;;  %v325_v29 = vrot.slane %v280_v10, %v292_v7  ;;  %v329_v30 = vrot.slane %v280_v10, %v296_v8 }
  0x76   : > { %432 = vst [vmem:[#allocation2 + $0x10] sm:$0xff] %v377_v22  ;;  %433 = vst [vmem:[#allocation2 + $0x18] sm:$0xff] %v381_v23  ;;  %v333_v31 = vrot.slane %v280_v10, %v300_v9  ;;  %v337_v32 = vrot.slane %v281_v11, %v288_v6  ;;  %v341_v33 = vrot.slane %v281_v11, %v292_v7 }
  0x77   : > { %434 = vst [vmem:[#allocation2 + $0x20] sm:$0xff] %v385_v24  ;;  %435 = vst [vmem:[#allocation2 + $0x28] sm:$0xff] %v389_v25  ;;  %v345_v34 = vrot.slane %v281_v11, %v296_v8  ;;  %v349_v35 = vrot.slane %v281_v11, %v300_v9  ;;  %v401_v36 = vrot.slane %v321_v28, %v288_v6 }
  0x78   : > { %436 = vst [vmem:[#allocation2 + $0x30] sm:$0xff] %v393_v26  ;;  %437 = vst [vmem:[#allocation2 + $0x38] sm:$0xff] %v397_v27  ;;  %v405_v37 = vrot.slane %v325_v29, %v288_v6  ;;  %v409_v38 = vrot.slane %v329_v30, %v288_v6  ;;  %v413_v39 = vrot.slane %v333_v31, %v288_v6 }
  0x79   : > { %v417_v40 = vrot.slane %v337_v32, %v288_v6  ;;  %v421_v41 = vrot.slane %v341_v33, %v288_v6  ;;  %v425_v42 = vrot.slane %v345_v34, %v288_v6  ;;  %v429_v43 = vrot.slane %v349_v35, %v288_v6  ;;  %438 = vst [vmem:[#allocation2 + $0x40] sm:$0xff] %v401_v36 }
  0x7a   : > { %439 = vst [vmem:[#allocation2 + $0x48] sm:$0xff] %v405_v37  ;;  %440 = vst [vmem:[#allocation2 + $0x50] sm:$0xff] %v409_v38 }
  0x7b   : > { %441 = vst [vmem:[#allocation2 + $0x58] sm:$0xff] %v413_v39  ;;  %442 = vst [vmem:[#allocation2 + $0x60] sm:$0xff] %v417_v40 }
  0x7c   : > { %443 = vst [vmem:[#allocation2 + $0x68] sm:$0xff] %v421_v41  ;;  %444 = vst [vmem:[#allocation2 + $0x70] sm:$0xff] %v425_v42 }
  0x7d   : > { %445 = vst [vmem:[#allocation2 + $0x78] sm:$0xff] %v429_v43 }
  0x7e PF: > { %v466_v44 = vld [vmem:[%s9967_s7] sm:$0xff]  ;;  %v10023_v34 = vld [vmem:[%s9983_s26 + $0x8] sm:$0xff]  ;;  %p9355_p3 = scmp.ne.s32.totalorder %s9705_s18, 3 }
  0x7f   : > { %v474_v45 = vld [vmem:[%s9967_s7 + $0x40] sm:$0xff]  ;;  %v10033_v39 = vcombine.high %v10023_v34, %v10023_v34 }
  0x80   : > { %v722_v46 = vld [vmem:[%s9967_s7 + $0x800] sm:$0xff]  ;;  %v8332_v47 = vcombine.high %v466_v44, %v474_v45  ;;  %v8331_v49 = vcombine.low %v466_v44, %v474_v45 }
  0x81   : > { %v730_v48 = vld [vmem:[%s9967_s7 + $0x840] sm:$0xff]  ;;  %6711 = vmatprep.mubr.bf16.mxu1 %v10033_v39 }
  0x82   : > { %v482_v50 = vld [vmem:[%s9967_s7 + $0x80] sm:$0xff]  ;;  %v8588_v52 = vcombine.high %v722_v46, %v730_v48  ;;  %v8587_v53 = vcombine.low %v722_v46, %v730_v48  ;;  %6638 = vmatprep.subr.bf16.mxu0 %v8332_v47 }
  0x83   : > { %v490_v51 = vld [vmem:[%s9967_s7 + $0xc0] sm:$0xff]  ;;  %6639 = vmatpush1.bf16.msra.mxu0 %v8331_v49 }
  0x84   : > { %v8348_v54 = vcombine.high %v482_v50, %v490_v51  ;;  %v738_v55 = vld [vmem:[%s9967_s7 + $0x880] sm:$0xff]  ;;  %6679 = vmatprep.subr.bf16.mxu1 %v8588_v52  ;;  %v8347_v62 = vcombine.low %v482_v50, %v490_v51 }
  0x85   : > { %v746_v56 = vld [vmem:[%s9967_s7 + $0x8c0] sm:$0xff]  ;;  %6680 = vmatpush1.bf16.msra.mxu1 %v8587_v53 }
  0x86   : > { %v498_v57 = vld [vmem:[%s9967_s7 + $0x100] sm:$0xff]  ;;  %v8604_v58 = vcombine.high %v738_v55, %v746_v56  ;;  %6640 = vmatprep.subr.bf16.mxu0 %v8348_v54  ;;  %v8603_v63 = vcombine.low %v738_v55, %v746_v56 }
  0x87   : > { %v506_v59 = vld [vmem:[%s9967_s7 + $0x140] sm:$0xff]  ;;  %6641 = vmatpush1.bf16.msra.mxu0 %v8347_v62 }
  0x88   : > { %v754_v60 = vld [vmem:[%s9967_s7 + $0x900] sm:$0xff]  ;;  %v8364_v0 = vcombine.high %v498_v57, %v506_v59  ;;  %6681 = vmatprep.subr.bf16.mxu1 %v8604_v58  ;;  %v8363_v6 = vcombine.low %v498_v57, %v506_v59 }
  0x89   : > { %v762_v61 = vld [vmem:[%s9967_s7 + $0x940] sm:$0xff]  ;;  %6682 = vmatpush1.bf16.msra.mxu1 %v8603_v63 }
  0x8a   : > { %v8620_v1 = vcombine.high %v754_v60, %v762_v61  ;;  %v514_v2 = vld [vmem:[%s9967_s7 + $0x180] sm:$0xff]  ;;  %6642 = vmatprep.subr.bf16.mxu0 %v8364_v0  ;;  %v8619_v7 = vcombine.low %v754_v60, %v762_v61 }
  0x8b   : > { %v522_v3 = vld [vmem:[%s9967_s7 + $0x1c0] sm:$0xff]  ;;  %6643 = vmatpush1.bf16.msra.mxu0 %v8363_v6 }
  0x8c   : > { %v770_v4 = vld [vmem:[%s9967_s7 + $0x980] sm:$0xff]  ;;  %v8380_v8 = vcombine.high %v514_v2, %v522_v3  ;;  %6683 = vmatprep.subr.bf16.mxu1 %v8620_v1  ;;  %v8379_v14 = vcombine.low %v514_v2, %v522_v3 }
  0x8d   : > { %v778_v5 = vld [vmem:[%s9967_s7 + $0x9c0] sm:$0xff]  ;;  %6684 = vmatpush1.bf16.msra.mxu1 %v8619_v7 }
  0x8e   : > { %v8636_v9 = vcombine.high %v770_v4, %v778_v5  ;;  %v530_v10 = vld [vmem:[%s9967_s7 + $0x200] sm:$0xff]  ;;  %6644 = vmatprep.subr.bf16.mxu0 %v8380_v8  ;;  %v8635_v15 = vcombine.low %v770_v4, %v778_v5 }
  0x8f   : > { %v538_v11 = vld [vmem:[%s9967_s7 + $0x240] sm:$0xff]  ;;  %6645 = vmatpush1.bf16.msra.mxu0 %v8379_v14 }
  0x90   : > { %v786_v12 = vld [vmem:[%s9967_s7 + $0xa00] sm:$0xff]  ;;  %v8396_v16 = vcombine.high %v530_v10, %v538_v11  ;;  %6685 = vmatprep.subr.bf16.mxu1 %v8636_v9  ;;  %v8395_v22 = vcombine.low %v530_v10, %v538_v11 }
  0x91   : > { %v794_v13 = vld [vmem:[%s9967_s7 + $0xa40] sm:$0xff]  ;;  %6686 = vmatpush1.bf16.msra.mxu1 %v8635_v15 }
  0x92   : > { %v8652_v17 = vcombine.high %v786_v12, %v794_v13  ;;  %v546_v18 = vld [vmem:[%s9967_s7 + $0x280] sm:$0xff]  ;;  %6646 = vmatprep.subr.bf16.mxu0 %v8396_v16  ;;  %v8651_v23 = vcombine.low %v786_v12, %v794_v13 }
  0x93   : > { %v554_v19 = vld [vmem:[%s9967_s7 + $0x2c0] sm:$0xff]  ;;  %6647 = vmatpush1.bf16.msra.mxu0 %v8395_v22 }
  0x94   : > { %v802_v20 = vld [vmem:[%s9967_s7 + $0xa80] sm:$0xff]  ;;  %v8412_v24 = vcombine.high %v546_v18, %v554_v19  ;;  %6687 = vmatprep.subr.bf16.mxu1 %v8652_v17  ;;  %v8411_v30 = vcombine.low %v546_v18, %v554_v19 }
  0x95   : > { %v810_v21 = vld [vmem:[%s9967_s7 + $0xac0] sm:$0xff]  ;;  %6688 = vmatpush1.bf16.msra.mxu1 %v8651_v23 }
  0x96   : > { %v8668_v25 = vcombine.high %v802_v20, %v810_v21  ;;  %v562_v26 = vld [vmem:[%s9967_s7 + $0x300] sm:$0xff]  ;;  %6648 = vmatprep.subr.bf16.mxu0 %v8412_v24  ;;  %v8667_v31 = vcombine.low %v802_v20, %v810_v21 }
  0x97   : > { %v570_v27 = vld [vmem:[%s9967_s7 + $0x340] sm:$0xff]  ;;  %6649 = vmatpush1.bf16.msra.mxu0 %v8411_v30 }
  0x98   : > { %v818_v28 = vld [vmem:[%s9967_s7 + $0xb00] sm:$0xff]  ;;  %v8428_v32 = vcombine.high %v562_v26, %v570_v27  ;;  %6689 = vmatprep.subr.bf16.mxu1 %v8668_v25  ;;  %v8427_v42 = vcombine.low %v562_v26, %v570_v27 }
  0x99   : > { %v826_v29 = vld [vmem:[%s9967_s7 + $0xb40] sm:$0xff]  ;;  %6690 = vmatpush1.bf16.msra.mxu1 %v8667_v31 }
  0x9a   : > { %v10020_v33 = vld [vmem:[%s9983_s26] sm:$0xff]  ;;  %v8684_v35 = vcombine.high %v818_v28, %v826_v29  ;;  %6650 = vmatprep.subr.bf16.mxu0 %v8428_v32  ;;  %v8683_v43 = vcombine.low %v818_v28, %v826_v29 }
  0x9b   : > { %v578_v36 = vld [vmem:[%s9967_s7 + $0x380] sm:$0xff]  ;;  %v10029_v38 = vcombine.high %v10020_v33, %v10020_v33  ;;  %6651 = vmatpush1.bf16.msra.mxu0 %v8427_v42 }
  0x9c   : > { %v586_v37 = vld [vmem:[%s9967_s7 + $0x3c0] sm:$0xff]  ;;  %6691 = vmatprep.subr.bf16.mxu1 %v8684_v35 }
  0x9d   : > { %v834_v40 = vld [vmem:[%s9967_s7 + $0xb80] sm:$0xff]  ;;  %6670 = vmatprep.mubr.bf16.mxu0 %v10029_v38  ;;  %v8444_v44 = vcombine.high %v578_v36, %v586_v37  ;;  %v8443_v50 = vcombine.low %v578_v36, %v586_v37  ;;  %6692 = vmatpush1.bf16.msra.mxu1 %v8683_v43 }
  0x9e   : > { %v842_v41 = vld [vmem:[%s9967_s7 + $0xbc0] sm:$0xff] }
  0x9f   : > { %v8700_v45 = vcombine.high %v834_v40, %v842_v41  ;;  %v594_v46 = vld [vmem:[%s9967_s7 + $0x400] sm:$0xff]  ;;  %6652 = vmatprep.subr.bf16.mxu0 %v8444_v44  ;;  %v8699_v51 = vcombine.low %v834_v40, %v842_v41 }
  0xa0   : > { %v602_v47 = vld [vmem:[%s9967_s7 + $0x440] sm:$0xff]  ;;  %6653 = vmatpush1.bf16.msra.mxu0 %v8443_v50 }
  0xa1   : > { %v850_v48 = vld [vmem:[%s9967_s7 + $0xc00] sm:$0xff]  ;;  %v8460_v52 = vcombine.high %v594_v46, %v602_v47  ;;  %6693 = vmatprep.subr.bf16.mxu1 %v8700_v45  ;;  %v8459_v58 = vcombine.low %v594_v46, %v602_v47 }
  0xa2   : > { %v858_v49 = vld [vmem:[%s9967_s7 + $0xc40] sm:$0xff]  ;;  %6694 = vmatpush1.bf16.msra.mxu1 %v8699_v51 }
  0xa3   : > { %v8716_v53 = vcombine.high %v850_v48, %v858_v49  ;;  %v610_v54 = vld [vmem:[%s9967_s7 + $0x480] sm:$0xff]  ;;  %6654 = vmatprep.subr.bf16.mxu0 %v8460_v52  ;;  %v8715_v59 = vcombine.low %v850_v48, %v858_v49 }
  0xa4   : > { %v618_v55 = vld [vmem:[%s9967_s7 + $0x4c0] sm:$0xff]  ;;  %6655 = vmatpush1.bf16.msra.mxu0 %v8459_v58 }
  0xa5   : > { %v866_v56 = vld [vmem:[%s9967_s7 + $0xc80] sm:$0xff]  ;;  %v8476_v60 = vcombine.high %v610_v54, %v618_v55  ;;  %6695 = vmatprep.subr.bf16.mxu1 %v8716_v53  ;;  %v8475_v2 = vcombine.low %v610_v54, %v618_v55 }
  0xa6   : > { %v874_v57 = vld [vmem:[%s9967_s7 + $0xcc0] sm:$0xff]  ;;  %6696 = vmatpush1.bf16.msra.mxu1 %v8715_v59 }
  0xa7   : > { %v8732_v61 = vcombine.high %v866_v56, %v874_v57  ;;  %v626_v62 = vld [vmem:[%s9967_s7 + $0x500] sm:$0xff]  ;;  %6656 = vmatprep.subr.bf16.mxu0 %v8476_v60  ;;  %v8731_v3 = vcombine.low %v866_v56, %v874_v57  ;;  %v10079_v60 = vcombine.low %v10020_v33, %v10020_v33 }
  0xa8   : > { %v634_v63 = vld [vmem:[%s9967_s7 + $0x540] sm:$0xff]  ;;  %6657 = vmatpush1.bf16.msra.mxu0 %v8475_v2  ;;  %v10091_v2 = vld [vmem:[%s9983_s26 + $0x18] sm:$0xff] }
  0xa9   : > { %v882_v0 = vld [vmem:[%s9967_s7 + $0xd00] sm:$0xff]  ;;  %v8492_v4 = vcombine.high %v626_v62, %v634_v63  ;;  %6697 = vmatprep.subr.bf16.mxu1 %v8732_v61  ;;  %v8491_v10 = vcombine.low %v626_v62, %v634_v63  ;;  %v10084_v63 = vld [vmem:[%s9983_s26 + $0x10] sm:$0xff] }
  0xaa   : > { %v890_v1 = vld [vmem:[%s9967_s7 + $0xd40] sm:$0xff]  ;;  %6698 = vmatpush1.bf16.msra.mxu1 %v8731_v3 }
  0xab   : > { %v8748_v5 = vcombine.high %v882_v0, %v890_v1  ;;  %v642_v6 = vld [vmem:[%s9967_s7 + $0x580] sm:$0xff]  ;;  %6658 = vmatprep.subr.bf16.mxu0 %v8492_v4  ;;  %v8747_v11 = vcombine.low %v882_v0, %v890_v1  ;;  %v10088_v0 = vcombine.low %v10023_v34, %v10023_v34 }
  0xac   : > { %v650_v7 = vld [vmem:[%s9967_s7 + $0x5c0] sm:$0xff]  ;;  %6659 = vmatpush1.bf16.msra.mxu0 %v8491_v10 }
  0xad   : > { %v898_v8 = vld [vmem:[%s9967_s7 + $0xd80] sm:$0xff]  ;;  %v8508_v12 = vcombine.high %v642_v6, %v650_v7  ;;  %6699 = vmatprep.subr.bf16.mxu1 %v8748_v5  ;;  %v8507_v18 = vcombine.low %v642_v6, %v650_v7  ;;  %v10097_v7 = vcombine.high %v10084_v63, %v10084_v63 }
  0xae   : > { %v906_v9 = vld [vmem:[%s9967_s7 + $0xdc0] sm:$0xff]  ;;  %6700 = vmatpush1.bf16.msra.mxu1 %v8747_v11 }
  0xaf   : > { %v8764_v13 = vcombine.high %v898_v8, %v906_v9  ;;  %v658_v14 = vld [vmem:[%s9967_s7 + $0x600] sm:$0xff]  ;;  %6660 = vmatprep.subr.bf16.mxu0 %v8508_v12  ;;  %v8763_v19 = vcombine.low %v898_v8, %v906_v9  ;;  %v10104_v9 = vcombine.high %v10091_v2, %v10091_v2 }
  0xb0   : > { %v666_v15 = vld [vmem:[%s9967_s7 + $0x640] sm:$0xff]  ;;  %6661 = vmatpush1.bf16.msra.mxu0 %v8507_v18 }
  0xb1   : > { %v914_v16 = vld [vmem:[%s9967_s7 + $0xe00] sm:$0xff]  ;;  %v8524_v20 = vcombine.high %v658_v14, %v666_v15  ;;  %6701 = vmatprep.subr.bf16.mxu1 %v8764_v13  ;;  %v8523_v26 = vcombine.low %v658_v14, %v666_v15 }
  0xb2   : > { %v922_v17 = vld [vmem:[%s9967_s7 + $0xe40] sm:$0xff]  ;;  %6702 = vmatpush1.bf16.msra.mxu1 %v8763_v19 }
  0xb3   : > { %v8780_v21 = vcombine.high %v914_v16, %v922_v17  ;;  %v674_v22 = vld [vmem:[%s9967_s7 + $0x680] sm:$0xff]  ;;  %6662 = vmatprep.subr.bf16.mxu0 %v8524_v20  ;;  %v8779_v27 = vcombine.low %v914_v16, %v922_v17 }
  0xb4   : > { %v682_v23 = vld [vmem:[%s9967_s7 + $0x6c0] sm:$0xff]  ;;  %6663 = vmatpush1.bf16.msra.mxu0 %v8523_v26 }
  0xb5   : > { %v930_v24 = vld [vmem:[%s9967_s7 + $0xe80] sm:$0xff]  ;;  %v8540_v28 = vcombine.high %v674_v22, %v682_v23  ;;  %6703 = vmatprep.subr.bf16.mxu1 %v8780_v21  ;;  %v8539_v36 = vcombine.low %v674_v22, %v682_v23 }
  0xb6   : > { %v938_v25 = vld [vmem:[%s9967_s7 + $0xec0] sm:$0xff]  ;;  %6704 = vmatpush1.bf16.msra.mxu1 %v8779_v27 }
  0xb7   : > { %v8796_v29 = vcombine.high %v930_v24, %v938_v25  ;;  %v690_v30 = vld [vmem:[%s9967_s7 + $0x700] sm:$0xff]  ;;  %6664 = vmatprep.subr.bf16.mxu0 %v8540_v28  ;;  %v8795_v37 = vcombine.low %v930_v24, %v938_v25 }
  0xb8   : > { %v698_v31 = vld [vmem:[%s9967_s7 + $0x740] sm:$0xff]  ;;  %6665 = vmatpush1.bf16.msra.mxu0 %v8539_v36 }
  0xb9   : > { %v946_v32 = vld [vmem:[%s9967_s7 + $0xf00] sm:$0xff]  ;;  %v8556_v40 = vcombine.high %v690_v30, %v698_v31  ;;  %6705 = vmatprep.subr.bf16.mxu1 %v8796_v29  ;;  %v8555_v46 = vcombine.low %v690_v30, %v698_v31 }
  0xba   : > { %v954_v35 = vld [vmem:[%s9967_s7 + $0xf40] sm:$0xff]  ;;  %6706 = vmatpush1.bf16.msra.mxu1 %v8795_v37 }
  0xbb   : > { %v8812_v41 = vcombine.high %v946_v32, %v954_v35  ;;  %v706_v42 = vld [vmem:[%s9967_s7 + $0x780] sm:$0xff]  ;;  %6666 = vmatprep.subr.bf16.mxu0 %v8556_v40  ;;  %v8811_v47 = vcombine.low %v946_v32, %v954_v35 }
  0xbc   : > { %v714_v43 = vld [vmem:[%s9967_s7 + $0x7c0] sm:$0xff]  ;;  %6667 = vmatpush1.bf16.msra.mxu0 %v8555_v46 }
  0xbd   : > { %v962_v44 = vld [vmem:[%s9967_s7 + $0xf80] sm:$0xff]  ;;  %v8572_v48 = vcombine.high %v706_v42, %v714_v43  ;;  %6707 = vmatprep.subr.bf16.mxu1 %v8812_v41  ;;  %v8571_v54 = vcombine.low %v706_v42, %v714_v43 }
  0xbe   : > { %v970_v45 = vld [vmem:[%s9967_s7 + $0xfc0] sm:$0xff]  ;;  %6708 = vmatpush1.bf16.msra.mxu1 %v8811_v47 }
  0xbf   : > { %v8828_v49 = vcombine.high %v962_v44, %v970_v45  ;;  %v978_v50 = vld [vmem:[%s9967_s7 + $0x1000] sm:$0xff]  ;;  %6668 = vmatprep.subr.bf16.mxu0 %v8572_v48  ;;  %v8827_v55 = vcombine.low %v962_v44, %v970_v45 }
  0xc0   : > { %v986_v51 = vld [vmem:[%s9967_s7 + $0x1040] sm:$0xff]  ;;  %6669 = vmatpush1.bf16.msra.mxu0 %v8571_v54 }
  0xc1   : > { %v1234_v52 = vld [vmem:[%s9967_s7 + $0x1800] sm:$0xff]  ;;  %v8844_v56 = vcombine.high %v978_v50, %v986_v51  ;;  %6709 = vmatprep.subr.bf16.mxu1 %v8828_v49  ;;  %v8843_v1 = vcombine.low %v978_v50, %v986_v51 }
  0xc2   : > { %v1242_v53 = vld [vmem:[%s9967_s7 + $0x1840] sm:$0xff]  ;;  %6710 = vmatpush1.bf16.msra.mxu1 %v8827_v55 }
  0xc3   : > { %v9100_v57 = vcombine.high %v1234_v52, %v1242_v53  ;;  %v994_v58 = vld [vmem:[%s9967_s7 + $0x1080] sm:$0xff]  ;;  %6720 = vmatprep.subr.bf16.mxu0 %v8844_v56  ;;  %v9099_v3 = vcombine.low %v1234_v52, %v1242_v53  ;;  %6671 = vmatmul.mubr.bf16.vlgmr.msra.gmra.mrb[0].mxu0 %v10079_v60 }
  0xc4   : > { %v1002_v59 = vld [vmem:[%s9967_s7 + $0x10c0] sm:$0xff]  ;;  %6721 = vmatpush1.bf16.msra.mxu0 %v8843_v1  ;;  %6752 = vmatprep.mubr.bf16.mxu0 %v10097_v7 }
  0xc5   : > { %v1250_v61 = vld [vmem:[%s9967_s7 + $0x1880] sm:$0xff]  ;;  %v8860_v4 = vcombine.high %v994_v58, %v1002_v59  ;;  %6761 = vmatprep.subr.bf16.mxu1 %v9100_v57  ;;  %6712 = vmatmul.mubr.bf16.vlgmr.msra.gmra.mrb[0].mxu1 %v10088_v0  ;;  %v8859_v10 = vcombine.low %v994_v58, %v1002_v59 }
  0xc6   : > { %v1258_v62 = vld [vmem:[%s9967_s7 + $0x18c0] sm:$0xff]  ;;  %6762 = vmatpush1.bf16.msra.mxu1 %v9099_v3  ;;  %6793 = vmatprep.mubr.bf16.mxu1 %v10104_v9 }
  0xc7   : > { %v9116_v33 = vcombine.high %v1250_v61, %v1258_v62  ;;  %v1010_v5 = vld [vmem:[%s9967_s7 + $0x1100] sm:$0xff]  ;;  %6722 = vmatprep.subr.bf16.mxu0 %v8860_v4  ;;  %v9115_v11 = vcombine.low %v1250_v61, %v1258_v62 }
  0xc8   : > { %v1018_v6 = vld [vmem:[%s9967_s7 + $0x1140] sm:$0xff]  ;;  %6723 = vmatpush1.bf16.msra.mxu0 %v8859_v10 }
  0xc9   : > { %v1266_v34 = vld [vmem:[%s9967_s7 + $0x1900] sm:$0xff]  ;;  %v8876_v12 = vcombine.high %v1010_v5, %v1018_v6  ;;  %6763 = vmatprep.subr.bf16.mxu1 %v9116_v33  ;;  %v8875_v18 = vcombine.low %v1010_v5, %v1018_v6 }
  0xca   : > { %v1274_v8 = vld [vmem:[%s9967_s7 + $0x1940] sm:$0xff]  ;;  %6764 = vmatpush1.bf16.msra.mxu1 %v9115_v11 }
  0xcb   : > { %v9132_v13 = vcombine.high %v1266_v34, %v1274_v8  ;;  %v1026_v14 = vld [vmem:[%s9967_s7 + $0x1180] sm:$0xff]  ;;  %6724 = vmatprep.subr.bf16.mxu0 %v8876_v12  ;;  %v9131_v19 = vcombine.low %v1266_v34, %v1274_v8 }
  0xcc   : > { %v1034_v15 = vld [vmem:[%s9967_s7 + $0x11c0] sm:$0xff]  ;;  %6725 = vmatpush1.bf16.msra.mxu0 %v8875_v18 }
  0xcd   : > { %v1282_v16 = vld [vmem:[%s9967_s7 + $0x1980] sm:$0xff]  ;;  %v8892_v20 = vcombine.high %v1026_v14, %v1034_v15  ;;  %6765 = vmatprep.subr.bf16.mxu1 %v9132_v13  ;;  %v8891_v26 = vcombine.low %v1026_v14, %v1034_v15 }
  0xce   : > { %v1290_v17 = vld [vmem:[%s9967_s7 + $0x19c0] sm:$0xff]  ;;  %6766 = vmatpush1.bf16.msra.mxu1 %v9131_v19 }
  0xcf   : > { %v9148_v21 = vcombine.high %v1282_v16, %v1290_v17  ;;  %v1042_v22 = vld [vmem:[%s9967_s7 + $0x1200] sm:$0xff]  ;;  %6726 = vmatprep.subr.bf16.mxu0 %v8892_v20  ;;  %v9147_v27 = vcombine.low %v1282_v16, %v1290_v17 }
  0xd0   : > { %v1050_v23 = vld [vmem:[%s9967_s7 + $0x1240] sm:$0xff]  ;;  %6727 = vmatpush1.bf16.msra.mxu0 %v8891_v26 }
  0xd1   : > { %v1298_v24 = vld [vmem:[%s9967_s7 + $0x1a00] sm:$0xff]  ;;  %v8908_v28 = vcombine.high %v1042_v22, %v1050_v23  ;;  %6767 = vmatprep.subr.bf16.mxu1 %v9148_v21  ;;  %v8907_v36 = vcombine.low %v1042_v22, %v1050_v23 }
  0xd2   : > { %v1306_v25 = vld [vmem:[%s9967_s7 + $0x1a40] sm:$0xff]  ;;  %6768 = vmatpush1.bf16.msra.mxu1 %v9147_v27 }
  0xd3   : > { %v9164_v29 = vcombine.high %v1298_v24, %v1306_v25  ;;  %v1058_v30 = vld [vmem:[%s9967_s7 + $0x1280] sm:$0xff]  ;;  %6728 = vmatprep.subr.bf16.mxu0 %v8908_v28  ;;  %v9163_v37 = vcombine.low %v1298_v24, %v1306_v25 }
  0xd4   : > { %v1066_v31 = vld [vmem:[%s9967_s7 + $0x12c0] sm:$0xff]  ;;  %6729 = vmatpush1.bf16.msra.mxu0 %v8907_v36 }
  0xd5   : > { %v1314_v32 = vld [vmem:[%s9967_s7 + $0x1a80] sm:$0xff]  ;;  %v8924_v40 = vcombine.high %v1058_v30, %v1066_v31  ;;  %6769 = vmatprep.subr.bf16.mxu1 %v9164_v29  ;;  %v8923_v46 = vcombine.low %v1058_v30, %v1066_v31 }
  0xd6   : > { %v1322_v35 = vld [vmem:[%s9967_s7 + $0x1ac0] sm:$0xff]  ;;  %6770 = vmatpush1.bf16.msra.mxu1 %v9163_v37 }
  0xd7   : > { %v9180_v41 = vcombine.high %v1314_v32, %v1322_v35  ;;  %v1074_v42 = vld [vmem:[%s9967_s7 + $0x1300] sm:$0xff]  ;;  %6730 = vmatprep.subr.bf16.mxu0 %v8924_v40  ;;  %v9179_v47 = vcombine.low %v1314_v32, %v1322_v35 }
  0xd8   : > { %v1082_v43 = vld [vmem:[%s9967_s7 + $0x1340] sm:$0xff]  ;;  %6731 = vmatpush1.bf16.msra.mxu0 %v8923_v46 }
  0xd9   : > { %v1330_v44 = vld [vmem:[%s9967_s7 + $0x1b00] sm:$0xff]  ;;  %v8940_v48 = vcombine.high %v1074_v42, %v1082_v43  ;;  %6771 = vmatprep.subr.bf16.mxu1 %v9180_v41  ;;  %v8939_v54 = vcombine.low %v1074_v42, %v1082_v43 }
  0xda   : > { %v1338_v45 = vld [vmem:[%s9967_s7 + $0x1b40] sm:$0xff]  ;;  %6772 = vmatpush1.bf16.msra.mxu1 %v9179_v47 }
  0xdb   : > { %v9196_v49 = vcombine.high %v1330_v44, %v1338_v45  ;;  %v1090_v50 = vld [vmem:[%s9967_s7 + $0x1380] sm:$0xff]  ;;  %6732 = vmatprep.subr.bf16.mxu0 %v8940_v48  ;;  %v9195_v55 = vcombine.low %v1330_v44, %v1338_v45 }
  0xdc   : > { %v1098_v51 = vld [vmem:[%s9967_s7 + $0x13c0] sm:$0xff]  ;;  %6733 = vmatpush1.bf16.msra.mxu0 %v8939_v54 }
  0xdd   : > { %v1346_v52 = vld [vmem:[%s9967_s7 + $0x1b80] sm:$0xff]  ;;  %v8956_v56 = vcombine.high %v1090_v50, %v1098_v51  ;;  %6773 = vmatprep.subr.bf16.mxu1 %v9196_v49  ;;  %v8955_v1 = vcombine.low %v1090_v50, %v1098_v51 }
  0xde   : > { %v1354_v53 = vld [vmem:[%s9967_s7 + $0x1bc0] sm:$0xff]  ;;  %6774 = vmatpush1.bf16.msra.mxu1 %v9195_v55 }
  0xdf   : > { %v9212_v57 = vcombine.high %v1346_v52, %v1354_v53  ;;  %v1106_v58 = vld [vmem:[%s9967_s7 + $0x1400] sm:$0xff]  ;;  %6734 = vmatprep.subr.bf16.mxu0 %v8956_v56  ;;  %v9211_v3 = vcombine.low %v1346_v52, %v1354_v53 }
  0xe0   : > { %v1114_v59 = vld [vmem:[%s9967_s7 + $0x1440] sm:$0xff]  ;;  %6735 = vmatpush1.bf16.msra.mxu0 %v8955_v1 }
  0xe1   : > { %v1362_v61 = vld [vmem:[%s9967_s7 + $0x1c00] sm:$0xff]  ;;  %v8972_v4 = vcombine.high %v1106_v58, %v1114_v59  ;;  %6775 = vmatprep.subr.bf16.mxu1 %v9212_v57  ;;  %v8971_v10 = vcombine.low %v1106_v58, %v1114_v59 }
  0xe2   : > { %v1370_v62 = vld [vmem:[%s9967_s7 + $0x1c40] sm:$0xff]  ;;  %6776 = vmatpush1.bf16.msra.mxu1 %v9211_v3 }
  0xe3   : > { %v9228_v33 = vcombine.high %v1362_v61, %v1370_v62  ;;  %v1122_v5 = vld [vmem:[%s9967_s7 + $0x1480] sm:$0xff]  ;;  %6736 = vmatprep.subr.bf16.mxu0 %v8972_v4  ;;  %v9227_v11 = vcombine.low %v1362_v61, %v1370_v62 }
  0xe4   : > { %v1130_v6 = vld [vmem:[%s9967_s7 + $0x14c0] sm:$0xff]  ;;  %6737 = vmatpush1.bf16.msra.mxu0 %v8971_v10 }
  0xe5   : > { %v1378_v34 = vld [vmem:[%s9967_s7 + $0x1c80] sm:$0xff]  ;;  %v8988_v12 = vcombine.high %v1122_v5, %v1130_v6  ;;  %6777 = vmatprep.subr.bf16.mxu1 %v9228_v33  ;;  %v8987_v18 = vcombine.low %v1122_v5, %v1130_v6  ;;  %v467_v5 = vld [vmem:[%s9967_s7 + $0x8] sm:$0xff] }
  0xe6   : > { %v1386_v8 = vld [vmem:[%s9967_s7 + $0x1cc0] sm:$0xff]  ;;  %6778 = vmatpush1.bf16.msra.mxu1 %v9227_v11  ;;  %v475_v6 = vld [vmem:[%s9967_s7 + $0x48] sm:$0xff] }
  0xe7   : > { %v9244_v13 = vcombine.high %v1378_v34, %v1386_v8  ;;  %v1138_v14 = vld [vmem:[%s9967_s7 + $0x1500] sm:$0xff]  ;;  %6738 = vmatprep.subr.bf16.mxu0 %v8988_v12  ;;  %v9243_v19 = vcombine.low %v1378_v34, %v1386_v8  ;;  %v723_v34 = vld [vmem:[%s9967_s7 + $0x808] sm:$0xff]  ;;  %v8334_v12 = vcombine.high %v467_v5, %v475_v6 }
  0xe8   : > { %v1146_v15 = vld [vmem:[%s9967_s7 + $0x1540] sm:$0xff]  ;;  %6739 = vmatpush1.bf16.msra.mxu0 %v8987_v18  ;;  %v731_v8 = vld [vmem:[%s9967_s7 + $0x848] sm:$0xff] }
  0xe9   : > { %v1394_v16 = vld [vmem:[%s9967_s7 + $0x1d00] sm:$0xff]  ;;  %v9004_v20 = vcombine.high %v1138_v14, %v1146_v15  ;;  %6779 = vmatprep.subr.bf16.mxu1 %v9244_v13  ;;  %v9003_v26 = vcombine.low %v1138_v14, %v1146_v15  ;;  %v8590_v13 = vcombine.high %v723_v34, %v731_v8  ;;  %v483_v14 = vld [vmem:[%s9967_s7 + $0x88] sm:$0xff] }
  0xea   : > { %v1402_v17 = vld [vmem:[%s9967_s7 + $0x1d40] sm:$0xff]  ;;  %6780 = vmatpush1.bf16.msra.mxu1 %v9243_v19  ;;  %v491_v15 = vld [vmem:[%s9967_s7 + $0xc8] sm:$0xff]  ;;  %v10175_v19 = vcombine.low %v10091_v2, %v10091_v2 }
  0xeb   : > { %v9260_v21 = vcombine.high %v1394_v16, %v1402_v17  ;;  %v1154_v22 = vld [vmem:[%s9967_s7 + $0x1580] sm:$0xff]  ;;  %6740 = vmatprep.subr.bf16.mxu0 %v9004_v20  ;;  %v9259_v27 = vcombine.low %v1394_v16, %v1402_v17  ;;  %v10169_v16 = vcombine.low %v10084_v63, %v10084_v63  ;;  %v739_v17 = vld [vmem:[%s9967_s7 + $0x888] sm:$0xff]  ;;  %v8333_v20 = vcombine.low %v467_v5, %v475_v6 }
  0xec   : > { %v1162_v23 = vld [vmem:[%s9967_s7 + $0x15c0] sm:$0xff]  ;;  %6741 = vmatpush1.bf16.msra.mxu0 %v9003_v26  ;;  %v747_v18 = vld [vmem:[%s9967_s7 + $0x8c8] sm:$0xff]  ;;  %v8349_v2 = vcombine.low %v483_v14, %v491_v15 }
  0xed   : > { %v1410_v24 = vld [vmem:[%s9967_s7 + $0x1d80] sm:$0xff]  ;;  %v9020_v28 = vcombine.high %v1154_v22, %v1162_v23  ;;  %6781 = vmatprep.subr.bf16.mxu1 %v9260_v21  ;;  %v9019_v36 = vcombine.low %v1154_v22, %v1162_v23  ;;  %v8589_v21 = vcombine.low %v723_v34, %v731_v8  ;;  %v8350_v22 = vcombine.high %v483_v14, %v491_v15  ;;  %v507_v63 = vld [vmem:[%s9967_s7 + $0x148] sm:$0xff] }
  0xee   : > { %v1418_v25 = vld [vmem:[%s9967_s7 + $0x1dc0] sm:$0xff]  ;;  %6782 = vmatpush1.bf16.msra.mxu1 %v9259_v27  ;;  %v8606_v23 = vcombine.high %v739_v17, %v747_v18  ;;  %v763_v26 = vld [vmem:[%s9967_s7 + $0x948] sm:$0xff]  ;;  %v8605_v27 = vcombine.low %v739_v17, %v747_v18 }
  0xef   : > { %v9276_v29 = vcombine.high %v1410_v24, %v1418_v25  ;;  %v1170_v30 = vld [vmem:[%s9967_s7 + $0x1600] sm:$0xff]  ;;  %6742 = vmatprep.subr.bf16.mxu0 %v9020_v28  ;;  %v9275_v37 = vcombine.low %v1410_v24, %v1418_v25  ;;  %v499_v24 = vld [vmem:[%s9967_s7 + $0x108] sm:$0xff] }
  0xf0   : > { %v1178_v31 = vld [vmem:[%s9967_s7 + $0x1640] sm:$0xff]  ;;  %6743 = vmatpush1.bf16.msra.mxu0 %v9019_v36  ;;  %v755_v25 = vld [vmem:[%s9967_s7 + $0x908] sm:$0xff]  ;;  %v8366_v28 = vcombine.high %v499_v24, %v507_v63  ;;  %v8365_v36 = vcombine.low %v499_v24, %v507_v63 }
  0xf1   : > { %v1426_v32 = vld [vmem:[%s9967_s7 + $0x1e00] sm:$0xff]  ;;  %v9036_v40 = vcombine.high %v1170_v30, %v1178_v31  ;;  %6783 = vmatprep.subr.bf16.mxu1 %v9276_v29  ;;  %v9035_v46 = vcombine.low %v1170_v30, %v1178_v31  ;;  %v8622_v29 = vcombine.high %v755_v25, %v763_v26  ;;  %v515_v30 = vld [vmem:[%s9967_s7 + $0x188] sm:$0xff] }
  0xf2   : > { %v1434_v35 = vld [vmem:[%s9967_s7 + $0x1e40] sm:$0xff]  ;;  %6784 = vmatpush1.bf16.msra.mxu1 %v9275_v37  ;;  %v523_v31 = vld [vmem:[%s9967_s7 + $0x1c8] sm:$0xff]  ;;  %v8621_v37 = vcombine.low %v755_v25, %v763_v26 }
  0xf3   : > { %v9292_v41 = vcombine.high %v1426_v32, %v1434_v35  ;;  %v1186_v42 = vld [vmem:[%s9967_s7 + $0x1680] sm:$0xff]  ;;  %6744 = vmatprep.subr.bf16.mxu0 %v9036_v40  ;;  %v9291_v47 = vcombine.low %v1426_v32, %v1434_v35  ;;  %v771_v32 = vld [vmem:[%s9967_s7 + $0x988] sm:$0xff]  ;;  %v8382_v40 = vcombine.high %v515_v30, %v523_v31 }
  0xf4   : > { %v1194_v43 = vld [vmem:[%s9967_s7 + $0x16c0] sm:$0xff]  ;;  %6745 = vmatpush1.bf16.msra.mxu0 %v9035_v46  ;;  %v779_v35 = vld [vmem:[%s9967_s7 + $0x9c8] sm:$0xff]  ;;  %v8381_v46 = vcombine.low %v515_v30, %v523_v31 }
  0xf5   : > { %v1442_v44 = vld [vmem:[%s9967_s7 + $0x1e80] sm:$0xff]  ;;  %v9052_v48 = vcombine.high %v1186_v42, %v1194_v43  ;;  %6785 = vmatprep.subr.bf16.mxu1 %v9292_v41  ;;  %v9051_v54 = vcombine.low %v1186_v42, %v1194_v43  ;;  %v8638_v41 = vcombine.high %v771_v32, %v779_v35  ;;  %v531_v42 = vld [vmem:[%s9967_s7 + $0x208] sm:$0xff] }
  0xf6   : > { %v1450_v45 = vld [vmem:[%s9967_s7 + $0x1ec0] sm:$0xff]  ;;  %6786 = vmatpush1.bf16.msra.mxu1 %v9291_v47  ;;  %v539_v43 = vld [vmem:[%s9967_s7 + $0x248] sm:$0xff]  ;;  %v8637_v47 = vcombine.low %v771_v32, %v779_v35 }
  0xf7   : > { %v9308_v49 = vcombine.high %v1442_v44, %v1450_v45  ;;  %v1202_v50 = vld [vmem:[%s9967_s7 + $0x1700] sm:$0xff]  ;;  %6746 = vmatprep.subr.bf16.mxu0 %v9052_v48  ;;  %v9307_v55 = vcombine.low %v1442_v44, %v1450_v45  ;;  %v787_v44 = vld [vmem:[%s9967_s7 + $0xa08] sm:$0xff]  ;;  %v8398_v48 = vcombine.high %v531_v42, %v539_v43 }
  0xf8   : > { %v1210_v51 = vld [vmem:[%s9967_s7 + $0x1740] sm:$0xff]  ;;  %6747 = vmatpush1.bf16.msra.mxu0 %v9051_v54  ;;  %v795_v45 = vld [vmem:[%s9967_s7 + $0xa48] sm:$0xff]  ;;  %v8397_v54 = vcombine.low %v531_v42, %v539_v43 }
  0xf9   : > { %v1458_v52 = vld [vmem:[%s9967_s7 + $0x1f00] sm:$0xff]  ;;  %v9068_v56 = vcombine.high %v1202_v50, %v1210_v51  ;;  %6787 = vmatprep.subr.bf16.mxu1 %v9308_v49  ;;  %v9067_v1 = vcombine.low %v1202_v50, %v1210_v51  ;;  %v8654_v49 = vcombine.high %v787_v44, %v795_v45  ;;  %v547_v50 = vld [vmem:[%s9967_s7 + $0x288] sm:$0xff] }
  0xfa   : > { %v1466_v53 = vld [vmem:[%s9967_s7 + $0x1f40] sm:$0xff]  ;;  %6788 = vmatpush1.bf16.msra.mxu1 %v9307_v55  ;;  %v555_v51 = vld [vmem:[%s9967_s7 + $0x2c8] sm:$0xff]  ;;  %v8653_v55 = vcombine.low %v787_v44, %v795_v45 }
  0xfb   : > { %v9324_v57 = vcombine.high %v1458_v52, %v1466_v53  ;;  %v1218_v58 = vld [vmem:[%s9967_s7 + $0x1780] sm:$0xff]  ;;  %6748 = vmatprep.subr.bf16.mxu0 %v9068_v56  ;;  %v9323_v3 = vcombine.low %v1458_v52, %v1466_v53  ;;  %v803_v52 = vld [vmem:[%s9967_s7 + $0xa88] sm:$0xff]  ;;  %v8414_v56 = vcombine.high %v547_v50, %v555_v51 }
  0xfc   : > { %v1226_v59 = vld [vmem:[%s9967_s7 + $0x17c0] sm:$0xff]  ;;  %6749 = vmatpush1.bf16.msra.mxu0 %v9067_v1  ;;  %v811_v53 = vld [vmem:[%s9967_s7 + $0xac8] sm:$0xff]  ;;  %v8413_v1 = vcombine.low %v547_v50, %v555_v51 }
  0xfd   : > { %v1474_v61 = vld [vmem:[%s9967_s7 + $0x1f80] sm:$0xff]  ;;  %v9084_v4 = vcombine.high %v1218_v58, %v1226_v59  ;;  %6789 = vmatprep.subr.bf16.mxu1 %v9324_v57  ;;  %v9083_v10 = vcombine.low %v1218_v58, %v1226_v59  ;;  %v8670_v57 = vcombine.high %v803_v52, %v811_v53  ;;  %v563_v58 = vld [vmem:[%s9967_s7 + $0x308] sm:$0xff] }
  0xfe   : > { %v1482_v62 = vld [vmem:[%s9967_s7 + $0x1fc0] sm:$0xff]  ;;  %6790 = vmatpush1.bf16.msra.mxu1 %v9323_v3  ;;  %v571_v59 = vld [vmem:[%s9967_s7 + $0x348] sm:$0xff]  ;;  %v8669_v3 = vcombine.low %v803_v52, %v811_v53 }
  0xff   : > { %v9340_v33 = vcombine.high %v1474_v61, %v1482_v62  ;;  %6750 = vmatprep.subr.bf16.mxu0 %v9084_v4  ;;  %v9339_v11 = vcombine.low %v1474_v61, %v1482_v62  ;;  %v819_v61 = vld [vmem:[%s9967_s7 + $0xb08] sm:$0xff]  ;;  %v8430_v4 = vcombine.high %v563_v58, %v571_v59 }
 0x100   : > { %6751 = vmatpush1.bf16.msra.mxu0 %v9083_v10  ;;  %v827_v62 = vld [vmem:[%s9967_s7 + $0xb48] sm:$0xff]  ;;  %v8429_v10 = vcombine.low %v563_v58, %v571_v59 }
 0x101   : > { %6791 = vmatprep.subr.bf16.mxu1 %v9340_v33  ;;  %6802 = vmatprep.subr.bf16.mxu0 %v8334_v12  ;;  %v8686_v33 = vcombine.high %v819_v61, %v827_v62  ;;  %v579_v5 = vld [vmem:[%s9967_s7 + $0x388] sm:$0xff] }
 0x102   : > { %6792 = vmatpush1.bf16.msra.mxu1 %v9339_v11  ;;  %v587_v6 = vld [vmem:[%s9967_s7 + $0x3c8] sm:$0xff]  ;;  %v8685_v11 = vcombine.low %v819_v61, %v827_v62 }
 0x103   : > { %6843 = vmatprep.subr.bf16.mxu1 %v8590_v13  ;;  %6753 = vmatmul.mubr.bf16.vlgmr.msra.gmra.mrb[4].mxu0 %v10169_v16  ;;  %v835_v34 = vld [vmem:[%s9967_s7 + $0xb88] sm:$0xff]  ;;  %v8446_v12 = vcombine.high %v579_v5, %v587_v6 }
 0x104   : > { %6803 = vmatpush1.bf16.msra.mxu0 %v8333_v20  ;;  %6834 = vmatprep.mubr.bf16.mxu0 %v10029_v38  ;;  %v843_v8 = vld [vmem:[%s9967_s7 + $0xbc8] sm:$0xff]  ;;  %v8445_v20 = vcombine.low %v579_v5, %v587_v6 }
 0x105   : > { %6794 = vmatmul.mubr.bf16.vlgmr.msra.gmra.mrb[4].mxu1 %v10175_v19  ;;  %6804 = vmatprep.subr.bf16.mxu0 %v8350_v22  ;;  %v8702_v13 = vcombine.high %v835_v34, %v843_v8  ;;  %v595_v14 = vld [vmem:[%s9967_s7 + $0x408] sm:$0xff] }
 0x106   : > { %6844 = vmatpush1.bf16.msra.mxu1 %v8589_v21  ;;  %6875 = vmatprep.mubr.bf16.mxu1 %v10033_v39  ;;  %v603_v15 = vld [vmem:[%s9967_s7 + $0x448] sm:$0xff]  ;;  %v8701_v21 = vcombine.low %v835_v34, %v843_v8 }
 0x107   : > { %6845 = vmatprep.subr.bf16.mxu1 %v8606_v23  ;;  %v851_v17 = vld [vmem:[%s9967_s7 + $0xc08] sm:$0xff]  ;;  %v8462_v22 = vcombine.high %v595_v14, %v603_v15 }
 0x108   : > { %6805 = vmatpush1.bf16.msra.mxu0 %v8349_v2  ;;  %v859_v18 = vld [vmem:[%s9967_s7 + $0xc48] sm:$0xff]  ;;  %v8461_v2 = vcombine.low %v595_v14, %v603_v15 }
 0x109   : > { %6806 = vmatprep.subr.bf16.mxu0 %v8366_v28  ;;  %v8718_v23 = vcombine.high %v851_v17, %v859_v18  ;;  %v611_v24 = vld [vmem:[%s9967_s7 + $0x488] sm:$0xff] }
 0x10a   : > { %6846 = vmatpush1.bf16.msra.mxu1 %v8605_v27  ;;  %v619_v63 = vld [vmem:[%s9967_s7 + $0x4c8] sm:$0xff]  ;;  %v8717_v27 = vcombine.low %v851_v17, %v859_v18 }
 0x10b   : > { %6847 = vmatprep.subr.bf16.mxu1 %v8622_v29  ;;  %v867_v25 = vld [vmem:[%s9967_s7 + $0xc88] sm:$0xff]  ;;  %v8478_v28 = vcombine.high %v611_v24, %v619_v63 }
 0x10c   : > { %6807 = vmatpush1.bf16.msra.mxu0 %v8365_v36  ;;  %v875_v26 = vld [vmem:[%s9967_s7 + $0xcc8] sm:$0xff]  ;;  %v8477_v36 = vcombine.low %v611_v24, %v619_v63 }
 0x10d   : > { %6808 = vmatprep.subr.bf16.mxu0 %v8382_v40  ;;  %v8734_v29 = vcombine.high %v867_v25, %v875_v26  ;;  %v627_v30 = vld [vmem:[%s9967_s7 + $0x508] sm:$0xff] }
 0x10e   : > { %6848 = vmatpush1.bf16.msra.mxu1 %v8621_v37  ;;  %v635_v31 = vld [vmem:[%s9967_s7 + $0x548] sm:$0xff]  ;;  %v8733_v37 = vcombine.low %v867_v25, %v875_v26 }
 0x10f   : > { %6849 = vmatprep.subr.bf16.mxu1 %v8638_v41  ;;  %v883_v32 = vld [vmem:[%s9967_s7 + $0xd08] sm:$0xff]  ;;  %v8494_v40 = vcombine.high %v627_v30, %v635_v31 }
 0x110   : > { %6809 = vmatpush1.bf16.msra.mxu0 %v8381_v46  ;;  %v891_v35 = vld [vmem:[%s9967_s7 + $0xd48] sm:$0xff]  ;;  %v8493_v46 = vcombine.low %v627_v30, %v635_v31 }
 0x111   : > { %6810 = vmatprep.subr.bf16.mxu0 %v8398_v48  ;;  %v8750_v41 = vcombine.high %v883_v32, %v891_v35  ;;  %v643_v42 = vld [vmem:[%s9967_s7 + $0x588] sm:$0xff] }
 0x112   : > { %6850 = vmatpush1.bf16.msra.mxu1 %v8637_v47  ;;  %v651_v43 = vld [vmem:[%s9967_s7 + $0x5c8] sm:$0xff]  ;;  %v8749_v47 = vcombine.low %v883_v32, %v891_v35 }
 0x113   : > { %6851 = vmatprep.subr.bf16.mxu1 %v8654_v49  ;;  %v899_v44 = vld [vmem:[%s9967_s7 + $0xd88] sm:$0xff]  ;;  %v8510_v48 = vcombine.high %v643_v42, %v651_v43 }
 0x114   : > { %6811 = vmatpush1.bf16.msra.mxu0 %v8397_v54  ;;  %v907_v45 = vld [vmem:[%s9967_s7 + $0xdc8] sm:$0xff]  ;;  %v8509_v54 = vcombine.low %v643_v42, %v651_v43 }
 0x115   : > { %6812 = vmatprep.subr.bf16.mxu0 %v8414_v56  ;;  %v8766_v49 = vcombine.high %v899_v44, %v907_v45  ;;  %v659_v50 = vld [vmem:[%s9967_s7 + $0x608] sm:$0xff] }
 0x116   : > { %6852 = vmatpush1.bf16.msra.mxu1 %v8653_v55  ;;  %v667_v51 = vld [vmem:[%s9967_s7 + $0x648] sm:$0xff]  ;;  %v8765_v55 = vcombine.low %v899_v44, %v907_v45 }
 0x117   : > { %6853 = vmatprep.subr.bf16.mxu1 %v8670_v57  ;;  %v915_v52 = vld [vmem:[%s9967_s7 + $0xe08] sm:$0xff]  ;;  %v8526_v56 = vcombine.high %v659_v50, %v667_v51 }
 0x118   : > { %6813 = vmatpush1.bf16.msra.mxu0 %v8413_v1  ;;  %v923_v53 = vld [vmem:[%s9967_s7 + $0xe48] sm:$0xff]  ;;  %v8525_v1 = vcombine.low %v659_v50, %v667_v51 }
 0x119   : > { %6814 = vmatprep.subr.bf16.mxu0 %v8430_v4  ;;  %v8782_v57 = vcombine.high %v915_v52, %v923_v53  ;;  %v675_v58 = vld [vmem:[%s9967_s7 + $0x688] sm:$0xff] }
 0x11a   : > { %6854 = vmatpush1.bf16.msra.mxu1 %v8669_v3  ;;  %v683_v59 = vld [vmem:[%s9967_s7 + $0x6c8] sm:$0xff]  ;;  %v8781_v3 = vcombine.low %v915_v52, %v923_v53 }
 0x11b   : > { %6855 = vmatprep.subr.bf16.mxu1 %v8686_v33  ;;  %v931_v61 = vld [vmem:[%s9967_s7 + $0xe88] sm:$0xff]  ;;  %v8542_v4 = vcombine.high %v675_v58, %v683_v59 }
 0x11c   : > { %6815 = vmatpush1.bf16.msra.mxu0 %v8429_v10  ;;  %v939_v62 = vld [vmem:[%s9967_s7 + $0xec8] sm:$0xff]  ;;  %v8541_v10 = vcombine.low %v675_v58, %v683_v59 }
 0x11d   : > { %6816 = vmatprep.subr.bf16.mxu0 %v8446_v12  ;;  %v8798_v33 = vcombine.high %v931_v61, %v939_v62  ;;  %v691_v5 = vld [vmem:[%s9967_s7 + $0x708] sm:$0xff] }
 0x11e   : > { %6856 = vmatpush1.bf16.msra.mxu1 %v8685_v11  ;;  %v699_v6 = vld [vmem:[%s9967_s7 + $0x748] sm:$0xff]  ;;  %v8797_v11 = vcombine.low %v931_v61, %v939_v62 }
 0x11f   : > { %6857 = vmatprep.subr.bf16.mxu1 %v8702_v13  ;;  %v947_v34 = vld [vmem:[%s9967_s7 + $0xf08] sm:$0xff]  ;;  %v8558_v12 = vcombine.high %v691_v5, %v699_v6 }
 0x120   : > { %6817 = vmatpush1.bf16.msra.mxu0 %v8445_v20  ;;  %v955_v8 = vld [vmem:[%s9967_s7 + $0xf48] sm:$0xff]  ;;  %v8557_v20 = vcombine.low %v691_v5, %v699_v6 }
 0x121   : > { %6818 = vmatprep.subr.bf16.mxu0 %v8462_v22  ;;  %v8814_v13 = vcombine.high %v947_v34, %v955_v8  ;;  %v707_v14 = vld [vmem:[%s9967_s7 + $0x788] sm:$0xff] }
 0x122   : > { %6858 = vmatpush1.bf16.msra.mxu1 %v8701_v21  ;;  %v715_v15 = vld [vmem:[%s9967_s7 + $0x7c8] sm:$0xff]  ;;  %v8813_v21 = vcombine.low %v947_v34, %v955_v8 }
 0x123   : > { %6859 = vmatprep.subr.bf16.mxu1 %v8718_v23  ;;  %v963_v17 = vld [vmem:[%s9967_s7 + $0xf88] sm:$0xff]  ;;  %v8574_v22 = vcombine.high %v707_v14, %v715_v15 }
 0x124   : > { %6819 = vmatpush1.bf16.msra.mxu0 %v8461_v2  ;;  %v971_v18 = vld [vmem:[%s9967_s7 + $0xfc8] sm:$0xff]  ;;  %v8573_v2 = vcombine.low %v707_v14, %v715_v15 }
 0x125   : > { %6820 = vmatprep.subr.bf16.mxu0 %v8478_v28  ;;  %v8830_v23 = vcombine.high %v963_v17, %v971_v18  ;;  %v979_v24 = vld [vmem:[%s9967_s7 + $0x1008] sm:$0xff] }
 0x126   : > { %6860 = vmatpush1.bf16.msra.mxu1 %v8717_v27  ;;  %v987_v63 = vld [vmem:[%s9967_s7 + $0x1048] sm:$0xff]  ;;  %v8829_v27 = vcombine.low %v963_v17, %v971_v18 }
 0x127   : > { %6861 = vmatprep.subr.bf16.mxu1 %v8734_v29  ;;  %v1235_v25 = vld [vmem:[%s9967_s7 + $0x1808] sm:$0xff]  ;;  %v8846_v28 = vcombine.high %v979_v24, %v987_v63 }
 0x128   : > { %6821 = vmatpush1.bf16.msra.mxu0 %v8477_v36  ;;  %v1243_v26 = vld [vmem:[%s9967_s7 + $0x1848] sm:$0xff]  ;;  %v8845_v36 = vcombine.low %v979_v24, %v987_v63 }
 0x129   : > { %6822 = vmatprep.subr.bf16.mxu0 %v8494_v40  ;;  %v9102_v29 = vcombine.high %v1235_v25, %v1243_v26  ;;  %v995_v30 = vld [vmem:[%s9967_s7 + $0x1088] sm:$0xff] }
 0x12a   : > { %6862 = vmatpush1.bf16.msra.mxu1 %v8733_v37  ;;  %v1003_v31 = vld [vmem:[%s9967_s7 + $0x10c8] sm:$0xff]  ;;  %v9101_v37 = vcombine.low %v1235_v25, %v1243_v26 }
 0x12b   : > { %6863 = vmatprep.subr.bf16.mxu1 %v8750_v41  ;;  %v1251_v32 = vld [vmem:[%s9967_s7 + $0x1888] sm:$0xff]  ;;  %v8862_v40 = vcombine.high %v995_v30, %v1003_v31 }
 0x12c   : > { %6823 = vmatpush1.bf16.msra.mxu0 %v8493_v46  ;;  %v1259_v35 = vld [vmem:[%s9967_s7 + $0x18c8] sm:$0xff]  ;;  %v8861_v46 = vcombine.low %v995_v30, %v1003_v31 }
 0x12d   : > { %6824 = vmatprep.subr.bf16.mxu0 %v8510_v48  ;;  %v9118_v41 = vcombine.high %v1251_v32, %v1259_v35  ;;  %v1011_v42 = vld [vmem:[%s9967_s7 + $0x1108] sm:$0xff] }
 0x12e   : > { %6864 = vmatpush1.bf16.msra.mxu1 %v8749_v47  ;;  %v1019_v43 = vld [vmem:[%s9967_s7 + $0x1148] sm:$0xff]  ;;  %v9117_v47 = vcombine.low %v1251_v32, %v1259_v35 }
 0x12f   : > { %6865 = vmatprep.subr.bf16.mxu1 %v8766_v49  ;;  %v1267_v44 = vld [vmem:[%s9967_s7 + $0x1908] sm:$0xff]  ;;  %v8878_v48 = vcombine.high %v1011_v42, %v1019_v43 }
 0x130   : > { %6825 = vmatpush1.bf16.msra.mxu0 %v8509_v54  ;;  %v1275_v45 = vld [vmem:[%s9967_s7 + $0x1948] sm:$0xff]  ;;  %v8877_v54 = vcombine.low %v1011_v42, %v1019_v43 }
 0x131   : > { %6826 = vmatprep.subr.bf16.mxu0 %v8526_v56  ;;  %v9134_v49 = vcombine.high %v1267_v44, %v1275_v45  ;;  %v1027_v50 = vld [vmem:[%s9967_s7 + $0x1188] sm:$0xff] }
 0x132   : > { %6866 = vmatpush1.bf16.msra.mxu1 %v8765_v55  ;;  %v1035_v51 = vld [vmem:[%s9967_s7 + $0x11c8] sm:$0xff]  ;;  %v9133_v55 = vcombine.low %v1267_v44, %v1275_v45 }
 0x133   : > { %6867 = vmatprep.subr.bf16.mxu1 %v8782_v57  ;;  %v1283_v52 = vld [vmem:[%s9967_s7 + $0x1988] sm:$0xff]  ;;  %v8894_v56 = vcombine.high %v1027_v50, %v1035_v51 }
 0x134   : > { %6827 = vmatpush1.bf16.msra.mxu0 %v8525_v1  ;;  %v1291_v53 = vld [vmem:[%s9967_s7 + $0x19c8] sm:$0xff]  ;;  %v8893_v1 = vcombine.low %v1027_v50, %v1035_v51 }
 0x135   : > { %6828 = vmatprep.subr.bf16.mxu0 %v8542_v4  ;;  %v9150_v57 = vcombine.high %v1283_v52, %v1291_v53  ;;  %v1043_v58 = vld [vmem:[%s9967_s7 + $0x1208] sm:$0xff] }
 0x136   : > { %6868 = vmatpush1.bf16.msra.mxu1 %v8781_v3  ;;  %v1051_v59 = vld [vmem:[%s9967_s7 + $0x1248] sm:$0xff]  ;;  %v9149_v3 = vcombine.low %v1283_v52, %v1291_v53 }
 0x137   : > { %6869 = vmatprep.subr.bf16.mxu1 %v8798_v33  ;;  %v1299_v61 = vld [vmem:[%s9967_s7 + $0x1a08] sm:$0xff]  ;;  %v8910_v4 = vcombine.high %v1043_v58, %v1051_v59 }
 0x138   : > { %6829 = vmatpush1.bf16.msra.mxu0 %v8541_v10  ;;  %v1307_v62 = vld [vmem:[%s9967_s7 + $0x1a48] sm:$0xff]  ;;  %v8909_v10 = vcombine.low %v1043_v58, %v1051_v59 }
 0x139   : > { %6830 = vmatprep.subr.bf16.mxu0 %v8558_v12  ;;  %v9166_v33 = vcombine.high %v1299_v61, %v1307_v62  ;;  %v1059_v5 = vld [vmem:[%s9967_s7 + $0x1288] sm:$0xff] }
 0x13a   : > { %6870 = vmatpush1.bf16.msra.mxu1 %v8797_v11  ;;  %v1067_v6 = vld [vmem:[%s9967_s7 + $0x12c8] sm:$0xff]  ;;  %v9165_v11 = vcombine.low %v1299_v61, %v1307_v62 }
 0x13b   : > { %6871 = vmatprep.subr.bf16.mxu1 %v8814_v13  ;;  %v1315_v34 = vld [vmem:[%s9967_s7 + $0x1a88] sm:$0xff]  ;;  %v8926_v12 = vcombine.high %v1059_v5, %v1067_v6 }
 0x13c   : > { %6831 = vmatpush1.bf16.msra.mxu0 %v8557_v20  ;;  %v1323_v8 = vld [vmem:[%s9967_s7 + $0x1ac8] sm:$0xff]  ;;  %v8925_v20 = vcombine.low %v1059_v5, %v1067_v6 }
 0x13d   : > { %6832 = vmatprep.subr.bf16.mxu0 %v8574_v22  ;;  %v9182_v13 = vcombine.high %v1315_v34, %v1323_v8  ;;  %v1075_v14 = vld [vmem:[%s9967_s7 + $0x1308] sm:$0xff] }
 0x13e   : > { %6872 = vmatpush1.bf16.msra.mxu1 %v8813_v21  ;;  %v1083_v15 = vld [vmem:[%s9967_s7 + $0x1348] sm:$0xff]  ;;  %v9181_v21 = vcombine.low %v1315_v34, %v1323_v8 }
 0x13f   : > { %6873 = vmatprep.subr.bf16.mxu1 %v8830_v23  ;;  %v1331_v17 = vld [vmem:[%s9967_s7 + $0x1b08] sm:$0xff]  ;;  %v8942_v22 = vcombine.high %v1075_v14, %v1083_v15 }
 0x140   : > { %6833 = vmatpush1.bf16.msra.mxu0 %v8573_v2  ;;  %v1339_v18 = vld [vmem:[%s9967_s7 + $0x1b48] sm:$0xff]  ;;  %v8941_v2 = vcombine.low %v1075_v14, %v1083_v15 }
 0x141   : > { %6884 = vmatprep.subr.bf16.mxu0 %v8846_v28  ;;  %v9198_v23 = vcombine.high %v1331_v17, %v1339_v18  ;;  %v1091_v24 = vld [vmem:[%s9967_s7 + $0x1388] sm:$0xff] }
 0x142   : > { %6874 = vmatpush1.bf16.msra.mxu1 %v8829_v27  ;;  %v1099_v63 = vld [vmem:[%s9967_s7 + $0x13c8] sm:$0xff]  ;;  %v9197_v27 = vcombine.low %v1331_v17, %v1339_v18 }
 0x143   : > { %6925 = vmatprep.subr.bf16.mxu1 %v9102_v29  ;;  %6835 = vmatmul.mubr.bf16.vlgmr.msra.gmra.mrb[8].mxu0 %v10079_v60  ;;  %v1347_v25 = vld [vmem:[%s9967_s7 + $0x1b88] sm:$0xff]  ;;  %v8958_v28 = vcombine.high %v1091_v24, %v1099_v63 }
 0x144   : > { %6885 = vmatpush1.bf16.msra.mxu0 %v8845_v36  ;;  %6916 = vmatprep.mubr.bf16.mxu0 %v10097_v7  ;;  %v1355_v26 = vld [vmem:[%s9967_s7 + $0x1bc8] sm:$0xff]  ;;  %v8957_v36 = vcombine.low %v1091_v24, %v1099_v63 }
 0x145   : > { %6876 = vmatmul.mubr.bf16.vlgmr.msra.gmra.mrb[8].mxu1 %v10088_v0  ;;  %6886 = vmatprep.subr.bf16.mxu0 %v8862_v40  ;;  %v9214_v29 = vcombine.high %v1347_v25, %v1355_v26  ;;  %v1107_v30 = vld [vmem:[%s9967_s7 + $0x1408] sm:$0xff] }
 0x146   : > { %6926 = vmatpush1.bf16.msra.mxu1 %v9101_v37  ;;  %6957 = vmatprep.mubr.bf16.mxu1 %v10104_v9  ;;  %v1115_v31 = vld [vmem:[%s9967_s7 + $0x1448] sm:$0xff]  ;;  %v9213_v37 = vcombine.low %v1347_v25, %v1355_v26 }
 0x147   : > { %6927 = vmatprep.subr.bf16.mxu1 %v9118_v41  ;;  %v1363_v32 = vld [vmem:[%s9967_s7 + $0x1c08] sm:$0xff]  ;;  %v8974_v40 = vcombine.high %v1107_v30, %v1115_v31 }
 0x148   : > { %6887 = vmatpush1.bf16.msra.mxu0 %v8861_v46  ;;  %v1371_v35 = vld [vmem:[%s9967_s7 + $0x1c48] sm:$0xff]  ;;  %v8973_v46 = vcombine.low %v1107_v30, %v1115_v31 }
 0x149   : > { %6888 = vmatprep.subr.bf16.mxu0 %v8878_v48  ;;  %v9230_v41 = vcombine.high %v1363_v32, %v1371_v35  ;;  %v1123_v42 = vld [vmem:[%s9967_s7 + $0x1488] sm:$0xff] }
 0x14a   : > { %6928 = vmatpush1.bf16.msra.mxu1 %v9117_v47  ;;  %v1131_v43 = vld [vmem:[%s9967_s7 + $0x14c8] sm:$0xff]  ;;  %v9229_v47 = vcombine.low %v1363_v32, %v1371_v35 }
 0x14b   : > { %6929 = vmatprep.subr.bf16.mxu1 %v9134_v49  ;;  %v1379_v44 = vld [vmem:[%s9967_s7 + $0x1c88] sm:$0xff]  ;;  %v8990_v48 = vcombine.high %v1123_v42, %v1131_v43 }
 0x14c   : > { %6889 = vmatpush1.bf16.msra.mxu0 %v8877_v54  ;;  %v1387_v45 = vld [vmem:[%s9967_s7 + $0x1cc8] sm:$0xff]  ;;  %v8989_v54 = vcombine.low %v1123_v42, %v1131_v43  ;;  %v468_v42 = vld [vmem:[%s9967_s7 + $0x10] sm:$0xff] }
 0x14d   : > { %6890 = vmatprep.subr.bf16.mxu0 %v8894_v56  ;;  %v9246_v49 = vcombine.high %v1379_v44, %v1387_v45  ;;  %v1139_v50 = vld [vmem:[%s9967_s7 + $0x1508] sm:$0xff]  ;;  %v476_v43 = vld [vmem:[%s9967_s7 + $0x50] sm:$0xff] }
 0x14e   : > { %6930 = vmatpush1.bf16.msra.mxu1 %v9133_v55  ;;  %v1147_v51 = vld [vmem:[%s9967_s7 + $0x1548] sm:$0xff]  ;;  %v9245_v55 = vcombine.low %v1379_v44, %v1387_v45  ;;  %v724_v44 = vld [vmem:[%s9967_s7 + $0x810] sm:$0xff] }
 0x14f   : > { %6931 = vmatprep.subr.bf16.mxu1 %v9150_v57  ;;  %v1395_v52 = vld [vmem:[%s9967_s7 + $0x1d08] sm:$0xff]  ;;  %v9006_v56 = vcombine.high %v1139_v50, %v1147_v51  ;;  %v732_v45 = vld [vmem:[%s9967_s7 + $0x850] sm:$0xff] }
 0x150   : > { %6891 = vmatpush1.bf16.msra.mxu0 %v8893_v1  ;;  %v1403_v53 = vld [vmem:[%s9967_s7 + $0x1d48] sm:$0xff]  ;;  %v9005_v1 = vcombine.low %v1139_v50, %v1147_v51  ;;  %v484_v50 = vld [vmem:[%s9967_s7 + $0x90] sm:$0xff] }
 0x151   : > { %6892 = vmatprep.subr.bf16.mxu0 %v8910_v4  ;;  %v9262_v57 = vcombine.high %v1395_v52, %v1403_v53  ;;  %v1155_v58 = vld [vmem:[%s9967_s7 + $0x1588] sm:$0xff]  ;;  %v492_v51 = vld [vmem:[%s9967_s7 + $0xd0] sm:$0xff] }
 0x152   : > { %6932 = vmatpush1.bf16.msra.mxu1 %v9149_v3  ;;  %v1163_v59 = vld [vmem:[%s9967_s7 + $0x15c8] sm:$0xff]  ;;  %v9261_v3 = vcombine.low %v1395_v52, %v1403_v53  ;;  %v740_v52 = vld [vmem:[%s9967_s7 + $0x890] sm:$0xff] }
 0x153   : > { %6933 = vmatprep.subr.bf16.mxu1 %v9166_v33  ;;  %v1411_v61 = vld [vmem:[%s9967_s7 + $0x1d88] sm:$0xff]  ;;  %v9022_v4 = vcombine.high %v1155_v58, %v1163_v59  ;;  %v748_v53 = vld [vmem:[%s9967_s7 + $0x8d0] sm:$0xff] }
 0x154   : > { %6893 = vmatpush1.bf16.msra.mxu0 %v8909_v10  ;;  %v1419_v62 = vld [vmem:[%s9967_s7 + $0x1dc8] sm:$0xff]  ;;  %v9021_v10 = vcombine.low %v1155_v58, %v1163_v59  ;;  %v500_v58 = vld [vmem:[%s9967_s7 + $0x110] sm:$0xff] }
 0x155   : > { %6894 = vmatprep.subr.bf16.mxu0 %v8926_v12  ;;  %v9278_v33 = vcombine.high %v1411_v61, %v1419_v62  ;;  %v1171_v5 = vld [vmem:[%s9967_s7 + $0x1608] sm:$0xff]  ;;  %v508_v59 = vld [vmem:[%s9967_s7 + $0x150] sm:$0xff] }
 0x156   : > { %6934 = vmatpush1.bf16.msra.mxu1 %v9165_v11  ;;  %v1179_v6 = vld [vmem:[%s9967_s7 + $0x1648] sm:$0xff]  ;;  %v9277_v11 = vcombine.low %v1411_v61, %v1419_v62  ;;  %v756_v61 = vld [vmem:[%s9967_s7 + $0x910] sm:$0xff] }
 0x157   : > { %6935 = vmatprep.subr.bf16.mxu1 %v9182_v13  ;;  %v1427_v34 = vld [vmem:[%s9967_s7 + $0x1e08] sm:$0xff]  ;;  %v9038_v12 = vcombine.high %v1171_v5, %v1179_v6  ;;  %v764_v62 = vld [vmem:[%s9967_s7 + $0x950] sm:$0xff] }
 0x158   : > { %6895 = vmatpush1.bf16.msra.mxu0 %v8925_v20  ;;  %v1435_v8 = vld [vmem:[%s9967_s7 + $0x1e48] sm:$0xff]  ;;  %v9037_v20 = vcombine.low %v1171_v5, %v1179_v6  ;;  %v516_v5 = vld [vmem:[%s9967_s7 + $0x190] sm:$0xff] }
 0x159   : > { %6896 = vmatprep.subr.bf16.mxu0 %v8942_v22  ;;  %v9294_v13 = vcombine.high %v1427_v34, %v1435_v8  ;;  %v1187_v14 = vld [vmem:[%s9967_s7 + $0x1688] sm:$0xff]  ;;  %v524_v6 = vld [vmem:[%s9967_s7 + $0x1d0] sm:$0xff] }
 0x15a   : > { %6936 = vmatpush1.bf16.msra.mxu1 %v9181_v21  ;;  %v1195_v15 = vld [vmem:[%s9967_s7 + $0x16c8] sm:$0xff]  ;;  %v9293_v21 = vcombine.low %v1427_v34, %v1435_v8  ;;  %v772_v34 = vld [vmem:[%s9967_s7 + $0x990] sm:$0xff] }
 0x15b   : > { %6937 = vmatprep.subr.bf16.mxu1 %v9198_v23  ;;  %v1443_v17 = vld [vmem:[%s9967_s7 + $0x1e88] sm:$0xff]  ;;  %v9054_v22 = vcombine.high %v1187_v14, %v1195_v15  ;;  %v780_v8 = vld [vmem:[%s9967_s7 + $0x9d0] sm:$0xff] }
 0x15c   : > { %6897 = vmatpush1.bf16.msra.mxu0 %v8941_v2  ;;  %v1451_v18 = vld [vmem:[%s9967_s7 + $0x1ec8] sm:$0xff]  ;;  %v9053_v2 = vcombine.low %v1187_v14, %v1195_v15  ;;  %v532_v14 = vld [vmem:[%s9967_s7 + $0x210] sm:$0xff] }
 0x15d   : > { %6898 = vmatprep.subr.bf16.mxu0 %v8958_v28  ;;  %v9310_v23 = vcombine.high %v1443_v17, %v1451_v18  ;;  %v1203_v24 = vld [vmem:[%s9967_s7 + $0x1708] sm:$0xff]  ;;  %v540_v15 = vld [vmem:[%s9967_s7 + $0x250] sm:$0xff] }
 0x15e   : > { %6938 = vmatpush1.bf16.msra.mxu1 %v9197_v27  ;;  %v1211_v63 = vld [vmem:[%s9967_s7 + $0x1748] sm:$0xff]  ;;  %v9309_v27 = vcombine.low %v1443_v17, %v1451_v18  ;;  %v788_v17 = vld [vmem:[%s9967_s7 + $0xa10] sm:$0xff] }
 0x15f   : > { %6939 = vmatprep.subr.bf16.mxu1 %v9214_v29  ;;  %v1459_v25 = vld [vmem:[%s9967_s7 + $0x1f08] sm:$0xff]  ;;  %v9070_v28 = vcombine.high %v1203_v24, %v1211_v63  ;;  %v796_v18 = vld [vmem:[%s9967_s7 + $0xa50] sm:$0xff] }
 0x160   : > { %6899 = vmatpush1.bf16.msra.mxu0 %v8957_v36  ;;  %v1467_v26 = vld [vmem:[%s9967_s7 + $0x1f48] sm:$0xff]  ;;  %v9069_v36 = vcombine.low %v1203_v24, %v1211_v63  ;;  %v548_v24 = vld [vmem:[%s9967_s7 + $0x290] sm:$0xff] }
 0x161   : > { %6900 = vmatprep.subr.bf16.mxu0 %v8974_v40  ;;  %v9326_v29 = vcombine.high %v1459_v25, %v1467_v26  ;;  %v1219_v30 = vld [vmem:[%s9967_s7 + $0x1788] sm:$0xff]  ;;  %v556_v63 = vld [vmem:[%s9967_s7 + $0x2d0] sm:$0xff] }
 0x162   : > { %6940 = vmatpush1.bf16.msra.mxu1 %v9213_v37  ;;  %v1227_v31 = vld [vmem:[%s9967_s7 + $0x17c8] sm:$0xff]  ;;  %v9325_v37 = vcombine.low %v1459_v25, %v1467_v26  ;;  %v804_v25 = vld [vmem:[%s9967_s7 + $0xa90] sm:$0xff] }
 0x163   : > { %6941 = vmatprep.subr.bf16.mxu1 %v9230_v41  ;;  %v1475_v32 = vld [vmem:[%s9967_s7 + $0x1f88] sm:$0xff]  ;;  %v9086_v40 = vcombine.high %v1219_v30, %v1227_v31  ;;  %v812_v26 = vld [vmem:[%s9967_s7 + $0xad0] sm:$0xff] }
 0x164   : > { %6901 = vmatpush1.bf16.msra.mxu0 %v8973_v46  ;;  %v1483_v35 = vld [vmem:[%s9967_s7 + $0x1fc8] sm:$0xff]  ;;  %v9085_v46 = vcombine.low %v1219_v30, %v1227_v31  ;;  %v564_v30 = vld [vmem:[%s9967_s7 + $0x310] sm:$0xff] }
 0x165   : > { %6902 = vmatprep.subr.bf16.mxu0 %v8990_v48  ;;  %v9342_v41 = vcombine.high %v1475_v32, %v1483_v35  ;;  %v8336_v48 = vcombine.high %v468_v42, %v476_v43  ;;  %v572_v31 = vld [vmem:[%s9967_s7 + $0x350] sm:$0xff] }
 0x166   : > { %6942 = vmatpush1.bf16.msra.mxu1 %v9229_v47  ;;  %v9341_v47 = vcombine.low %v1475_v32, %v1483_v35  ;;  %v820_v32 = vld [vmem:[%s9967_s7 + $0xb10] sm:$0xff] }
 0x167   : > { %6943 = vmatprep.subr.bf16.mxu1 %v9246_v49  ;;  %v8592_v49 = vcombine.high %v724_v44, %v732_v45  ;;  %v828_v35 = vld [vmem:[%s9967_s7 + $0xb50] sm:$0xff] }
 0x168   : > { %6903 = vmatpush1.bf16.msra.mxu0 %v8989_v54  ;;  %v8335_v54 = vcombine.low %v468_v42, %v476_v43  ;;  %v8688_v42 = vcombine.high %v820_v32, %v828_v35  ;;  %v580_v43 = vld [vmem:[%s9967_s7 + $0x390] sm:$0xff] }
 0x169   : > { %6904 = vmatprep.subr.bf16.mxu0 %v9006_v56  ;;  %v8352_v56 = vcombine.high %v484_v50, %v492_v51 }
 0x16a   : > { %6944 = vmatpush1.bf16.msra.mxu1 %v9245_v55  ;;  %v8591_v55 = vcombine.low %v724_v44, %v732_v45  ;;  %v588_v44 = vld [vmem:[%s9967_s7 + $0x3d0] sm:$0xff] }
 0x16b   : > { %6945 = vmatprep.subr.bf16.mxu1 %v9262_v57  ;;  %v8608_v57 = vcombine.high %v740_v52, %v748_v53 }
 0x16c   : > { %6905 = vmatpush1.bf16.msra.mxu0 %v9005_v1  ;;  %v8351_v1 = vcombine.low %v484_v50, %v492_v51 }
 0x16d   : > { %6906 = vmatprep.subr.bf16.mxu0 %v9022_v4  ;;  %v8368_v4 = vcombine.high %v500_v58, %v508_v59 }
 0x16e   : > { %6946 = vmatpush1.bf16.msra.mxu1 %v9261_v3  ;;  %v8607_v3 = vcombine.low %v740_v52, %v748_v53  ;;  %v8431_v52 = vcombine.low %v564_v30, %v572_v31 }
 0x16f   : > { %6947 = vmatprep.subr.bf16.mxu1 %v9278_v33  ;;  %v8624_v33 = vcombine.high %v756_v61, %v764_v62 }
 0x170   : > { %6907 = vmatpush1.bf16.msra.mxu0 %v9021_v10  ;;  %v8367_v10 = vcombine.low %v500_v58, %v508_v59 }
 0x171   : > { %6908 = vmatprep.subr.bf16.mxu0 %v9038_v12  ;;  %v8384_v12 = vcombine.high %v516_v5, %v524_v6 }
 0x172   : > { %6948 = vmatpush1.bf16.msra.mxu1 %v9277_v11  ;;  %v8623_v11 = vcombine.low %v756_v61, %v764_v62  ;;  %v596_v61 = vld [vmem:[%s9967_s7 + $0x410] sm:$0xff] }
 0x173   : > { %6949 = vmatprep.subr.bf16.mxu1 %v9294_v13  ;;  %v8640_v13 = vcombine.high %v772_v34, %v780_v8  ;;  %v604_v62 = vld [vmem:[%s9967_s7 + $0x450] sm:$0xff] }
 0x174   : > { %6909 = vmatpush1.bf16.msra.mxu0 %v9037_v20  ;;  %v8383_v20 = vcombine.low %v516_v5, %v524_v6  ;;  %v8464_v5 = vcombine.high %v596_v61, %v604_v62 }
 0x175   : > { %6910 = vmatprep.subr.bf16.mxu0 %v9054_v22  ;;  %v8400_v22 = vcombine.high %v532_v14, %v540_v15 }
 0x176   : > { %6950 = vmatpush1.bf16.msra.mxu1 %v9293_v21  ;;  %v8639_v21 = vcombine.low %v772_v34, %v780_v8  ;;  %v612_v34 = vld [vmem:[%s9967_s7 + $0x490] sm:$0xff] }
 0x177   : > { %6951 = vmatprep.subr.bf16.mxu1 %v9310_v23  ;;  %v8656_v23 = vcombine.high %v788_v17, %v796_v18  ;;  %v620_v8 = vld [vmem:[%s9967_s7 + $0x4d0] sm:$0xff] }
 0x178   : > { %6911 = vmatpush1.bf16.msra.mxu0 %v9053_v2  ;;  %v8399_v2 = vcombine.low %v532_v14, %v540_v15  ;;  %v8480_v14 = vcombine.high %v612_v34, %v620_v8 }
 0x179   : > { %6912 = vmatprep.subr.bf16.mxu0 %v9070_v28  ;;  %v8416_v28 = vcombine.high %v548_v24, %v556_v63 }
 0x17a   : > { %6952 = vmatpush1.bf16.msra.mxu1 %v9309_v27  ;;  %v8655_v27 = vcombine.low %v788_v17, %v796_v18  ;;  %v628_v17 = vld [vmem:[%s9967_s7 + $0x510] sm:$0xff] }
 0x17b   : > { %6953 = vmatprep.subr.bf16.mxu1 %v9326_v29  ;;  %v8672_v29 = vcombine.high %v804_v25, %v812_v26  ;;  %v636_v18 = vld [vmem:[%s9967_s7 + $0x550] sm:$0xff] }
 0x17c   : > { %6913 = vmatpush1.bf16.msra.mxu0 %v9069_v36  ;;  %v8415_v36 = vcombine.low %v548_v24, %v556_v63  ;;  %v8496_v24 = vcombine.high %v628_v17, %v636_v18 }
 0x17d   : > { %6914 = vmatprep.subr.bf16.mxu0 %v9086_v40  ;;  %v8432_v40 = vcombine.high %v564_v30, %v572_v31 }
 0x17e   : > { %6954 = vmatpush1.bf16.msra.mxu1 %v9325_v37  ;;  %v8671_v37 = vcombine.low %v804_v25, %v812_v26  ;;  %v644_v25 = vld [vmem:[%s9967_s7 + $0x590] sm:$0xff] }
 0x17f   : > { %6955 = vmatprep.subr.bf16.mxu1 %v9342_v41  ;;  %v652_v26 = vld [vmem:[%s9967_s7 + $0x5d0] sm:$0xff] }
 0x180   : > { %6915 = vmatpush1.bf16.msra.mxu0 %v9085_v46  ;;  %v8512_v30 = vcombine.high %v644_v25, %v652_v26 }
 0x181   : > { %6966 = vmatprep.subr.bf16.mxu0 %v8336_v48  ;;  %v844_v48 = vld [vmem:[%s9967_s7 + $0xbd0] sm:$0xff] }
 0x182   : > { %6956 = vmatpush1.bf16.msra.mxu1 %v9341_v47  ;;  %v836_v47 = vld [vmem:[%s9967_s7 + $0xb90] sm:$0xff] }
 0x183   : > { %7007 = vmatprep.subr.bf16.mxu1 %v8592_v49  ;;  %6917 = vmatmul.mubr.bf16.vlgmr.msra.gmra.mrb[12].mxu0 %v10169_v16  ;;  %v8704_v59 = vcombine.high %v836_v47, %v844_v48 }
 0x184   : > { %6967 = vmatpush1.bf16.msra.mxu0 %v8335_v54  ;;  %6998 = vmatprep.mubr.bf16.mxu0 %v10029_v38 }
 0x185   : > { %6958 = vmatmul.mubr.bf16.vlgmr.msra.gmra.mrb[12].mxu1 %v10175_v19  ;;  %6968 = vmatprep.subr.bf16.mxu0 %v8352_v56  ;;  %v8687_v56 = vcombine.low %v820_v32, %v828_v35  ;;  %v660_v32 = vld [vmem:[%s9967_s7 + $0x610] sm:$0xff] }
 0x186   : > { %7008 = vmatpush1.bf16.msra.mxu1 %v8591_v55  ;;  %7039 = vmatprep.mubr.bf16.mxu1 %v10033_v39  ;;  %v668_v35 = vld [vmem:[%s9967_s7 + $0x650] sm:$0xff] }
 0x187   : > { %7009 = vmatprep.subr.bf16.mxu1 %v8608_v57  ;;  %v8448_v57 = vcombine.high %v580_v43, %v588_v44 }
 0x188   : > { %6969 = vmatpush1.bf16.msra.mxu0 %v8351_v1  ;;  %v852_v1 = vld [vmem:[%s9967_s7 + $0xc10] sm:$0xff] }
 0x189   : > { %6970 = vmatprep.subr.bf16.mxu0 %v8368_v4  ;;  %v8447_v4 = vcombine.low %v580_v43, %v588_v44  ;;  %v676_v44 = vld [vmem:[%s9967_s7 + $0x690] sm:$0xff] }
 0x18a   : > { %7010 = vmatpush1.bf16.msra.mxu1 %v8607_v3  ;;  %v860_v3 = vld [vmem:[%s9967_s7 + $0xc50] sm:$0xff] }
 0x18b   : > { %7011 = vmatprep.subr.bf16.mxu1 %v8624_v33  ;;  %v8703_v33 = vcombine.low %v836_v47, %v844_v48  ;;  %v8720_v6 = vcombine.high %v852_v1, %v860_v3  ;;  %v940_v47 = vld [vmem:[%s9967_s7 + $0xed0] sm:$0xff]  ;;  %v8527_v48 = vcombine.low %v660_v32, %v668_v35 }
 0x18c   : > { %6971 = vmatpush1.bf16.msra.mxu0 %v8367_v10  ;;  %v868_v10 = vld [vmem:[%s9967_s7 + $0xc90] sm:$0xff] }
 0x18d   : > { %6972 = vmatprep.subr.bf16.mxu0 %v8384_v12  ;;  %v8463_v12 = vcombine.low %v596_v61, %v604_v62 }
 0x18e   : > { %7012 = vmatpush1.bf16.msra.mxu1 %v8623_v11  ;;  %v876_v11 = vld [vmem:[%s9967_s7 + $0xcd0] sm:$0xff] }
 0x18f   : > { %7013 = vmatprep.subr.bf16.mxu1 %v8640_v13  ;;  %v8719_v13 = vcombine.low %v852_v1, %v860_v3  ;;  %v8736_v15 = vcombine.high %v868_v10, %v876_v11  ;;  %v708_v1 = vld [vmem:[%s9967_s7 + $0x790] sm:$0xff] }
 0x190   : > { %6973 = vmatpush1.bf16.msra.mxu0 %v8383_v20  ;;  %v884_v20 = vld [vmem:[%s9967_s7 + $0xd10] sm:$0xff] }
 0x191   : > { %6974 = vmatprep.subr.bf16.mxu0 %v8400_v22  ;;  %v8479_v22 = vcombine.low %v612_v34, %v620_v8  ;;  %v716_v3 = vld [vmem:[%s9967_s7 + $0x7d0] sm:$0xff] }
 0x192   : > { %7014 = vmatpush1.bf16.msra.mxu1 %v8639_v21  ;;  %v892_v21 = vld [vmem:[%s9967_s7 + $0xd50] sm:$0xff]  ;;  %v8576_v34 = vcombine.high %v708_v1, %v716_v3 }
 0x193   : > { %7015 = vmatprep.subr.bf16.mxu1 %v8656_v23  ;;  %v8735_v23 = vcombine.low %v868_v10, %v876_v11  ;;  %v8752_v63 = vcombine.high %v884_v20, %v892_v21  ;;  %v980_v10 = vld [vmem:[%s9967_s7 + $0x1010] sm:$0xff] }
 0x194   : > { %6975 = vmatpush1.bf16.msra.mxu0 %v8399_v2  ;;  %v900_v2 = vld [vmem:[%s9967_s7 + $0xd90] sm:$0xff] }
 0x195   : > { %6976 = vmatprep.subr.bf16.mxu0 %v8416_v28  ;;  %v8495_v28 = vcombine.low %v628_v17, %v636_v18  ;;  %v988_v11 = vld [vmem:[%s9967_s7 + $0x1050] sm:$0xff] }
 0x196   : > { %7016 = vmatpush1.bf16.msra.mxu1 %v8655_v27  ;;  %v6672_v41 = vpop.f32.mrb[0].mxu0  ;;  %v908_v27 = vld [vmem:[%s9967_s7 + $0xdd0] sm:$0xff]  ;;  %v8848_v17 = vcombine.high %v980_v10, %v988_v11 }
 0x197   : > { %7017 = vmatprep.subr.bf16.mxu1 %v8672_v29  ;;  %v6674_v46 = vpop.f32.mrb[1].mxu0  ;;  %v8751_v29 = vcombine.low %v884_v20, %v892_v21  ;;  %v8768_v31 = vcombine.high %v900_v2, %v908_v27  ;;  %v996_v20 = vld [vmem:[%s9967_s7 + $0x1090] sm:$0xff] }
 0x198   : > { %v6713_v45 = vpop.f32.mrb[0].mxu1  ;;  %v6676_v51 = vpop.f32.mrb[2].mxu0  ;;  %6977 = vmatpush1.bf16.msra.mxu0 %v8415_v36  ;;  %v916_v36 = vld [vmem:[%s9967_s7 + $0xe10] sm:$0xff] }
 0x199   : > { %v10341_v49 = vadd.f32 %v6713_v45, %v6672_v41  ;;  %v6715_v50 = vpop.f32.mrb[1].mxu1  ;;  %v6677_v55 = vpop.f32.mrb[3].mxu0  ;;  %6978 = vmatprep.subr.bf16.mxu0 %v8432_v40  ;;  %v8511_v40 = vcombine.low %v644_v25, %v652_v26  ;;  %v8767_v41 = vcombine.low %v900_v2, %v908_v27  ;;  %v684_v45 = vld [vmem:[%s9967_s7 + $0x6d0] sm:$0xff] }
 0x19a   : > { %v10343_v53 = vadd.f32 %v6715_v50, %v6674_v46  ;;  %v6717_v54 = vpop.f32.mrb[2].mxu1  ;;  %7018 = vmatpush1.bf16.msra.mxu1 %v8671_v37  ;;  %v924_v37 = vld [vmem:[%s9967_s7 + $0xe50] sm:$0xff]  ;;  %v8544_v51 = vcombine.high %v676_v44, %v684_v45 }
 0x19b   : > { %v6718_v58 = vpop.f32.mrb[3].mxu1  ;;  %7019 = vmatprep.subr.bf16.mxu1 %v8688_v42  ;;  %v8528_v42 = vcombine.high %v660_v32, %v668_v35  ;;  %v8784_v43 = vcombine.high %v916_v36, %v924_v37  ;;  %v932_v46 = vld [vmem:[%s9967_s7 + $0xe90] sm:$0xff]  ;;  %v8783_v50 = vcombine.low %v916_v36, %v924_v37 }
 0x19c   : > { %6979 = vmatpush1.bf16.msra.mxu0 %v8431_v52  ;;  %v8800_v52 = vcombine.high %v932_v46, %v940_v47  ;;  %v692_v54 = vld [vmem:[%s9967_s7 + $0x710] sm:$0xff]  ;;  %v8543_v58 = vcombine.low %v676_v44, %v684_v45 }
 0x19d   : > { %6980 = vmatprep.subr.bf16.mxu0 %v8448_v57  ;;  %v700_v55 = vld [vmem:[%s9967_s7 + $0x750] sm:$0xff] }
 0x19e   : > { %7020 = vmatpush1.bf16.msra.mxu1 %v8687_v56  ;;  %v948_v56 = vld [vmem:[%s9967_s7 + $0xf10] sm:$0xff]  ;;  %v8560_v61 = vcombine.high %v692_v54, %v700_v55 }
 0x19f   : > { %7021 = vmatprep.subr.bf16.mxu1 %v8704_v59  ;;  %v956_v57 = vld [vmem:[%s9967_s7 + $0xf50] sm:$0xff]  ;;  %v8799_v59 = vcombine.low %v932_v46, %v940_v47 }
 0x1a0   : > { %6981 = vmatpush1.bf16.msra.mxu0 %v8447_v4  ;;  %v8816_v62 = vcombine.high %v948_v56, %v956_v57  ;;  %v964_v4 = vld [vmem:[%s9967_s7 + $0xf90] sm:$0xff] }
 0x1a1   : > { %6982 = vmatprep.subr.bf16.mxu0 %v8464_v5  ;;  %v8559_v5 = vcombine.low %v692_v54, %v700_v55  ;;  %v1004_v21 = vld [vmem:[%s9967_s7 + $0x10d0] sm:$0xff] }
 0x1a2   : > { %7022 = vmatpush1.bf16.msra.mxu1 %v8703_v33  ;;  %v972_v33 = vld [vmem:[%s9967_s7 + $0xfd0] sm:$0xff]  ;;  %v8864_v25 = vcombine.high %v996_v20, %v1004_v21 }
 0x1a3   : > { %7023 = vmatprep.subr.bf16.mxu1 %v8720_v6  ;;  %v8815_v6 = vcombine.low %v948_v56, %v956_v57  ;;  %v8832_v8 = vcombine.high %v964_v4, %v972_v33  ;;  %v1012_v2 = vld [vmem:[%s9967_s7 + $0x1110] sm:$0xff] }
 0x1a4   : > { %6983 = vmatpush1.bf16.msra.mxu0 %v8463_v12  ;;  %v1236_v12 = vld [vmem:[%s9967_s7 + $0x1810] sm:$0xff] }
 0x1a5   : > { %6984 = vmatprep.subr.bf16.mxu0 %v8480_v14  ;;  %v8575_v14 = vcombine.low %v708_v1, %v716_v3  ;;  %v1020_v27 = vld [vmem:[%s9967_s7 + $0x1150] sm:$0xff] }
 0x1a6   : > { %7024 = vmatpush1.bf16.msra.mxu1 %v8719_v13  ;;  %v1244_v13 = vld [vmem:[%s9967_s7 + $0x1850] sm:$0xff]  ;;  %v8880_v32 = vcombine.high %v1012_v2, %v1020_v27 }
 0x1a7   : > { %7025 = vmatprep.subr.bf16.mxu1 %v8736_v15  ;;  %v8831_v15 = vcombine.low %v964_v4, %v972_v33  ;;  %v9104_v18 = vcombine.high %v1236_v12, %v1244_v13  ;;  %v1028_v36 = vld [vmem:[%s9967_s7 + $0x1190] sm:$0xff] }
 0x1a8   : > { %6985 = vmatpush1.bf16.msra.mxu0 %v8479_v22  ;;  %v1252_v22 = vld [vmem:[%s9967_s7 + $0x1890] sm:$0xff] }
 0x1a9   : > { %6986 = vmatprep.subr.bf16.mxu0 %v8496_v24  ;;  %v8847_v24 = vcombine.low %v980_v10, %v988_v11  ;;  %v1036_v37 = vld [vmem:[%s9967_s7 + $0x11d0] sm:$0xff] }
 0x1aa   : > { %7026 = vmatpush1.bf16.msra.mxu1 %v8735_v23  ;;  %v1260_v23 = vld [vmem:[%s9967_s7 + $0x18d0] sm:$0xff]  ;;  %v8896_v44 = vcombine.high %v1028_v36, %v1036_v37 }
 0x1ab   : > { %7027 = vmatprep.subr.bf16.mxu1 %v8752_v63  ;;  %v9103_v63 = vcombine.low %v1236_v12, %v1244_v13  ;;  %v9120_v26 = vcombine.high %v1252_v22, %v1260_v23  ;;  %v1044_v46 = vld [vmem:[%s9967_s7 + $0x1210] sm:$0xff] }
 0x1ac   : > { %6987 = vmatpush1.bf16.msra.mxu0 %v8495_v28  ;;  %v1268_v28 = vld [vmem:[%s9967_s7 + $0x1910] sm:$0xff] }
 0x1ad   : > { %6988 = vmatprep.subr.bf16.mxu0 %v8512_v30  ;;  %v8863_v30 = vcombine.low %v996_v20, %v1004_v21  ;;  %v1052_v47 = vld [vmem:[%s9967_s7 + $0x1250] sm:$0xff] }
 0x1ae   : > { %7028 = vmatpush1.bf16.msra.mxu1 %v8751_v29  ;;  %v1276_v29 = vld [vmem:[%s9967_s7 + $0x1950] sm:$0xff]  ;;  %v8912_v54 = vcombine.high %v1044_v46, %v1052_v47 }
 0x1af   : > { %7029 = vmatprep.subr.bf16.mxu1 %v8768_v31  ;;  %v9119_v31 = vcombine.low %v1252_v22, %v1260_v23  ;;  %v9136_v35 = vcombine.high %v1268_v28, %v1276_v29  ;;  %v1060_v56 = vld [vmem:[%s9967_s7 + $0x1290] sm:$0xff]  ;;  %v446_v22 = vld [vmem:[#allocation2] sm:$0xff] }
 0x1b0   : > { %6989 = vmatpush1.bf16.msra.mxu0 %v8511_v40  ;;  %v1284_v40 = vld [vmem:[%s9967_s7 + $0x1990] sm:$0xff] }
 0x1b1   : > { %6990 = vmatprep.subr.bf16.mxu0 %v8528_v42  ;;  %v8879_v42 = vcombine.low %v1012_v2, %v1020_v27  ;;  %v1068_v57 = vld [vmem:[%s9967_s7 + $0x12d0] sm:$0xff]  ;;  %v447_v2 = vld [vmem:[#allocation2 + $0x8] sm:$0xff] }
 0x1b2   : > { %7030 = vmatpush1.bf16.msra.mxu1 %v8767_v41  ;;  %v1292_v41 = vld [vmem:[%s9967_s7 + $0x19d0] sm:$0xff]  ;;  %v8928_v1 = vcombine.high %v1060_v56, %v1068_v57 }
 0x1b3   : > { %7031 = vmatprep.subr.bf16.mxu1 %v8784_v43  ;;  %v9135_v43 = vcombine.low %v1268_v28, %v1276_v29  ;;  %v9152_v45 = vcombine.high %v1284_v40, %v1292_v41  ;;  %v1076_v4 = vld [vmem:[%s9967_s7 + $0x1310] sm:$0xff] }
 0x1b4   : > { %6991 = vmatpush1.bf16.msra.mxu0 %v8527_v48  ;;  %v1300_v48 = vld [vmem:[%s9967_s7 + $0x1a10] sm:$0xff] }
 0x1b5   : > { %6992 = vmatprep.subr.bf16.mxu0 %v8544_v51  ;;  %v8895_v51 = vcombine.low %v1028_v36, %v1036_v37  ;;  %v1084_v33 = vld [vmem:[%s9967_s7 + $0x1350] sm:$0xff] }
 0x1b6   : > { %7032 = vmatpush1.bf16.msra.mxu1 %v8783_v50  ;;  %v1308_v50 = vld [vmem:[%s9967_s7 + $0x1a50] sm:$0xff]  ;;  %v8944_v10 = vcombine.high %v1076_v4, %v1084_v33 }
 0x1b7   : > { %7033 = vmatprep.subr.bf16.mxu1 %v8800_v52  ;;  %v9151_v52 = vcombine.low %v1284_v40, %v1292_v41  ;;  %v9168_v55 = vcombine.high %v1300_v48, %v1308_v50  ;;  %v1092_v13 = vld [vmem:[%s9967_s7 + $0x1390] sm:$0xff] }
 0x1b8   : > { %6993 = vmatpush1.bf16.msra.mxu0 %v8543_v58  ;;  %v1316_v58 = vld [vmem:[%s9967_s7 + $0x1a90] sm:$0xff] }
 0x1b9   : > { %6994 = vmatprep.subr.bf16.mxu0 %v8560_v61  ;;  %v8911_v61 = vcombine.low %v1044_v46, %v1052_v47  ;;  %v1348_v20 = vld [vmem:[%s9967_s7 + $0x1b90] sm:$0xff] }
 0x1ba   : > { %7034 = vmatpush1.bf16.msra.mxu1 %v8799_v59  ;;  %v1324_v59 = vld [vmem:[%s9967_s7 + $0x1ad0] sm:$0xff] }
 0x1bb   : > { %7035 = vmatprep.subr.bf16.mxu1 %v8816_v62  ;;  %v9167_v62 = vcombine.low %v1300_v48, %v1308_v50  ;;  %v9184_v3 = vcombine.high %v1316_v58, %v1324_v59  ;;  %v1356_v21 = vld [vmem:[%s9967_s7 + $0x1bd0] sm:$0xff] }
 0x1bc   : > { %6995 = vmatpush1.bf16.msra.mxu0 %v8559_v5  ;;  %v1332_v5 = vld [vmem:[%s9967_s7 + $0x1b10] sm:$0xff] }
 0x1bd   : > { %6996 = vmatprep.subr.bf16.mxu0 %v8576_v34  ;;  %v8927_v34 = vcombine.low %v1060_v56, %v1068_v57  ;;  %v1364_v37 = vld [vmem:[%s9967_s7 + $0x1c10] sm:$0xff] }
 0x1be   : > { %7036 = vmatpush1.bf16.msra.mxu1 %v8815_v6  ;;  %v1340_v6 = vld [vmem:[%s9967_s7 + $0x1b50] sm:$0xff] }
 0x1bf   : > { %7037 = vmatprep.subr.bf16.mxu1 %v8832_v8  ;;  %v9183_v8 = vcombine.low %v1316_v58, %v1324_v59  ;;  %v9200_v12 = vcombine.high %v1332_v5, %v1340_v6  ;;  %v9199_v28 = vcombine.low %v1332_v5, %v1340_v6  ;;  %v1372_v40 = vld [vmem:[%s9967_s7 + $0x1c50] sm:$0xff] }
 0x1c0   : > { %6997 = vmatpush1.bf16.msra.mxu0 %v8575_v14  ;;  %v1100_v14 = vld [vmem:[%s9967_s7 + $0x13d0] sm:$0xff] }
 0x1c1   : > { %7048 = vmatprep.subr.bf16.mxu0 %v8848_v17  ;;  %v8960_v29 = vcombine.high %v1092_v13, %v1100_v14  ;;  %v1124_v46 = vld [vmem:[%s9967_s7 + $0x1490] sm:$0xff] }
 0x1c2   : > { %7038 = vmatpush1.bf16.msra.mxu1 %v8831_v15  ;;  %v1132_v47 = vld [vmem:[%s9967_s7 + $0x14d0] sm:$0xff] }
 0x1c3   : > { %7089 = vmatprep.subr.bf16.mxu1 %v9104_v18  ;;  %6999 = vmatmul.mubr.bf16.vlgmr.msra.gmra.mrb[16].mxu0 %v10079_v60  ;;  %v1380_v48 = vld [vmem:[%s9967_s7 + $0x1c90] sm:$0xff] }
 0x1c4   : > { %7049 = vmatpush1.bf16.msra.mxu0 %v8847_v24  ;;  %7080 = vmatprep.mubr.bf16.mxu0 %v10097_v7  ;;  %v1388_v50 = vld [vmem:[%s9967_s7 + $0x1cd0] sm:$0xff] }
 0x1c5   : > { %7040 = vmatmul.mubr.bf16.vlgmr.msra.gmra.mrb[16].mxu1 %v10088_v0  ;;  %7050 = vmatprep.subr.bf16.mxu0 %v8864_v25  ;;  %v8943_v25 = vcombine.low %v1076_v4, %v1084_v33  ;;  %v1140_v56 = vld [vmem:[%s9967_s7 + $0x1510] sm:$0xff] }
 0x1c6   : > { %7090 = vmatpush1.bf16.msra.mxu1 %v9103_v63  ;;  %7121 = vmatprep.mubr.bf16.mxu1 %v10104_v9  ;;  %v1148_v57 = vld [vmem:[%s9967_s7 + $0x1550] sm:$0xff] }
 0x1c7   : > { %7091 = vmatprep.subr.bf16.mxu1 %v9120_v26  ;;  %v1396_v58 = vld [vmem:[%s9967_s7 + $0x1d10] sm:$0xff] }
 0x1c8   : > { %7051 = vmatpush1.bf16.msra.mxu0 %v8863_v30  ;;  %v1404_v59 = vld [vmem:[%s9967_s7 + $0x1d50] sm:$0xff] }
 0x1c9   : > { %7052 = vmatprep.subr.bf16.mxu0 %v8880_v32  ;;  %v1108_v32 = vld [vmem:[%s9967_s7 + $0x1410] sm:$0xff] }
 0x1ca   : > { %7092 = vmatpush1.bf16.msra.mxu1 %v9119_v31  ;;  %v1156_v4 = vld [vmem:[%s9967_s7 + $0x1590] sm:$0xff] }
 0x1cb   : > { %7093 = vmatprep.subr.bf16.mxu1 %v9136_v35  ;;  %v1116_v35 = vld [vmem:[%s9967_s7 + $0x1450] sm:$0xff] }
 0x1cc   : > { %7053 = vmatpush1.bf16.msra.mxu0 %v8879_v42  ;;  %v8959_v42 = vcombine.low %v1092_v13, %v1100_v14  ;;  %v1164_v33 = vld [vmem:[%s9967_s7 + $0x15d0] sm:$0xff] }
 0x1cd   : > { %7054 = vmatprep.subr.bf16.mxu0 %v8896_v44  ;;  %v8976_v44 = vcombine.high %v1108_v32, %v1116_v35  ;;  %v1412_v5 = vld [vmem:[%s9967_s7 + $0x1d90] sm:$0xff] }
 0x1ce   : > { %7094 = vmatpush1.bf16.msra.mxu1 %v9135_v43  ;;  %v9215_v43 = vcombine.low %v1348_v20, %v1356_v21  ;;  %v1420_v6 = vld [vmem:[%s9967_s7 + $0x1dd0] sm:$0xff] }
 0x1cf   : > { %7095 = vmatprep.subr.bf16.mxu1 %v9152_v45  ;;  %v9232_v45 = vcombine.high %v1364_v37, %v1372_v40  ;;  %v1180_v13 = vld [vmem:[%s9967_s7 + $0x1650] sm:$0xff] }
 0x1d0   : > { %7055 = vmatpush1.bf16.msra.mxu0 %v8895_v51  ;;  %v8975_v51 = vcombine.low %v1108_v32, %v1116_v35  ;;  %v1428_v14 = vld [vmem:[%s9967_s7 + $0x1e10] sm:$0xff] }
 0x1d1   : > { %7056 = vmatprep.subr.bf16.mxu0 %v8912_v54  ;;  %v8992_v54 = vcombine.high %v1124_v46, %v1132_v47 }
 0x1d2   : > { %7096 = vmatpush1.bf16.msra.mxu1 %v9151_v52  ;;  %v9231_v52 = vcombine.low %v1364_v37, %v1372_v40  ;;  %v1228_v37 = vld [vmem:[%s9967_s7 + $0x17d0] sm:$0xff] }
 0x1d3   : > { %7097 = vmatprep.subr.bf16.mxu1 %v9168_v55  ;;  %v9248_v55 = vcombine.high %v1380_v48, %v1388_v50  ;;  %v1476_v40 = vld [vmem:[%s9967_s7 + $0x1f90] sm:$0xff] }
 0x1d4   : > { %7057 = vmatpush1.bf16.msra.mxu0 %v8911_v61  ;;  %v8991_v61 = vcombine.low %v1124_v46, %v1132_v47  ;;  %v469_v46 = vld [vmem:[%s9967_s7 + $0x18] sm:$0xff] }
 0x1d5   : > { %7058 = vmatprep.subr.bf16.mxu0 %v8928_v1  ;;  %v9008_v1 = vcombine.high %v1140_v56, %v1148_v57  ;;  %v477_v47 = vld [vmem:[%s9967_s7 + $0x58] sm:$0xff] }
 0x1d6   : > { %7098 = vmatpush1.bf16.msra.mxu1 %v9167_v62  ;;  %v6754_v11 = vpop.f32.mrb[4].mxu0  ;;  %v9247_v62 = vcombine.low %v1380_v48, %v1388_v50  ;;  %v725_v48 = vld [vmem:[%s9967_s7 + $0x818] sm:$0xff] }
 0x1d7   : > { %7099 = vmatprep.subr.bf16.mxu1 %v9184_v3  ;;  %v6755_v15 = vadd.f32 %v6754_v11, %v10341_v49  ;;  %v6756_v18 = vpop.f32.mrb[5].mxu0  ;;  %v9264_v3 = vcombine.high %v1396_v58, %v1404_v59  ;;  %v9280_v11 = vcombine.high %v1412_v5, %v1420_v6  ;;  %v733_v50 = vld [vmem:[%s9967_s7 + $0x858] sm:$0xff] }
 0x1d8   : > { %v6795_v17 = vpop.f32.mrb[4].mxu1  ;;  %v6757_v23 = vadd.f32 %v6756_v18, %v10343_v53  ;;  %v6758_v63 = vpop.f32.mrb[6].mxu0  ;;  %7059 = vmatpush1.bf16.msra.mxu0 %v8927_v34  ;;  %v9216_v53 = vcombine.high %v1348_v20, %v1356_v21  ;;  %v9007_v34 = vcombine.low %v1140_v56, %v1148_v57  ;;  %v9279_v18 = vcombine.low %v1412_v5, %v1420_v6  ;;  %v485_v56 = vld [vmem:[%s9967_s7 + $0x98] sm:$0xff] }
 0x1d9   : > { %v6797_v24 = vpop.f32.mrb[5].mxu1  ;;  %v6796_v26 = vadd.f32 %v6795_v17, %v6755_v15  ;;  %v6759_v49 = vpop.f32.mrb[7].mxu0  ;;  %7060 = vmatprep.subr.bf16.mxu0 %v8944_v10  ;;  %v9024_v10 = vcombine.high %v1156_v4, %v1164_v33  ;;  %v1436_v15 = vld [vmem:[%s9967_s7 + $0x1e50] sm:$0xff]  ;;  %v9023_v17 = vcombine.low %v1156_v4, %v1164_v33  ;;  %v493_v57 = vld [vmem:[%s9967_s7 + $0xd8] sm:$0xff] }
 0x1da   : > { %v6799_v27 = vpop.f32.mrb[6].mxu1  ;;  %7100 = vmatpush1.bf16.msra.mxu1 %v9183_v8  ;;  %v6798_v30 = vadd.f32 %v6797_v24, %v6757_v23  ;;  %v9263_v8 = vcombine.low %v1396_v58, %v1404_v59  ;;  %v9296_v21 = vcombine.high %v1428_v14, %v1436_v15  ;;  %v1196_v23 = vld [vmem:[%s9967_s7 + $0x16d0] sm:$0xff]  ;;  %v741_v58 = vld [vmem:[%s9967_s7 + $0x898] sm:$0xff] }
 0x1db   : > { %v6800_v31 = vpop.f32.mrb[7].mxu1  ;;  %7101 = vmatprep.subr.bf16.mxu1 %v9200_v12  ;;  %v7950_v36 = vadd.f32 %v6796_v26, %v446_v22  ;;  %v1172_v12 = vld [vmem:[%s9967_s7 + $0x1610] sm:$0xff]  ;;  %v9295_v26 = vcombine.low %v1428_v14, %v1436_v15  ;;  %v749_v59 = vld [vmem:[%s9967_s7 + $0x8d8] sm:$0xff] }
 0x1dc   : > { %v7951_v41 = vadd.f32 %v6798_v30, %v447_v2  ;;  %7061 = vmatpush1.bf16.msra.mxu0 %v8943_v25  ;;  %v9040_v20 = vcombine.high %v1172_v12, %v1180_v13  ;;  %v1188_v22 = vld [vmem:[%s9967_s7 + $0x1690] sm:$0xff]  ;;  %v9039_v25 = vcombine.low %v1172_v12, %v1180_v13  ;;  %v501_v4 = vld [vmem:[%s9967_s7 + $0x118] sm:$0xff] }
 0x1dd   : > { %7966 = vst [vmem:[#allocation2] sm:$0xff] %v7950_v36  ;;  %7062 = vmatprep.subr.bf16.mxu0 %v8960_v29  ;;  %v1444_v24 = vld [vmem:[%s9967_s7 + $0x1e90] sm:$0xff]  ;;  %v9056_v2 = vcombine.high %v1188_v22, %v1196_v23  ;;  %v9055_v31 = vcombine.low %v1188_v22, %v1196_v23  ;;  %v509_v33 = vld [vmem:[%s9967_s7 + $0x158] sm:$0xff] }
 0x1de   : > { %7102 = vmatpush1.bf16.msra.mxu1 %v9199_v28  ;;  %7967 = vst [vmem:[#allocation2 + $0x8] sm:$0xff] %v7951_v41  ;;  %v1452_v63 = vld [vmem:[%s9967_s7 + $0x1ed0] sm:$0xff]  ;;  %v757_v5 = vld [vmem:[%s9967_s7 + $0x918] sm:$0xff] }
 0x1df   : > { %7103 = vmatprep.subr.bf16.mxu1 %v9216_v53  ;;  %v9312_v27 = vcombine.high %v1444_v24, %v1452_v63  ;;  %v1204_v49 = vld [vmem:[%s9967_s7 + $0x1710] sm:$0xff]  ;;  %v9311_v53 = vcombine.low %v1444_v24, %v1452_v63  ;;  %v765_v6 = vld [vmem:[%s9967_s7 + $0x958] sm:$0xff] }
 0x1e0   : > { %7063 = vmatpush1.bf16.msra.mxu0 %v8959_v42  ;;  %v1212_v28 = vld [vmem:[%s9967_s7 + $0x1750] sm:$0xff]  ;;  %v517_v12 = vld [vmem:[%s9967_s7 + $0x198] sm:$0xff] }
 0x1e1   : > { %7064 = vmatprep.subr.bf16.mxu0 %v8976_v44  ;;  %v1460_v29 = vld [vmem:[%s9967_s7 + $0x1f10] sm:$0xff]  ;;  %v9072_v32 = vcombine.high %v1204_v49, %v1212_v28  ;;  %v9071_v42 = vcombine.low %v1204_v49, %v1212_v28  ;;  %v525_v13 = vld [vmem:[%s9967_s7 + $0x1d8] sm:$0xff] }
 0x1e2   : > { %7104 = vmatpush1.bf16.msra.mxu1 %v9215_v43  ;;  %v1468_v30 = vld [vmem:[%s9967_s7 + $0x1f50] sm:$0xff]  ;;  %v773_v14 = vld [vmem:[%s9967_s7 + $0x998] sm:$0xff] }
 0x1e3   : > { %7105 = vmatprep.subr.bf16.mxu1 %v9232_v45  ;;  %v9328_v35 = vcombine.high %v1460_v29, %v1468_v30  ;;  %v1220_v36 = vld [vmem:[%s9967_s7 + $0x1790] sm:$0xff]  ;;  %v9327_v43 = vcombine.low %v1460_v29, %v1468_v30  ;;  %v781_v15 = vld [vmem:[%s9967_s7 + $0x9d8] sm:$0xff] }
 0x1e4   : > { %7065 = vmatpush1.bf16.msra.mxu0 %v8975_v51  ;;  %v1484_v41 = vld [vmem:[%s9967_s7 + $0x1fd0] sm:$0xff]  ;;  %v9088_v44 = vcombine.high %v1220_v36, %v1228_v37  ;;  %v9087_v51 = vcombine.low %v1220_v36, %v1228_v37  ;;  %v533_v22 = vld [vmem:[%s9967_s7 + $0x218] sm:$0xff] }
 0x1e5   : > { %7066 = vmatprep.subr.bf16.mxu0 %v8992_v54  ;;  %v9344_v45 = vcombine.high %v1476_v40, %v1484_v41  ;;  %v8338_v54 = vcombine.high %v469_v46, %v477_v47  ;;  %v541_v23 = vld [vmem:[%s9967_s7 + $0x258] sm:$0xff] }
 0x1e6   : > { %7106 = vmatpush1.bf16.msra.mxu1 %v9231_v52  ;;  %v9343_v52 = vcombine.low %v1476_v40, %v1484_v41  ;;  %v789_v24 = vld [vmem:[%s9967_s7 + $0xa18] sm:$0xff] }
 0x1e7   : > { %7107 = vmatprep.subr.bf16.mxu1 %v9248_v55  ;;  %v8594_v55 = vcombine.high %v725_v48, %v733_v50  ;;  %v797_v63 = vld [vmem:[%s9967_s7 + $0xa58] sm:$0xff] }
 0x1e8   : > { %7067 = vmatpush1.bf16.msra.mxu0 %v8991_v61  ;;  %v8337_v61 = vcombine.low %v469_v46, %v477_v47  ;;  %v549_v49 = vld [vmem:[%s9967_s7 + $0x298] sm:$0xff] }
 0x1e9   : > { %7068 = vmatprep.subr.bf16.mxu0 %v9008_v1  ;;  %v8354_v1 = vcombine.high %v485_v56, %v493_v57  ;;  %v557_v28 = vld [vmem:[%s9967_s7 + $0x2d8] sm:$0xff] }
 0x1ea   : > { %7108 = vmatpush1.bf16.msra.mxu1 %v9247_v62  ;;  %v8593_v62 = vcombine.low %v725_v48, %v733_v50  ;;  %v805_v29 = vld [vmem:[%s9967_s7 + $0xa98] sm:$0xff] }
 0x1eb   : > { %7109 = vmatprep.subr.bf16.mxu1 %v9264_v3  ;;  %v8610_v3 = vcombine.high %v741_v58, %v749_v59  ;;  %v813_v30 = vld [vmem:[%s9967_s7 + $0xad8] sm:$0xff] }
 0x1ec   : > { %7069 = vmatpush1.bf16.msra.mxu0 %v9007_v34  ;;  %v8353_v34 = vcombine.low %v485_v56, %v493_v57  ;;  %v565_v36 = vld [vmem:[%s9967_s7 + $0x318] sm:$0xff] }
 0x1ed   : > { %7070 = vmatprep.subr.bf16.mxu0 %v9024_v10  ;;  %v8370_v10 = vcombine.high %v501_v4, %v509_v33  ;;  %v573_v37 = vld [vmem:[%s9967_s7 + $0x358] sm:$0xff] }
 0x1ee   : > { %7110 = vmatpush1.bf16.msra.mxu1 %v9263_v8  ;;  %v8609_v8 = vcombine.low %v741_v58, %v749_v59  ;;  %v821_v40 = vld [vmem:[%s9967_s7 + $0xb18] sm:$0xff]  ;;  %v8433_v58 = vcombine.low %v565_v36, %v573_v37 }
 0x1ef   : > { %7111 = vmatprep.subr.bf16.mxu1 %v9280_v11  ;;  %v8626_v11 = vcombine.high %v757_v5, %v765_v6  ;;  %v829_v41 = vld [vmem:[%s9967_s7 + $0xb58] sm:$0xff] }
 0x1f0   : > { %7071 = vmatpush1.bf16.msra.mxu0 %v9023_v17  ;;  %v8369_v17 = vcombine.low %v501_v4, %v509_v33  ;;  %v8690_v46 = vcombine.high %v821_v40, %v829_v41  ;;  %v581_v47 = vld [vmem:[%s9967_s7 + $0x398] sm:$0xff] }
 0x1f1   : > { %7072 = vmatprep.subr.bf16.mxu0 %v9040_v20  ;;  %v8386_v20 = vcombine.high %v517_v12, %v525_v13  ;;  %v589_v48 = vld [vmem:[%s9967_s7 + $0x3d8] sm:$0xff] }
 0x1f2   : > { %7112 = vmatpush1.bf16.msra.mxu1 %v9279_v18  ;;  %v8625_v18 = vcombine.low %v757_v5, %v765_v6  ;;  %v597_v5 = vld [vmem:[%s9967_s7 + $0x418] sm:$0xff] }
 0x1f3   : > { %7113 = vmatprep.subr.bf16.mxu1 %v9296_v21  ;;  %v8642_v21 = vcombine.high %v773_v14, %v781_v15  ;;  %v605_v6 = vld [vmem:[%s9967_s7 + $0x458] sm:$0xff] }
 0x1f4   : > { %7073 = vmatpush1.bf16.msra.mxu0 %v9039_v25  ;;  %v8385_v25 = vcombine.low %v517_v12, %v525_v13  ;;  %v8466_v12 = vcombine.high %v597_v5, %v605_v6 }
 0x1f5   : > { %7074 = vmatprep.subr.bf16.mxu0 %v9056_v2  ;;  %v8402_v2 = vcombine.high %v533_v22, %v541_v23 }
 0x1f6   : > { %7114 = vmatpush1.bf16.msra.mxu1 %v9295_v26  ;;  %v8641_v26 = vcombine.low %v773_v14, %v781_v15  ;;  %v613_v14 = vld [vmem:[%s9967_s7 + $0x498] sm:$0xff] }
 0x1f7   : > { %7115 = vmatprep.subr.bf16.mxu1 %v9312_v27  ;;  %v8658_v27 = vcombine.high %v789_v24, %v797_v63  ;;  %v621_v15 = vld [vmem:[%s9967_s7 + $0x4d8] sm:$0xff] }
 0x1f8   : > { %7075 = vmatpush1.bf16.msra.mxu0 %v9055_v31  ;;  %v8401_v31 = vcombine.low %v533_v22, %v541_v23  ;;  %v8482_v22 = vcombine.high %v613_v14, %v621_v15 }
 0x1f9   : > { %7076 = vmatprep.subr.bf16.mxu0 %v9072_v32  ;;  %v8418_v32 = vcombine.high %v549_v49, %v557_v28 }
 0x1fa   : > { %7116 = vmatpush1.bf16.msra.mxu1 %v9311_v53  ;;  %v8657_v53 = vcombine.low %v789_v24, %v797_v63  ;;  %v629_v24 = vld [vmem:[%s9967_s7 + $0x518] sm:$0xff] }
 0x1fb   : > { %7117 = vmatprep.subr.bf16.mxu1 %v9328_v35  ;;  %v8674_v35 = vcombine.high %v805_v29, %v813_v30  ;;  %v637_v63 = vld [vmem:[%s9967_s7 + $0x558] sm:$0xff] }
 0x1fc   : > { %7077 = vmatpush1.bf16.msra.mxu0 %v9071_v42  ;;  %v8417_v42 = vcombine.low %v549_v49, %v557_v28  ;;  %v8498_v49 = vcombine.high %v629_v24, %v637_v63 }
 0x1fd   : > { %7078 = vmatprep.subr.bf16.mxu0 %v9088_v44  ;;  %v8434_v44 = vcombine.high %v565_v36, %v573_v37 }
 0x1fe   : > { %7118 = vmatpush1.bf16.msra.mxu1 %v9327_v43  ;;  %v8673_v43 = vcombine.low %v805_v29, %v813_v30  ;;  %v645_v29 = vld [vmem:[%s9967_s7 + $0x598] sm:$0xff] }
 0x1ff   : > { %7119 = vmatprep.subr.bf16.mxu1 %v9344_v45  ;;  %v653_v30 = vld [vmem:[%s9967_s7 + $0x5d8] sm:$0xff] }
 0x200   : > { %7079 = vmatpush1.bf16.msra.mxu0 %v9087_v51  ;;  %v8514_v36 = vcombine.high %v645_v29, %v653_v30 }
 0x201   : > { %7130 = vmatprep.subr.bf16.mxu0 %v8338_v54  ;;  %v845_v54 = vld [vmem:[%s9967_s7 + $0xbd8] sm:$0xff] }
 0x202   : > { %7120 = vmatpush1.bf16.msra.mxu1 %v9343_v52  ;;  %v837_v52 = vld [vmem:[%s9967_s7 + $0xb98] sm:$0xff] }
 0x203   : > { %7171 = vmatprep.subr.bf16.mxu1 %v8594_v55  ;;  %7081 = vmatmul.mubr.bf16.vlgmr.msra.gmra.mrb[20].mxu0 %v10169_v16  ;;  %v8706_v33 = vcombine.high %v837_v52, %v845_v54 }
 0x204   : > { %7131 = vmatpush1.bf16.msra.mxu0 %v8337_v61  ;;  %7162 = vmatprep.mubr.bf16.mxu0 %v10029_v38 }
 0x205   : > { %7122 = vmatmul.mubr.bf16.vlgmr.msra.gmra.mrb[20].mxu1 %v10175_v19  ;;  %7132 = vmatprep.subr.bf16.mxu0 %v8354_v1  ;;  %v8689_v1 = vcombine.low %v821_v40, %v829_v41  ;;  %v661_v40 = vld [vmem:[%s9967_s7 + $0x618] sm:$0xff] }
 0x206   : > { %7172 = vmatpush1.bf16.msra.mxu1 %v8593_v62  ;;  %7203 = vmatprep.mubr.bf16.mxu1 %v10033_v39  ;;  %v669_v41 = vld [vmem:[%s9967_s7 + $0x658] sm:$0xff] }
 0x207   : > { %7173 = vmatprep.subr.bf16.mxu1 %v8610_v3  ;;  %v8450_v3 = vcombine.high %v581_v47, %v589_v48 }
 0x208   : > { %7133 = vmatpush1.bf16.msra.mxu0 %v8353_v34  ;;  %v853_v34 = vld [vmem:[%s9967_s7 + $0xc18] sm:$0xff] }
 0x209   : > { %7134 = vmatprep.subr.bf16.mxu0 %v8370_v10  ;;  %v8449_v10 = vcombine.low %v581_v47, %v589_v48  ;;  %v677_v48 = vld [vmem:[%s9967_s7 + $0x698] sm:$0xff] }
 0x20a   : > { %7174 = vmatpush1.bf16.msra.mxu1 %v8609_v8  ;;  %v861_v8 = vld [vmem:[%s9967_s7 + $0xc58] sm:$0xff] }
 0x20b   : > { %7175 = vmatprep.subr.bf16.mxu1 %v8626_v11  ;;  %v8705_v11 = vcombine.low %v837_v52, %v845_v54  ;;  %v8722_v13 = vcombine.high %v853_v34, %v861_v8  ;;  %v941_v52 = vld [vmem:[%s9967_s7 + $0xed8] sm:$0xff]  ;;  %v8529_v54 = vcombine.low %v661_v40, %v669_v41 }
 0x20c   : > { %7135 = vmatpush1.bf16.msra.mxu0 %v8369_v17  ;;  %v869_v17 = vld [vmem:[%s9967_s7 + $0xc98] sm:$0xff] }
 0x20d   : > { %7136 = vmatprep.subr.bf16.mxu0 %v8386_v20  ;;  %v8465_v20 = vcombine.low %v597_v5, %v605_v6 }
 0x20e   : > { %7176 = vmatpush1.bf16.msra.mxu1 %v8625_v18  ;;  %v877_v18 = vld [vmem:[%s9967_s7 + $0xcd8] sm:$0xff] }
 0x20f   : > { %7177 = vmatprep.subr.bf16.mxu1 %v8642_v21  ;;  %v8721_v21 = vcombine.low %v853_v34, %v861_v8  ;;  %v8738_v23 = vcombine.high %v869_v17, %v877_v18  ;;  %v709_v34 = vld [vmem:[%s9967_s7 + $0x798] sm:$0xff] }
 0x210   : > { %7137 = vmatpush1.bf16.msra.mxu0 %v8385_v25  ;;  %v885_v25 = vld [vmem:[%s9967_s7 + $0xd18] sm:$0xff] }
 0x211   : > { %7138 = vmatprep.subr.bf16.mxu0 %v8402_v2  ;;  %v8481_v2 = vcombine.low %v613_v14, %v621_v15  ;;  %v717_v8 = vld [vmem:[%s9967_s7 + $0x7d8] sm:$0xff] }
 0x212   : > { %7178 = vmatpush1.bf16.msra.mxu1 %v8641_v26  ;;  %v893_v26 = vld [vmem:[%s9967_s7 + $0xd58] sm:$0xff]  ;;  %v8578_v14 = vcombine.high %v709_v34, %v717_v8 }
 0x213   : > { %7179 = vmatprep.subr.bf16.mxu1 %v8658_v27  ;;  %v8737_v27 = vcombine.low %v869_v17, %v877_v18  ;;  %v8754_v28 = vcombine.high %v885_v25, %v893_v26  ;;  %v981_v17 = vld [vmem:[%s9967_s7 + $0x1018] sm:$0xff] }
 0x214   : > { %7139 = vmatpush1.bf16.msra.mxu0 %v8401_v31  ;;  %v901_v31 = vld [vmem:[%s9967_s7 + $0xd98] sm:$0xff] }
 0x215   : > { %7140 = vmatprep.subr.bf16.mxu0 %v8418_v32  ;;  %v8497_v32 = vcombine.low %v629_v24, %v637_v63  ;;  %v989_v18 = vld [vmem:[%s9967_s7 + $0x1058] sm:$0xff] }
 0x216   : > { %7180 = vmatpush1.bf16.msra.mxu1 %v8657_v53  ;;  %v6836_v45 = vpop.f32.mrb[8].mxu0  ;;  %v909_v53 = vld [vmem:[%s9967_s7 + $0xdd8] sm:$0xff]  ;;  %v8850_v24 = vcombine.high %v981_v17, %v989_v18 }
 0x217   : > { %7181 = vmatprep.subr.bf16.mxu1 %v8674_v35  ;;  %v6838_v51 = vpop.f32.mrb[9].mxu0  ;;  %v8753_v35 = vcombine.low %v885_v25, %v893_v26  ;;  %v8770_v37 = vcombine.high %v901_v31, %v909_v53  ;;  %v997_v25 = vld [vmem:[%s9967_s7 + $0x1098] sm:$0xff] }
 0x218   : > { %v6877_v50 = vpop.f32.mrb[8].mxu1  ;;  %v6840_v57 = vpop.f32.mrb[10].mxu0  ;;  %7141 = vmatpush1.bf16.msra.mxu0 %v8417_v42  ;;  %v917_v42 = vld [vmem:[%s9967_s7 + $0xe18] sm:$0xff] }
 0x219   : > { %v10483_v55 = vadd.f32 %v6877_v50, %v6836_v45  ;;  %v6879_v56 = vpop.f32.mrb[9].mxu1  ;;  %v6841_v62 = vpop.f32.mrb[11].mxu0  ;;  %7142 = vmatprep.subr.bf16.mxu0 %v8434_v44  ;;  %v8513_v44 = vcombine.low %v645_v29, %v653_v30  ;;  %v8769_v45 = vcombine.low %v901_v31, %v909_v53  ;;  %v685_v50 = vld [vmem:[%s9967_s7 + $0x6d8] sm:$0xff] }
 0x21a   : > { %v10485_v59 = vadd.f32 %v6879_v56, %v6838_v51  ;;  %v6881_v61 = vpop.f32.mrb[10].mxu1  ;;  %7182 = vmatpush1.bf16.msra.mxu1 %v8673_v43  ;;  %v925_v43 = vld [vmem:[%s9967_s7 + $0xe58] sm:$0xff]  ;;  %v8546_v57 = vcombine.high %v677_v48, %v685_v50 }
 0x21b   : > { %v6882_v4 = vpop.f32.mrb[11].mxu1  ;;  %7183 = vmatprep.subr.bf16.mxu1 %v8690_v46  ;;  %v8530_v46 = vcombine.high %v661_v40, %v669_v41  ;;  %v8786_v47 = vcombine.high %v917_v42, %v925_v43  ;;  %v933_v51 = vld [vmem:[%s9967_s7 + $0xe98] sm:$0xff]  ;;  %v8785_v56 = vcombine.low %v917_v42, %v925_v43 }
 0x21c   : > { %7143 = vmatpush1.bf16.msra.mxu0 %v8433_v58  ;;  %v8802_v58 = vcombine.high %v933_v51, %v941_v52  ;;  %v693_v61 = vld [vmem:[%s9967_s7 + $0x718] sm:$0xff]  ;;  %v8545_v4 = vcombine.low %v677_v48, %v685_v50 }
 0x21d   : > { %7144 = vmatprep.subr.bf16.mxu0 %v8450_v3  ;;  %v701_v62 = vld [vmem:[%s9967_s7 + $0x758] sm:$0xff] }
 0x21e   : > { %7184 = vmatpush1.bf16.msra.mxu1 %v8689_v1  ;;  %v949_v1 = vld [vmem:[%s9967_s7 + $0xf18] sm:$0xff]  ;;  %v8562_v5 = vcombine.high %v693_v61, %v701_v62 }
 0x21f   : > { %7185 = vmatprep.subr.bf16.mxu1 %v8706_v33  ;;  %v957_v3 = vld [vmem:[%s9967_s7 + $0xf58] sm:$0xff]  ;;  %v8801_v33 = vcombine.low %v933_v51, %v941_v52 }
 0x220   : > { %7145 = vmatpush1.bf16.msra.mxu0 %v8449_v10  ;;  %v8818_v6 = vcombine.high %v949_v1, %v957_v3  ;;  %v965_v10 = vld [vmem:[%s9967_s7 + $0xf98] sm:$0xff] }
 0x221   : > { %7146 = vmatprep.subr.bf16.mxu0 %v8466_v12  ;;  %v8561_v12 = vcombine.low %v693_v61, %v701_v62  ;;  %v1005_v26 = vld [vmem:[%s9967_s7 + $0x10d8] sm:$0xff] }
 0x222   : > { %7186 = vmatpush1.bf16.msra.mxu1 %v8705_v11  ;;  %v973_v11 = vld [vmem:[%s9967_s7 + $0xfd8] sm:$0xff]  ;;  %v8866_v29 = vcombine.high %v997_v25, %v1005_v26 }
 0x223   : > { %7187 = vmatprep.subr.bf16.mxu1 %v8722_v13  ;;  %v8817_v13 = vcombine.low %v949_v1, %v957_v3  ;;  %v8834_v15 = vcombine.high %v965_v10, %v973_v11  ;;  %v1013_v31 = vld [vmem:[%s9967_s7 + $0x1118] sm:$0xff] }
 0x224   : > { %7147 = vmatpush1.bf16.msra.mxu0 %v8465_v20  ;;  %v1237_v20 = vld [vmem:[%s9967_s7 + $0x1818] sm:$0xff] }
 0x225   : > { %7148 = vmatprep.subr.bf16.mxu0 %v8482_v22  ;;  %v8577_v22 = vcombine.low %v709_v34, %v717_v8  ;;  %v1021_v53 = vld [vmem:[%s9967_s7 + $0x1158] sm:$0xff] }
 0x226   : > { %7188 = vmatpush1.bf16.msra.mxu1 %v8721_v21  ;;  %v1245_v21 = vld [vmem:[%s9967_s7 + $0x1858] sm:$0xff]  ;;  %v8882_v40 = vcombine.high %v1013_v31, %v1021_v53 }
 0x227   : > { %7189 = vmatprep.subr.bf16.mxu1 %v8738_v23  ;;  %v8833_v23 = vcombine.low %v965_v10, %v973_v11  ;;  %v9106_v63 = vcombine.high %v1237_v20, %v1245_v21  ;;  %v1029_v42 = vld [vmem:[%s9967_s7 + $0x1198] sm:$0xff] }
 0x228   : > { %7149 = vmatpush1.bf16.msra.mxu0 %v8481_v2  ;;  %v1253_v2 = vld [vmem:[%s9967_s7 + $0x1898] sm:$0xff] }
 0x229   : > { %7150 = vmatprep.subr.bf16.mxu0 %v8498_v49  ;;  %v8849_v49 = vcombine.low %v981_v17, %v989_v18  ;;  %v1037_v43 = vld [vmem:[%s9967_s7 + $0x11d8] sm:$0xff] }
 0x22a   : > { %7190 = vmatpush1.bf16.msra.mxu1 %v8737_v27  ;;  %v1261_v27 = vld [vmem:[%s9967_s7 + $0x18d8] sm:$0xff]  ;;  %v8898_v48 = vcombine.high %v1029_v42, %v1037_v43 }
 0x22b   : > { %7191 = vmatprep.subr.bf16.mxu1 %v8754_v28  ;;  %v9105_v28 = vcombine.low %v1237_v20, %v1245_v21  ;;  %v9122_v30 = vcombine.high %v1253_v2, %v1261_v27  ;;  %v1045_v51 = vld [vmem:[%s9967_s7 + $0x1218] sm:$0xff] }
 0x22c   : > { %7151 = vmatpush1.bf16.msra.mxu0 %v8497_v32  ;;  %v1269_v32 = vld [vmem:[%s9967_s7 + $0x1918] sm:$0xff] }
 0x22d   : > { %7152 = vmatprep.subr.bf16.mxu0 %v8514_v36  ;;  %v8865_v36 = vcombine.low %v997_v25, %v1005_v26  ;;  %v1053_v52 = vld [vmem:[%s9967_s7 + $0x1258] sm:$0xff] }
 0x22e   : > { %7192 = vmatpush1.bf16.msra.mxu1 %v8753_v35  ;;  %v1277_v35 = vld [vmem:[%s9967_s7 + $0x1958] sm:$0xff]  ;;  %v8914_v61 = vcombine.high %v1045_v51, %v1053_v52 }
 0x22f   : > { %7193 = vmatprep.subr.bf16.mxu1 %v8770_v37  ;;  %v9121_v37 = vcombine.low %v1253_v2, %v1261_v27  ;;  %v9138_v41 = vcombine.high %v1269_v32, %v1277_v35  ;;  %v1061_v1 = vld [vmem:[%s9967_s7 + $0x1298] sm:$0xff]  ;;  %v448_v2 = vld [vmem:[#allocation2 + $0x10] sm:$0xff] }
 0x230   : > { %7153 = vmatpush1.bf16.msra.mxu0 %v8513_v44  ;;  %v1285_v44 = vld [vmem:[%s9967_s7 + $0x1998] sm:$0xff] }
 0x231   : > { %7154 = vmatprep.subr.bf16.mxu0 %v8530_v46  ;;  %v8881_v46 = vcombine.low %v1013_v31, %v1021_v53  ;;  %v1069_v3 = vld [vmem:[%s9967_s7 + $0x12d8] sm:$0xff] }
 0x232   : > { %7194 = vmatpush1.bf16.msra.mxu1 %v8769_v45  ;;  %v1293_v45 = vld [vmem:[%s9967_s7 + $0x19d8] sm:$0xff]  ;;  %v8930_v34 = vcombine.high %v1061_v1, %v1069_v3 }
 0x233   : > { %7195 = vmatprep.subr.bf16.mxu1 %v8786_v47  ;;  %v9137_v47 = vcombine.low %v1269_v32, %v1277_v35  ;;  %v9154_v50 = vcombine.high %v1285_v44, %v1293_v45  ;;  %v1077_v10 = vld [vmem:[%s9967_s7 + $0x1318] sm:$0xff] }
 0x234   : > { %7155 = vmatpush1.bf16.msra.mxu0 %v8529_v54  ;;  %v1301_v54 = vld [vmem:[%s9967_s7 + $0x1a18] sm:$0xff] }
 0x235   : > { %7156 = vmatprep.subr.bf16.mxu0 %v8546_v57  ;;  %v8897_v57 = vcombine.low %v1029_v42, %v1037_v43  ;;  %v1085_v11 = vld [vmem:[%s9967_s7 + $0x1358] sm:$0xff] }
 0x236   : > { %7196 = vmatpush1.bf16.msra.mxu1 %v8785_v56  ;;  %v1309_v56 = vld [vmem:[%s9967_s7 + $0x1a58] sm:$0xff]  ;;  %v8946_v17 = vcombine.high %v1077_v10, %v1085_v11 }
 0x237   : > { %7197 = vmatprep.subr.bf16.mxu1 %v8802_v58  ;;  %v9153_v58 = vcombine.low %v1285_v44, %v1293_v45  ;;  %v9170_v62 = vcombine.high %v1301_v54, %v1309_v56  ;;  %v1093_v21 = vld [vmem:[%s9967_s7 + $0x1398] sm:$0xff] }
 0x238   : > { %7157 = vmatpush1.bf16.msra.mxu0 %v8545_v4  ;;  %v1317_v4 = vld [vmem:[%s9967_s7 + $0x1a98] sm:$0xff] }
 0x239   : > { %7158 = vmatprep.subr.bf16.mxu0 %v8562_v5  ;;  %v8913_v5 = vcombine.low %v1045_v51, %v1053_v52  ;;  %v1349_v25 = vld [vmem:[%s9967_s7 + $0x1b98] sm:$0xff] }
 0x23a   : > { %7198 = vmatpush1.bf16.msra.mxu1 %v8801_v33  ;;  %v1325_v33 = vld [vmem:[%s9967_s7 + $0x1ad8] sm:$0xff] }
 0x23b   : > { %7199 = vmatprep.subr.bf16.mxu1 %v8818_v6  ;;  %v9169_v6 = vcombine.low %v1301_v54, %v1309_v56  ;;  %v9186_v8 = vcombine.high %v1317_v4, %v1325_v33  ;;  %v1357_v26 = vld [vmem:[%s9967_s7 + $0x1bd8] sm:$0xff] }
 0x23c   : > { %7159 = vmatpush1.bf16.msra.mxu0 %v8561_v12  ;;  %v1333_v12 = vld [vmem:[%s9967_s7 + $0x1b18] sm:$0xff] }
 0x23d   : > { %7160 = vmatprep.subr.bf16.mxu0 %v8578_v14  ;;  %v8929_v14 = vcombine.low %v1061_v1, %v1069_v3  ;;  %v449_v31 = vld [vmem:[#allocation2 + $0x18] sm:$0xff] }
 0x23e   : > { %7200 = vmatpush1.bf16.msra.mxu1 %v8817_v13  ;;  %v1341_v13 = vld [vmem:[%s9967_s7 + $0x1b58] sm:$0xff] }
 0x23f   : > { %7201 = vmatprep.subr.bf16.mxu1 %v8834_v15  ;;  %v9185_v15 = vcombine.low %v1317_v4, %v1325_v33  ;;  %v9202_v20 = vcombine.high %v1333_v12, %v1341_v13  ;;  %v9201_v32 = vcombine.low %v1333_v12, %v1341_v13  ;;  %v1365_v43 = vld [vmem:[%s9967_s7 + $0x1c18] sm:$0xff] }
 0x240   : > { %7161 = vmatpush1.bf16.msra.mxu0 %v8577_v22  ;;  %v1101_v22 = vld [vmem:[%s9967_s7 + $0x13d8] sm:$0xff] }
 0x241   : > { %7212 = vmatprep.subr.bf16.mxu0 %v8850_v24  ;;  %v8962_v35 = vcombine.high %v1093_v21, %v1101_v22  ;;  %v1373_v44 = vld [vmem:[%s9967_s7 + $0x1c58] sm:$0xff] }
 0x242   : > { %7202 = vmatpush1.bf16.msra.mxu1 %v8833_v23  ;;  %v1125_v51 = vld [vmem:[%s9967_s7 + $0x1498] sm:$0xff] }
 0x243   : > { %7253 = vmatprep.subr.bf16.mxu1 %v9106_v63  ;;  %7163 = vmatmul.mubr.bf16.vlgmr.msra.gmra.mrb[24].mxu0 %v10079_v60  ;;  %v1133_v52 = vld [vmem:[%s9967_s7 + $0x14d8] sm:$0xff] }
 0x244   : > { %7213 = vmatpush1.bf16.msra.mxu0 %v8849_v49  ;;  %7244 = vmatprep.mubr.bf16.mxu0 %v10097_v7  ;;  %v1381_v54 = vld [vmem:[%s9967_s7 + $0x1c98] sm:$0xff] }
 0x245   : > { %7204 = vmatmul.mubr.bf16.vlgmr.msra.gmra.mrb[24].mxu1 %v10088_v0  ;;  %7214 = vmatprep.subr.bf16.mxu0 %v8866_v29  ;;  %v8945_v29 = vcombine.low %v1077_v10, %v1085_v11  ;;  %v1389_v56 = vld [vmem:[%s9967_s7 + $0x1cd8] sm:$0xff] }
 0x246   : > { %7254 = vmatpush1.bf16.msra.mxu1 %v9105_v28  ;;  %7285 = vmatprep.mubr.bf16.mxu1 %v10104_v9  ;;  %v1141_v1 = vld [vmem:[%s9967_s7 + $0x1518] sm:$0xff] }
 0x247   : > { %7255 = vmatprep.subr.bf16.mxu1 %v9122_v30  ;;  %v1149_v3 = vld [vmem:[%s9967_s7 + $0x1558] sm:$0xff] }
 0x248   : > { %7215 = vmatpush1.bf16.msra.mxu0 %v8865_v36  ;;  %v1397_v4 = vld [vmem:[%s9967_s7 + $0x1d18] sm:$0xff] }
 0x249   : > { %7216 = vmatprep.subr.bf16.mxu0 %v8882_v40  ;;  %v1109_v40 = vld [vmem:[%s9967_s7 + $0x1418] sm:$0xff] }
 0x24a   : > { %7256 = vmatpush1.bf16.msra.mxu1 %v9121_v37  ;;  %v1405_v33 = vld [vmem:[%s9967_s7 + $0x1d58] sm:$0xff] }
 0x24b   : > { %7257 = vmatprep.subr.bf16.mxu1 %v9138_v41  ;;  %v1117_v41 = vld [vmem:[%s9967_s7 + $0x1458] sm:$0xff] }
 0x24c   : > { %7217 = vmatpush1.bf16.msra.mxu0 %v8881_v46  ;;  %v8961_v46 = vcombine.low %v1093_v21, %v1101_v22  ;;  %v1157_v10 = vld [vmem:[%s9967_s7 + $0x1598] sm:$0xff] }
 0x24d   : > { %7218 = vmatprep.subr.bf16.mxu0 %v8898_v48  ;;  %v8978_v48 = vcombine.high %v1109_v40, %v1117_v41  ;;  %v1165_v11 = vld [vmem:[%s9967_s7 + $0x15d8] sm:$0xff] }
 0x24e   : > { %7258 = vmatpush1.bf16.msra.mxu1 %v9137_v47  ;;  %v9217_v47 = vcombine.low %v1349_v25, %v1357_v26  ;;  %v1413_v12 = vld [vmem:[%s9967_s7 + $0x1d98] sm:$0xff] }
 0x24f   : > { %7259 = vmatprep.subr.bf16.mxu1 %v9154_v50  ;;  %v9234_v50 = vcombine.high %v1365_v43, %v1373_v44  ;;  %v1421_v13 = vld [vmem:[%s9967_s7 + $0x1dd8] sm:$0xff] }
 0x250   : > { %7219 = vmatpush1.bf16.msra.mxu0 %v8897_v57  ;;  %v8977_v57 = vcombine.low %v1109_v40, %v1117_v41  ;;  %v1181_v21 = vld [vmem:[%s9967_s7 + $0x1658] sm:$0xff] }
 0x251   : > { %7220 = vmatprep.subr.bf16.mxu0 %v8914_v61  ;;  %v8994_v61 = vcombine.high %v1125_v51, %v1133_v52  ;;  %v1429_v22 = vld [vmem:[%s9967_s7 + $0x1e18] sm:$0xff] }
 0x252   : > { %7260 = vmatpush1.bf16.msra.mxu1 %v9153_v58  ;;  %v9233_v58 = vcombine.low %v1365_v43, %v1373_v44  ;;  %v1229_v43 = vld [vmem:[%s9967_s7 + $0x17d8] sm:$0xff] }
 0x253   : > { %7261 = vmatprep.subr.bf16.mxu1 %v9170_v62  ;;  %v9250_v62 = vcombine.high %v1381_v54, %v1389_v56  ;;  %v1477_v44 = vld [vmem:[%s9967_s7 + $0x1f98] sm:$0xff] }
 0x254   : > { %7221 = vmatpush1.bf16.msra.mxu0 %v8913_v5  ;;  %v8993_v5 = vcombine.low %v1125_v51, %v1133_v52  ;;  %v470_v51 = vld [vmem:[%s9967_s7 + $0x20] sm:$0xff] }
 0x255   : > { %7222 = vmatprep.subr.bf16.mxu0 %v8930_v34  ;;  %v9010_v34 = vcombine.high %v1141_v1, %v1149_v3  ;;  %v478_v52 = vld [vmem:[%s9967_s7 + $0x60] sm:$0xff] }
 0x256   : > { %7262 = vmatpush1.bf16.msra.mxu1 %v9169_v6  ;;  %v6918_v18 = vpop.f32.mrb[12].mxu0  ;;  %v9249_v6 = vcombine.low %v1381_v54, %v1389_v56  ;;  %v726_v54 = vld [vmem:[%s9967_s7 + $0x820] sm:$0xff] }
 0x257   : > { %7263 = vmatprep.subr.bf16.mxu1 %v9186_v8  ;;  %v6919_v23 = vadd.f32 %v6918_v18, %v10483_v55  ;;  %v6920_v63 = vpop.f32.mrb[13].mxu0  ;;  %v9266_v8 = vcombine.high %v1397_v4, %v1405_v33  ;;  %v9282_v18 = vcombine.high %v1413_v12, %v1421_v13  ;;  %v734_v56 = vld [vmem:[%s9967_s7 + $0x860] sm:$0xff] }
 0x258   : > { %v6959_v24 = vpop.f32.mrb[12].mxu1  ;;  %v6921_v27 = vadd.f32 %v6920_v63, %v10485_v59  ;;  %v6922_v28 = vpop.f32.mrb[14].mxu0  ;;  %7223 = vmatpush1.bf16.msra.mxu0 %v8929_v14  ;;  %v9218_v59 = vcombine.high %v1349_v25, %v1357_v26  ;;  %v9009_v14 = vcombine.low %v1141_v1, %v1149_v3  ;;  %v9281_v63 = vcombine.low %v1413_v12, %v1421_v13  ;;  %v486_v1 = vld [vmem:[%s9967_s7 + $0xa0] sm:$0xff] }
 0x259   : > { %v6961_v49 = vpop.f32.mrb[13].mxu1  ;;  %v6960_v30 = vadd.f32 %v6959_v24, %v6919_v23  ;;  %v6923_v55 = vpop.f32.mrb[15].mxu0  ;;  %7224 = vmatprep.subr.bf16.mxu0 %v8946_v17  ;;  %v9026_v17 = vcombine.high %v1157_v10, %v1165_v11  ;;  %v1437_v23 = vld [vmem:[%s9967_s7 + $0x1e58] sm:$0xff]  ;;  %v9025_v24 = vcombine.low %v1157_v10, %v1165_v11  ;;  %v494_v3 = vld [vmem:[%s9967_s7 + $0xe0] sm:$0xff] }
 0x25a   : > { %v6963_v53 = vpop.f32.mrb[14].mxu1  ;;  %7264 = vmatpush1.bf16.msra.mxu1 %v9185_v15  ;;  %v6962_v36 = vadd.f32 %v6961_v49, %v6921_v27  ;;  %v9265_v15 = vcombine.low %v1397_v4, %v1405_v33  ;;  %v9298_v26 = vcombine.high %v1429_v22, %v1437_v23  ;;  %v1197_v27 = vld [vmem:[%s9967_s7 + $0x16d8] sm:$0xff]  ;;  %v742_v4 = vld [vmem:[%s9967_s7 + $0x8a0] sm:$0xff] }
 0x25b   : > { %v6964_v37 = vpop.f32.mrb[15].mxu1  ;;  %7265 = vmatprep.subr.bf16.mxu1 %v9202_v20  ;;  %v7952_v42 = vadd.f32 %v6960_v30, %v448_v2  ;;  %v1173_v20 = vld [vmem:[%s9967_s7 + $0x1618] sm:$0xff]  ;;  %v9297_v30 = vcombine.low %v1429_v22, %v1437_v23  ;;  %v750_v33 = vld [vmem:[%s9967_s7 + $0x8e0] sm:$0xff] }
 0x25c   : > { %v7953_v45 = vadd.f32 %v6962_v36, %v449_v31  ;;  %7225 = vmatpush1.bf16.msra.mxu0 %v8945_v29  ;;  %v9042_v25 = vcombine.high %v1173_v20, %v1181_v21  ;;  %v1189_v2 = vld [vmem:[%s9967_s7 + $0x1698] sm:$0xff]  ;;  %v9041_v29 = vcombine.low %v1173_v20, %v1181_v21  ;;  %v502_v10 = vld [vmem:[%s9967_s7 + $0x120] sm:$0xff] }
 0x25d   : > { %7968 = vst [vmem:[#allocation2 + $0x10] sm:$0xff] %v7952_v42  ;;  %7226 = vmatprep.subr.bf16.mxu0 %v8962_v35  ;;  %v1445_v49 = vld [vmem:[%s9967_s7 + $0x1e98] sm:$0xff]  ;;  %v9058_v31 = vcombine.high %v1189_v2, %v1197_v27  ;;  %v9057_v37 = vcombine.low %v1189_v2, %v1197_v27  ;;  %v510_v11 = vld [vmem:[%s9967_s7 + $0x160] sm:$0xff] }
 0x25e   : > { %7266 = vmatpush1.bf16.msra.mxu1 %v9201_v32  ;;  %7969 = vst [vmem:[#allocation2 + $0x18] sm:$0xff] %v7953_v45  ;;  %v1453_v28 = vld [vmem:[%s9967_s7 + $0x1ed8] sm:$0xff]  ;;  %v758_v12 = vld [vmem:[%s9967_s7 + $0x920] sm:$0xff] }
 0x25f   : > { %7267 = vmatprep.subr.bf16.mxu1 %v9218_v59  ;;  %v9314_v53 = vcombine.high %v1445_v49, %v1453_v28  ;;  %v1205_v55 = vld [vmem:[%s9967_s7 + $0x1718] sm:$0xff]  ;;  %v9313_v59 = vcombine.low %v1445_v49, %v1453_v28  ;;  %v766_v13 = vld [vmem:[%s9967_s7 + $0x960] sm:$0xff] }
 0x260   : > { %7227 = vmatpush1.bf16.msra.mxu0 %v8961_v46  ;;  %v1213_v32 = vld [vmem:[%s9967_s7 + $0x1758] sm:$0xff]  ;;  %v518_v20 = vld [vmem:[%s9967_s7 + $0x1a0] sm:$0xff] }
 0x261   : > { %7228 = vmatprep.subr.bf16.mxu0 %v8978_v48  ;;  %v1461_v35 = vld [vmem:[%s9967_s7 + $0x1f18] sm:$0xff]  ;;  %v9074_v40 = vcombine.high %v1205_v55, %v1213_v32  ;;  %v9073_v46 = vcombine.low %v1205_v55, %v1213_v32  ;;  %v526_v21 = vld [vmem:[%s9967_s7 + $0x1e0] sm:$0xff] }
 0x262   : > { %7268 = vmatpush1.bf16.msra.mxu1 %v9217_v47  ;;  %v1469_v36 = vld [vmem:[%s9967_s7 + $0x1f58] sm:$0xff]  ;;  %v774_v22 = vld [vmem:[%s9967_s7 + $0x9a0] sm:$0xff] }
 0x263   : > { %7269 = vmatprep.subr.bf16.mxu1 %v9234_v50  ;;  %v9330_v41 = vcombine.high %v1461_v35, %v1469_v36  ;;  %v1221_v42 = vld [vmem:[%s9967_s7 + $0x1798] sm:$0xff]  ;;  %v9329_v47 = vcombine.low %v1461_v35, %v1469_v36  ;;  %v782_v23 = vld [vmem:[%s9967_s7 + $0x9e0] sm:$0xff] }
 0x264   : > { %7229 = vmatpush1.bf16.msra.mxu0 %v8977_v57  ;;  %v1485_v45 = vld [vmem:[%s9967_s7 + $0x1fd8] sm:$0xff]  ;;  %v9090_v48 = vcombine.high %v1221_v42, %v1229_v43  ;;  %v9089_v57 = vcombine.low %v1221_v42, %v1229_v43  ;;  %v534_v2 = vld [vmem:[%s9967_s7 + $0x220] sm:$0xff] }
 0x265   : > { %7230 = vmatprep.subr.bf16.mxu0 %v8994_v61  ;;  %v9346_v50 = vcombine.high %v1477_v44, %v1485_v45  ;;  %v8340_v61 = vcombine.high %v470_v51, %v478_v52  ;;  %v542_v27 = vld [vmem:[%s9967_s7 + $0x260] sm:$0xff] }
 0x266   : > { %7270 = vmatpush1.bf16.msra.mxu1 %v9233_v58  ;;  %v9345_v58 = vcombine.low %v1477_v44, %v1485_v45  ;;  %v790_v49 = vld [vmem:[%s9967_s7 + $0xa20] sm:$0xff] }
 0x267   : > { %7271 = vmatprep.subr.bf16.mxu1 %v9250_v62  ;;  %v8596_v62 = vcombine.high %v726_v54, %v734_v56  ;;  %v798_v28 = vld [vmem:[%s9967_s7 + $0xa60] sm:$0xff] }
 0x268   : > { %7231 = vmatpush1.bf16.msra.mxu0 %v8993_v5  ;;  %v8339_v5 = vcombine.low %v470_v51, %v478_v52  ;;  %v550_v55 = vld [vmem:[%s9967_s7 + $0x2a0] sm:$0xff] }
 0x269   : > { %7232 = vmatprep.subr.bf16.mxu0 %v9010_v34  ;;  %v8356_v34 = vcombine.high %v486_v1, %v494_v3  ;;  %v558_v32 = vld [vmem:[%s9967_s7 + $0x2e0] sm:$0xff] }
 0x26a   : > { %7272 = vmatpush1.bf16.msra.mxu1 %v9249_v6  ;;  %v8595_v6 = vcombine.low %v726_v54, %v734_v56  ;;  %v806_v35 = vld [vmem:[%s9967_s7 + $0xaa0] sm:$0xff] }
 0x26b   : > { %7273 = vmatprep.subr.bf16.mxu1 %v9266_v8  ;;  %v8612_v8 = vcombine.high %v742_v4, %v750_v33  ;;  %v814_v36 = vld [vmem:[%s9967_s7 + $0xae0] sm:$0xff] }
 0x26c   : > { %7233 = vmatpush1.bf16.msra.mxu0 %v9009_v14  ;;  %v8355_v14 = vcombine.low %v486_v1, %v494_v3  ;;  %v566_v42 = vld [vmem:[%s9967_s7 + $0x320] sm:$0xff] }
 0x26d   : > { %7234 = vmatprep.subr.bf16.mxu0 %v9026_v17  ;;  %v8372_v17 = vcombine.high %v502_v10, %v510_v11  ;;  %v574_v43 = vld [vmem:[%s9967_s7 + $0x360] sm:$0xff] }
 0x26e   : > { %7274 = vmatpush1.bf16.msra.mxu1 %v9265_v15  ;;  %v8611_v15 = vcombine.low %v742_v4, %v750_v33  ;;  %v822_v44 = vld [vmem:[%s9967_s7 + $0xb20] sm:$0xff]  ;;  %v8435_v4 = vcombine.low %v566_v42, %v574_v43 }
 0x26f   : > { %7275 = vmatprep.subr.bf16.mxu1 %v9282_v18  ;;  %v8628_v18 = vcombine.high %v758_v12, %v766_v13  ;;  %v830_v45 = vld [vmem:[%s9967_s7 + $0xb60] sm:$0xff] }
 0x270   : > { %7235 = vmatpush1.bf16.msra.mxu0 %v9025_v24  ;;  %v8371_v24 = vcombine.low %v502_v10, %v510_v11  ;;  %v8692_v51 = vcombine.high %v822_v44, %v830_v45  ;;  %v582_v52 = vld [vmem:[%s9967_s7 + $0x3a0] sm:$0xff] }
 0x271   : > { %7236 = vmatprep.subr.bf16.mxu0 %v9042_v25  ;;  %v8388_v25 = vcombine.high %v518_v20, %v526_v21  ;;  %v590_v54 = vld [vmem:[%s9967_s7 + $0x3e0] sm:$0xff] }
 0x272   : > { %7276 = vmatpush1.bf16.msra.mxu1 %v9281_v63  ;;  %v8627_v63 = vcombine.low %v758_v12, %v766_v13  ;;  %v598_v12 = vld [vmem:[%s9967_s7 + $0x420] sm:$0xff] }
 0x273   : > { %7277 = vmatprep.subr.bf16.mxu1 %v9298_v26  ;;  %v8644_v26 = vcombine.high %v774_v22, %v782_v23  ;;  %v606_v13 = vld [vmem:[%s9967_s7 + $0x460] sm:$0xff] }
 0x274   : > { %7237 = vmatpush1.bf16.msra.mxu0 %v9041_v29  ;;  %v8387_v29 = vcombine.low %v518_v20, %v526_v21  ;;  %v8468_v20 = vcombine.high %v598_v12, %v606_v13 }
 0x275   : > { %7238 = vmatprep.subr.bf16.mxu0 %v9058_v31  ;;  %v8404_v31 = vcombine.high %v534_v2, %v542_v27 }
 0x276   : > { %7278 = vmatpush1.bf16.msra.mxu1 %v9297_v30  ;;  %v8643_v30 = vcombine.low %v774_v22, %v782_v23  ;;  %v614_v22 = vld [vmem:[%s9967_s7 + $0x4a0] sm:$0xff] }
 0x277   : > { %7279 = vmatprep.subr.bf16.mxu1 %v9314_v53  ;;  %v8660_v53 = vcombine.high %v790_v49, %v798_v28  ;;  %v622_v23 = vld [vmem:[%s9967_s7 + $0x4e0] sm:$0xff] }
 0x278   : > { %7239 = vmatpush1.bf16.msra.mxu0 %v9057_v37  ;;  %v8403_v37 = vcombine.low %v534_v2, %v542_v27  ;;  %v8484_v2 = vcombine.high %v614_v22, %v622_v23 }
 0x279   : > { %7240 = vmatprep.subr.bf16.mxu0 %v9074_v40  ;;  %v8420_v40 = vcombine.high %v550_v55, %v558_v32 }
 0x27a   : > { %7280 = vmatpush1.bf16.msra.mxu1 %v9313_v59  ;;  %v8659_v59 = vcombine.low %v790_v49, %v798_v28  ;;  %v630_v49 = vld [vmem:[%s9967_s7 + $0x520] sm:$0xff] }
 0x27b   : > { %7281 = vmatprep.subr.bf16.mxu1 %v9330_v41  ;;  %v8676_v41 = vcombine.high %v806_v35, %v814_v36  ;;  %v638_v28 = vld [vmem:[%s9967_s7 + $0x560] sm:$0xff] }
 0x27c   : > { %7241 = vmatpush1.bf16.msra.mxu0 %v9073_v46  ;;  %v8419_v46 = vcombine.low %v550_v55, %v558_v32  ;;  %v8500_v55 = vcombine.high %v630_v49, %v638_v28 }
 0x27d   : > { %7242 = vmatprep.subr.bf16.mxu0 %v9090_v48  ;;  %v8436_v48 = vcombine.high %v566_v42, %v574_v43 }
 0x27e   : > { %7282 = vmatpush1.bf16.msra.mxu1 %v9329_v47  ;;  %v8675_v47 = vcombine.low %v806_v35, %v814_v36  ;;  %v646_v35 = vld [vmem:[%s9967_s7 + $0x5a0] sm:$0xff] }
 0x27f   : > { %7283 = vmatprep.subr.bf16.mxu1 %v9346_v50  ;;  %v654_v36 = vld [vmem:[%s9967_s7 + $0x5e0] sm:$0xff] }
 0x280   : > { %7243 = vmatpush1.bf16.msra.mxu0 %v9089_v57  ;;  %v8516_v42 = vcombine.high %v646_v35, %v654_v36 }
 0x281   : > { %7294 = vmatprep.subr.bf16.mxu0 %v8340_v61  ;;  %v846_v61 = vld [vmem:[%s9967_s7 + $0xbe0] sm:$0xff] }
 0x282   : > { %7284 = vmatpush1.bf16.msra.mxu1 %v9345_v58  ;;  %v838_v58 = vld [vmem:[%s9967_s7 + $0xba0] sm:$0xff] }
 0x283   : > { %7335 = vmatprep.subr.bf16.mxu1 %v8596_v62  ;;  %7245 = vmatmul.mubr.bf16.vlgmr.msra.gmra.mrb[28].mxu0 %v10169_v16  ;;  %v8708_v11 = vcombine.high %v838_v58, %v846_v61 }
 0x284   : > { %7295 = vmatpush1.bf16.msra.mxu0 %v8339_v5  ;;  %7326 = vmatprep.mubr.bf16.mxu0 %v10029_v38 }
 0x285   : > { %7286 = vmatmul.mubr.bf16.vlgmr.msra.gmra.mrb[28].mxu1 %v10175_v19  ;;  %7296 = vmatprep.subr.bf16.mxu0 %v8356_v34  ;;  %v8691_v34 = vcombine.low %v822_v44, %v830_v45  ;;  %v662_v44 = vld [vmem:[%s9967_s7 + $0x620] sm:$0xff] }
 0x286   : > { %7336 = vmatpush1.bf16.msra.mxu1 %v8595_v6  ;;  %7367 = vmatprep.mubr.bf16.mxu1 %v10033_v39  ;;  %v670_v45 = vld [vmem:[%s9967_s7 + $0x660] sm:$0xff] }
 0x287   : > { %7337 = vmatprep.subr.bf16.mxu1 %v8612_v8  ;;  %v8452_v8 = vcombine.high %v582_v52, %v590_v54 }
 0x288   : > { %7297 = vmatpush1.bf16.msra.mxu0 %v8355_v14  ;;  %v854_v14 = vld [vmem:[%s9967_s7 + $0xc20] sm:$0xff] }
 0x289   : > { %7298 = vmatprep.subr.bf16.mxu0 %v8372_v17  ;;  %v8451_v17 = vcombine.low %v582_v52, %v590_v54  ;;  %v678_v54 = vld [vmem:[%s9967_s7 + $0x6a0] sm:$0xff] }
 0x28a   : > { %7338 = vmatpush1.bf16.msra.mxu1 %v8611_v15  ;;  %v862_v15 = vld [vmem:[%s9967_s7 + $0xc60] sm:$0xff] }
 0x28b   : > { %7339 = vmatprep.subr.bf16.mxu1 %v8628_v18  ;;  %v8707_v18 = vcombine.low %v838_v58, %v846_v61  ;;  %v8724_v21 = vcombine.high %v854_v14, %v862_v15  ;;  %v942_v58 = vld [vmem:[%s9967_s7 + $0xee0] sm:$0xff]  ;;  %v8531_v61 = vcombine.low %v662_v44, %v670_v45 }
 0x28c   : > { %7299 = vmatpush1.bf16.msra.mxu0 %v8371_v24  ;;  %v870_v24 = vld [vmem:[%s9967_s7 + $0xca0] sm:$0xff] }
 0x28d   : > { %7300 = vmatprep.subr.bf16.mxu0 %v8388_v25  ;;  %v8467_v25 = vcombine.low %v598_v12, %v606_v13 }
 0x28e   : > { %7340 = vmatpush1.bf16.msra.mxu1 %v8627_v63  ;;  %v878_v63 = vld [vmem:[%s9967_s7 + $0xce0] sm:$0xff] }
 0x28f   : > { %7341 = vmatprep.subr.bf16.mxu1 %v8644_v26  ;;  %v8723_v26 = vcombine.low %v854_v14, %v862_v15  ;;  %v8740_v27 = vcombine.high %v870_v24, %v878_v63  ;;  %v710_v14 = vld [vmem:[%s9967_s7 + $0x7a0] sm:$0xff] }
 0x290   : > { %7301 = vmatpush1.bf16.msra.mxu0 %v8387_v29  ;;  %v886_v29 = vld [vmem:[%s9967_s7 + $0xd20] sm:$0xff] }
 0x291   : > { %7302 = vmatprep.subr.bf16.mxu0 %v8404_v31  ;;  %v8483_v31 = vcombine.low %v614_v22, %v622_v23  ;;  %v718_v15 = vld [vmem:[%s9967_s7 + $0x7e0] sm:$0xff] }
 0x292   : > { %7342 = vmatpush1.bf16.msra.mxu1 %v8643_v30  ;;  %v894_v30 = vld [vmem:[%s9967_s7 + $0xd60] sm:$0xff]  ;;  %v8580_v22 = vcombine.high %v710_v14, %v718_v15 }
 0x293   : > { %7343 = vmatprep.subr.bf16.mxu1 %v8660_v53  ;;  %v8739_v53 = vcombine.low %v870_v24, %v878_v63  ;;  %v8756_v32 = vcombine.high %v886_v29, %v894_v30  ;;  %v982_v24 = vld [vmem:[%s9967_s7 + $0x1020] sm:$0xff] }
 0x294   : > { %7303 = vmatpush1.bf16.msra.mxu0 %v8403_v37  ;;  %v902_v37 = vld [vmem:[%s9967_s7 + $0xda0] sm:$0xff] }
 0x295   : > { %7304 = vmatprep.subr.bf16.mxu0 %v8420_v40  ;;  %v8499_v40 = vcombine.low %v630_v49, %v638_v28  ;;  %v990_v63 = vld [vmem:[%s9967_s7 + $0x1060] sm:$0xff] }
 0x296   : > { %7344 = vmatpush1.bf16.msra.mxu1 %v8659_v59  ;;  %v7000_v50 = vpop.f32.mrb[16].mxu0  ;;  %v910_v59 = vld [vmem:[%s9967_s7 + $0xde0] sm:$0xff]  ;;  %v8852_v49 = vcombine.high %v982_v24, %v990_v63 }
 0x297   : > { %7345 = vmatprep.subr.bf16.mxu1 %v8676_v41  ;;  %v7002_v57 = vpop.f32.mrb[17].mxu0  ;;  %v8755_v41 = vcombine.low %v886_v29, %v894_v30  ;;  %v8772_v43 = vcombine.high %v902_v37, %v910_v59  ;;  %v998_v29 = vld [vmem:[%s9967_s7 + $0x10a0] sm:$0xff] }
 0x298   : > { %v7041_v56 = vpop.f32.mrb[16].mxu1  ;;  %v7004_v3 = vpop.f32.mrb[18].mxu0  ;;  %7305 = vmatpush1.bf16.msra.mxu0 %v8419_v46  ;;  %v918_v46 = vld [vmem:[%s9967_s7 + $0xe20] sm:$0xff] }
 0x299   : > { %v10625_v62 = vadd.f32 %v7041_v56, %v7000_v50  ;;  %v7043_v1 = vpop.f32.mrb[17].mxu1  ;;  %v7005_v6 = vpop.f32.mrb[19].mxu0  ;;  %7306 = vmatprep.subr.bf16.mxu0 %v8436_v48  ;;  %v8515_v48 = vcombine.low %v646_v35, %v654_v36  ;;  %v8771_v50 = vcombine.low %v902_v37, %v910_v59  ;;  %v686_v56 = vld [vmem:[%s9967_s7 + $0x6e0] sm:$0xff] }
 0x29a   : > { %v10627_v33 = vadd.f32 %v7043_v1, %v7002_v57  ;;  %v7045_v5 = vpop.f32.mrb[18].mxu1  ;;  %7346 = vmatpush1.bf16.msra.mxu1 %v8675_v47  ;;  %v926_v47 = vld [vmem:[%s9967_s7 + $0xe60] sm:$0xff]  ;;  %v8548_v3 = vcombine.high %v678_v54, %v686_v56 }
 0x29b   : > { %v7046_v10 = vpop.f32.mrb[19].mxu1  ;;  %7347 = vmatprep.subr.bf16.mxu1 %v8692_v51  ;;  %v8532_v51 = vcombine.high %v662_v44, %v670_v45  ;;  %v8788_v52 = vcombine.high %v918_v46, %v926_v47  ;;  %v934_v57 = vld [vmem:[%s9967_s7 + $0xea0] sm:$0xff]  ;;  %v8787_v1 = vcombine.low %v918_v46, %v926_v47 }
 0x29c   : > { %7307 = vmatpush1.bf16.msra.mxu0 %v8435_v4  ;;  %v8804_v4 = vcombine.high %v934_v57, %v942_v58  ;;  %v694_v5 = vld [vmem:[%s9967_s7 + $0x720] sm:$0xff]  ;;  %v8547_v10 = vcombine.low %v678_v54, %v686_v56 }
 0x29d   : > { %7308 = vmatprep.subr.bf16.mxu0 %v8452_v8  ;;  %v702_v6 = vld [vmem:[%s9967_s7 + $0x760] sm:$0xff] }
 0x29e   : > { %7348 = vmatpush1.bf16.msra.mxu1 %v8691_v34  ;;  %v950_v34 = vld [vmem:[%s9967_s7 + $0xf20] sm:$0xff]  ;;  %v8564_v12 = vcombine.high %v694_v5, %v702_v6 }
 0x29f   : > { %7349 = vmatprep.subr.bf16.mxu1 %v8708_v11  ;;  %v958_v8 = vld [vmem:[%s9967_s7 + $0xf60] sm:$0xff]  ;;  %v8803_v11 = vcombine.low %v934_v57, %v942_v58 }
 0x2a0   : > { %7309 = vmatpush1.bf16.msra.mxu0 %v8451_v17  ;;  %v8820_v13 = vcombine.high %v950_v34, %v958_v8  ;;  %v966_v17 = vld [vmem:[%s9967_s7 + $0xfa0] sm:$0xff] }
 0x2a1   : > { %7310 = vmatprep.subr.bf16.mxu0 %v8468_v20  ;;  %v8563_v20 = vcombine.low %v694_v5, %v702_v6  ;;  %v1006_v30 = vld [vmem:[%s9967_s7 + $0x10e0] sm:$0xff] }
 0x2a2   : > { %7350 = vmatpush1.bf16.msra.mxu1 %v8707_v18  ;;  %v974_v18 = vld [vmem:[%s9967_s7 + $0xfe0] sm:$0xff]  ;;  %v8868_v35 = vcombine.high %v998_v29, %v1006_v30 }
 0x2a3   : > { %7351 = vmatprep.subr.bf16.mxu1 %v8724_v21  ;;  %v8819_v21 = vcombine.low %v950_v34, %v958_v8  ;;  %v8836_v23 = vcombine.high %v966_v17, %v974_v18  ;;  %v1014_v37 = vld [vmem:[%s9967_s7 + $0x1120] sm:$0xff] }
 0x2a4   : > { %7311 = vmatpush1.bf16.msra.mxu0 %v8467_v25  ;;  %v1238_v25 = vld [vmem:[%s9967_s7 + $0x1820] sm:$0xff] }
 0x2a5   : > { %7312 = vmatprep.subr.bf16.mxu0 %v8484_v2  ;;  %v8579_v2 = vcombine.low %v710_v14, %v718_v15  ;;  %v1022_v59 = vld [vmem:[%s9967_s7 + $0x1160] sm:$0xff] }
 0x2a6   : > { %7352 = vmatpush1.bf16.msra.mxu1 %v8723_v26  ;;  %v1246_v26 = vld [vmem:[%s9967_s7 + $0x1860] sm:$0xff]  ;;  %v8884_v44 = vcombine.high %v1014_v37, %v1022_v59 }
 0x2a7   : > { %7353 = vmatprep.subr.bf16.mxu1 %v8740_v27  ;;  %v8835_v27 = vcombine.low %v966_v17, %v974_v18  ;;  %v9108_v28 = vcombine.high %v1238_v25, %v1246_v26  ;;  %v1030_v46 = vld [vmem:[%s9967_s7 + $0x11a0] sm:$0xff] }
 0x2a8   : > { %7313 = vmatpush1.bf16.msra.mxu0 %v8483_v31  ;;  %v1254_v31 = vld [vmem:[%s9967_s7 + $0x18a0] sm:$0xff] }
 0x2a9   : > { %7314 = vmatprep.subr.bf16.mxu0 %v8500_v55  ;;  %v8851_v55 = vcombine.low %v982_v24, %v990_v63  ;;  %v1038_v47 = vld [vmem:[%s9967_s7 + $0x11e0] sm:$0xff] }
 0x2aa   : > { %7354 = vmatpush1.bf16.msra.mxu1 %v8739_v53  ;;  %v1262_v53 = vld [vmem:[%s9967_s7 + $0x18e0] sm:$0xff]  ;;  %v8900_v54 = vcombine.high %v1030_v46, %v1038_v47 }
 0x2ab   : > { %7355 = vmatprep.subr.bf16.mxu1 %v8756_v32  ;;  %v9107_v32 = vcombine.low %v1238_v25, %v1246_v26  ;;  %v9124_v36 = vcombine.high %v1254_v31, %v1262_v53  ;;  %v1046_v57 = vld [vmem:[%s9967_s7 + $0x1220] sm:$0xff] }
 0x2ac   : > { %7315 = vmatpush1.bf16.msra.mxu0 %v8499_v40  ;;  %v1270_v40 = vld [vmem:[%s9967_s7 + $0x1920] sm:$0xff] }
 0x2ad   : > { %7316 = vmatprep.subr.bf16.mxu0 %v8516_v42  ;;  %v8867_v42 = vcombine.low %v998_v29, %v1006_v30  ;;  %v1054_v58 = vld [vmem:[%s9967_s7 + $0x1260] sm:$0xff] }
 0x2ae   : > { %7356 = vmatpush1.bf16.msra.mxu1 %v8755_v41  ;;  %v1278_v41 = vld [vmem:[%s9967_s7 + $0x1960] sm:$0xff]  ;;  %v8916_v5 = vcombine.high %v1046_v57, %v1054_v58 }
 0x2af   : > { %7357 = vmatprep.subr.bf16.mxu1 %v8772_v43  ;;  %v9123_v43 = vcombine.low %v1254_v31, %v1262_v53  ;;  %v9140_v45 = vcombine.high %v1270_v40, %v1278_v41  ;;  %v1062_v34 = vld [vmem:[%s9967_s7 + $0x12a0] sm:$0xff] }
 0x2b0   : > { %7317 = vmatpush1.bf16.msra.mxu0 %v8515_v48  ;;  %v1286_v48 = vld [vmem:[%s9967_s7 + $0x19a0] sm:$0xff] }
 0x2b1   : > { %7318 = vmatprep.subr.bf16.mxu0 %v8532_v51  ;;  %v8883_v51 = vcombine.low %v1014_v37, %v1022_v59  ;;  %v1070_v8 = vld [vmem:[%s9967_s7 + $0x12e0] sm:$0xff]  ;;  %v451_v37 = vld [vmem:[#allocation2 + $0x28] sm:$0xff] }
 0x2b2   : > { %7358 = vmatpush1.bf16.msra.mxu1 %v8771_v50  ;;  %v1294_v50 = vld [vmem:[%s9967_s7 + $0x19e0] sm:$0xff]  ;;  %v8932_v14 = vcombine.high %v1062_v34, %v1070_v8 }
 0x2b3   : > { %7359 = vmatprep.subr.bf16.mxu1 %v8788_v52  ;;  %v9139_v52 = vcombine.low %v1270_v40, %v1278_v41  ;;  %v9156_v56 = vcombine.high %v1286_v48, %v1294_v50  ;;  %v1078_v17 = vld [vmem:[%s9967_s7 + $0x1320] sm:$0xff] }
 0x2b4   : > { %7319 = vmatpush1.bf16.msra.mxu0 %v8531_v61  ;;  %v1302_v61 = vld [vmem:[%s9967_s7 + $0x1a20] sm:$0xff] }
 0x2b5   : > { %7320 = vmatprep.subr.bf16.mxu0 %v8548_v3  ;;  %v8899_v3 = vcombine.low %v1030_v46, %v1038_v47  ;;  %v1086_v18 = vld [vmem:[%s9967_s7 + $0x1360] sm:$0xff] }
 0x2b6   : > { %7360 = vmatpush1.bf16.msra.mxu1 %v8787_v1  ;;  %v1310_v1 = vld [vmem:[%s9967_s7 + $0x1a60] sm:$0xff]  ;;  %v8948_v24 = vcombine.high %v1078_v17, %v1086_v18 }
 0x2b7   : > { %7361 = vmatprep.subr.bf16.mxu1 %v8804_v4  ;;  %v9155_v4 = vcombine.low %v1286_v48, %v1294_v50  ;;  %v9172_v6 = vcombine.high %v1302_v61, %v1310_v1  ;;  %v1094_v26 = vld [vmem:[%s9967_s7 + $0x13a0] sm:$0xff] }
 0x2b8   : > { %7321 = vmatpush1.bf16.msra.mxu0 %v8547_v10  ;;  %v1318_v10 = vld [vmem:[%s9967_s7 + $0x1aa0] sm:$0xff] }
 0x2b9   : > { %7322 = vmatprep.subr.bf16.mxu0 %v8564_v12  ;;  %v8915_v12 = vcombine.low %v1046_v57, %v1054_v58  ;;  %v1350_v29 = vld [vmem:[%s9967_s7 + $0x1ba0] sm:$0xff] }
 0x2ba   : > { %7362 = vmatpush1.bf16.msra.mxu1 %v8803_v11  ;;  %v1326_v11 = vld [vmem:[%s9967_s7 + $0x1ae0] sm:$0xff] }
 0x2bb   : > { %7363 = vmatprep.subr.bf16.mxu1 %v8820_v13  ;;  %v9171_v13 = vcombine.low %v1302_v61, %v1310_v1  ;;  %v9188_v15 = vcombine.high %v1318_v10, %v1326_v11  ;;  %v1358_v30 = vld [vmem:[%s9967_s7 + $0x1be0] sm:$0xff] }
 0x2bc   : > { %7323 = vmatpush1.bf16.msra.mxu0 %v8563_v20  ;;  %v1334_v20 = vld [vmem:[%s9967_s7 + $0x1b20] sm:$0xff] }
 0x2bd   : > { %7324 = vmatprep.subr.bf16.mxu0 %v8580_v22  ;;  %v8931_v22 = vcombine.low %v1062_v34, %v1070_v8  ;;  %v450_v31 = vld [vmem:[#allocation2 + $0x20] sm:$0xff] }
 0x2be   : > { %7364 = vmatpush1.bf16.msra.mxu1 %v8819_v21  ;;  %v1342_v21 = vld [vmem:[%s9967_s7 + $0x1b60] sm:$0xff] }
 0x2bf   : > { %7365 = vmatprep.subr.bf16.mxu1 %v8836_v23  ;;  %v9187_v23 = vcombine.low %v1318_v10, %v1326_v11  ;;  %v9204_v25 = vcombine.high %v1334_v20, %v1342_v21  ;;  %v9203_v40 = vcombine.low %v1334_v20, %v1342_v21  ;;  %v1366_v47 = vld [vmem:[%s9967_s7 + $0x1c20] sm:$0xff] }
 0x2c0   : > { %7325 = vmatpush1.bf16.msra.mxu0 %v8579_v2  ;;  %v1102_v2 = vld [vmem:[%s9967_s7 + $0x13e0] sm:$0xff] }
 0x2c1   : > { %7376 = vmatprep.subr.bf16.mxu0 %v8852_v49  ;;  %v8964_v41 = vcombine.high %v1094_v26, %v1102_v2  ;;  %v1374_v48 = vld [vmem:[%s9967_s7 + $0x1c60] sm:$0xff] }
 0x2c2   : > { %7366 = vmatpush1.bf16.msra.mxu1 %v8835_v27  ;;  %v1126_v57 = vld [vmem:[%s9967_s7 + $0x14a0] sm:$0xff] }
 0x2c3   : > { %7417 = vmatprep.subr.bf16.mxu1 %v9108_v28  ;;  %7327 = vmatmul.mubr.bf16.vlgmr.msra.gmra.mrb[32].mxu0 %v10079_v60  ;;  %v1134_v58 = vld [vmem:[%s9967_s7 + $0x14e0] sm:$0xff] }
 0x2c4   : > { %7377 = vmatpush1.bf16.msra.mxu0 %v8851_v55  ;;  %7408 = vmatprep.mubr.bf16.mxu0 %v10097_v7  ;;  %v1382_v61 = vld [vmem:[%s9967_s7 + $0x1ca0] sm:$0xff] }
 0x2c5   : > { %7368 = vmatmul.mubr.bf16.vlgmr.msra.gmra.mrb[32].mxu1 %v10088_v0  ;;  %7378 = vmatprep.subr.bf16.mxu0 %v8868_v35  ;;  %v8947_v35 = vcombine.low %v1078_v17, %v1086_v18  ;;  %v1390_v1 = vld [vmem:[%s9967_s7 + $0x1ce0] sm:$0xff] }
 0x2c6   : > { %7418 = vmatpush1.bf16.msra.mxu1 %v9107_v32  ;;  %7449 = vmatprep.mubr.bf16.mxu1 %v10104_v9  ;;  %v1142_v34 = vld [vmem:[%s9967_s7 + $0x1520] sm:$0xff] }
 0x2c7   : > { %7419 = vmatprep.subr.bf16.mxu1 %v9124_v36  ;;  %v1150_v8 = vld [vmem:[%s9967_s7 + $0x1560] sm:$0xff] }
 0x2c8   : > { %7379 = vmatpush1.bf16.msra.mxu0 %v8867_v42  ;;  %v1398_v10 = vld [vmem:[%s9967_s7 + $0x1d20] sm:$0xff] }
 0x2c9   : > { %7380 = vmatprep.subr.bf16.mxu0 %v8884_v44  ;;  %v1110_v44 = vld [vmem:[%s9967_s7 + $0x1420] sm:$0xff] }
 0x2ca   : > { %7420 = vmatpush1.bf16.msra.mxu1 %v9123_v43  ;;  %v1406_v11 = vld [vmem:[%s9967_s7 + $0x1d60] sm:$0xff] }
 0x2cb   : > { %7421 = vmatprep.subr.bf16.mxu1 %v9140_v45  ;;  %v1118_v45 = vld [vmem:[%s9967_s7 + $0x1460] sm:$0xff] }
 0x2cc   : > { %7381 = vmatpush1.bf16.msra.mxu0 %v8883_v51  ;;  %v8963_v51 = vcombine.low %v1094_v26, %v1102_v2  ;;  %v1158_v17 = vld [vmem:[%s9967_s7 + $0x15a0] sm:$0xff] }
 0x2cd   : > { %7382 = vmatprep.subr.bf16.mxu0 %v8900_v54  ;;  %v8980_v54 = vcombine.high %v1110_v44, %v1118_v45  ;;  %v1166_v18 = vld [vmem:[%s9967_s7 + $0x15e0] sm:$0xff] }
 0x2ce   : > { %7422 = vmatpush1.bf16.msra.mxu1 %v9139_v52  ;;  %v9219_v52 = vcombine.low %v1350_v29, %v1358_v30  ;;  %v1414_v20 = vld [vmem:[%s9967_s7 + $0x1da0] sm:$0xff] }
 0x2cf   : > { %7423 = vmatprep.subr.bf16.mxu1 %v9156_v56  ;;  %v9236_v56 = vcombine.high %v1366_v47, %v1374_v48  ;;  %v1422_v21 = vld [vmem:[%s9967_s7 + $0x1de0] sm:$0xff] }
 0x2d0   : > { %7383 = vmatpush1.bf16.msra.mxu0 %v8899_v3  ;;  %v8979_v3 = vcombine.low %v1110_v44, %v1118_v45  ;;  %v1182_v26 = vld [vmem:[%s9967_s7 + $0x1660] sm:$0xff] }
 0x2d1   : > { %7384 = vmatprep.subr.bf16.mxu0 %v8916_v5  ;;  %v8996_v5 = vcombine.high %v1126_v57, %v1134_v58  ;;  %v1430_v2 = vld [vmem:[%s9967_s7 + $0x1e20] sm:$0xff] }
 0x2d2   : > { %7424 = vmatpush1.bf16.msra.mxu1 %v9155_v4  ;;  %v9235_v4 = vcombine.low %v1366_v47, %v1374_v48  ;;  %v1230_v47 = vld [vmem:[%s9967_s7 + $0x17e0] sm:$0xff] }
 0x2d3   : > { %7425 = vmatprep.subr.bf16.mxu1 %v9172_v6  ;;  %v9252_v6 = vcombine.high %v1382_v61, %v1390_v1  ;;  %v1478_v48 = vld [vmem:[%s9967_s7 + $0x1fa0] sm:$0xff] }
 0x2d4   : > { %7385 = vmatpush1.bf16.msra.mxu0 %v8915_v12  ;;  %v8995_v12 = vcombine.low %v1126_v57, %v1134_v58  ;;  %v471_v57 = vld [vmem:[%s9967_s7 + $0x28] sm:$0xff] }
 0x2d5   : > { %7386 = vmatprep.subr.bf16.mxu0 %v8932_v14  ;;  %v9012_v14 = vcombine.high %v1142_v34, %v1150_v8  ;;  %v479_v58 = vld [vmem:[%s9967_s7 + $0x68] sm:$0xff] }
 0x2d6   : > { %7426 = vmatpush1.bf16.msra.mxu1 %v9171_v13  ;;  %v7082_v63 = vpop.f32.mrb[20].mxu0  ;;  %v9251_v13 = vcombine.low %v1382_v61, %v1390_v1  ;;  %v727_v61 = vld [vmem:[%s9967_s7 + $0x828] sm:$0xff] }
 0x2d7   : > { %7427 = vmatprep.subr.bf16.mxu1 %v9188_v15  ;;  %v7083_v27 = vadd.f32 %v7082_v63, %v10625_v62  ;;  %v7084_v28 = vpop.f32.mrb[21].mxu0  ;;  %v9268_v15 = vcombine.high %v1398_v10, %v1406_v11  ;;  %v9284_v63 = vcombine.high %v1414_v20, %v1422_v21  ;;  %v735_v1 = vld [vmem:[%s9967_s7 + $0x868] sm:$0xff] }
 0x2d8   : > { %v7123_v49 = vpop.f32.mrb[20].mxu1  ;;  %v7085_v53 = vadd.f32 %v7084_v28, %v10627_v33  ;;  %v7086_v32 = vpop.f32.mrb[22].mxu0  ;;  %7387 = vmatpush1.bf16.msra.mxu0 %v8931_v22  ;;  %v9220_v33 = vcombine.high %v1350_v29, %v1358_v30  ;;  %v9011_v22 = vcombine.low %v1142_v34, %v1150_v8  ;;  %v9283_v28 = vcombine.low %v1414_v20, %v1422_v21  ;;  %v487_v34 = vld [vmem:[%s9967_s7 + $0xa8] sm:$0xff] }
 0x2d9   : > { %v7125_v55 = vpop.f32.mrb[21].mxu1  ;;  %v7124_v36 = vadd.f32 %v7123_v49, %v7083_v27  ;;  %v7087_v62 = vpop.f32.mrb[23].mxu0  ;;  %7388 = vmatprep.subr.bf16.mxu0 %v8948_v24  ;;  %v9028_v24 = vcombine.high %v1158_v17, %v1166_v18  ;;  %v1438_v27 = vld [vmem:[%s9967_s7 + $0x1e60] sm:$0xff]  ;;  %v9027_v49 = vcombine.low %v1158_v17, %v1166_v18  ;;  %v495_v8 = vld [vmem:[%s9967_s7 + $0xe8] sm:$0xff] }
 0x2da   : > { %v7127_v59 = vpop.f32.mrb[22].mxu1  ;;  %7428 = vmatpush1.bf16.msra.mxu1 %v9187_v23  ;;  %v7126_v42 = vadd.f32 %v7125_v55, %v7085_v53  ;;  %v9267_v23 = vcombine.low %v1398_v10, %v1406_v11  ;;  %v9300_v30 = vcombine.high %v1430_v2, %v1438_v27  ;;  %v1198_v53 = vld [vmem:[%s9967_s7 + $0x16e0] sm:$0xff]  ;;  %v743_v10 = vld [vmem:[%s9967_s7 + $0x8a8] sm:$0xff] }
 0x2db   : > { %v7128_v43 = vpop.f32.mrb[23].mxu1  ;;  %7429 = vmatprep.subr.bf16.mxu1 %v9204_v25  ;;  %v7954_v46 = vadd.f32 %v7124_v36, %v450_v31  ;;  %v1174_v25 = vld [vmem:[%s9967_s7 + $0x1620] sm:$0xff]  ;;  %v9299_v36 = vcombine.low %v1430_v2, %v1438_v27  ;;  %v751_v11 = vld [vmem:[%s9967_s7 + $0x8e8] sm:$0xff] }
 0x2dc   : > { %v7955_v50 = vadd.f32 %v7126_v42, %v451_v37  ;;  %7389 = vmatpush1.bf16.msra.mxu0 %v8947_v35  ;;  %v9044_v29 = vcombine.high %v1174_v25, %v1182_v26  ;;  %v1190_v31 = vld [vmem:[%s9967_s7 + $0x16a0] sm:$0xff]  ;;  %v9043_v35 = vcombine.low %v1174_v25, %v1182_v26  ;;  %v503_v17 = vld [vmem:[%s9967_s7 + $0x128] sm:$0xff] }
 0x2dd   : > { %7970 = vst [vmem:[#allocation2 + $0x20] sm:$0xff] %v7954_v46  ;;  %7390 = vmatprep.subr.bf16.mxu0 %v8964_v41  ;;  %v1446_v55 = vld [vmem:[%s9967_s7 + $0x1ea0] sm:$0xff]  ;;  %v9060_v37 = vcombine.high %v1190_v31, %v1198_v53  ;;  %v9059_v43 = vcombine.low %v1190_v31, %v1198_v53  ;;  %v511_v18 = vld [vmem:[%s9967_s7 + $0x168] sm:$0xff] }
 0x2de   : > { %7430 = vmatpush1.bf16.msra.mxu1 %v9203_v40  ;;  %7971 = vst [vmem:[#allocation2 + $0x28] sm:$0xff] %v7955_v50  ;;  %v1454_v32 = vld [vmem:[%s9967_s7 + $0x1ee0] sm:$0xff]  ;;  %v759_v20 = vld [vmem:[%s9967_s7 + $0x928] sm:$0xff] }
 0x2df   : > { %7431 = vmatprep.subr.bf16.mxu1 %v9220_v33  ;;  %v9316_v59 = vcombine.high %v1446_v55, %v1454_v32  ;;  %v1206_v62 = vld [vmem:[%s9967_s7 + $0x1720] sm:$0xff]  ;;  %v9315_v33 = vcombine.low %v1446_v55, %v1454_v32  ;;  %v767_v21 = vld [vmem:[%s9967_s7 + $0x968] sm:$0xff] }
 0x2e0   : > { %7391 = vmatpush1.bf16.msra.mxu0 %v8963_v51  ;;  %v1214_v40 = vld [vmem:[%s9967_s7 + $0x1760] sm:$0xff]  ;;  %v519_v25 = vld [vmem:[%s9967_s7 + $0x1a8] sm:$0xff] }
 0x2e1   : > { %7392 = vmatprep.subr.bf16.mxu0 %v8980_v54  ;;  %v1462_v41 = vld [vmem:[%s9967_s7 + $0x1f20] sm:$0xff]  ;;  %v9076_v44 = vcombine.high %v1206_v62, %v1214_v40  ;;  %v9075_v51 = vcombine.low %v1206_v62, %v1214_v40  ;;  %v527_v26 = vld [vmem:[%s9967_s7 + $0x1e8] sm:$0xff] }
 0x2e2   : > { %7432 = vmatpush1.bf16.msra.mxu1 %v9219_v52  ;;  %v1470_v42 = vld [vmem:[%s9967_s7 + $0x1f60] sm:$0xff]  ;;  %v775_v2 = vld [vmem:[%s9967_s7 + $0x9a8] sm:$0xff] }
 0x2e3   : > { %7433 = vmatprep.subr.bf16.mxu1 %v9236_v56  ;;  %v9332_v45 = vcombine.high %v1462_v41, %v1470_v42  ;;  %v1222_v46 = vld [vmem:[%s9967_s7 + $0x17a0] sm:$0xff]  ;;  %v9331_v52 = vcombine.low %v1462_v41, %v1470_v42  ;;  %v783_v27 = vld [vmem:[%s9967_s7 + $0x9e8] sm:$0xff] }
 0x2e4   : > { %7393 = vmatpush1.bf16.msra.mxu0 %v8979_v3  ;;  %v1486_v50 = vld [vmem:[%s9967_s7 + $0x1fe0] sm:$0xff]  ;;  %v9092_v54 = vcombine.high %v1222_v46, %v1230_v47  ;;  %v9091_v3 = vcombine.low %v1222_v46, %v1230_v47  ;;  %v535_v31 = vld [vmem:[%s9967_s7 + $0x228] sm:$0xff] }
 0x2e5   : > { %7394 = vmatprep.subr.bf16.mxu0 %v8996_v5  ;;  %v9348_v56 = vcombine.high %v1478_v48, %v1486_v50  ;;  %v8342_v5 = vcombine.high %v471_v57, %v479_v58  ;;  %v543_v53 = vld [vmem:[%s9967_s7 + $0x268] sm:$0xff] }
 0x2e6   : > { %7434 = vmatpush1.bf16.msra.mxu1 %v9235_v4  ;;  %v9347_v4 = vcombine.low %v1478_v48, %v1486_v50  ;;  %v791_v55 = vld [vmem:[%s9967_s7 + $0xa28] sm:$0xff] }
 0x2e7   : > { %7435 = vmatprep.subr.bf16.mxu1 %v9252_v6  ;;  %v8598_v6 = vcombine.high %v727_v61, %v735_v1  ;;  %v799_v32 = vld [vmem:[%s9967_s7 + $0xa68] sm:$0xff] }
 0x2e8   : > { %7395 = vmatpush1.bf16.msra.mxu0 %v8995_v12  ;;  %v8341_v12 = vcombine.low %v471_v57, %v479_v58  ;;  %v551_v62 = vld [vmem:[%s9967_s7 + $0x2a8] sm:$0xff] }
 0x2e9   : > { %7396 = vmatprep.subr.bf16.mxu0 %v9012_v14  ;;  %v8358_v14 = vcombine.high %v487_v34, %v495_v8  ;;  %v559_v40 = vld [vmem:[%s9967_s7 + $0x2e8] sm:$0xff] }
 0x2ea   : > { %7436 = vmatpush1.bf16.msra.mxu1 %v9251_v13  ;;  %v8597_v13 = vcombine.low %v727_v61, %v735_v1  ;;  %v807_v41 = vld [vmem:[%s9967_s7 + $0xaa8] sm:$0xff] }
 0x2eb   : > { %7437 = vmatprep.subr.bf16.mxu1 %v9268_v15  ;;  %v8614_v15 = vcombine.high %v743_v10, %v751_v11  ;;  %v815_v42 = vld [vmem:[%s9967_s7 + $0xae8] sm:$0xff] }
 0x2ec   : > { %7397 = vmatpush1.bf16.msra.mxu0 %v9011_v22  ;;  %v8357_v22 = vcombine.low %v487_v34, %v495_v8  ;;  %v567_v46 = vld [vmem:[%s9967_s7 + $0x328] sm:$0xff] }
 0x2ed   : > { %7398 = vmatprep.subr.bf16.mxu0 %v9028_v24  ;;  %v8374_v24 = vcombine.high %v503_v17, %v511_v18  ;;  %v575_v47 = vld [vmem:[%s9967_s7 + $0x368] sm:$0xff] }
 0x2ee   : > { %7438 = vmatpush1.bf16.msra.mxu1 %v9267_v23  ;;  %v8613_v23 = vcombine.low %v743_v10, %v751_v11  ;;  %v823_v48 = vld [vmem:[%s9967_s7 + $0xb28] sm:$0xff]  ;;  %v8437_v10 = vcombine.low %v567_v46, %v575_v47 }
 0x2ef   : > { %7439 = vmatprep.subr.bf16.mxu1 %v9284_v63  ;;  %v8630_v63 = vcombine.high %v759_v20, %v767_v21  ;;  %v831_v50 = vld [vmem:[%s9967_s7 + $0xb68] sm:$0xff] }
 0x2f0   : > { %7399 = vmatpush1.bf16.msra.mxu0 %v9027_v49  ;;  %v8373_v49 = vcombine.low %v503_v17, %v511_v18  ;;  %v8694_v57 = vcombine.high %v823_v48, %v831_v50  ;;  %v583_v58 = vld [vmem:[%s9967_s7 + $0x3a8] sm:$0xff] }
 0x2f1   : > { %7400 = vmatprep.subr.bf16.mxu0 %v9044_v29  ;;  %v8390_v29 = vcombine.high %v519_v25, %v527_v26  ;;  %v591_v61 = vld [vmem:[%s9967_s7 + $0x3e8] sm:$0xff] }
 0x2f2   : > { %7440 = vmatpush1.bf16.msra.mxu1 %v9283_v28  ;;  %v8629_v28 = vcombine.low %v759_v20, %v767_v21  ;;  %v599_v20 = vld [vmem:[%s9967_s7 + $0x428] sm:$0xff] }
 0x2f3   : > { %7441 = vmatprep.subr.bf16.mxu1 %v9300_v30  ;;  %v8646_v30 = vcombine.high %v775_v2, %v783_v27  ;;  %v607_v21 = vld [vmem:[%s9967_s7 + $0x468] sm:$0xff] }
 0x2f4   : > { %7401 = vmatpush1.bf16.msra.mxu0 %v9043_v35  ;;  %v8389_v35 = vcombine.low %v519_v25, %v527_v26  ;;  %v8470_v25 = vcombine.high %v599_v20, %v607_v21 }
 0x2f5   : > { %7402 = vmatprep.subr.bf16.mxu0 %v9060_v37  ;;  %v8406_v37 = vcombine.high %v535_v31, %v543_v53 }
 0x2f6   : > { %7442 = vmatpush1.bf16.msra.mxu1 %v9299_v36  ;;  %v8645_v36 = vcombine.low %v775_v2, %v783_v27  ;;  %v615_v2 = vld [vmem:[%s9967_s7 + $0x4a8] sm:$0xff] }
 0x2f7   : > { %7443 = vmatprep.subr.bf16.mxu1 %v9316_v59  ;;  %v8662_v59 = vcombine.high %v791_v55, %v799_v32  ;;  %v623_v27 = vld [vmem:[%s9967_s7 + $0x4e8] sm:$0xff] }
 0x2f8   : > { %7403 = vmatpush1.bf16.msra.mxu0 %v9059_v43  ;;  %v8405_v43 = vcombine.low %v535_v31, %v543_v53  ;;  %v8486_v31 = vcombine.high %v615_v2, %v623_v27 }
 0x2f9   : > { %7404 = vmatprep.subr.bf16.mxu0 %v9076_v44  ;;  %v8422_v44 = vcombine.high %v551_v62, %v559_v40 }
 0x2fa   : > { %7444 = vmatpush1.bf16.msra.mxu1 %v9315_v33  ;;  %v8661_v33 = vcombine.low %v791_v55, %v799_v32  ;;  %v631_v55 = vld [vmem:[%s9967_s7 + $0x528] sm:$0xff] }
 0x2fb   : > { %7445 = vmatprep.subr.bf16.mxu1 %v9332_v45  ;;  %v8678_v45 = vcombine.high %v807_v41, %v815_v42  ;;  %v639_v32 = vld [vmem:[%s9967_s7 + $0x568] sm:$0xff] }
 0x2fc   : > { %7405 = vmatpush1.bf16.msra.mxu0 %v9075_v51  ;;  %v8421_v51 = vcombine.low %v551_v62, %v559_v40  ;;  %v8502_v62 = vcombine.high %v631_v55, %v639_v32 }
 0x2fd   : > { %7406 = vmatprep.subr.bf16.mxu0 %v9092_v54  ;;  %v8438_v54 = vcombine.high %v567_v46, %v575_v47 }
 0x2fe   : > { %7446 = vmatpush1.bf16.msra.mxu1 %v9331_v52  ;;  %v8677_v52 = vcombine.low %v807_v41, %v815_v42  ;;  %v647_v41 = vld [vmem:[%s9967_s7 + $0x5a8] sm:$0xff] }
 0x2ff   : > { %7447 = vmatprep.subr.bf16.mxu1 %v9348_v56  ;;  %v655_v42 = vld [vmem:[%s9967_s7 + $0x5e8] sm:$0xff] }
 0x300   : > { %7407 = vmatpush1.bf16.msra.mxu0 %v9091_v3  ;;  %v8518_v46 = vcombine.high %v647_v41, %v655_v42 }
 0x301   : > { %7458 = vmatprep.subr.bf16.mxu0 %v8342_v5  ;;  %v847_v5 = vld [vmem:[%s9967_s7 + $0xbe8] sm:$0xff] }
 0x302   : > { %7448 = vmatpush1.bf16.msra.mxu1 %v9347_v4  ;;  %v839_v4 = vld [vmem:[%s9967_s7 + $0xba8] sm:$0xff] }
 0x303   : > { %7499 = vmatprep.subr.bf16.mxu1 %v8598_v6  ;;  %7409 = vmatmul.mubr.bf16.vlgmr.msra.gmra.mrb[36].mxu0 %v10169_v16  ;;  %v8710_v18 = vcombine.high %v839_v4, %v847_v5 }
 0x304   : > { %7459 = vmatpush1.bf16.msra.mxu0 %v8341_v12  ;;  %7490 = vmatprep.mubr.bf16.mxu0 %v10029_v38 }
 0x305   : > { %7450 = vmatmul.mubr.bf16.vlgmr.msra.gmra.mrb[36].mxu1 %v10175_v19  ;;  %7460 = vmatprep.subr.bf16.mxu0 %v8358_v14  ;;  %v8693_v14 = vcombine.low %v823_v48, %v831_v50  ;;  %v663_v48 = vld [vmem:[%s9967_s7 + $0x628] sm:$0xff] }
 0x306   : > { %7500 = vmatpush1.bf16.msra.mxu1 %v8597_v13  ;;  %7531 = vmatprep.mubr.bf16.mxu1 %v10033_v39  ;;  %v671_v50 = vld [vmem:[%s9967_s7 + $0x668] sm:$0xff] }
 0x307   : > { %7501 = vmatprep.subr.bf16.mxu1 %v8614_v15  ;;  %v8454_v15 = vcombine.high %v583_v58, %v591_v61 }
 0x308   : > { %7461 = vmatpush1.bf16.msra.mxu0 %v8357_v22  ;;  %v855_v22 = vld [vmem:[%s9967_s7 + $0xc28] sm:$0xff] }
 0x309   : > { %7462 = vmatprep.subr.bf16.mxu0 %v8374_v24  ;;  %v8453_v24 = vcombine.low %v583_v58, %v591_v61  ;;  %v679_v61 = vld [vmem:[%s9967_s7 + $0x6a8] sm:$0xff] }
 0x30a   : > { %7502 = vmatpush1.bf16.msra.mxu1 %v8613_v23  ;;  %v863_v23 = vld [vmem:[%s9967_s7 + $0xc68] sm:$0xff] }
 0x30b   : > { %7503 = vmatprep.subr.bf16.mxu1 %v8630_v63  ;;  %v8709_v63 = vcombine.low %v839_v4, %v847_v5  ;;  %v8726_v26 = vcombine.high %v855_v22, %v863_v23  ;;  %v943_v4 = vld [vmem:[%s9967_s7 + $0xee8] sm:$0xff]  ;;  %v8533_v5 = vcombine.low %v663_v48, %v671_v50 }
 0x30c   : > { %7463 = vmatpush1.bf16.msra.mxu0 %v8373_v49  ;;  %v871_v49 = vld [vmem:[%s9967_s7 + $0xca8] sm:$0xff] }
 0x30d   : > { %7464 = vmatprep.subr.bf16.mxu0 %v8390_v29  ;;  %v8469_v29 = vcombine.low %v599_v20, %v607_v21 }
 0x30e   : > { %7504 = vmatpush1.bf16.msra.mxu1 %v8629_v28  ;;  %v879_v28 = vld [vmem:[%s9967_s7 + $0xce8] sm:$0xff] }
 0x30f   : > { %7505 = vmatprep.subr.bf16.mxu1 %v8646_v30  ;;  %v8725_v30 = vcombine.low %v855_v22, %v863_v23  ;;  %v8742_v53 = vcombine.high %v871_v49, %v879_v28  ;;  %v711_v22 = vld [vmem:[%s9967_s7 + $0x7a8] sm:$0xff] }
 0x310   : > { %7465 = vmatpush1.bf16.msra.mxu0 %v8389_v35  ;;  %v887_v35 = vld [vmem:[%s9967_s7 + $0xd28] sm:$0xff] }
 0x311   : > { %7466 = vmatprep.subr.bf16.mxu0 %v8406_v37  ;;  %v8485_v37 = vcombine.low %v615_v2, %v623_v27  ;;  %v719_v23 = vld [vmem:[%s9967_s7 + $0x7e8] sm:$0xff] }
 0x312   : > { %7506 = vmatpush1.bf16.msra.mxu1 %v8645_v36  ;;  %v895_v36 = vld [vmem:[%s9967_s7 + $0xd68] sm:$0xff]  ;;  %v8582_v2 = vcombine.high %v711_v22, %v719_v23 }
 0x313   : > { %7507 = vmatprep.subr.bf16.mxu1 %v8662_v59  ;;  %v8741_v59 = vcombine.low %v871_v49, %v879_v28  ;;  %v8758_v40 = vcombine.high %v887_v35, %v895_v36  ;;  %v983_v49 = vld [vmem:[%s9967_s7 + $0x1028] sm:$0xff] }
 0x314   : > { %7467 = vmatpush1.bf16.msra.mxu0 %v8405_v43  ;;  %v903_v43 = vld [vmem:[%s9967_s7 + $0xda8] sm:$0xff] }
 0x315   : > { %7468 = vmatprep.subr.bf16.mxu0 %v8422_v44  ;;  %v8501_v44 = vcombine.low %v631_v55, %v639_v32  ;;  %v991_v28 = vld [vmem:[%s9967_s7 + $0x1068] sm:$0xff] }
 0x316   : > { %7508 = vmatpush1.bf16.msra.mxu1 %v8661_v33  ;;  %v7164_v56 = vpop.f32.mrb[24].mxu0  ;;  %v911_v33 = vld [vmem:[%s9967_s7 + $0xde8] sm:$0xff]  ;;  %v8854_v55 = vcombine.high %v983_v49, %v991_v28 }
 0x317   : > { %7509 = vmatprep.subr.bf16.mxu1 %v8678_v45  ;;  %v7166_v3 = vpop.f32.mrb[25].mxu0  ;;  %v8757_v45 = vcombine.low %v887_v35, %v895_v36  ;;  %v8774_v47 = vcombine.high %v903_v43, %v911_v33  ;;  %v999_v35 = vld [vmem:[%s9967_s7 + $0x10a8] sm:$0xff] }
 0x318   : > { %v7205_v1 = vpop.f32.mrb[24].mxu1  ;;  %v7168_v8 = vpop.f32.mrb[26].mxu0  ;;  %7469 = vmatpush1.bf16.msra.mxu0 %v8421_v51  ;;  %v919_v51 = vld [vmem:[%s9967_s7 + $0xe28] sm:$0xff] }
 0x319   : > { %v10767_v6 = vadd.f32 %v7205_v1, %v7164_v56  ;;  %v7207_v34 = vpop.f32.mrb[25].mxu1  ;;  %v7169_v13 = vpop.f32.mrb[27].mxu0  ;;  %7470 = vmatprep.subr.bf16.mxu0 %v8438_v54  ;;  %v8517_v54 = vcombine.low %v647_v41, %v655_v42  ;;  %v8773_v56 = vcombine.low %v903_v43, %v911_v33  ;;  %v687_v1 = vld [vmem:[%s9967_s7 + $0x6e8] sm:$0xff] }
 0x31a   : > { %v10769_v11 = vadd.f32 %v7207_v34, %v7166_v3  ;;  %v7209_v12 = vpop.f32.mrb[26].mxu1  ;;  %7510 = vmatpush1.bf16.msra.mxu1 %v8677_v52  ;;  %v927_v52 = vld [vmem:[%s9967_s7 + $0xe68] sm:$0xff]  ;;  %v8550_v8 = vcombine.high %v679_v61, %v687_v1 }
 0x31b   : > { %v7210_v17 = vpop.f32.mrb[27].mxu1  ;;  %7511 = vmatprep.subr.bf16.mxu1 %v8694_v57  ;;  %v8534_v57 = vcombine.high %v663_v48, %v671_v50  ;;  %v8790_v58 = vcombine.high %v919_v51, %v927_v52  ;;  %v935_v3 = vld [vmem:[%s9967_s7 + $0xea8] sm:$0xff]  ;;  %v8789_v34 = vcombine.low %v919_v51, %v927_v52 }
 0x31c   : > { %7471 = vmatpush1.bf16.msra.mxu0 %v8437_v10  ;;  %v8806_v10 = vcombine.high %v935_v3, %v943_v4  ;;  %v695_v12 = vld [vmem:[%s9967_s7 + $0x728] sm:$0xff]  ;;  %v8549_v17 = vcombine.low %v679_v61, %v687_v1 }
 0x31d   : > { %7472 = vmatprep.subr.bf16.mxu0 %v8454_v15  ;;  %v703_v13 = vld [vmem:[%s9967_s7 + $0x768] sm:$0xff] }
 0x31e   : > { %7512 = vmatpush1.bf16.msra.mxu1 %v8693_v14  ;;  %v951_v14 = vld [vmem:[%s9967_s7 + $0xf28] sm:$0xff]  ;;  %v8566_v20 = vcombine.high %v695_v12, %v703_v13 }
 0x31f   : > { %7513 = vmatprep.subr.bf16.mxu1 %v8710_v18  ;;  %v959_v15 = vld [vmem:[%s9967_s7 + $0xf68] sm:$0xff]  ;;  %v8805_v18 = vcombine.low %v935_v3, %v943_v4 }
 0x320   : > { %7473 = vmatpush1.bf16.msra.mxu0 %v8453_v24  ;;  %v8822_v21 = vcombine.high %v951_v14, %v959_v15  ;;  %v967_v24 = vld [vmem:[%s9967_s7 + $0xfa8] sm:$0xff] }
 0x321   : > { %7474 = vmatprep.subr.bf16.mxu0 %v8470_v25  ;;  %v8565_v25 = vcombine.low %v695_v12, %v703_v13  ;;  %v1007_v36 = vld [vmem:[%s9967_s7 + $0x10e8] sm:$0xff] }
 0x322   : > { %7514 = vmatpush1.bf16.msra.mxu1 %v8709_v63  ;;  %v975_v63 = vld [vmem:[%s9967_s7 + $0xfe8] sm:$0xff]  ;;  %v8870_v41 = vcombine.high %v999_v35, %v1007_v36 }
 0x323   : > { %7515 = vmatprep.subr.bf16.mxu1 %v8726_v26  ;;  %v8821_v26 = vcombine.low %v951_v14, %v959_v15  ;;  %v8838_v27 = vcombine.high %v967_v24, %v975_v63  ;;  %v1015_v43 = vld [vmem:[%s9967_s7 + $0x1128] sm:$0xff] }
 0x324   : > { %7475 = vmatpush1.bf16.msra.mxu0 %v8469_v29  ;;  %v1239_v29 = vld [vmem:[%s9967_s7 + $0x1828] sm:$0xff] }
 0x325   : > { %7476 = vmatprep.subr.bf16.mxu0 %v8486_v31  ;;  %v8581_v31 = vcombine.low %v711_v22, %v719_v23  ;;  %v1023_v33 = vld [vmem:[%s9967_s7 + $0x1168] sm:$0xff] }
 0x326   : > { %7516 = vmatpush1.bf16.msra.mxu1 %v8725_v30  ;;  %v1247_v30 = vld [vmem:[%s9967_s7 + $0x1868] sm:$0xff]  ;;  %v8886_v48 = vcombine.high %v1015_v43, %v1023_v33 }
 0x327   : > { %7517 = vmatprep.subr.bf16.mxu1 %v8742_v53  ;;  %v8837_v53 = vcombine.low %v967_v24, %v975_v63  ;;  %v9110_v32 = vcombine.high %v1239_v29, %v1247_v30  ;;  %v1031_v51 = vld [vmem:[%s9967_s7 + $0x11a8] sm:$0xff] }
 0x328   : > { %7477 = vmatpush1.bf16.msra.mxu0 %v8485_v37  ;;  %v1255_v37 = vld [vmem:[%s9967_s7 + $0x18a8] sm:$0xff] }
 0x329   : > { %7478 = vmatprep.subr.bf16.mxu0 %v8502_v62  ;;  %v8853_v62 = vcombine.low %v983_v49, %v991_v28  ;;  %v1039_v52 = vld [vmem:[%s9967_s7 + $0x11e8] sm:$0xff] }
 0x32a   : > { %7518 = vmatpush1.bf16.msra.mxu1 %v8741_v59  ;;  %v1263_v59 = vld [vmem:[%s9967_s7 + $0x18e8] sm:$0xff]  ;;  %v8902_v61 = vcombine.high %v1031_v51, %v1039_v52 }
 0x32b   : > { %7519 = vmatprep.subr.bf16.mxu1 %v8758_v40  ;;  %v9109_v40 = vcombine.low %v1239_v29, %v1247_v30  ;;  %v9126_v42 = vcombine.high %v1255_v37, %v1263_v59  ;;  %v1047_v3 = vld [vmem:[%s9967_s7 + $0x1228] sm:$0xff] }
 0x32c   : > { %7479 = vmatpush1.bf16.msra.mxu0 %v8501_v44  ;;  %v1271_v44 = vld [vmem:[%s9967_s7 + $0x1928] sm:$0xff] }
 0x32d   : > { %7480 = vmatprep.subr.bf16.mxu0 %v8518_v46  ;;  %v8869_v46 = vcombine.low %v999_v35, %v1007_v36  ;;  %v1055_v4 = vld [vmem:[%s9967_s7 + $0x1268] sm:$0xff] }
 0x32e   : > { %7520 = vmatpush1.bf16.msra.mxu1 %v8757_v45  ;;  %v1279_v45 = vld [vmem:[%s9967_s7 + $0x1968] sm:$0xff]  ;;  %v8918_v12 = vcombine.high %v1047_v3, %v1055_v4 }
 0x32f   : > { %7521 = vmatprep.subr.bf16.mxu1 %v8774_v47  ;;  %v9125_v47 = vcombine.low %v1255_v37, %v1263_v59  ;;  %v9142_v50 = vcombine.high %v1271_v44, %v1279_v45  ;;  %v1063_v14 = vld [vmem:[%s9967_s7 + $0x12a8] sm:$0xff]  ;;  %v452_v37 = vld [vmem:[#allocation2 + $0x30] sm:$0xff] }
 0x330   : > { %7481 = vmatpush1.bf16.msra.mxu0 %v8517_v54  ;;  %v1287_v54 = vld [vmem:[%s9967_s7 + $0x19a8] sm:$0xff] }
 0x331   : > { %7482 = vmatprep.subr.bf16.mxu0 %v8534_v57  ;;  %v8885_v57 = vcombine.low %v1015_v43, %v1023_v33  ;;  %v1071_v15 = vld [vmem:[%s9967_s7 + $0x12e8] sm:$0xff]  ;;  %v453_v43 = vld [vmem:[#allocation2 + $0x38] sm:$0xff] }
 0x332   : > { %7522 = vmatpush1.bf16.msra.mxu1 %v8773_v56  ;;  %v1295_v56 = vld [vmem:[%s9967_s7 + $0x19e8] sm:$0xff]  ;;  %v8934_v22 = vcombine.high %v1063_v14, %v1071_v15 }
 0x333   : > { %7523 = vmatprep.subr.bf16.mxu1 %v8790_v58  ;;  %v9141_v58 = vcombine.low %v1271_v44, %v1279_v45  ;;  %v9158_v1 = vcombine.high %v1287_v54, %v1295_v56  ;;  %v1079_v24 = vld [vmem:[%s9967_s7 + $0x1328] sm:$0xff] }
 0x334   : > { %7483 = vmatpush1.bf16.msra.mxu0 %v8533_v5  ;;  %v1303_v5 = vld [vmem:[%s9967_s7 + $0x1a28] sm:$0xff] }
 0x335   : > { %7484 = vmatprep.subr.bf16.mxu0 %v8550_v8  ;;  %v8901_v8 = vcombine.low %v1031_v51, %v1039_v52  ;;  %v1087_v63 = vld [vmem:[%s9967_s7 + $0x1368] sm:$0xff] }
 0x336   : > { %7524 = vmatpush1.bf16.msra.mxu1 %v8789_v34  ;;  %v1311_v34 = vld [vmem:[%s9967_s7 + $0x1a68] sm:$0xff]  ;;  %v8950_v49 = vcombine.high %v1079_v24, %v1087_v63 }
 0x337   : > { %7525 = vmatprep.subr.bf16.mxu1 %v8806_v10  ;;  %v9157_v10 = vcombine.low %v1287_v54, %v1295_v56  ;;  %v9174_v13 = vcombine.high %v1303_v5, %v1311_v34  ;;  %v1095_v30 = vld [vmem:[%s9967_s7 + $0x13a8] sm:$0xff] }
 0x338   : > { %7485 = vmatpush1.bf16.msra.mxu0 %v8549_v17  ;;  %v1319_v17 = vld [vmem:[%s9967_s7 + $0x1aa8] sm:$0xff] }
 0x339   : > { %7486 = vmatprep.subr.bf16.mxu0 %v8566_v20  ;;  %v8917_v20 = vcombine.low %v1047_v3, %v1055_v4  ;;  %v1351_v35 = vld [vmem:[%s9967_s7 + $0x1ba8] sm:$0xff] }
 0x33a   : > { %7526 = vmatpush1.bf16.msra.mxu1 %v8805_v18  ;;  %v1327_v18 = vld [vmem:[%s9967_s7 + $0x1ae8] sm:$0xff] }
 0x33b   : > { %7527 = vmatprep.subr.bf16.mxu1 %v8822_v21  ;;  %v9173_v21 = vcombine.low %v1303_v5, %v1311_v34  ;;  %v9190_v23 = vcombine.high %v1319_v17, %v1327_v18  ;;  %v1359_v36 = vld [vmem:[%s9967_s7 + $0x1be8] sm:$0xff] }
 0x33c   : > { %7487 = vmatpush1.bf16.msra.mxu0 %v8565_v25  ;;  %v1335_v25 = vld [vmem:[%s9967_s7 + $0x1b28] sm:$0xff] }
 0x33d   : > { %7488 = vmatprep.subr.bf16.mxu0 %v8582_v2  ;;  %v8933_v2 = vcombine.low %v1063_v14, %v1071_v15  ;;  %v1367_v52 = vld [vmem:[%s9967_s7 + $0x1c28] sm:$0xff] }
 0x33e   : > { %7528 = vmatpush1.bf16.msra.mxu1 %v8821_v26  ;;  %v1343_v26 = vld [vmem:[%s9967_s7 + $0x1b68] sm:$0xff] }
 0x33f   : > { %7529 = vmatprep.subr.bf16.mxu1 %v8838_v27  ;;  %v9189_v27 = vcombine.low %v1319_v17, %v1327_v18  ;;  %v9206_v29 = vcombine.high %v1335_v25, %v1343_v26  ;;  %v9205_v44 = vcombine.low %v1335_v25, %v1343_v26  ;;  %v1375_v54 = vld [vmem:[%s9967_s7 + $0x1c68] sm:$0xff] }
 0x340   : > { %7489 = vmatpush1.bf16.msra.mxu0 %v8581_v31  ;;  %v1103_v31 = vld [vmem:[%s9967_s7 + $0x13e8] sm:$0xff] }
 0x341   : > { %7540 = vmatprep.subr.bf16.mxu0 %v8854_v55  ;;  %v8966_v45 = vcombine.high %v1095_v30, %v1103_v31  ;;  %v1127_v3 = vld [vmem:[%s9967_s7 + $0x14a8] sm:$0xff] }
 0x342   : > { %7530 = vmatpush1.bf16.msra.mxu1 %v8837_v53  ;;  %v1135_v4 = vld [vmem:[%s9967_s7 + $0x14e8] sm:$0xff] }
 0x343   : > { %7581 = vmatprep.subr.bf16.mxu1 %v9110_v32  ;;  %7491 = vmatmul.mubr.bf16.vlgmr.msra.gmra.mrb[40].mxu0 %v10079_v60  ;;  %v1383_v5 = vld [vmem:[%s9967_s7 + $0x1ca8] sm:$0xff] }
 0x344   : > { %7541 = vmatpush1.bf16.msra.mxu0 %v8853_v62  ;;  %7572 = vmatprep.mubr.bf16.mxu0 %v10097_v7  ;;  %v1391_v34 = vld [vmem:[%s9967_s7 + $0x1ce8] sm:$0xff] }
 0x345   : > { %7532 = vmatmul.mubr.bf16.vlgmr.msra.gmra.mrb[40].mxu1 %v10088_v0  ;;  %7542 = vmatprep.subr.bf16.mxu0 %v8870_v41  ;;  %v8949_v41 = vcombine.low %v1079_v24, %v1087_v63  ;;  %v1143_v14 = vld [vmem:[%s9967_s7 + $0x1528] sm:$0xff] }
 0x346   : > { %7582 = vmatpush1.bf16.msra.mxu1 %v9109_v40  ;;  %7613 = vmatprep.mubr.bf16.mxu1 %v10104_v9  ;;  %v1151_v15 = vld [vmem:[%s9967_s7 + $0x1568] sm:$0xff] }
 0x347   : > { %7583 = vmatprep.subr.bf16.mxu1 %v9126_v42  ;;  %v1399_v17 = vld [vmem:[%s9967_s7 + $0x1d28] sm:$0xff] }
 0x348   : > { %7543 = vmatpush1.bf16.msra.mxu0 %v8869_v46  ;;  %v1407_v18 = vld [vmem:[%s9967_s7 + $0x1d68] sm:$0xff] }
 0x349   : > { %7544 = vmatprep.subr.bf16.mxu0 %v8886_v48  ;;  %v1111_v48 = vld [vmem:[%s9967_s7 + $0x1428] sm:$0xff] }
 0x34a   : > { %7584 = vmatpush1.bf16.msra.mxu1 %v9125_v47  ;;  %v1159_v24 = vld [vmem:[%s9967_s7 + $0x15a8] sm:$0xff] }
 0x34b   : > { %7585 = vmatprep.subr.bf16.mxu1 %v9142_v50  ;;  %v1119_v50 = vld [vmem:[%s9967_s7 + $0x1468] sm:$0xff] }
 0x34c   : > { %7545 = vmatpush1.bf16.msra.mxu0 %v8885_v57  ;;  %v8965_v57 = vcombine.low %v1095_v30, %v1103_v31  ;;  %v1167_v63 = vld [vmem:[%s9967_s7 + $0x15e8] sm:$0xff] }
 0x34d   : > { %7546 = vmatprep.subr.bf16.mxu0 %v8902_v61  ;;  %v8982_v61 = vcombine.high %v1111_v48, %v1119_v50  ;;  %v1415_v25 = vld [vmem:[%s9967_s7 + $0x1da8] sm:$0xff] }
 0x34e   : > { %7586 = vmatpush1.bf16.msra.mxu1 %v9141_v58  ;;  %v9221_v58 = vcombine.low %v1351_v35, %v1359_v36  ;;  %v1423_v26 = vld [vmem:[%s9967_s7 + $0x1de8] sm:$0xff] }
 0x34f   : > { %7587 = vmatprep.subr.bf16.mxu1 %v9158_v1  ;;  %v9238_v1 = vcombine.high %v1367_v52, %v1375_v54  ;;  %v1183_v30 = vld [vmem:[%s9967_s7 + $0x1668] sm:$0xff] }
 0x350   : > { %7547 = vmatpush1.bf16.msra.mxu0 %v8901_v8  ;;  %v8981_v8 = vcombine.low %v1111_v48, %v1119_v50  ;;  %v1431_v31 = vld [vmem:[%s9967_s7 + $0x1e28] sm:$0xff] }
 0x351   : > { %7548 = vmatprep.subr.bf16.mxu0 %v8918_v12  ;;  %v8998_v12 = vcombine.high %v1127_v3, %v1135_v4 }
 0x352   : > { %7588 = vmatpush1.bf16.msra.mxu1 %v9157_v10  ;;  %v9237_v10 = vcombine.low %v1367_v52, %v1375_v54  ;;  %v1231_v52 = vld [vmem:[%s9967_s7 + $0x17e8] sm:$0xff] }
 0x353   : > { %7589 = vmatprep.subr.bf16.mxu1 %v9174_v13  ;;  %v9254_v13 = vcombine.high %v1383_v5, %v1391_v34  ;;  %v1479_v54 = vld [vmem:[%s9967_s7 + $0x1fa8] sm:$0xff] }
 0x354   : > { %7549 = vmatpush1.bf16.msra.mxu0 %v8917_v20  ;;  %v8997_v20 = vcombine.low %v1127_v3, %v1135_v4  ;;  %v472_v3 = vld [vmem:[%s9967_s7 + $0x30] sm:$0xff] }
 0x355   : > { %7550 = vmatprep.subr.bf16.mxu0 %v8934_v22  ;;  %v9014_v22 = vcombine.high %v1143_v14, %v1151_v15  ;;  %v480_v4 = vld [vmem:[%s9967_s7 + $0x70] sm:$0xff] }
 0x356   : > { %7590 = vmatpush1.bf16.msra.mxu1 %v9173_v21  ;;  %v7246_v28 = vpop.f32.mrb[28].mxu0  ;;  %v9253_v21 = vcombine.low %v1383_v5, %v1391_v34  ;;  %v728_v5 = vld [vmem:[%s9967_s7 + $0x830] sm:$0xff] }
 0x357   : > { %7591 = vmatprep.subr.bf16.mxu1 %v9190_v23  ;;  %v7247_v53 = vadd.f32 %v7246_v28, %v10767_v6  ;;  %v7248_v32 = vpop.f32.mrb[29].mxu0  ;;  %v9270_v23 = vcombine.high %v1399_v17, %v1407_v18  ;;  %v9286_v28 = vcombine.high %v1415_v25, %v1423_v26  ;;  %v736_v34 = vld [vmem:[%s9967_s7 + $0x870] sm:$0xff] }
 0x358   : > { %v7287_v55 = vpop.f32.mrb[28].mxu1  ;;  %v7249_v59 = vadd.f32 %v7248_v32, %v10769_v11  ;;  %v7250_v40 = vpop.f32.mrb[30].mxu0  ;;  %7551 = vmatpush1.bf16.msra.mxu0 %v8933_v2  ;;  %v9222_v11 = vcombine.high %v1351_v35, %v1359_v36  ;;  %v9013_v2 = vcombine.low %v1143_v14, %v1151_v15  ;;  %v9285_v32 = vcombine.low %v1415_v25, %v1423_v26  ;;  %v488_v14 = vld [vmem:[%s9967_s7 + $0xb0] sm:$0xff] }
 0x359   : > { %v7289_v62 = vpop.f32.mrb[29].mxu1  ;;  %v7288_v42 = vadd.f32 %v7287_v55, %v7247_v53  ;;  %v7251_v6 = vpop.f32.mrb[31].mxu0  ;;  %7552 = vmatprep.subr.bf16.mxu0 %v8950_v49  ;;  %v9030_v49 = vcombine.high %v1159_v24, %v1167_v63  ;;  %v1439_v53 = vld [vmem:[%s9967_s7 + $0x1e68] sm:$0xff]  ;;  %v9029_v55 = vcombine.low %v1159_v24, %v1167_v63  ;;  %v496_v15 = vld [vmem:[%s9967_s7 + $0xf0] sm:$0xff] }
 0x35a   : > { %v7291_v33 = vpop.f32.mrb[30].mxu1  ;;  %7592 = vmatpush1.bf16.msra.mxu1 %v9189_v27  ;;  %v7290_v46 = vadd.f32 %v7289_v62, %v7249_v59  ;;  %v9269_v27 = vcombine.low %v1399_v17, %v1407_v18  ;;  %v9302_v36 = vcombine.high %v1431_v31, %v1439_v53  ;;  %v1199_v59 = vld [vmem:[%s9967_s7 + $0x16e8] sm:$0xff]  ;;  %v744_v17 = vld [vmem:[%s9967_s7 + $0x8b0] sm:$0xff] }
 0x35b   : > { %v7292_v47 = vpop.f32.mrb[31].mxu1  ;;  %7593 = vmatprep.subr.bf16.mxu1 %v9206_v29  ;;  %v7956_v51 = vadd.f32 %v7288_v42, %v452_v37  ;;  %v1175_v29 = vld [vmem:[%s9967_s7 + $0x1628] sm:$0xff]  ;;  %v9301_v42 = vcombine.low %v1431_v31, %v1439_v53  ;;  %v752_v18 = vld [vmem:[%s9967_s7 + $0x8f0] sm:$0xff] }
 0x35c   : > { %v7957_v56 = vadd.f32 %v7290_v46, %v453_v43  ;;  %7553 = vmatpush1.bf16.msra.mxu0 %v8949_v41  ;;  %v9046_v35 = vcombine.high %v1175_v29, %v1183_v30  ;;  %v1191_v37 = vld [vmem:[%s9967_s7 + $0x16a8] sm:$0xff]  ;;  %v9045_v41 = vcombine.low %v1175_v29, %v1183_v30  ;;  %v504_v24 = vld [vmem:[%s9967_s7 + $0x130] sm:$0xff] }
 0x35d   : > { %7972 = vst [vmem:[#allocation2 + $0x30] sm:$0xff] %v7956_v51  ;;  %7554 = vmatprep.subr.bf16.mxu0 %v8966_v45  ;;  %v1447_v62 = vld [vmem:[%s9967_s7 + $0x1ea8] sm:$0xff]  ;;  %v9062_v43 = vcombine.high %v1191_v37, %v1199_v59  ;;  %v9061_v47 = vcombine.low %v1191_v37, %v1199_v59  ;;  %v512_v63 = vld [vmem:[%s9967_s7 + $0x170] sm:$0xff] }
 0x35e   : > { %7594 = vmatpush1.bf16.msra.mxu1 %v9205_v44  ;;  %7973 = vst [vmem:[#allocation2 + $0x38] sm:$0xff] %v7957_v56  ;;  %v1455_v40 = vld [vmem:[%s9967_s7 + $0x1ee8] sm:$0xff]  ;;  %v760_v25 = vld [vmem:[%s9967_s7 + $0x930] sm:$0xff] }
 0x35f   : > { %7595 = vmatprep.subr.bf16.mxu1 %v9222_v11  ;;  %v9318_v33 = vcombine.high %v1447_v62, %v1455_v40  ;;  %v1207_v6 = vld [vmem:[%s9967_s7 + $0x1728] sm:$0xff]  ;;  %v9317_v11 = vcombine.low %v1447_v62, %v1455_v40  ;;  %v768_v26 = vld [vmem:[%s9967_s7 + $0x970] sm:$0xff] }
 0x360   : > { %7555 = vmatpush1.bf16.msra.mxu0 %v8965_v57  ;;  %v1215_v44 = vld [vmem:[%s9967_s7 + $0x1768] sm:$0xff]  ;;  %v520_v29 = vld [vmem:[%s9967_s7 + $0x1b0] sm:$0xff] }
 0x361   : > { %7556 = vmatprep.subr.bf16.mxu0 %v8982_v61  ;;  %v1463_v45 = vld [vmem:[%s9967_s7 + $0x1f28] sm:$0xff]  ;;  %v9078_v48 = vcombine.high %v1207_v6, %v1215_v44  ;;  %v9077_v57 = vcombine.low %v1207_v6, %v1215_v44  ;;  %v528_v30 = vld [vmem:[%s9967_s7 + $0x1f0] sm:$0xff] }
 0x362   : > { %7596 = vmatpush1.bf16.msra.mxu1 %v9221_v58  ;;  %v1471_v46 = vld [vmem:[%s9967_s7 + $0x1f68] sm:$0xff]  ;;  %v776_v31 = vld [vmem:[%s9967_s7 + $0x9b0] sm:$0xff] }
 0x363   : > { %7597 = vmatprep.subr.bf16.mxu1 %v9238_v1  ;;  %v9334_v50 = vcombine.high %v1463_v45, %v1471_v46  ;;  %v1223_v51 = vld [vmem:[%s9967_s7 + $0x17a8] sm:$0xff]  ;;  %v9333_v58 = vcombine.low %v1463_v45, %v1471_v46  ;;  %v784_v53 = vld [vmem:[%s9967_s7 + $0x9f0] sm:$0xff] }
 0x364   : > { %7557 = vmatpush1.bf16.msra.mxu0 %v8981_v8  ;;  %v1487_v56 = vld [vmem:[%s9967_s7 + $0x1fe8] sm:$0xff]  ;;  %v9094_v61 = vcombine.high %v1223_v51, %v1231_v52  ;;  %v9093_v8 = vcombine.low %v1223_v51, %v1231_v52  ;;  %v536_v37 = vld [vmem:[%s9967_s7 + $0x230] sm:$0xff] }
 0x365   : > { %7558 = vmatprep.subr.bf16.mxu0 %v8998_v12  ;;  %v9350_v1 = vcombine.high %v1479_v54, %v1487_v56  ;;  %v8344_v12 = vcombine.high %v472_v3, %v480_v4  ;;  %v544_v59 = vld [vmem:[%s9967_s7 + $0x270] sm:$0xff] }
 0x366   : > { %7598 = vmatpush1.bf16.msra.mxu1 %v9237_v10  ;;  %v9349_v10 = vcombine.low %v1479_v54, %v1487_v56  ;;  %v792_v62 = vld [vmem:[%s9967_s7 + $0xa30] sm:$0xff] }
 0x367   : > { %7599 = vmatprep.subr.bf16.mxu1 %v9254_v13  ;;  %v8600_v13 = vcombine.high %v728_v5, %v736_v34  ;;  %v800_v40 = vld [vmem:[%s9967_s7 + $0xa70] sm:$0xff] }
 0x368   : > { %7559 = vmatpush1.bf16.msra.mxu0 %v8997_v20  ;;  %v8343_v20 = vcombine.low %v472_v3, %v480_v4  ;;  %v552_v6 = vld [vmem:[%s9967_s7 + $0x2b0] sm:$0xff] }
 0x369   : > { %7560 = vmatprep.subr.bf16.mxu0 %v9014_v22  ;;  %v8360_v22 = vcombine.high %v488_v14, %v496_v15  ;;  %v560_v44 = vld [vmem:[%s9967_s7 + $0x2f0] sm:$0xff] }
 0x36a   : > { %7600 = vmatpush1.bf16.msra.mxu1 %v9253_v21  ;;  %v8599_v21 = vcombine.low %v728_v5, %v736_v34  ;;  %v808_v45 = vld [vmem:[%s9967_s7 + $0xab0] sm:$0xff] }
 0x36b   : > { %7601 = vmatprep.subr.bf16.mxu1 %v9270_v23  ;;  %v8616_v23 = vcombine.high %v744_v17, %v752_v18  ;;  %v816_v46 = vld [vmem:[%s9967_s7 + $0xaf0] sm:$0xff] }
 0x36c   : > { %7561 = vmatpush1.bf16.msra.mxu0 %v9013_v2  ;;  %v8359_v2 = vcombine.low %v488_v14, %v496_v15  ;;  %v568_v51 = vld [vmem:[%s9967_s7 + $0x330] sm:$0xff] }
 0x36d   : > { %7562 = vmatprep.subr.bf16.mxu0 %v9030_v49  ;;  %v8376_v49 = vcombine.high %v504_v24, %v512_v63  ;;  %v576_v52 = vld [vmem:[%s9967_s7 + $0x370] sm:$0xff] }
 0x36e   : > { %7602 = vmatpush1.bf16.msra.mxu1 %v9269_v27  ;;  %v8615_v27 = vcombine.low %v744_v17, %v752_v18  ;;  %v824_v54 = vld [vmem:[%s9967_s7 + $0xb30] sm:$0xff]  ;;  %v8439_v17 = vcombine.low %v568_v51, %v576_v52 }
 0x36f   : > { %7603 = vmatprep.subr.bf16.mxu1 %v9286_v28  ;;  %v8632_v28 = vcombine.high %v760_v25, %v768_v26  ;;  %v832_v56 = vld [vmem:[%s9967_s7 + $0xb70] sm:$0xff] }
 0x370   : > { %7563 = vmatpush1.bf16.msra.mxu0 %v9029_v55  ;;  %v8375_v55 = vcombine.low %v504_v24, %v512_v63  ;;  %v8696_v3 = vcombine.high %v824_v54, %v832_v56  ;;  %v584_v4 = vld [vmem:[%s9967_s7 + $0x3b0] sm:$0xff] }
 0x371   : > { %7564 = vmatprep.subr.bf16.mxu0 %v9046_v35  ;;  %v8392_v35 = vcombine.high %v520_v29, %v528_v30  ;;  %v592_v5 = vld [vmem:[%s9967_s7 + $0x3f0] sm:$0xff] }
 0x372   : > { %7604 = vmatpush1.bf16.msra.mxu1 %v9285_v32  ;;  %v8631_v32 = vcombine.low %v760_v25, %v768_v26  ;;  %v600_v25 = vld [vmem:[%s9967_s7 + $0x430] sm:$0xff] }
 0x373   : > { %7605 = vmatprep.subr.bf16.mxu1 %v9302_v36  ;;  %v8648_v36 = vcombine.high %v776_v31, %v784_v53  ;;  %v608_v26 = vld [vmem:[%s9967_s7 + $0x470] sm:$0xff] }
 0x374   : > { %7565 = vmatpush1.bf16.msra.mxu0 %v9045_v41  ;;  %v8391_v41 = vcombine.low %v520_v29, %v528_v30  ;;  %v8472_v29 = vcombine.high %v600_v25, %v608_v26 }
 0x375   : > { %7566 = vmatprep.subr.bf16.mxu0 %v9062_v43  ;;  %v8408_v43 = vcombine.high %v536_v37, %v544_v59 }
 0x376   : > { %7606 = vmatpush1.bf16.msra.mxu1 %v9301_v42  ;;  %v8647_v42 = vcombine.low %v776_v31, %v784_v53  ;;  %v616_v31 = vld [vmem:[%s9967_s7 + $0x4b0] sm:$0xff] }
 0x377   : > { %7607 = vmatprep.subr.bf16.mxu1 %v9318_v33  ;;  %v8664_v33 = vcombine.high %v792_v62, %v800_v40  ;;  %v624_v53 = vld [vmem:[%s9967_s7 + $0x4f0] sm:$0xff] }
 0x378   : > { %7567 = vmatpush1.bf16.msra.mxu0 %v9061_v47  ;;  %v8407_v47 = vcombine.low %v536_v37, %v544_v59  ;;  %v8488_v37 = vcombine.high %v616_v31, %v624_v53 }
 0x379   : > { %7568 = vmatprep.subr.bf16.mxu0 %v9078_v48  ;;  %v8424_v48 = vcombine.high %v552_v6, %v560_v44 }
 0x37a   : > { %7608 = vmatpush1.bf16.msra.mxu1 %v9317_v11  ;;  %v8663_v11 = vcombine.low %v792_v62, %v800_v40  ;;  %v632_v62 = vld [vmem:[%s9967_s7 + $0x530] sm:$0xff] }
 0x37b   : > { %7609 = vmatprep.subr.bf16.mxu1 %v9334_v50  ;;  %v8680_v50 = vcombine.high %v808_v45, %v816_v46  ;;  %v640_v40 = vld [vmem:[%s9967_s7 + $0x570] sm:$0xff] }
 0x37c   : > { %7569 = vmatpush1.bf16.msra.mxu0 %v9077_v57  ;;  %v8423_v57 = vcombine.low %v552_v6, %v560_v44  ;;  %v8504_v6 = vcombine.high %v632_v62, %v640_v40 }
 0x37d   : > { %7570 = vmatprep.subr.bf16.mxu0 %v9094_v61  ;;  %v8440_v61 = vcombine.high %v568_v51, %v576_v52 }
 0x37e   : > { %7610 = vmatpush1.bf16.msra.mxu1 %v9333_v58  ;;  %v8679_v58 = vcombine.low %v808_v45, %v816_v46  ;;  %v648_v45 = vld [vmem:[%s9967_s7 + $0x5b0] sm:$0xff] }
 0x37f   : > { %7611 = vmatprep.subr.bf16.mxu1 %v9350_v1  ;;  %v656_v46 = vld [vmem:[%s9967_s7 + $0x5f0] sm:$0xff] }
 0x380   : > { %7571 = vmatpush1.bf16.msra.mxu0 %v9093_v8  ;;  %v8520_v51 = vcombine.high %v648_v45, %v656_v46 }
 0x381   : > { %7622 = vmatprep.subr.bf16.mxu0 %v8344_v12  ;;  %v848_v12 = vld [vmem:[%s9967_s7 + $0xbf0] sm:$0xff] }
 0x382   : > { %7612 = vmatpush1.bf16.msra.mxu1 %v9349_v10  ;;  %v840_v10 = vld [vmem:[%s9967_s7 + $0xbb0] sm:$0xff] }
 0x383   : > { %7663 = vmatprep.subr.bf16.mxu1 %v8600_v13  ;;  %7573 = vmatmul.mubr.bf16.vlgmr.msra.gmra.mrb[44].mxu0 %v10169_v16  ;;  %v8712_v63 = vcombine.high %v840_v10, %v848_v12 }
 0x384   : > { %7623 = vmatpush1.bf16.msra.mxu0 %v8343_v20  ;;  %7654 = vmatprep.mubr.bf16.mxu0 %v10029_v38 }
 0x385   : > { %7614 = vmatmul.mubr.bf16.vlgmr.msra.gmra.mrb[44].mxu1 %v10175_v19  ;;  %7624 = vmatprep.subr.bf16.mxu0 %v8360_v22  ;;  %v8695_v22 = vcombine.low %v824_v54, %v832_v56  ;;  %v664_v54 = vld [vmem:[%s9967_s7 + $0x630] sm:$0xff] }
 0x386   : > { %7664 = vmatpush1.bf16.msra.mxu1 %v8599_v21  ;;  %7695 = vmatprep.mubr.bf16.mxu1 %v10033_v39  ;;  %v672_v56 = vld [vmem:[%s9967_s7 + $0x670] sm:$0xff] }
 0x387   : > { %7665 = vmatprep.subr.bf16.mxu1 %v8616_v23  ;;  %v8456_v23 = vcombine.high %v584_v4, %v592_v5 }
 0x388   : > { %7625 = vmatpush1.bf16.msra.mxu0 %v8359_v2  ;;  %v856_v2 = vld [vmem:[%s9967_s7 + $0xc30] sm:$0xff] }
 0x389   : > { %7626 = vmatprep.subr.bf16.mxu0 %v8376_v49  ;;  %v8455_v49 = vcombine.low %v584_v4, %v592_v5  ;;  %v680_v5 = vld [vmem:[%s9967_s7 + $0x6b0] sm:$0xff] }
 0x38a   : > { %7666 = vmatpush1.bf16.msra.mxu1 %v8615_v27  ;;  %v864_v27 = vld [vmem:[%s9967_s7 + $0xc70] sm:$0xff] }
 0x38b   : > { %7667 = vmatprep.subr.bf16.mxu1 %v8632_v28  ;;  %v8711_v28 = vcombine.low %v840_v10, %v848_v12  ;;  %v8728_v30 = vcombine.high %v856_v2, %v864_v27  ;;  %v944_v10 = vld [vmem:[%s9967_s7 + $0xef0] sm:$0xff]  ;;  %v8535_v12 = vcombine.low %v664_v54, %v672_v56 }
 0x38c   : > { %7627 = vmatpush1.bf16.msra.mxu0 %v8375_v55  ;;  %v872_v55 = vld [vmem:[%s9967_s7 + $0xcb0] sm:$0xff] }
 0x38d   : > { %7628 = vmatprep.subr.bf16.mxu0 %v8392_v35  ;;  %v8471_v35 = vcombine.low %v600_v25, %v608_v26 }
 0x38e   : > { %7668 = vmatpush1.bf16.msra.mxu1 %v8631_v32  ;;  %v880_v32 = vld [vmem:[%s9967_s7 + $0xcf0] sm:$0xff] }
 0x38f   : > { %7669 = vmatprep.subr.bf16.mxu1 %v8648_v36  ;;  %v8727_v36 = vcombine.low %v856_v2, %v864_v27  ;;  %v8744_v59 = vcombine.high %v872_v55, %v880_v32  ;;  %v712_v2 = vld [vmem:[%s9967_s7 + $0x7b0] sm:$0xff] }
 0x390   : > { %7629 = vmatpush1.bf16.msra.mxu0 %v8391_v41  ;;  %v888_v41 = vld [vmem:[%s9967_s7 + $0xd30] sm:$0xff] }
 0x391   : > { %7630 = vmatprep.subr.bf16.mxu0 %v8408_v43  ;;  %v8487_v43 = vcombine.low %v616_v31, %v624_v53  ;;  %v720_v27 = vld [vmem:[%s9967_s7 + $0x7f0] sm:$0xff] }
 0x392   : > { %7670 = vmatpush1.bf16.msra.mxu1 %v8647_v42  ;;  %v896_v42 = vld [vmem:[%s9967_s7 + $0xd70] sm:$0xff]  ;;  %v8584_v31 = vcombine.high %v712_v2, %v720_v27 }
 0x393   : > { %7671 = vmatprep.subr.bf16.mxu1 %v8664_v33  ;;  %v8743_v33 = vcombine.low %v872_v55, %v880_v32  ;;  %v8760_v44 = vcombine.high %v888_v41, %v896_v42  ;;  %v984_v55 = vld [vmem:[%s9967_s7 + $0x1030] sm:$0xff] }
 0x394   : > { %7631 = vmatpush1.bf16.msra.mxu0 %v8407_v47  ;;  %v904_v47 = vld [vmem:[%s9967_s7 + $0xdb0] sm:$0xff] }
 0x395   : > { %7632 = vmatprep.subr.bf16.mxu0 %v8424_v48  ;;  %v8503_v48 = vcombine.low %v632_v62, %v640_v40  ;;  %v992_v32 = vld [vmem:[%s9967_s7 + $0x1070] sm:$0xff] }
 0x396   : > { %7672 = vmatpush1.bf16.msra.mxu1 %v8663_v11  ;;  %v7328_v1 = vpop.f32.mrb[32].mxu0  ;;  %v912_v11 = vld [vmem:[%s9967_s7 + $0xdf0] sm:$0xff]  ;;  %v8856_v62 = vcombine.high %v984_v55, %v992_v32 }
 0x397   : > { %7673 = vmatprep.subr.bf16.mxu1 %v8680_v50  ;;  %v7330_v8 = vpop.f32.mrb[33].mxu0  ;;  %v8759_v50 = vcombine.low %v888_v41, %v896_v42  ;;  %v8776_v52 = vcombine.high %v904_v47, %v912_v11  ;;  %v1000_v41 = vld [vmem:[%s9967_s7 + $0x10b0] sm:$0xff] }
 0x398   : > { %v7369_v34 = vpop.f32.mrb[32].mxu1  ;;  %v7332_v15 = vpop.f32.mrb[34].mxu0  ;;  %7633 = vmatpush1.bf16.msra.mxu0 %v8423_v57  ;;  %v920_v57 = vld [vmem:[%s9967_s7 + $0xe30] sm:$0xff] }
 0x399   : > { %v10909_v13 = vadd.f32 %v7369_v34, %v7328_v1  ;;  %v7371_v14 = vpop.f32.mrb[33].mxu1  ;;  %v7333_v21 = vpop.f32.mrb[35].mxu0  ;;  %7634 = vmatprep.subr.bf16.mxu0 %v8440_v61  ;;  %v8519_v61 = vcombine.low %v648_v45, %v656_v46  ;;  %v8775_v1 = vcombine.low %v904_v47, %v912_v11  ;;  %v688_v34 = vld [vmem:[%s9967_s7 + $0x6f0] sm:$0xff] }
 0x39a   : > { %v10911_v18 = vadd.f32 %v7371_v14, %v7330_v8  ;;  %v7373_v20 = vpop.f32.mrb[34].mxu1  ;;  %7674 = vmatpush1.bf16.msra.mxu1 %v8679_v58  ;;  %v928_v58 = vld [vmem:[%s9967_s7 + $0xe70] sm:$0xff]  ;;  %v8552_v15 = vcombine.high %v680_v5, %v688_v34 }
 0x39b   : > { %v7374_v24 = vpop.f32.mrb[35].mxu1  ;;  %7675 = vmatprep.subr.bf16.mxu1 %v8696_v3  ;;  %v8536_v3 = vcombine.high %v664_v54, %v672_v56  ;;  %v8792_v4 = vcombine.high %v920_v57, %v928_v58  ;;  %v936_v8 = vld [vmem:[%s9967_s7 + $0xeb0] sm:$0xff]  ;;  %v8791_v14 = vcombine.low %v920_v57, %v928_v58 }
 0x39c   : > { %7635 = vmatpush1.bf16.msra.mxu0 %v8439_v17  ;;  %v8808_v17 = vcombine.high %v936_v8, %v944_v10  ;;  %v696_v20 = vld [vmem:[%s9967_s7 + $0x730] sm:$0xff]  ;;  %v8551_v24 = vcombine.low %v680_v5, %v688_v34 }
 0x39d   : > { %7636 = vmatprep.subr.bf16.mxu0 %v8456_v23  ;;  %v704_v21 = vld [vmem:[%s9967_s7 + $0x770] sm:$0xff] }
 0x39e   : > { %7676 = vmatpush1.bf16.msra.mxu1 %v8695_v22  ;;  %v952_v22 = vld [vmem:[%s9967_s7 + $0xf30] sm:$0xff]  ;;  %v8568_v25 = vcombine.high %v696_v20, %v704_v21 }
 0x39f   : > { %7677 = vmatprep.subr.bf16.mxu1 %v8712_v63  ;;  %v960_v23 = vld [vmem:[%s9967_s7 + $0xf70] sm:$0xff]  ;;  %v8807_v63 = vcombine.low %v936_v8, %v944_v10 }
 0x3a0   : > { %7637 = vmatpush1.bf16.msra.mxu0 %v8455_v49  ;;  %v8824_v26 = vcombine.high %v952_v22, %v960_v23  ;;  %v968_v49 = vld [vmem:[%s9967_s7 + $0xfb0] sm:$0xff] }
 0x3a1   : > { %7638 = vmatprep.subr.bf16.mxu0 %v8472_v29  ;;  %v8567_v29 = vcombine.low %v696_v20, %v704_v21  ;;  %v1008_v42 = vld [vmem:[%s9967_s7 + $0x10f0] sm:$0xff] }
 0x3a2   : > { %7678 = vmatpush1.bf16.msra.mxu1 %v8711_v28  ;;  %v976_v28 = vld [vmem:[%s9967_s7 + $0xff0] sm:$0xff]  ;;  %v8872_v45 = vcombine.high %v1000_v41, %v1008_v42 }
 0x3a3   : > { %7679 = vmatprep.subr.bf16.mxu1 %v8728_v30  ;;  %v8823_v30 = vcombine.low %v952_v22, %v960_v23  ;;  %v8840_v53 = vcombine.high %v968_v49, %v976_v28  ;;  %v1016_v47 = vld [vmem:[%s9967_s7 + $0x1130] sm:$0xff] }
 0x3a4   : > { %7639 = vmatpush1.bf16.msra.mxu0 %v8471_v35  ;;  %v1240_v35 = vld [vmem:[%s9967_s7 + $0x1830] sm:$0xff] }
 0x3a5   : > { %7640 = vmatprep.subr.bf16.mxu0 %v8488_v37  ;;  %v8583_v37 = vcombine.low %v712_v2, %v720_v27  ;;  %v1024_v11 = vld [vmem:[%s9967_s7 + $0x1170] sm:$0xff] }
 0x3a6   : > { %7680 = vmatpush1.bf16.msra.mxu1 %v8727_v36  ;;  %v1248_v36 = vld [vmem:[%s9967_s7 + $0x1870] sm:$0xff]  ;;  %v8888_v54 = vcombine.high %v1016_v47, %v1024_v11 }
 0x3a7   : > { %7681 = vmatprep.subr.bf16.mxu1 %v8744_v59  ;;  %v8839_v59 = vcombine.low %v968_v49, %v976_v28  ;;  %v9112_v40 = vcombine.high %v1240_v35, %v1248_v36  ;;  %v1032_v57 = vld [vmem:[%s9967_s7 + $0x11b0] sm:$0xff] }
 0x3a8   : > { %7641 = vmatpush1.bf16.msra.mxu0 %v8487_v43  ;;  %v1256_v43 = vld [vmem:[%s9967_s7 + $0x18b0] sm:$0xff] }
 0x3a9   : > { %7642 = vmatprep.subr.bf16.mxu0 %v8504_v6  ;;  %v8855_v6 = vcombine.low %v984_v55, %v992_v32  ;;  %v1040_v58 = vld [vmem:[%s9967_s7 + $0x11f0] sm:$0xff] }
 0x3aa   : > { %7682 = vmatpush1.bf16.msra.mxu1 %v8743_v33  ;;  %v1264_v33 = vld [vmem:[%s9967_s7 + $0x18f0] sm:$0xff]  ;;  %v8904_v5 = vcombine.high %v1032_v57, %v1040_v58 }
 0x3ab   : > { %7683 = vmatprep.subr.bf16.mxu1 %v8760_v44  ;;  %v9111_v44 = vcombine.low %v1240_v35, %v1248_v36  ;;  %v9128_v46 = vcombine.high %v1256_v43, %v1264_v33  ;;  %v1048_v8 = vld [vmem:[%s9967_s7 + $0x1230] sm:$0xff] }
 0x3ac   : > { %7643 = vmatpush1.bf16.msra.mxu0 %v8503_v48  ;;  %v1272_v48 = vld [vmem:[%s9967_s7 + $0x1930] sm:$0xff] }
 0x3ad   : > { %7644 = vmatprep.subr.bf16.mxu0 %v8520_v51  ;;  %v8871_v51 = vcombine.low %v1000_v41, %v1008_v42  ;;  %v1056_v10 = vld [vmem:[%s9967_s7 + $0x1270] sm:$0xff] }
 0x3ae   : > { %7684 = vmatpush1.bf16.msra.mxu1 %v8759_v50  ;;  %v1280_v50 = vld [vmem:[%s9967_s7 + $0x1970] sm:$0xff]  ;;  %v8920_v20 = vcombine.high %v1048_v8, %v1056_v10 }
 0x3af   : > { %7685 = vmatprep.subr.bf16.mxu1 %v8776_v52  ;;  %v9127_v52 = vcombine.low %v1256_v43, %v1264_v33  ;;  %v9144_v56 = vcombine.high %v1272_v48, %v1280_v50  ;;  %v1064_v22 = vld [vmem:[%s9967_s7 + $0x12b0] sm:$0xff]  ;;  %v454_v43 = vld [vmem:[#allocation2 + $0x40] sm:$0xff] }
 0x3b0   : > { %7645 = vmatpush1.bf16.msra.mxu0 %v8519_v61  ;;  %v1288_v61 = vld [vmem:[%s9967_s7 + $0x19b0] sm:$0xff] }
 0x3b1   : > { %7646 = vmatprep.subr.bf16.mxu0 %v8536_v3  ;;  %v8887_v3 = vcombine.low %v1016_v47, %v1024_v11  ;;  %v1072_v23 = vld [vmem:[%s9967_s7 + $0x12f0] sm:$0xff]  ;;  %v455_v47 = vld [vmem:[#allocation2 + $0x48] sm:$0xff] }
 0x3b2   : > { %7686 = vmatpush1.bf16.msra.mxu1 %v8775_v1  ;;  %v1296_v1 = vld [vmem:[%s9967_s7 + $0x19f0] sm:$0xff]  ;;  %v8936_v2 = vcombine.high %v1064_v22, %v1072_v23 }
 0x3b3   : > { %7687 = vmatprep.subr.bf16.mxu1 %v8792_v4  ;;  %v9143_v4 = vcombine.low %v1272_v48, %v1280_v50  ;;  %v9160_v34 = vcombine.high %v1288_v61, %v1296_v1  ;;  %v1080_v49 = vld [vmem:[%s9967_s7 + $0x1330] sm:$0xff] }
 0x3b4   : > { %7647 = vmatpush1.bf16.msra.mxu0 %v8535_v12  ;;  %v1304_v12 = vld [vmem:[%s9967_s7 + $0x1a30] sm:$0xff] }
 0x3b5   : > { %7648 = vmatprep.subr.bf16.mxu0 %v8552_v15  ;;  %v8903_v15 = vcombine.low %v1032_v57, %v1040_v58  ;;  %v1088_v28 = vld [vmem:[%s9967_s7 + $0x1370] sm:$0xff] }
 0x3b6   : > { %7688 = vmatpush1.bf16.msra.mxu1 %v8791_v14  ;;  %v1312_v14 = vld [vmem:[%s9967_s7 + $0x1a70] sm:$0xff]  ;;  %v8952_v55 = vcombine.high %v1080_v49, %v1088_v28 }
 0x3b7   : > { %7689 = vmatprep.subr.bf16.mxu1 %v8808_v17  ;;  %v9159_v17 = vcombine.low %v1288_v61, %v1296_v1  ;;  %v9176_v21 = vcombine.high %v1304_v12, %v1312_v14  ;;  %v1096_v36 = vld [vmem:[%s9967_s7 + $0x13b0] sm:$0xff] }
 0x3b8   : > { %7649 = vmatpush1.bf16.msra.mxu0 %v8551_v24  ;;  %v1320_v24 = vld [vmem:[%s9967_s7 + $0x1ab0] sm:$0xff] }
 0x3b9   : > { %7650 = vmatprep.subr.bf16.mxu0 %v8568_v25  ;;  %v8919_v25 = vcombine.low %v1048_v8, %v1056_v10  ;;  %v1352_v41 = vld [vmem:[%s9967_s7 + $0x1bb0] sm:$0xff] }
 0x3ba   : > { %7690 = vmatpush1.bf16.msra.mxu1 %v8807_v63  ;;  %v1328_v63 = vld [vmem:[%s9967_s7 + $0x1af0] sm:$0xff] }
 0x3bb   : > { %7691 = vmatprep.subr.bf16.mxu1 %v8824_v26  ;;  %v9175_v26 = vcombine.low %v1304_v12, %v1312_v14  ;;  %v9192_v27 = vcombine.high %v1320_v24, %v1328_v63  ;;  %v1360_v42 = vld [vmem:[%s9967_s7 + $0x1bf0] sm:$0xff] }
 0x3bc   : > { %7651 = vmatpush1.bf16.msra.mxu0 %v8567_v29  ;;  %v1336_v29 = vld [vmem:[%s9967_s7 + $0x1b30] sm:$0xff] }
 0x3bd   : > { %7652 = vmatprep.subr.bf16.mxu0 %v8584_v31  ;;  %v8935_v31 = vcombine.low %v1064_v22, %v1072_v23  ;;  %v1368_v58 = vld [vmem:[%s9967_s7 + $0x1c30] sm:$0xff] }
 0x3be   : > { %7692 = vmatpush1.bf16.msra.mxu1 %v8823_v30  ;;  %v1344_v30 = vld [vmem:[%s9967_s7 + $0x1b70] sm:$0xff] }
 0x3bf   : > { %7693 = vmatprep.subr.bf16.mxu1 %v8840_v53  ;;  %v9191_v53 = vcombine.low %v1320_v24, %v1328_v63  ;;  %v9208_v35 = vcombine.high %v1336_v29, %v1344_v30  ;;  %v9207_v48 = vcombine.low %v1336_v29, %v1344_v30  ;;  %v1376_v61 = vld [vmem:[%s9967_s7 + $0x1c70] sm:$0xff] }
 0x3c0   : > { %7653 = vmatpush1.bf16.msra.mxu0 %v8583_v37  ;;  %v1104_v37 = vld [vmem:[%s9967_s7 + $0x13f0] sm:$0xff] }
 0x3c1   : > { %7704 = vmatprep.subr.bf16.mxu0 %v8856_v62  ;;  %v8968_v50 = vcombine.high %v1096_v36, %v1104_v37  ;;  %v1128_v8 = vld [vmem:[%s9967_s7 + $0x14b0] sm:$0xff] }
 0x3c2   : > { %7694 = vmatpush1.bf16.msra.mxu1 %v8839_v59  ;;  %v1136_v10 = vld [vmem:[%s9967_s7 + $0x14f0] sm:$0xff] }
 0x3c3   : > { %7745 = vmatprep.subr.bf16.mxu1 %v9112_v40  ;;  %7655 = vmatmul.mubr.bf16.vlgmr.msra.gmra.mrb[48].mxu0 %v10079_v60  ;;  %v1384_v12 = vld [vmem:[%s9967_s7 + $0x1cb0] sm:$0xff] }
 0x3c4   : > { %7705 = vmatpush1.bf16.msra.mxu0 %v8855_v6  ;;  %7736 = vmatprep.mubr.bf16.mxu0 %v10097_v7  ;;  %v1392_v14 = vld [vmem:[%s9967_s7 + $0x1cf0] sm:$0xff] }
 0x3c5   : > { %7696 = vmatmul.mubr.bf16.vlgmr.msra.gmra.mrb[48].mxu1 %v10088_v0  ;;  %7706 = vmatprep.subr.bf16.mxu0 %v8872_v45  ;;  %v8951_v45 = vcombine.low %v1080_v49, %v1088_v28  ;;  %v1144_v22 = vld [vmem:[%s9967_s7 + $0x1530] sm:$0xff] }
 0x3c6   : > { %7746 = vmatpush1.bf16.msra.mxu1 %v9111_v44  ;;  %7777 = vmatprep.mubr.bf16.mxu1 %v10104_v9  ;;  %v1152_v23 = vld [vmem:[%s9967_s7 + $0x1570] sm:$0xff] }
 0x3c7   : > { %7747 = vmatprep.subr.bf16.mxu1 %v9128_v46  ;;  %v1400_v24 = vld [vmem:[%s9967_s7 + $0x1d30] sm:$0xff] }
 0x3c8   : > { %7707 = vmatpush1.bf16.msra.mxu0 %v8871_v51  ;;  %v1408_v63 = vld [vmem:[%s9967_s7 + $0x1d70] sm:$0xff] }
 0x3c9   : > { %7708 = vmatprep.subr.bf16.mxu0 %v8888_v54  ;;  %v1112_v54 = vld [vmem:[%s9967_s7 + $0x1430] sm:$0xff] }
 0x3ca   : > { %7748 = vmatpush1.bf16.msra.mxu1 %v9127_v52  ;;  %v1160_v49 = vld [vmem:[%s9967_s7 + $0x15b0] sm:$0xff] }
 0x3cb   : > { %7749 = vmatprep.subr.bf16.mxu1 %v9144_v56  ;;  %v1120_v56 = vld [vmem:[%s9967_s7 + $0x1470] sm:$0xff] }
 0x3cc   : > { %7709 = vmatpush1.bf16.msra.mxu0 %v8887_v3  ;;  %v8967_v3 = vcombine.low %v1096_v36, %v1104_v37  ;;  %v1168_v28 = vld [vmem:[%s9967_s7 + $0x15f0] sm:$0xff] }
 0x3cd   : > { %7710 = vmatprep.subr.bf16.mxu0 %v8904_v5  ;;  %v8984_v5 = vcombine.high %v1112_v54, %v1120_v56  ;;  %v1416_v29 = vld [vmem:[%s9967_s7 + $0x1db0] sm:$0xff] }
 0x3ce   : > { %7750 = vmatpush1.bf16.msra.mxu1 %v9143_v4  ;;  %v9223_v4 = vcombine.low %v1352_v41, %v1360_v42  ;;  %v1424_v30 = vld [vmem:[%s9967_s7 + $0x1df0] sm:$0xff] }
 0x3cf   : > { %7751 = vmatprep.subr.bf16.mxu1 %v9160_v34  ;;  %v9240_v34 = vcombine.high %v1368_v58, %v1376_v61  ;;  %v1184_v36 = vld [vmem:[%s9967_s7 + $0x1670] sm:$0xff] }
 0x3d0   : > { %7711 = vmatpush1.bf16.msra.mxu0 %v8903_v15  ;;  %v8983_v15 = vcombine.low %v1112_v54, %v1120_v56  ;;  %v1432_v37 = vld [vmem:[%s9967_s7 + $0x1e30] sm:$0xff] }
 0x3d1   : > { %7712 = vmatprep.subr.bf16.mxu0 %v8920_v20  ;;  %v9000_v20 = vcombine.high %v1128_v8, %v1136_v10 }
 0x3d2   : > { %7752 = vmatpush1.bf16.msra.mxu1 %v9159_v17  ;;  %v9239_v17 = vcombine.low %v1368_v58, %v1376_v61  ;;  %v1232_v58 = vld [vmem:[%s9967_s7 + $0x17f0] sm:$0xff] }
 0x3d3   : > { %7753 = vmatprep.subr.bf16.mxu1 %v9176_v21  ;;  %v9256_v21 = vcombine.high %v1384_v12, %v1392_v14  ;;  %v1480_v61 = vld [vmem:[%s9967_s7 + $0x1fb0] sm:$0xff] }
 0x3d4   : > { %7713 = vmatpush1.bf16.msra.mxu0 %v8919_v25  ;;  %v8999_v25 = vcombine.low %v1128_v8, %v1136_v10  ;;  %v473_v8 = vld [vmem:[%s9967_s7 + $0x38] sm:$0xff] }
 0x3d5   : > { %7714 = vmatprep.subr.bf16.mxu0 %v8936_v2  ;;  %v9016_v2 = vcombine.high %v1144_v22, %v1152_v23  ;;  %v481_v10 = vld [vmem:[%s9967_s7 + $0x78] sm:$0xff] }
 0x3d6   : > { %7754 = vmatpush1.bf16.msra.mxu1 %v9175_v26  ;;  %v7410_v32 = vpop.f32.mrb[36].mxu0  ;;  %v9255_v26 = vcombine.low %v1384_v12, %v1392_v14  ;;  %v729_v12 = vld [vmem:[%s9967_s7 + $0x838] sm:$0xff] }
 0x3d7   : > { %7755 = vmatprep.subr.bf16.mxu1 %v9192_v27  ;;  %v7411_v59 = vadd.f32 %v7410_v32, %v10909_v13  ;;  %v7412_v40 = vpop.f32.mrb[37].mxu0  ;;  %v9272_v27 = vcombine.high %v1400_v24, %v1408_v63  ;;  %v9288_v32 = vcombine.high %v1416_v29, %v1424_v30  ;;  %v737_v14 = vld [vmem:[%s9967_s7 + $0x878] sm:$0xff] }
 0x3d8   : > { %v7451_v62 = vpop.f32.mrb[36].mxu1  ;;  %v7413_v33 = vadd.f32 %v7412_v40, %v10911_v18  ;;  %v7414_v44 = vpop.f32.mrb[38].mxu0  ;;  %7715 = vmatpush1.bf16.msra.mxu0 %v8935_v31  ;;  %v9224_v18 = vcombine.high %v1352_v41, %v1360_v42  ;;  %v9015_v31 = vcombine.low %v1144_v22, %v1152_v23  ;;  %v9287_v40 = vcombine.low %v1416_v29, %v1424_v30  ;;  %v489_v22 = vld [vmem:[%s9967_s7 + $0xb8] sm:$0xff] }
 0x3d9   : > { %v7453_v6 = vpop.f32.mrb[37].mxu1  ;;  %v7452_v46 = vadd.f32 %v7451_v62, %v7411_v59  ;;  %v7415_v13 = vpop.f32.mrb[39].mxu0  ;;  %7716 = vmatprep.subr.bf16.mxu0 %v8952_v55  ;;  %v9032_v55 = vcombine.high %v1160_v49, %v1168_v28  ;;  %v1440_v59 = vld [vmem:[%s9967_s7 + $0x1e70] sm:$0xff]  ;;  %v9031_v62 = vcombine.low %v1160_v49, %v1168_v28  ;;  %v497_v23 = vld [vmem:[%s9967_s7 + $0xf8] sm:$0xff] }
 0x3da   : > { %v7455_v11 = vpop.f32.mrb[38].mxu1  ;;  %7756 = vmatpush1.bf16.msra.mxu1 %v9191_v53  ;;  %v7454_v51 = vadd.f32 %v7453_v6, %v7413_v33  ;;  %v9271_v53 = vcombine.low %v1400_v24, %v1408_v63  ;;  %v9304_v42 = vcombine.high %v1432_v37, %v1440_v59  ;;  %v1200_v33 = vld [vmem:[%s9967_s7 + $0x16f0] sm:$0xff]  ;;  %v745_v24 = vld [vmem:[%s9967_s7 + $0x8b8] sm:$0xff] }
 0x3db   : > { %v7456_v52 = vpop.f32.mrb[39].mxu1  ;;  %7757 = vmatprep.subr.bf16.mxu1 %v9208_v35  ;;  %v7958_v57 = vadd.f32 %v7452_v46, %v454_v43  ;;  %v1176_v35 = vld [vmem:[%s9967_s7 + $0x1630] sm:$0xff]  ;;  %v9303_v46 = vcombine.low %v1432_v37, %v1440_v59  ;;  %v753_v63 = vld [vmem:[%s9967_s7 + $0x8f8] sm:$0xff] }
 0x3dc   : > { %v7959_v1 = vadd.f32 %v7454_v51, %v455_v47  ;;  %7717 = vmatpush1.bf16.msra.mxu0 %v8951_v45  ;;  %v9048_v41 = vcombine.high %v1176_v35, %v1184_v36  ;;  %v1192_v43 = vld [vmem:[%s9967_s7 + $0x16b0] sm:$0xff]  ;;  %v9047_v45 = vcombine.low %v1176_v35, %v1184_v36  ;;  %v505_v49 = vld [vmem:[%s9967_s7 + $0x138] sm:$0xff] }
 0x3dd   : > { %7974 = vst [vmem:[#allocation2 + $0x40] sm:$0xff] %v7958_v57  ;;  %7718 = vmatprep.subr.bf16.mxu0 %v8968_v50  ;;  %v1448_v6 = vld [vmem:[%s9967_s7 + $0x1eb0] sm:$0xff]  ;;  %v9064_v47 = vcombine.high %v1192_v43, %v1200_v33  ;;  %v9063_v52 = vcombine.low %v1192_v43, %v1200_v33  ;;  %v513_v28 = vld [vmem:[%s9967_s7 + $0x178] sm:$0xff] }
 0x3de   : > { %7758 = vmatpush1.bf16.msra.mxu1 %v9207_v48  ;;  %7975 = vst [vmem:[#allocation2 + $0x48] sm:$0xff] %v7959_v1  ;;  %v1456_v44 = vld [vmem:[%s9967_s7 + $0x1ef0] sm:$0xff]  ;;  %v761_v29 = vld [vmem:[%s9967_s7 + $0x938] sm:$0xff] }
 0x3df   : > { %7759 = vmatprep.subr.bf16.mxu1 %v9224_v18  ;;  %v9320_v11 = vcombine.high %v1448_v6, %v1456_v44  ;;  %v1208_v13 = vld [vmem:[%s9967_s7 + $0x1730] sm:$0xff]  ;;  %v9319_v18 = vcombine.low %v1448_v6, %v1456_v44  ;;  %v769_v30 = vld [vmem:[%s9967_s7 + $0x978] sm:$0xff] }
 0x3e0   : > { %7719 = vmatpush1.bf16.msra.mxu0 %v8967_v3  ;;  %v1216_v48 = vld [vmem:[%s9967_s7 + $0x1770] sm:$0xff]  ;;  %v521_v35 = vld [vmem:[%s9967_s7 + $0x1b8] sm:$0xff] }
 0x3e1   : > { %7720 = vmatprep.subr.bf16.mxu0 %v8984_v5  ;;  %v1464_v50 = vld [vmem:[%s9967_s7 + $0x1f30] sm:$0xff]  ;;  %v9080_v54 = vcombine.high %v1208_v13, %v1216_v48  ;;  %v9079_v3 = vcombine.low %v1208_v13, %v1216_v48  ;;  %v529_v36 = vld [vmem:[%s9967_s7 + $0x1f8] sm:$0xff] }
 0x3e2   : > { %7760 = vmatpush1.bf16.msra.mxu1 %v9223_v4  ;;  %v1472_v51 = vld [vmem:[%s9967_s7 + $0x1f70] sm:$0xff]  ;;  %v777_v37 = vld [vmem:[%s9967_s7 + $0x9b8] sm:$0xff]  ;;  %v8393_v44 = vcombine.low %v521_v35, %v529_v36 }
 0x3e3   : > { %7761 = vmatprep.subr.bf16.mxu1 %v9240_v34  ;;  %v9336_v56 = vcombine.high %v1464_v50, %v1472_v51  ;;  %v1224_v57 = vld [vmem:[%s9967_s7 + $0x17b0] sm:$0xff]  ;;  %v9335_v4 = vcombine.low %v1464_v50, %v1472_v51  ;;  %v785_v59 = vld [vmem:[%s9967_s7 + $0x9f8] sm:$0xff] }
 0x3e4   : > { %7721 = vmatpush1.bf16.msra.mxu0 %v8983_v15  ;;  %v1488_v1 = vld [vmem:[%s9967_s7 + $0x1ff0] sm:$0xff]  ;;  %v9096_v5 = vcombine.high %v1224_v57, %v1232_v58  ;;  %v9095_v15 = vcombine.low %v1224_v57, %v1232_v58  ;;  %v537_v43 = vld [vmem:[%s9967_s7 + $0x238] sm:$0xff] }
 0x3e5   : > { %7722 = vmatprep.subr.bf16.mxu0 %v9000_v20  ;;  %v9352_v34 = vcombine.high %v1480_v61, %v1488_v1  ;;  %v8346_v20 = vcombine.high %v473_v8, %v481_v10  ;;  %v545_v33 = vld [vmem:[%s9967_s7 + $0x278] sm:$0xff] }
 0x3e6   : > { %7762 = vmatpush1.bf16.msra.mxu1 %v9239_v17  ;;  %v9351_v17 = vcombine.low %v1480_v61, %v1488_v1  ;;  %v793_v6 = vld [vmem:[%s9967_s7 + $0xa38] sm:$0xff]  ;;  %v8409_v50 = vcombine.low %v537_v43, %v545_v33 }
 0x3e7   : > { %7763 = vmatprep.subr.bf16.mxu1 %v9256_v21  ;;  %v8602_v21 = vcombine.high %v729_v12, %v737_v14  ;;  %v809_v13 = vld [vmem:[%s9967_s7 + $0xab8] sm:$0xff] }
 0x3e8   : > { %7723 = vmatpush1.bf16.msra.mxu0 %v8999_v25  ;;  %v8345_v25 = vcombine.low %v473_v8, %v481_v10  ;;  %v817_v48 = vld [vmem:[%s9967_s7 + $0xaf8] sm:$0xff] }
 0x3e9   : > { %7724 = vmatprep.subr.bf16.mxu0 %v9016_v2  ;;  %v8362_v2 = vcombine.high %v489_v22, %v497_v23  ;;  %v825_v57 = vld [vmem:[%s9967_s7 + $0xb38] sm:$0xff]  ;;  %v8681_v1 = vcombine.low %v809_v13, %v817_v48 }
 0x3ea   : > { %7764 = vmatpush1.bf16.msra.mxu1 %v9255_v26  ;;  %v8601_v26 = vcombine.low %v729_v12, %v737_v14  ;;  %v833_v58 = vld [vmem:[%s9967_s7 + $0xb78] sm:$0xff] }
 0x3eb   : > { %7765 = vmatprep.subr.bf16.mxu1 %v9272_v27  ;;  %v8618_v27 = vcombine.high %v745_v24, %v753_v63  ;;  %v593_v8 = vld [vmem:[%s9967_s7 + $0x3f8] sm:$0xff] }
 0x3ec   : > { %7725 = vmatpush1.bf16.msra.mxu0 %v9015_v31  ;;  %v8361_v31 = vcombine.low %v489_v22, %v497_v23  ;;  %v841_v14 = vld [vmem:[%s9967_s7 + $0xbb8] sm:$0xff] }
 0x3ed   : > { %7726 = vmatprep.subr.bf16.mxu0 %v9032_v55  ;;  %v8378_v55 = vcombine.high %v505_v49, %v513_v28 }
 0x3ee   : > { %7766 = vmatpush1.bf16.msra.mxu1 %v9271_v53  ;;  %v8617_v53 = vcombine.low %v745_v24, %v753_v63 }
 0x3ef   : > { %7767 = vmatprep.subr.bf16.mxu1 %v9288_v32  ;;  %v8634_v32 = vcombine.high %v761_v29, %v769_v30 }
 0x3f0   : > { %7727 = vmatpush1.bf16.msra.mxu0 %v9031_v62  ;;  %v8377_v62 = vcombine.low %v505_v49, %v513_v28  ;;  %v601_v49 = vld [vmem:[%s9967_s7 + $0x438] sm:$0xff] }
 0x3f1   : > { %7728 = vmatprep.subr.bf16.mxu0 %v9048_v41  ;;  %v8394_v41 = vcombine.high %v521_v35, %v529_v36  ;;  %v609_v28 = vld [vmem:[%s9967_s7 + $0x478] sm:$0xff] }
 0x3f2   : > { %7768 = vmatpush1.bf16.msra.mxu1 %v9287_v40  ;;  %v8633_v40 = vcombine.low %v761_v29, %v769_v30  ;;  %v857_v29 = vld [vmem:[%s9967_s7 + $0xc38] sm:$0xff] }
 0x3f3   : > { %7769 = vmatprep.subr.bf16.mxu1 %v9304_v42  ;;  %v8650_v42 = vcombine.high %v777_v37, %v785_v59  ;;  %v865_v30 = vld [vmem:[%s9967_s7 + $0xc78] sm:$0xff] }
 0x3f4   : > { %7729 = vmatpush1.bf16.msra.mxu0 %v9047_v45  ;;  %v8410_v45 = vcombine.high %v537_v43, %v545_v33  ;;  %v617_v35 = vld [vmem:[%s9967_s7 + $0x4b8] sm:$0xff] }
 0x3f5   : > { %7730 = vmatprep.subr.bf16.mxu0 %v9064_v47  ;;  %v553_v47 = vld [vmem:[%s9967_s7 + $0x2b8] sm:$0xff] }
 0x3f6   : > { %7770 = vmatpush1.bf16.msra.mxu1 %v9303_v46  ;;  %v625_v36 = vld [vmem:[%s9967_s7 + $0x4f8] sm:$0xff] }
 0x3f7   : > { %7771 = vmatprep.subr.bf16.mxu1 %v9320_v11  ;;  %v561_v11 = vld [vmem:[%s9967_s7 + $0x2f8] sm:$0xff] }
 0x3f8   : > { %7731 = vmatpush1.bf16.msra.mxu0 %v9063_v52  ;;  %v8426_v52 = vcombine.high %v553_v47, %v561_v11  ;;  %v8425_v61 = vcombine.low %v553_v47, %v561_v11  ;;  %v633_v43 = vld [vmem:[%s9967_s7 + $0x538] sm:$0xff] }
 0x3f9   : > { %7732 = vmatprep.subr.bf16.mxu0 %v9080_v54  ;;  %v569_v54 = vld [vmem:[%s9967_s7 + $0x338] sm:$0xff] }
 0x3fa   : > { %7772 = vmatpush1.bf16.msra.mxu1 %v9319_v18  ;;  %v8682_v18 = vcombine.high %v809_v13, %v817_v48  ;;  %v641_v33 = vld [vmem:[%s9967_s7 + $0x578] sm:$0xff] }
 0x3fb   : > { %7773 = vmatprep.subr.bf16.mxu1 %v9336_v56  ;;  %v577_v56 = vld [vmem:[%s9967_s7 + $0x378] sm:$0xff] }
 0x3fc   : > { %7733 = vmatpush1.bf16.msra.mxu0 %v9079_v3  ;;  %v8442_v3 = vcombine.high %v569_v54, %v577_v56  ;;  %v8441_v22 = vcombine.low %v569_v54, %v577_v56  ;;  %v649_v47 = vld [vmem:[%s9967_s7 + $0x5b8] sm:$0xff] }
 0x3fd   : > { %7734 = vmatprep.subr.bf16.mxu0 %v9096_v5  ;;  %v8698_v5 = vcombine.high %v825_v57, %v833_v58  ;;  %v657_v11 = vld [vmem:[%s9967_s7 + $0x5f8] sm:$0xff] }
 0x3fe   : > { %7774 = vmatpush1.bf16.msra.mxu1 %v9335_v4  ;;  %v905_v13 = vld [vmem:[%s9967_s7 + $0xdb8] sm:$0xff] }
 0x3ff   : > { %7775 = vmatprep.subr.bf16.mxu1 %v9352_v34  ;;  %v585_v34 = vld [vmem:[%s9967_s7 + $0x3b8] sm:$0xff] }
 0x400   : > { %7735 = vmatpush1.bf16.msra.mxu0 %v9095_v15  ;;  %v849_v15 = vld [vmem:[%s9967_s7 + $0xbf8] sm:$0xff] }
 0x401   : > { %7786 = vmatprep.subr.bf16.mxu0 %v8346_v20  ;;  %v913_v48 = vld [vmem:[%s9967_s7 + $0xdf8] sm:$0xff] }
 0x402   : > { %7776 = vmatpush1.bf16.msra.mxu1 %v9351_v17  ;;  %v665_v54 = vld [vmem:[%s9967_s7 + $0x638] sm:$0xff] }
 0x403   : > { %7827 = vmatprep.subr.bf16.mxu1 %v8602_v21  ;;  %7737 = vmatmul.mubr.bf16.vlgmr.msra.gmra.mrb[52].mxu0 %v10169_v16  ;;  %v673_v56 = vld [vmem:[%s9967_s7 + $0x678] sm:$0xff] }
 0x404   : > { %7787 = vmatpush1.bf16.msra.mxu0 %v8345_v25  ;;  %7818 = vmatprep.mubr.bf16.mxu0 %v10029_v38  ;;  %v801_v38 = vld [vmem:[%s9967_s7 + $0xa78] sm:$0xff]  ;;  %v8697_v25 = vcombine.low %v825_v57, %v833_v58 }
 0x405   : > { %7778 = vmatmul.mubr.bf16.vlgmr.msra.gmra.mrb[52].mxu1 %v10175_v19  ;;  %7788 = vmatprep.subr.bf16.mxu0 %v8362_v2  ;;  %v8666_v46 = vcombine.high %v793_v6, %v801_v38  ;;  %v8665_v51 = vcombine.low %v793_v6, %v801_v38  ;;  %v889_v6 = vld [vmem:[%s9967_s7 + $0xd38] sm:$0xff] }
 0x406   : > { %7828 = vmatpush1.bf16.msra.mxu1 %v8601_v26  ;;  %7859 = vmatprep.mubr.bf16.mxu1 %v10033_v39  ;;  %v8649_v39 = vcombine.low %v777_v37, %v785_v59  ;;  %v8458_v26 = vcombine.high %v585_v34, %v593_v8  ;;  %v873_v37 = vld [vmem:[%s9967_s7 + $0xcb8] sm:$0xff] }
 0x407   : > { %7829 = vmatprep.subr.bf16.mxu1 %v8618_v27  ;;  %v8714_v27 = vcombine.high %v841_v14, %v849_v15  ;;  %v881_v59 = vld [vmem:[%s9967_s7 + $0xcf8] sm:$0xff] }
 0x408   : > { %7789 = vmatpush1.bf16.msra.mxu0 %v8361_v31  ;;  %v8457_v31 = vcombine.low %v585_v34, %v593_v8  ;;  %v897_v38 = vld [vmem:[%s9967_s7 + $0xd78] sm:$0xff] }
 0x409   : > { %7790 = vmatprep.subr.bf16.mxu0 %v8378_v55  ;;  %v8474_v55 = vcombine.high %v601_v49, %v609_v28  ;;  %v921_v57 = vld [vmem:[%s9967_s7 + $0xe38] sm:$0xff] }
 0x40a   : > { %7830 = vmatpush1.bf16.msra.mxu1 %v8617_v53  ;;  %v8713_v53 = vcombine.low %v841_v14, %v849_v15  ;;  %v929_v58 = vld [vmem:[%s9967_s7 + $0xe78] sm:$0xff] }
 0x40b   : > { %7831 = vmatprep.subr.bf16.mxu1 %v8634_v32  ;;  %v8730_v32 = vcombine.high %v857_v29, %v865_v30  ;;  %v689_v34 = vld [vmem:[%s9967_s7 + $0x6f8] sm:$0xff]  ;;  %v8793_v14 = vcombine.low %v921_v57, %v929_v58 }
 0x40c   : > { %7791 = vmatpush1.bf16.msra.mxu0 %v8377_v62  ;;  %v8473_v62 = vcombine.low %v601_v49, %v609_v28  ;;  %v937_v8 = vld [vmem:[%s9967_s7 + $0xeb8] sm:$0xff] }
 0x40d   : > { %7792 = vmatprep.subr.bf16.mxu0 %v8394_v41  ;;  %v8490_v41 = vcombine.high %v617_v35, %v625_v36  ;;  %v713_v49 = vld [vmem:[%s9967_s7 + $0x7b8] sm:$0xff] }
 0x40e   : > { %7832 = vmatpush1.bf16.msra.mxu1 %v8633_v40  ;;  %v8729_v40 = vcombine.low %v857_v29, %v865_v30  ;;  %v721_v28 = vld [vmem:[%s9967_s7 + $0x7f8] sm:$0xff] }
 0x40f   : > { %7833 = vmatprep.subr.bf16.mxu1 %v8650_v42  ;;  %v8746_v42 = vcombine.high %v873_v37, %v881_v59  ;;  %v969_v29 = vld [vmem:[%s9967_s7 + $0xfb8] sm:$0xff] }
 0x410   : > { %7793 = vmatpush1.bf16.msra.mxu0 %v8393_v44  ;;  %v8489_v44 = vcombine.low %v617_v35, %v625_v36  ;;  %v977_v30 = vld [vmem:[%s9967_s7 + $0xff8] sm:$0xff] }
 0x411   : > { %7794 = vmatprep.subr.bf16.mxu0 %v8410_v45  ;;  %v8506_v45 = vcombine.high %v633_v43, %v641_v33  ;;  %v985_v35 = vld [vmem:[%s9967_s7 + $0x1038] sm:$0xff] }
 0x412   : > { %7834 = vmatpush1.bf16.msra.mxu1 %v8649_v39  ;;  %v8745_v39 = vcombine.low %v873_v37, %v881_v59  ;;  %v993_v36 = vld [vmem:[%s9967_s7 + $0x1078] sm:$0xff] }
 0x413   : > { %7835 = vmatprep.subr.bf16.mxu1 %v8666_v46  ;;  %v8762_v46 = vcombine.high %v889_v6, %v897_v38  ;;  %v1241_v37 = vld [vmem:[%s9967_s7 + $0x1838] sm:$0xff] }
 0x414   : > { %7795 = vmatpush1.bf16.msra.mxu0 %v8409_v50  ;;  %v8505_v50 = vcombine.low %v633_v43, %v641_v33  ;;  %v1249_v59 = vld [vmem:[%s9967_s7 + $0x1878] sm:$0xff] }
 0x415   : > { %7796 = vmatprep.subr.bf16.mxu0 %v8426_v52  ;;  %v8522_v52 = vcombine.high %v649_v47, %v657_v11  ;;  %v1001_v43 = vld [vmem:[%s9967_s7 + $0x10b8] sm:$0xff] }
 0x416   : > { %7836 = vmatpush1.bf16.msra.mxu1 %v8665_v51  ;;  %v7492_v4 = vpop.f32.mrb[40].mxu0  ;;  %v8761_v51 = vcombine.low %v889_v6, %v897_v38  ;;  %v1009_v33 = vld [vmem:[%s9967_s7 + $0x10f8] sm:$0xff] }
 0x417   : > { %7837 = vmatprep.subr.bf16.mxu1 %v8682_v18  ;;  %v7494_v12 = vpop.f32.mrb[41].mxu0  ;;  %v8778_v18 = vcombine.high %v905_v13, %v913_v48  ;;  %v1257_v6 = vld [vmem:[%s9967_s7 + $0x18b8] sm:$0xff] }
 0x418   : > { %v7533_v10 = vpop.f32.mrb[40].mxu1  ;;  %v7496_v21 = vpop.f32.mrb[42].mxu0  ;;  %7797 = vmatpush1.bf16.msra.mxu0 %v8425_v61  ;;  %v8521_v61 = vcombine.low %v649_v47, %v657_v11  ;;  %v1265_v38 = vld [vmem:[%s9967_s7 + $0x18f8] sm:$0xff] }
 0x419   : > { %v11051_v17 = vadd.f32 %v7533_v10, %v7492_v4  ;;  %v7535_v20 = vpop.f32.mrb[41].mxu1  ;;  %v7497_v63 = vpop.f32.mrb[43].mxu0  ;;  %7798 = vmatprep.subr.bf16.mxu0 %v8442_v3  ;;  %v8538_v3 = vcombine.high %v665_v54, %v673_v56  ;;  %v8794_v4 = vcombine.high %v921_v57, %v929_v58  ;;  %v945_v10 = vld [vmem:[%s9967_s7 + $0xef8] sm:$0xff] }
 0x41a   : > { %v11053_v23 = vadd.f32 %v7535_v20, %v7494_v12  ;;  %v7537_v24 = vpop.f32.mrb[42].mxu1  ;;  %7838 = vmatpush1.bf16.msra.mxu1 %v8681_v1  ;;  %v8777_v1 = vcombine.low %v905_v13, %v913_v48  ;;  %v8537_v12 = vcombine.low %v665_v54, %v673_v56  ;;  %v8810_v20 = vcombine.high %v937_v8, %v945_v10  ;;  %v697_v21 = vld [vmem:[%s9967_s7 + $0x738] sm:$0xff] }
 0x41b   : > { %v7538_v2 = vpop.f32.mrb[43].mxu1  ;;  %7839 = vmatprep.subr.bf16.mxu1 %v8698_v5  ;;  %v681_v5 = vld [vmem:[%s9967_s7 + $0x6b8] sm:$0xff] }
 0x41c   : > { %7799 = vmatpush1.bf16.msra.mxu0 %v8441_v22  ;;  %v8554_v15 = vcombine.high %v681_v5, %v689_v34  ;;  %v705_v22 = vld [vmem:[%s9967_s7 + $0x778] sm:$0xff] }
 0x41d   : > { %7800 = vmatprep.subr.bf16.mxu0 %v8458_v26  ;;  %v953_v24 = vld [vmem:[%s9967_s7 + $0xf38] sm:$0xff]  ;;  %v8809_v26 = vcombine.low %v937_v8, %v945_v10  ;;  %v8570_v2 = vcombine.high %v697_v21, %v705_v22 }
 0x41e   : > { %7840 = vmatpush1.bf16.msra.mxu1 %v8697_v25  ;;  %v961_v63 = vld [vmem:[%s9967_s7 + $0xf78] sm:$0xff]  ;;  %v8553_v25 = vcombine.low %v681_v5, %v689_v34 }
 0x41f   : > { %7841 = vmatprep.subr.bf16.mxu1 %v8714_v27  ;;  %v8826_v27 = vcombine.high %v953_v24, %v961_v63  ;;  %v1017_v47 = vld [vmem:[%s9967_s7 + $0x1138] sm:$0xff] }
 0x420   : > { %7801 = vmatpush1.bf16.msra.mxu0 %v8457_v31  ;;  %v8569_v31 = vcombine.low %v697_v21, %v705_v22  ;;  %v1025_v11 = vld [vmem:[%s9967_s7 + $0x1178] sm:$0xff] }
 0x421   : > { %7802 = vmatprep.subr.bf16.mxu0 %v8474_v55  ;;  %v8586_v55 = vcombine.high %v713_v49, %v721_v28  ;;  %v1273_v13 = vld [vmem:[%s9967_s7 + $0x1938] sm:$0xff] }
 0x422   : > { %7842 = vmatpush1.bf16.msra.mxu1 %v8713_v53  ;;  %v8825_v53 = vcombine.low %v953_v24, %v961_v63  ;;  %v1281_v48 = vld [vmem:[%s9967_s7 + $0x1978] sm:$0xff] }
 0x423   : > { %7843 = vmatprep.subr.bf16.mxu1 %v8730_v32  ;;  %v8842_v32 = vcombine.high %v969_v29, %v977_v30  ;;  %v1033_v54 = vld [vmem:[%s9967_s7 + $0x11b8] sm:$0xff]  ;;  %v9145_v58 = vcombine.low %v1273_v13, %v1281_v48 }
 0x424   : > { %7803 = vmatpush1.bf16.msra.mxu0 %v8473_v62  ;;  %v8585_v62 = vcombine.low %v713_v49, %v721_v28  ;;  %v1041_v56 = vld [vmem:[%s9967_s7 + $0x11f8] sm:$0xff] }
 0x425   : > { %7804 = vmatprep.subr.bf16.mxu0 %v8490_v41  ;;  %v8858_v41 = vcombine.high %v985_v35, %v993_v36  ;;  %v1297_v57 = vld [vmem:[%s9967_s7 + $0x19f8] sm:$0xff]  ;;  %v8905_v34 = vcombine.low %v1033_v54, %v1041_v56 }
 0x426   : > { %7844 = vmatpush1.bf16.msra.mxu1 %v8729_v40  ;;  %v8841_v40 = vcombine.low %v969_v29, %v977_v30  ;;  %v1305_v5 = vld [vmem:[%s9967_s7 + $0x1a38] sm:$0xff] }
 0x427   : > { %7845 = vmatprep.subr.bf16.mxu1 %v8746_v42  ;;  %v9114_v42 = vcombine.high %v1241_v37, %v1249_v59 }
 0x428   : > { %7805 = vmatpush1.bf16.msra.mxu0 %v8489_v44  ;;  %v8857_v44 = vcombine.low %v985_v35, %v993_v36 }
 0x429   : > { %7806 = vmatprep.subr.bf16.mxu0 %v8506_v45  ;;  %v8874_v45 = vcombine.high %v1001_v43, %v1009_v33 }
 0x42a   : > { %7846 = vmatpush1.bf16.msra.mxu1 %v8745_v39  ;;  %v9113_v39 = vcombine.low %v1241_v37, %v1249_v59  ;;  %v1353_v37 = vld [vmem:[%s9967_s7 + $0x1bb8] sm:$0xff] }
 0x42b   : > { %7847 = vmatprep.subr.bf16.mxu1 %v8762_v46  ;;  %v9130_v46 = vcombine.high %v1257_v6, %v1265_v38  ;;  %v1361_v59 = vld [vmem:[%s9967_s7 + $0x1bf8] sm:$0xff] }
 0x42c   : > { %7807 = vmatpush1.bf16.msra.mxu0 %v8505_v50  ;;  %v8873_v50 = vcombine.low %v1001_v43, %v1009_v33 }
 0x42d   : > { %7808 = vmatprep.subr.bf16.mxu0 %v8522_v52  ;;  %v8890_v52 = vcombine.high %v1017_v47, %v1025_v11 }
 0x42e   : > { %7848 = vmatpush1.bf16.msra.mxu1 %v8761_v51  ;;  %v9129_v51 = vcombine.low %v1257_v6, %v1265_v38  ;;  %v457_v6 = vld [vmem:[#allocation2 + $0x58] sm:$0xff] }
 0x42f   : > { %7849 = vmatprep.subr.bf16.mxu1 %v8778_v18  ;;  %v9146_v18 = vcombine.high %v1273_v13, %v1281_v48  ;;  %v1369_v48 = vld [vmem:[%s9967_s7 + $0x1c38] sm:$0xff] }
 0x430   : > { %7809 = vmatpush1.bf16.msra.mxu0 %v8521_v61  ;;  %v8906_v61 = vcombine.high %v1033_v54, %v1041_v56 }
 0x431   : > { %7810 = vmatprep.subr.bf16.mxu0 %v8538_v3  ;;  %v1049_v3 = vld [vmem:[%s9967_s7 + $0x1238] sm:$0xff] }
 0x432   : > { %7850 = vmatpush1.bf16.msra.mxu1 %v8777_v1 }
 0x433   : > { %7851 = vmatprep.subr.bf16.mxu1 %v8794_v4  ;;  %v1057_v4 = vld [vmem:[%s9967_s7 + $0x1278] sm:$0xff] }
 0x434   : > { %7811 = vmatpush1.bf16.msra.mxu0 %v8537_v12  ;;  %v8922_v8 = vcombine.high %v1049_v3, %v1057_v4  ;;  %v1065_v12 = vld [vmem:[%s9967_s7 + $0x12b8] sm:$0xff]  ;;  %v8921_v21 = vcombine.low %v1049_v3, %v1057_v4 }
 0x435   : > { %7812 = vmatprep.subr.bf16.mxu0 %v8554_v15  ;;  %v1321_v15 = vld [vmem:[%s9967_s7 + $0x1ab8] sm:$0xff] }
 0x436   : > { %7852 = vmatpush1.bf16.msra.mxu1 %v8793_v14  ;;  %v1073_v14 = vld [vmem:[%s9967_s7 + $0x12f8] sm:$0xff] }
 0x437   : > { %7853 = vmatprep.subr.bf16.mxu1 %v8810_v20  ;;  %v1329_v20 = vld [vmem:[%s9967_s7 + $0x1af8] sm:$0xff]  ;;  %v8938_v24 = vcombine.high %v1065_v12, %v1073_v14  ;;  %v8937_v49 = vcombine.low %v1065_v12, %v1073_v14 }
 0x438   : > { %7813 = vmatpush1.bf16.msra.mxu0 %v8553_v25  ;;  %v9194_v63 = vcombine.high %v1321_v15, %v1329_v20  ;;  %v1081_v25 = vld [vmem:[%s9967_s7 + $0x1338] sm:$0xff]  ;;  %v9193_v28 = vcombine.low %v1321_v15, %v1329_v20 }
 0x439   : > { %7814 = vmatprep.subr.bf16.mxu0 %v8570_v2  ;;  %v1337_v2 = vld [vmem:[%s9967_s7 + $0x1b38] sm:$0xff] }
 0x43a   : > { %7854 = vmatpush1.bf16.msra.mxu1 %v8809_v26  ;;  %v1089_v26 = vld [vmem:[%s9967_s7 + $0x1378] sm:$0xff] }
 0x43b   : > { %7855 = vmatprep.subr.bf16.mxu1 %v8826_v27  ;;  %v1345_v27 = vld [vmem:[%s9967_s7 + $0x1b78] sm:$0xff]  ;;  %v8954_v29 = vcombine.high %v1081_v25, %v1089_v26  ;;  %v8953_v43 = vcombine.low %v1081_v25, %v1089_v26 }
 0x43c   : > { %7815 = vmatpush1.bf16.msra.mxu0 %v8569_v31  ;;  %v9210_v31 = vcombine.high %v1337_v2, %v1345_v27  ;;  %v1161_v15 = vld [vmem:[%s9967_s7 + $0x15b8] sm:$0xff] }
 0x43d   : > { %7816 = vmatprep.subr.bf16.mxu0 %v8586_v55  ;;  %v1105_v55 = vld [vmem:[%s9967_s7 + $0x13f8] sm:$0xff] }
 0x43e   : > { %7856 = vmatpush1.bf16.msra.mxu1 %v8825_v53  ;;  %v1097_v53 = vld [vmem:[%s9967_s7 + $0x13b8] sm:$0xff] }
 0x43f   : > { %7857 = vmatprep.subr.bf16.mxu1 %v8842_v32  ;;  %v1169_v20 = vld [vmem:[%s9967_s7 + $0x15f8] sm:$0xff] }
 0x440   : > { %7817 = vmatpush1.bf16.msra.mxu0 %v8585_v62  ;;  %v456_v62 = vld [vmem:[#allocation2 + $0x50] sm:$0xff]  ;;  %v9034_v25 = vcombine.high %v1161_v15, %v1169_v20 }
 0x441   : > { %7868 = vmatprep.subr.bf16.mxu0 %v8858_v41 }
 0x442   : > { %7858 = vmatpush1.bf16.msra.mxu1 %v8841_v40 }
 0x443   : > { %7909 = vmatprep.subr.bf16.mxu1 %v9114_v42  ;;  %7819 = vmatmul.mubr.bf16.vlgmr.msra.gmra.mrb[56].mxu0 %v10079_v60  ;;  %v1289_v60 = vld [vmem:[%s9967_s7 + $0x19b8] sm:$0xff] }
 0x444   : > { %7869 = vmatpush1.bf16.msra.mxu0 %v8857_v44  ;;  %7900 = vmatprep.mubr.bf16.mxu0 %v10097_v7  ;;  %v9162_v1 = vcombine.high %v1289_v60, %v1297_v57  ;;  %v1313_v7 = vld [vmem:[%s9967_s7 + $0x1a78] sm:$0xff]  ;;  %v9209_v44 = vcombine.low %v1337_v2, %v1345_v27 }
 0x445   : > { %7860 = vmatmul.mubr.bf16.vlgmr.msra.gmra.mrb[56].mxu1 %v10088_v0  ;;  %7870 = vmatprep.subr.bf16.mxu0 %v8874_v45  ;;  %v8889_v0 = vcombine.low %v1017_v47, %v1025_v11  ;;  %v9178_v10 = vcombine.high %v1305_v5, %v1313_v7  ;;  %v9177_v22 = vcombine.low %v1305_v5, %v1313_v7  ;;  %v1113_v47 = vld [vmem:[%s9967_s7 + $0x1438] sm:$0xff] }
 0x446   : > { %7910 = vmatpush1.bf16.msra.mxu1 %v9113_v39  ;;  %7941 = vmatprep.mubr.bf16.mxu1 %v10104_v9  ;;  %v9161_v9 = vcombine.low %v1289_v60, %v1297_v57  ;;  %v8970_v39 = vcombine.high %v1097_v53, %v1105_v55  ;;  %v1121_v11 = vld [vmem:[%s9967_s7 + $0x1478] sm:$0xff] }
 0x447   : > { %7911 = vmatprep.subr.bf16.mxu1 %v9130_v46  ;;  %v8986_v54 = vcombine.high %v1113_v47, %v1121_v11  ;;  %v1129_v60 = vld [vmem:[%s9967_s7 + $0x14b8] sm:$0xff] }
 0x448   : > { %7871 = vmatpush1.bf16.msra.mxu0 %v8873_v50  ;;  %v1377_v50 = vld [vmem:[%s9967_s7 + $0x1c78] sm:$0xff] }
 0x449   : > { %7872 = vmatprep.subr.bf16.mxu0 %v8890_v52  ;;  %v8969_v52 = vcombine.low %v1097_v53, %v1105_v55  ;;  %v9242_v56 = vcombine.high %v1369_v48, %v1377_v50  ;;  %v1137_v57 = vld [vmem:[%s9967_s7 + $0x14f8] sm:$0xff] }
 0x44a   : > { %7912 = vmatpush1.bf16.msra.mxu1 %v9129_v51  ;;  %v9002_v3 = vcombine.high %v1129_v60, %v1137_v57  ;;  %v1145_v5 = vld [vmem:[%s9967_s7 + $0x1538] sm:$0xff] }
 0x44b   : > { %7913 = vmatprep.subr.bf16.mxu1 %v9146_v18  ;;  %v9225_v18 = vcombine.low %v1353_v37, %v1361_v59  ;;  %v1153_v7 = vld [vmem:[%s9967_s7 + $0x1578] sm:$0xff] }
 0x44c   : > { %7873 = vmatpush1.bf16.msra.mxu0 %v8889_v0  ;;  %v1385_v0 = vld [vmem:[%s9967_s7 + $0x1cb8] sm:$0xff]  ;;  %v9018_v12 = vcombine.high %v1145_v5, %v1153_v7 }
 0x44d   : > { %7874 = vmatprep.subr.bf16.mxu0 %v8906_v61  ;;  %v8985_v61 = vcombine.low %v1113_v47, %v1121_v11  ;;  %v1177_v2 = vld [vmem:[%s9967_s7 + $0x1638] sm:$0xff] }
 0x44e   : > { %7914 = vmatpush1.bf16.msra.mxu1 %v9145_v58  ;;  %v1393_v58 = vld [vmem:[%s9967_s7 + $0x1cf8] sm:$0xff] }
 0x44f   : > { %7915 = vmatprep.subr.bf16.mxu1 %v9162_v1  ;;  %v9241_v1 = vcombine.low %v1369_v48, %v1377_v50  ;;  %v9258_v4 = vcombine.high %v1385_v0, %v1393_v58  ;;  %v1185_v27 = vld [vmem:[%s9967_s7 + $0x1678] sm:$0xff] }
 0x450   : > { %7875 = vmatpush1.bf16.msra.mxu0 %v8905_v34  ;;  %v1401_v34 = vld [vmem:[%s9967_s7 + $0x1d38] sm:$0xff] }
 0x451   : > { %7876 = vmatprep.subr.bf16.mxu0 %v8922_v8  ;;  %v9001_v8 = vcombine.low %v1129_v60, %v1137_v57  ;;  %v1193_v55 = vld [vmem:[%s9967_s7 + $0x16b8] sm:$0xff] }
 0x452   : > { %7916 = vmatpush1.bf16.msra.mxu1 %v9161_v9  ;;  %v1409_v9 = vld [vmem:[%s9967_s7 + $0x1d78] sm:$0xff] }
 0x453   : > { %7917 = vmatprep.subr.bf16.mxu1 %v9178_v10  ;;  %v9257_v10 = vcombine.low %v1385_v0, %v1393_v58  ;;  %v9274_v14 = vcombine.high %v1401_v34, %v1409_v9 }
 0x454   : > { %7877 = vmatpush1.bf16.msra.mxu0 %v8921_v21  ;;  %v1417_v21 = vld [vmem:[%s9967_s7 + $0x1db8] sm:$0xff] }
 0x455   : > { %7878 = vmatprep.subr.bf16.mxu0 %v8938_v24  ;;  %v9017_v24 = vcombine.low %v1145_v5, %v1153_v7 }
 0x456   : > { %7918 = vmatpush1.bf16.msra.mxu1 %v9177_v22  ;;  %v7574_v30 = vpop.f32.mrb[44].mxu0  ;;  %v1425_v22 = vld [vmem:[%s9967_s7 + $0x1df8] sm:$0xff] }
 0x457   : > { %7919 = vmatprep.subr.bf16.mxu1 %v9194_v63  ;;  %v7575_v32 = vadd.f32 %v7574_v30, %v11051_v17  ;;  %v7576_v36 = vpop.f32.mrb[45].mxu0  ;;  %v9273_v63 = vcombine.low %v1401_v34, %v1409_v9  ;;  %v9290_v26 = vcombine.high %v1417_v21, %v1425_v22  ;;  %v9289_v30 = vcombine.low %v1417_v21, %v1425_v22  ;;  %v458_v34 = vld [vmem:[#allocation2 + $0x60] sm:$0xff] }
 0x458   : > { %v7615_v35 = vpop.f32.mrb[44].mxu1  ;;  %v7577_v40 = vadd.f32 %v7576_v36, %v11053_v23  ;;  %v7578_v42 = vpop.f32.mrb[46].mxu0  ;;  %7879 = vmatpush1.bf16.msra.mxu0 %v8937_v49  ;;  %v9226_v23 = vcombine.high %v1353_v37, %v1361_v59  ;;  %v1433_v49 = vld [vmem:[%s9967_s7 + $0x1e38] sm:$0xff]  ;;  %v9049_v37 = vcombine.low %v1177_v2, %v1185_v27 }
 0x459   : > { %v7617_v41 = vpop.f32.mrb[45].mxu1  ;;  %v7616_v33 = vadd.f32 %v7615_v35, %v7575_v32  ;;  %v7579_v17 = vpop.f32.mrb[47].mxu0  ;;  %7880 = vmatprep.subr.bf16.mxu0 %v8954_v29  ;;  %v9033_v29 = vcombine.low %v1161_v15, %v1169_v20  ;;  %v1201_v32 = vld [vmem:[%s9967_s7 + $0x16f8] sm:$0xff] }
 0x45a   : > { %v7619_v38 = vpop.f32.mrb[46].mxu1  ;;  %7920 = vmatpush1.bf16.msra.mxu1 %v9193_v28  ;;  %v7618_v45 = vadd.f32 %v7617_v41, %v7577_v40  ;;  %v1441_v28 = vld [vmem:[%s9967_s7 + $0x1e78] sm:$0xff] }
 0x45b   : > { %v7620_v46 = vpop.f32.mrb[47].mxu1  ;;  %7921 = vmatprep.subr.bf16.mxu1 %v9210_v31  ;;  %v7960_v13 = vadd.f32 %v7616_v33, %v456_v62  ;;  %v9050_v31 = vcombine.high %v1177_v2, %v1185_v27  ;;  %v9306_v53 = vcombine.high %v1433_v49, %v1441_v28  ;;  %v1449_v35 = vld [vmem:[%s9967_s7 + $0x1eb8] sm:$0xff]  ;;  %v9305_v59 = vcombine.low %v1433_v49, %v1441_v28 }
 0x45c   : > { %v7961_v51 = vadd.f32 %v7618_v45, %v457_v6  ;;  %7881 = vmatpush1.bf16.msra.mxu0 %v8953_v43  ;;  %v1457_v36 = vld [vmem:[%s9967_s7 + $0x1ef8] sm:$0xff]  ;;  %v9066_v62 = vcombine.high %v1193_v55, %v1201_v32  ;;  %v9065_v6 = vcombine.low %v1193_v55, %v1201_v32 }
 0x45d   : > { %7976 = vst [vmem:[#allocation2 + $0x50] sm:$0xff] %v7960_v13  ;;  %7882 = vmatprep.subr.bf16.mxu0 %v8970_v39  ;;  %v9322_v40 = vcombine.high %v1449_v35, %v1457_v36  ;;  %v1209_v41 = vld [vmem:[%s9967_s7 + $0x1738] sm:$0xff]  ;;  %v9321_v38 = vcombine.low %v1449_v35, %v1457_v36  ;;  %v460_v35 = vld [vmem:[#allocation2 + $0x70] sm:$0xff] }
 0x45e   : > { %7922 = vmatpush1.bf16.msra.mxu1 %v9209_v44  ;;  %7977 = vst [vmem:[#allocation2 + $0x58] sm:$0xff] %v7961_v51  ;;  %v1217_v42 = vld [vmem:[%s9967_s7 + $0x1778] sm:$0xff] }
 0x45f   : > { %7923 = vmatprep.subr.bf16.mxu1 %v9226_v23  ;;  %v1465_v43 = vld [vmem:[%s9967_s7 + $0x1f38] sm:$0xff]  ;;  %v9082_v17 = vcombine.high %v1209_v41, %v1217_v42  ;;  %v9081_v47 = vcombine.low %v1209_v41, %v1217_v42 }
 0x460   : > { %7883 = vmatpush1.bf16.msra.mxu0 %v8969_v52  ;;  %v1473_v33 = vld [vmem:[%s9967_s7 + $0x1f78] sm:$0xff] }
 0x461   : > { %7884 = vmatprep.subr.bf16.mxu0 %v8986_v54  ;;  %v9338_v44 = vcombine.high %v1465_v43, %v1473_v33  ;;  %v1225_v39 = vld [vmem:[%s9967_s7 + $0x17b8] sm:$0xff]  ;;  %v9337_v11 = vcombine.low %v1465_v43, %v1473_v33 }
 0x462   : > { %7924 = vmatpush1.bf16.msra.mxu1 %v9225_v18  ;;  %v1233_v45 = vld [vmem:[%s9967_s7 + $0x17f8] sm:$0xff] }
 0x463   : > { %7925 = vmatprep.subr.bf16.mxu1 %v9242_v56  ;;  %v1481_v46 = vld [vmem:[%s9967_s7 + $0x1fb8] sm:$0xff]  ;;  %v9098_v13 = vcombine.high %v1225_v39, %v1233_v45  ;;  %v9097_v50 = vcombine.low %v1225_v39, %v1233_v45  ;;  %v11164_v39 = vld [vmem:[#allocation2 + $0x10] sm:$0xff] (!%p9355_p3) }
 0x464   : > { %7885 = vmatpush1.bf16.msra.mxu0 %v8985_v61  ;;  %v1489_v23 = vld [vmem:[%s9967_s7 + $0x1ff8] sm:$0xff] }
 0x465   : > { %7886 = vmatprep.subr.bf16.mxu0 %v9002_v3  ;;  %v9354_v48 = vcombine.high %v1481_v46, %v1489_v23  ;;  %v9353_v51 = vcombine.low %v1481_v46, %v1489_v23  ;;  %v11168_v23 = vld [vmem:[#allocation2 + $0x18] sm:$0xff] (!%p9355_p3) }
 0x466   : > { %7926 = vmatpush1.bf16.msra.mxu1 %v9241_v1 }
 0x467   : > { %7927 = vmatprep.subr.bf16.mxu1 %v9258_v4 }
 0x468   : > { %7887 = vmatpush1.bf16.msra.mxu0 %v9001_v8 }
 0x469   : > { %7888 = vmatprep.subr.bf16.mxu0 %v9018_v12 }
 0x46a   : > { %7928 = vmatpush1.bf16.msra.mxu1 %v9257_v10 }
 0x46b   : > { %7929 = vmatprep.subr.bf16.mxu1 %v9274_v14 }
 0x46c   : > { %7889 = vmatpush1.bf16.msra.mxu0 %v9017_v24 }
 0x46d   : > { %7890 = vmatprep.subr.bf16.mxu0 %v9034_v25 }
 0x46e   : > { %7930 = vmatpush1.bf16.msra.mxu1 %v9273_v63 }
 0x46f   : > { %7931 = vmatprep.subr.bf16.mxu1 %v9290_v26 }
 0x470   : > { %7891 = vmatpush1.bf16.msra.mxu0 %v9033_v29 }
 0x471   : > { %7892 = vmatprep.subr.bf16.mxu0 %v9050_v31 }
 0x472   : > { %7932 = vmatpush1.bf16.msra.mxu1 %v9289_v30 }
 0x473   : > { %7933 = vmatprep.subr.bf16.mxu1 %v9306_v53 }
 0x474   : > { %7893 = vmatpush1.bf16.msra.mxu0 %v9049_v37 }
 0x475   : > { %7894 = vmatprep.subr.bf16.mxu0 %v9066_v62 }
 0x476   : > { %7934 = vmatpush1.bf16.msra.mxu1 %v9305_v59 }
 0x477   : > { %7935 = vmatprep.subr.bf16.mxu1 %v9322_v40  ;;  %v461_v40 = vld [vmem:[#allocation2 + $0x78] sm:$0xff] }
 0x478   : > { %7895 = vmatpush1.bf16.msra.mxu0 %v9065_v6 }
 0x479   : > { %7896 = vmatprep.subr.bf16.mxu0 %v9082_v17  ;;  %v11160_v17 = vld [vmem:[#allocation2] sm:$0xff] (!%p9355_p3) }
 0x47a   : > { %7936 = vmatpush1.bf16.msra.mxu1 %v9321_v38  ;;  %v9356_v45 = vmul.f32 (!%p9355_p3), -1.442695, %v11160_v17 }
 0x47b   : > { %7937 = vmatprep.subr.bf16.mxu1 %v9338_v44  ;;  %v11162_v44 = vld [vmem:[#allocation2 + $0x8] sm:$0xff] (!%p9355_p3) }
 0x47c   : > { %7897 = vmatpush1.bf16.msra.mxu0 %v9081_v47  ;;  %v9357_v46 = vmul.f32 (!%p9355_p3), -1.442695, %v11162_v44  ;;  %v11170_v47 = vld [vmem:[#allocation2 + $0x20] sm:$0xff] (!%p9355_p3)  ;;  %9503 = vpow2.f32 (!%p9355_p3), %v9356_v45 }
 0x47d   : > { %7898 = vmatprep.subr.bf16.mxu0 %v9098_v13  ;;  %v9359_v13 = vmul.f32 (!%p9355_p3), -1.442695, %v11168_v23 }
 0x47e   : > { %7938 = vmatpush1.bf16.msra.mxu1 %v9337_v11  ;;  %v9358_v11 = vmul.f32 (!%p9355_p3), -1.442695, %v11164_v39  ;;  %9505 = vpow2.f32 (!%p9355_p3), %v9357_v46 }
 0x47f   : > { %7939 = vmatprep.subr.bf16.mxu1 %v9354_v48  ;;  %v11174_v48 = vld [vmem:[#allocation2 + $0x28] sm:$0xff] (!%p9355_p3) }
 0x480   : > { %7899 = vmatpush1.bf16.msra.mxu0 %v9097_v50  ;;  %v11176_v50 = vld [vmem:[#allocation2 + $0x30] sm:$0xff] (!%p9355_p3)  ;;  %9507 = vpow2.f32 (!%p9355_p3), %v9358_v11 }
 0x481   : > { %9509 = vpow2.f32 (!%p9355_p3), %v9359_v13 }
 0x482   : > { %7940 = vmatpush1.bf16.msra.mxu1 %v9353_v51  ;;  %v9360_v51 = vmul.f32 (!%p9355_p3), -1.442695, %v11170_v47 }
 0x483   : > { %7901 = vmatmul.mubr.bf16.vlgmr.msra.gmra.mrb[60].mxu0 %v10169_v16 }
 0x484   : > { %9511 = vpow2.f32 (!%p9355_p3), %v9360_v51 }
 0x485   : > { %7942 = vmatmul.mubr.bf16.vlgmr.msra.gmra.mrb[60].mxu1 %v10175_v19  ;;  %v459_v19 = vld [vmem:[#allocation2 + $0x68] sm:$0xff] }
 0x496   : > { %v7656_v52 = vpop.f32.mrb[48].mxu0 }
 0x497   : > { %v7658_v54 = vpop.f32.mrb[49].mxu0 }
 0x498   : > { %v7697_v18 = vpop.f32.mrb[48].mxu1  ;;  %v7660_v57 = vpop.f32.mrb[50].mxu0 }
 0x499   : > { %v7698_v56 = vadd.f32 %v7697_v18, %v7656_v52  ;;  %v7699_v60 = vpop.f32.mrb[49].mxu1  ;;  %v7661_v61 = vpop.f32.mrb[51].mxu0  ;;  %v11179_v52 = vld [vmem:[#allocation2 + $0x38] sm:$0xff] (!%p9355_p3)  ;;  %v9361_v18 = vmul.f32 (!%p9355_p3), -1.442695, %v11174_v48 }
 0x49a   : > { %v7700_v0 = vadd.f32 %v7699_v60, %v7658_v54  ;;  %v7701_v58 = vpop.f32.mrb[50].mxu1  ;;  %v11182_v54 = vld [vmem:[#allocation2 + $0x40] sm:$0xff] (!%p9355_p3)  ;;  %v11185_v60 = vld [vmem:[#allocation2 + $0x48] sm:$0xff] (!%p9355_p3)  ;;  %v9363_v57 = vmul.f32 (!%p9355_p3), -1.442695, %v11179_v52  ;;  %v11191_v61 = vld [vmem:[#allocation2 + $0x58] sm:$0xff] (!%p9355_p3) }
 0x49b   : > { %v7702_v1 = vpop.f32.mrb[51].mxu1  ;;  %v9364_v58 = vmul.f32 (!%p9355_p3), -1.442695, %v11182_v54  ;;  %9513 = vpow2.f32 (!%p9355_p3), %v9361_v18 }
 0x49c   : > { %v9365_v1 = vmul.f32 (!%p9355_p3), -1.442695, %v11185_v60 }
 0x4d6   : > { %v7738_v3 = vpop.f32.mrb[52].mxu0 }
 0x4d7   : > { %v7739_v4 = vadd.f32 %v7738_v3, %v7698_v56  ;;  %v7740_v7 = vpop.f32.mrb[53].mxu0  ;;  %v9362_v56 = vmul.f32 (!%p9355_p3), -1.442695, %v11176_v50 }
 0x4d8   : > { %v7779_v5 = vpop.f32.mrb[52].mxu1  ;;  %v7741_v9 = vadd.f32 %v7740_v7, %v7700_v0  ;;  %v7742_v16 = vpop.f32.mrb[54].mxu0  ;;  %v11188_v0 = vld [vmem:[#allocation2 + $0x50] sm:$0xff] (!%p9355_p3) }
 0x4d9   : > { %v7781_v8 = vpop.f32.mrb[53].mxu1  ;;  %v7780_v10 = vadd.f32 %v7779_v5, %v7739_v4  ;;  %v7743_v14 = vpop.f32.mrb[55].mxu0  ;;  %9515 = vpow2.f32 (!%p9355_p3), %v9362_v56  ;;  %v9366_v4 = vmul.f32 (!%p9355_p3), -1.442695, %v11188_v0  ;;  %v9367_v5 = vmul.f32 (!%p9355_p3), -1.442695, %v11191_v61 }
 0x4da   : > { %v7783_v12 = vpop.f32.mrb[54].mxu1  ;;  %v7782_v15 = vadd.f32 %v7781_v8, %v7741_v9  ;;  %9517 = vpow2.f32 (!%p9355_p3), %v9363_v57 }
 0x4db   : > { %v7784_v20 = vpop.f32.mrb[55].mxu1  ;;  %v7962_v21 = vadd.f32 %v7780_v10, %v458_v34  ;;  %9519 = vpow2.f32 (!%p9355_p3), %v9364_v58  ;;  %v9504_v34 = vpop.eup (!%p9355_p3), %9503 }
 0x4dc   : > { %v7963_v22 = vadd.f32 %v7782_v15, %v459_v19  ;;  %9521 = vpow2.f32 (!%p9355_p3), %v9365_v1  ;;  %v9506_v9 = vpop.eup (!%p9355_p3), %9505  ;;  %v8050_v8 = vadd.f32 (!%p9355_p3), 1.0, %v9504_v34 }
 0x4dd   : > { %7978 = vst [vmem:[#allocation2 + $0x60] sm:$0xff] %v7962_v21  ;;  %9523 = vpow2.f32 (!%p9355_p3), %v9366_v4  ;;  %v9508_v16 = vpop.eup (!%p9355_p3), %9507  ;;  %v8051_v10 = vadd.f32 (!%p9355_p3), 1.0, %v9506_v9 }
 0x4de   : > { %7979 = vst [vmem:[#allocation2 + $0x68] sm:$0xff] %v7963_v22  ;;  %9525 = vpow2.f32 (!%p9355_p3), %v9367_v5  ;;  %v9510_v19 = vpop.eup (!%p9355_p3), %9509  ;;  %v8052_v12 = vadd.f32 (!%p9355_p3), 1.0, %v9508_v16 }
 0x4df   : > { %v9512_v14 = vpop.eup (!%p9355_p3), %9511  ;;  %v8053_v15 = vadd.f32 (!%p9355_p3), 1.0, %v9510_v19 }
 0x4e0   : > { %v9514_v20 = vpop.eup (!%p9355_p3), %9513  ;;  %v8054_v21 = vadd.f32 (!%p9355_p3), 1.0, %v9512_v14 }
 0x4e3   : > { %v9516_v22 = vpop.eup (!%p9355_p3), %9515 }
 0x4e4   : > { %v11194_v3 = vld [vmem:[#allocation2 + $0x60] sm:$0xff] (!%p9355_p3) }
 0x4e5   : > { %v9368_v7 = vmul.f32 (!%p9355_p3), -1.442695, %v11194_v3 }
 0x4e7   : > { %9527 = vpow2.f32 (!%p9355_p3), %v9368_v7 }
 0x4e8   : > { %9529 = vrcp.f32 (!%p9355_p3), %v8050_v8 }
 0x4e9   : > { %9531 = vrcp.f32 (!%p9355_p3), %v8051_v10 }
 0x4ea   : > { %9533 = vrcp.f32 (!%p9355_p3), %v8052_v12 }
 0x4eb   : > { %9535 = vrcp.f32 (!%p9355_p3), %v8053_v15 }
 0x4ec   : > { %9537 = vrcp.f32 (!%p9355_p3), %v8054_v21 }
 0x516   : > { %v7820_v24 = vpop.f32.mrb[56].mxu0 }
 0x517   : > { %v7822_v25 = vpop.f32.mrb[57].mxu0 }
 0x518   : > { %v7861_v63 = vpop.f32.mrb[56].mxu1  ;;  %v7824_v27 = vpop.f32.mrb[58].mxu0 }
 0x519   : > { %v7862_v26 = vadd.f32 %v7861_v63, %v7820_v24  ;;  %v7863_v2 = vpop.f32.mrb[57].mxu1  ;;  %v7825_v29 = vpop.f32.mrb[59].mxu0  ;;  %v8055_v24 = vadd.f32 (!%p9355_p3), 1.0, %v9514_v20  ;;  %v11199_v27 = vld [vmem:[#allocation2 + $0x68] sm:$0xff] (!%p9355_p3) }
 0x51a   : > { %v7864_v49 = vadd.f32 %v7863_v2, %v7822_v25  ;;  %v7865_v28 = vpop.f32.mrb[58].mxu1  ;;  %v9518_v63 = vpop.eup (!%p9355_p3), %9517  ;;  %v8056_v25 = vadd.f32 (!%p9355_p3), 1.0, %v9516_v22 }
 0x51b   : > { %v7866_v30 = vpop.f32.mrb[59].mxu1  ;;  %9539 = vrcp.f32 (!%p9355_p3), %v8055_v24  ;;  %v8057_v2 = vadd.f32 (!%p9355_p3), 1.0, %v9518_v63 }
 0x51c   : > { %9541 = vrcp.f32 (!%p9355_p3), %v8056_v25 }
 0x51d   : > { %9543 = vrcp.f32 (!%p9355_p3), %v8057_v2 }
 0x556   : > { %v7902_v31 = vpop.f32.mrb[60].mxu0 }
 0x557   : > { %v7903_v53 = vadd.f32 %v7902_v31, %v7862_v26  ;;  %v7904_v32 = vpop.f32.mrb[61].mxu0  ;;  %v9520_v26 = vpop.eup (!%p9355_p3), %9519 }
 0x558   : > { %v7943_v55 = vpop.f32.mrb[60].mxu1  ;;  %v7905_v36 = vadd.f32 %v7904_v32, %v7864_v49  ;;  %v7906_v59 = vpop.f32.mrb[62].mxu0  ;;  %7985 = sbr.rel (%p9355_p3) target bundleno = 1413 (0x585), region = 48  ;;  %v8058_v28 = vadd.f32 (!%p9355_p3), 1.0, %v9520_v26  ;;  %v9369_v32 = vmul.f32 (!%p9355_p3), -1.442695, %v11199_v27 }
 0x559   : > { %v7945_v37 = vpop.f32.mrb[61].mxu1  ;;  %v7944_v62 = vadd.f32 %v7943_v55, %v7903_v53  ;;  %v7907_v42 = vpop.f32.mrb[63].mxu0 }
 0x55a   : > { %v7947_v41 = vpop.f32.mrb[62].mxu1  ;;  %v7946_v43 = vadd.f32 %v7945_v37, %v7905_v36  ;;  %v9522_v49 = vpop.eup (!%p9355_p3), %9521  ;;  %9545 = vrcp.f32 (!%p9355_p3), %v8058_v28 }
 0x55b   : > { %v7948_v33 = vpop.f32.mrb[63].mxu1  ;;  %v7964_v6 = vadd.f32 %v7944_v62, %v460_v35  ;;  %v9524_v29 = vpop.eup (!%p9355_p3), %9523  ;;  %v8059_v30 = vadd.f32 (!%p9355_p3), 1.0, %v9522_v49 }
 0x55c   : > { %v7965_v38 = vadd.f32 %v7946_v43, %v461_v40  ;;  %v9526_v53 = vpop.eup (!%p9355_p3), %9525  ;;  %v8060_v55 = vadd.f32 (!%p9355_p3), 1.0, %v9524_v29 }
 0x55d   : > { %7980 = vst [vmem:[#allocation2 + $0x70] sm:$0xff] %v7964_v6  ;;  %v9528_v36 = vpop.eup (!%p9355_p3), %9527  ;;  %9547 = vrcp.f32 (!%p9355_p3), %v8059_v30  ;;  %v8061_v37 = vadd.f32 (!%p9355_p3), 1.0, %v9526_v53 }
 0x55e   : > { %7981 = vst [vmem:[#allocation2 + $0x78] sm:$0xff] %v7965_v38  ;;  %v9530_v59 = vpop.eup (!%p9355_p3), %9529  ;;  %9549 = vrcp.f32 (!%p9355_p3), %v8060_v55 }
 0x55f   : > { %v9532_v40 = vpop.eup %9531  ;;  %v8098_v41 = vmul.f32 %v9530_v59, %v11160_v17  ;;  %9551 = vrcp.f32 %v8061_v37 }
 0x560   : > { %v9534_v43 = vpop.eup %9533  ;;  %v8099_v33 = vmul.f32 %v9532_v40, %v11162_v44  ;;  %9553 = vpow2.f32 %v9369_v32 }
 0x561   : > { %v9536_v6 = vpop.eup %9535  ;;  %v8100_v38 = vmul.f32 %v9534_v43, %v11164_v39  ;;  %v8062_v39 = vadd.f32 1.0, %v9528_v36 }
 0x562   : > { %v9538_v45 = vpop.eup %9537  ;;  %v9384_v46 = vpack.c.bf16 %v8099_v33, %v8098_v41  ;;  %v8101_v11 = vmul.f32 %v9536_v6, %v11168_v23 }
 0x563   : > { %v9540_v13 = vpop.eup %9539  ;;  %v8102_v17 = vmul.f32 %v9538_v45, %v11170_v47 }
 0x564   : > { %v11201_v31 = vld [vmem:[#allocation2 + $0x70] sm:$0xff]  ;;  %v9542_v51 = vpop.eup %9541  ;;  %8178 = vst [vmem:[%s9988_s4] sm:$0xff] %v9384_v46  ;;  %v9385_v18 = vpack.c.bf16 %v8101_v11, %v8100_v38  ;;  %v8103_v44 = vmul.f32 %v9540_v13, %v11174_v48 }
 0x565   : > { %v11204_v35 = vld [vmem:[#allocation2 + $0x78] sm:$0xff]  ;;  %v9370_v62 = vmul.f32 -1.442695, %v11201_v31  ;;  %v9544_v56 = vpop.eup %9543  ;;  %v8104_v57 = vmul.f32 %v9542_v51, %v11176_v50 }
 0x566   : > { %v9371_v42 = vmul.f32 -1.442695, %v11204_v35  ;;  %v9546_v58 = vpop.eup %9545  ;;  %8179 = vst [vmem:[%s9988_s4 + $0x8] sm:$0xff] %v9385_v18  ;;  %v9386_v1 = vpack.c.bf16 %v8103_v44, %v8102_v17  ;;  %v8105_v23 = vmul.f32 %v9544_v56, %v11179_v52 }
 0x567   : > { %9555 = vpow2.f32 %v9370_v62  ;;  %v9548_v4 = vpop.eup %9547  ;;  %v8106_v47 = vmul.f32 %v9546_v58, %v11182_v54 }
 0x568   : > { %9557 = vpow2.f32 %v9371_v42  ;;  %v9550_v5 = vpop.eup %9549  ;;  %8180 = vst [vmem:[%s9988_s4 + $0x10] sm:$0xff] %v9386_v1  ;;  %v9387_v7 = vpack.c.bf16 %v8105_v23, %v8104_v57  ;;  %v8107_v48 = vmul.f32 %v9548_v4, %v11185_v60 }
 0x569   : > { %v9552_v34 = vpop.eup %9551  ;;  %v8108_v50 = vmul.f32 %v9550_v5, %v11188_v0  ;;  %9559 = vrcp.f32 %v8062_v39 }
 0x56a   : > { %v9554_v9 = vpop.eup %9553  ;;  %8181 = vst [vmem:[%s9988_s4 + $0x18] sm:$0xff] %v9387_v7  ;;  %v9388_v8 = vpack.c.bf16 %v8107_v48, %v8106_v47  ;;  %v8109_v16 = vmul.f32 %v9552_v34, %v11191_v61 }
 0x56b   : > { %v8063_v52 = vadd.f32 1.0, %v9554_v9 }
 0x56c   : > { %8182 = vst [vmem:[%s9988_s4 + $0x20] sm:$0xff] %v9388_v8  ;;  %v9389_v19 = vpack.c.bf16 %v8109_v16, %v8108_v50 }
 0x56d   : > { %9561 = vrcp.f32 %v8063_v52 }
 0x56e   : > { %8183 = vst [vmem:[%s9988_s4 + $0x28] sm:$0xff] %v9389_v19 }
 0x571   : > { %v9556_v10 = vpop.eup %9555 }
 0x572   : > { %v9558_v54 = vpop.eup %9557  ;;  %v8064_v12 = vadd.f32 1.0, %v9556_v10 }
 0x573   : > { %v8065_v60 = vadd.f32 1.0, %v9558_v54  ;;  %v9560_v0 = vpop.eup %9559 }
 0x574   : > { %9563 = vrcp.f32 %v8064_v12  ;;  %v8110_v14 = vmul.f32 %v9560_v0, %v11194_v3 }
 0x575   : > { %9565 = vrcp.f32 %v8065_v60 }
 0x577   : > { %v9562_v15 = vpop.eup %9561 }
 0x578   : > { %v8111_v20 = vmul.f32 %v9562_v15, %v11199_v27 }
 0x57a   : > { %v9390_v22 = vpack.c.bf16 %v8111_v20, %v8110_v14 }
 0x57c   : > { %8184 = vst [vmem:[%s9988_s4 + $0x30] sm:$0xff] %v9390_v22 }
 0x57e   : > { %v9564_v61 = vpop.eup %9563 }
 0x57f   : > { %v9566_v21 = vpop.eup %9565  ;;  %v8112_v24 = vmul.f32 %v9564_v61, %v11201_v31 }
 0x580   : > { %v8113_v63 = vmul.f32 %v9566_v21, %v11204_v35 }
 0x582   : > { %v9391_v25 = vpack.c.bf16 %v8113_v63, %v8112_v24 }
 0x584   : > { %8185 = vst [vmem:[%s9988_s4 + $0x38] sm:$0xff] %v9391_v25 }
 0x585 PF: > { %s19_s22 = sadd.s32 1, %s9721_s22   ;;  %s11290_s7 = sld [smem:[#allocation9_spill]] }
 0x586   : > { %p16_p11 = scmp.ge.s32.totalorder %s19_s22, 10   ;;  %s11291_s12 = smov %s9685_s13 }
 0x587   : > { %s11292_s13 = smov %s9689_s14  ;;  %s11293_s14 = smov %s9916_s29 }
 0x588   : > { %s11294_s15 = smov %s9697_s16  ;;  %s11295_s16 = smov %s9701_s17 }
 0x589   : > { %s11296_s17 = smov %s9921_s6  ;;  %s11297_s18 = smov %s9713_s20 }
 0x58a   : > { %s11298_s19 = smov %s9717_s21  ;;  %s11299_s20 = smov %s11302_s23 }
 0x58b   : > { %s11300_s21 = smov %s11290_s7  ;;  %18 = sbr.rel (!%p16_p11) target bundleno = 11 (0xb), region = 96 }
 0x592   :  { %8208 = vsyncpa [#allocation4], 1 }
 0x593   :  { %8210 = vsyncpa [#allocation4 + $0x1], 1 }
 0x594   :  { %8211 = vsyncpa [#allocation6], 1 }
 0x595   :  { %8213 = vsyncpa [#allocation6 + $0x1], 1 }

</bundles_post_ra>
